<compile_context>
chip_gen: v7x
topology: tpu7x:2x2x1
jax: 0.10.0
libtpu: 0.0.40
codegen_flags: <defaults>
</compile_context>

<pallas_src>
import numpy as np
import jax
import jax.numpy as jnp
from jax.experimental import pallas as pl
from jax.experimental.pallas import tpu as pltpu


def _round_up(x, m):
    return (x + m - 1) // m * m


def simple_cnn_forward(x_nchw, params, *, block_batch=None):
    """Fused, batch-blocked Pallas forward of SimpleCNN: (N,C,H,W) -> (N, classes)."""
    f32, bf16 = jnp.float32, jnp.bfloat16
    N, C, H, W = x_nchw.shape
    NC = params["wl"].shape[1]
    assert H >= 4 and W >= 4, "spatial size too small for SimpleCNN"
    assert W % 2 == 0, "fused pooling path requires an even input width"

    # ---- static geometry (all Python ints) ----------------------------------
    Wf = W + 2                  # flattening width of the conv1/conv2 feature maps
    Wq = Wf // 2                # flattening width of the zero-padded pooled map
    Ph, Pw = (H - 2) // 2, (W - 2) // 2
    S = H * Wf                  # per-sample slab (rows) in the Wf-wide space
    SH = S // 2                 # per-sample slab of the stride-2 picked pool rows
    SP = (Ph + 2) * Wq          # per-sample slab of the zero-padded pooled map
    OUTW = max(128, _round_up(NC, 128))

    # ---- batch blocking ------------------------------------------------------
    if block_batch is None:
        # Rough lane-padded per-sample scratch bytes; keep the default block well
        # inside v7x's 64 MiB VMEM (32 MiB default scoped limit).
        per_sample = S * 128 * 12 + SP * 128 * 10
        B = max(1, min(8, N, (8 << 20) // max(per_sample, 1)))
    else:
        B = int(block_batch)
    NB = -(-N // B)             # grid length (tune B so this is even on v7x)
    Npad = NB * B

    BS, BSP = B * S, B * SP
    BSR = _round_up(BS, 8)                  # conv1 im2col rows per block (padded)
    F1R = _round_up(BS + 2 * Wf + 2, 8)     # conv1 output scratch rows (+ tap slack)
    F2R = _round_up(BS + Wf + 2, 8)         # conv2 output scratch rows (+ pool slack)
    PPR = _round_up(BSP + 2 * Wq + 2, 8)    # padded pooled-map scratch rows
    CNT = BS // 2                           # stride-2 picked rows (BS is even)
    MXR = _round_up(CNT, 8)
    H4R = _round_up(BSP, 8)
    GR = _round_up(B, 8)

    # ---- wrapper-side layout plumbing (tiny, pure XLA) -----------------------
    x = jnp.transpose(x_nchw, (0, 2, 3, 1)).astype(f32)             # NHWC
    if Npad != N:
        x = jnp.pad(x, ((0, Npad - N), (0, 0), (0, 0), (0, 0)))
    xpad = jnp.pad(x, ((0, 0), (1, 1), (1, 1), (0, 0)))             # zero pad=1
    xflat = xpad.reshape(Npad, (H + 2) * Wf, C)
    xflat = jnp.pad(xflat, ((0, 0), (0, 2), (0, 0)))                # tap-read slack

    # conv1 im2col: (Npad, S, 9*C) in (dh, dw, cin) tap order -> one K=9*C matmul.
    taps = [dh * Wf + dw for dh in range(3) for dw in range(3)]
    xcol = jnp.concatenate([xflat[:, s:s + S, :] for s in taps], axis=-1)
    xcol = xcol.reshape(NB, BS, 9 * C)
    if BSR != BS:
        xcol = jnp.pad(xcol, ((0, 0), (0, BSR - BS), (0, 0)))
    xcol = xcol.astype(bf16)

    # Weights: dw taps folded into the contraction dim, bf16 for the MXU.
    w1 = params["w1"].reshape(9 * C, 32).astype(bf16)               # (9C, 32)
    w2 = params["w2"].reshape(3, 3 * 32, 32).astype(bf16)           # (dh, 96, 32)
    w3 = params["w3"].reshape(3, 3 * 32, 64).astype(bf16)           # (dh, 96, 64)
    w4 = params["w4"].astype(bf16)
    b1 = params["b1"].reshape(1, 32).astype(f32)
    b2 = params["b2"].reshape(1, 32).astype(f32)
    b3 = params["b3"].reshape(1, 64).astype(f32)
    b4 = params["b4"].reshape(1, 64).astype(f32)
    wl = jnp.zeros((64, OUTW), f32).at[:, :NC].set(params["wl"]).astype(bf16)
    bl = jnp.zeros((1, OUTW), f32).at[:, :NC].set(params["bl"].reshape(1, NC))

    # Validity mask of the conv3/conv4 rows (drops wrapped columns / pad rows).
    # Used with jnp.where, so garbage rows may hold anything (incl. NaN).
    m_np = np.zeros((SP, 1), np.float32)
    for a in range(Ph):
        m_np[a * Wq:a * Wq + Pw, 0] = 1.0
    gmask = jnp.asarray(np.tile(m_np, (B, 1)))                      # (BSP, 1)

    # ---- the fused kernel ----------------------------------------------------
    def kernel(xcol_ref, w1_ref, b1_ref, w2_ref, b2_ref, w3_ref, b3_ref,
               w4_ref, b4_ref, wl_ref, bl_ref, msk_ref, o_ref,
               f1_ref, f2_ref, mx_ref, pp_ref, h4_ref, g_ref):

        def conv3x3(src_ref, rows, w_ref, width):
            # 3x3 conv over a row-major flattened map; the 3 dw taps are fused
            # into the contraction dim (K = 3*Cin) -> only 3 MXU matmuls.
            acc = None
            for dh in range(3):
                base = dh * width
                lhs = jnp.concatenate(
                    [src_ref[base + 0:base + 0 + rows, :],
                     src_ref[base + 1:base + 1 + rows, :],
                     src_ref[base + 2:base + 2 + rows, :]], axis=-1)
                part = jnp.dot(lhs, w_ref[dh], preferred_element_type=jnp.float32)
                acc = part if acc is None else acc + part
            return acc

        # conv1 (3x3, pad=1; im2col pre-built in the wrapper) + ReLU -> f1 (bf16)
        h1 = jnp.dot(xcol_ref[0:BS, :], w1_ref[...],
                     preferred_element_type=jnp.float32)
        f1_ref[0:BS, :] = jnp.maximum(h1 + b1_ref[...], 0.0).astype(jnp.bfloat16)

        # conv2 (3x3, valid) + ReLU -> f2 (f32 so the pooling compares stay f32)
        h2 = conv3x3(f1_ref, BS, w2_ref, Wf)
        f2_ref[0:BS, :] = jnp.maximum(h2 + b2_ref[...], 0.0)

        # 2x2/2 max-pool: Wf is even, so a global stride-2 row read of the
        # flattened map selects exactly the even-j columns (for every i and every
        # sample, since the per-sample slab S is even).  Four such reads give the
        # full 2x2 window max anchored at (i, even j).
        mm = jnp.maximum(
            jnp.maximum(f2_ref[pl.ds(0, CNT, stride=2), :],
                        f2_ref[pl.ds(1, CNT, stride=2), :]),
            jnp.maximum(f2_ref[pl.ds(Wf, CNT, stride=2), :],
                        f2_ref[pl.ds(Wf + 1, CNT, stride=2), :]))
        mx_ref[0:CNT, :] = mm.astype(jnp.bfloat16)

        # Scatter the even-i rows into the zero-padded pooled map (pad=1 border
        # for conv3).  The border must be zero; scratch is per-core on megacore,
        # so it is (cheaply) re-zeroed every step rather than only at step 0.
        pp_ref[...] = jnp.zeros_like(pp_ref)
        for b in range(B):
            for a in range(Ph):
                src = b * SH + 2 * a * Wq
                dst = b * SP + (a + 1) * Wq + 1
                pp_ref[dst:dst + Pw, :] = mx_ref[src:src + Pw, :]

        # conv3 (3x3, pad=1 via the pre-padded pooled map) + ReLU
        h3 = jnp.maximum(conv3x3(pp_ref, BSP, w3_ref, Wq) + b3_ref[...], 0.0)

        # conv4 (1x1) + ReLU
        h4 = jnp.maximum(
            jnp.dot(h3.astype(jnp.bfloat16), w4_ref[...],
                    preferred_element_type=jnp.float32) + b4_ref[...], 0.0)

        # AdaptiveMaxPool2d(1): mask wrapped/garbage rows (h4 >= 0 post-ReLU, so 0
        # is a safe neutral for the max), then per-sample row-max into g.
        h4_ref[0:BSP, :] = jnp.where(msk_ref[...] > 0.0, h4, 0.0)
        for b in range(B):
            g_ref[b:b + 1, :] = jnp.max(h4_ref[b * SP:(b + 1) * SP, :],
                                        axis=0, keepdims=True)

        # Linear head, written to a lane-dense 128-wide padded logits block.
        logits = jnp.dot(g_ref[0:B, :].astype(jnp.bfloat16), wl_ref[...],
                         preferred_element_type=jnp.float32) + bl_ref[...]
        o_ref[...] = logits.astype(o_ref.dtype)

    # ---- advisory cost estimate ----------------------------------------------
    macs = NB * (BS * 9 * C * 32 + BS * 3 * 96 * 32 + BSP * 3 * 96 * 64
                 + BSP * 64 * 64 + B * 64 * OUTW)
    operands = (xcol, w1, b1, w2, b2, w3, b3, w4, b4, wl, bl, gmask)
    bytes_accessed = sum(int(np.prod(a.shape)) * a.dtype.itemsize
                         for a in operands) + Npad * OUTW * 4
    cost = pl.CostEstimate(flops=2 * macs, transcendentals=0,
                           bytes_accessed=int(bytes_accessed))

    out = pl.pallas_call(
        kernel,
        out_shape=jax.ShapeDtypeStruct((NB, B, OUTW), f32),
        grid=(NB,),
        in_specs=[
            pl.BlockSpec((None, BSR, 9 * C), lambda i: (i, 0, 0)),   # im2col input
            pl.BlockSpec((9 * C, 32), lambda i: (0, 0)),             # w1
            pl.BlockSpec((1, 32), lambda i: (0, 0)),                 # b1
            pl.BlockSpec((3, 96, 32), lambda i: (0, 0, 0)),          # w2 (per-dh)
            pl.BlockSpec((1, 32), lambda i: (0, 0)),                 # b2
            pl.BlockSpec((3, 96, 64), lambda i: (0, 0, 0)),          # w3 (per-dh)
            pl.BlockSpec((1, 64), lambda i: (0, 0)),                 # b3
            pl.BlockSpec((64, 64), lambda i: (0, 0)),                # w4 (1x1 conv)
            pl.BlockSpec((1, 64), lambda i: (0, 0)),                 # b4
            pl.BlockSpec((64, OUTW), lambda i: (0, 0)),              # linear W (padded)
            pl.BlockSpec((1, OUTW), lambda i: (0, 0)),               # linear b (padded)
            pl.BlockSpec((BSP, 1), lambda i: (0, 0)),                # validity mask
        ],
        out_specs=pl.BlockSpec((None, B, OUTW), lambda i: (i, 0, 0)),
        scratch_shapes=[
            pltpu.VMEM((F1R, 32), bf16),     # conv1 feature map (bf16)
            pltpu.VMEM((F2R, 32), f32),      # conv2 feature map (f32)
            pltpu.VMEM((MXR, 32), bf16),     # 2x2 window maxes at even-j rows
            pltpu.VMEM((PPR, 32), bf16),     # zero-padded pooled map (bf16)
            pltpu.VMEM((H4R, 64), f32),      # masked conv4 output
            pltpu.VMEM((GR, 64), f32),       # per-sample pooled features
        ],
        compiler_params=pltpu.CompilerParams(
            dimension_semantics=("parallel",),
            vmem_limit_bytes=64 * 1024 * 1024),
        cost_estimate=cost,
    )(xcol, w1, b1, w2, b2, w3, b3, w4, b4, wl, bl, gmask)

    return out.reshape(Npad, OUTW)[:N, :NC]


def init_params(key, num_channels=4, num_classes=10):
    """PyTorch-style uniform(+-1/sqrt(fan_in)) init; conv weights kept in HWIO."""
    ks = jax.random.split(key, 10)

    def u(k, shape, fan_in):
        bound = 1.0 / np.sqrt(fan_in)
        return jax.random.uniform(k, shape, jnp.float32, -bound, bound)

    return {
        "w1": u(ks[0], (3, 3, num_channels, 32), 9 * num_channels),
        "b1": u(ks[1], (32,), 9 * num_channels),
        "w2": u(ks[2], (3, 3, 32, 32), 9 * 32),
        "b2": u(ks[3], (32,), 9 * 32),
        "w3": u(ks[4], (3, 3, 32, 64), 9 * 32),
        "b3": u(ks[5], (64,), 9 * 32),
        "w4": u(ks[6], (64, 64), 64),          # 1x1 conv == dense over channels
        "b4": u(ks[7], (64,), 64),
        "wl": u(ks[8], (64, num_classes), 64),
        "bl": u(ks[9], (num_classes,), 64),
    }


def reference_forward(x_nchw, p):
    """Pure-JAX/XLA f32 reference mirroring the PyTorch module exactly."""
    x = jnp.transpose(x_nchw, (0, 2, 3, 1)).astype(jnp.float32)

    def conv(h, w, b, pad):
        y = jax.lax.conv_general_dilated(
            h, w, (1, 1), [(pad, pad), (pad, pad)],
            dimension_numbers=("NHWC", "HWIO", "NHWC"))
        return jax.nn.relu(y + b.reshape(1, 1, 1, -1))

    h = conv(x, p["w1"], p["b1"], 1)
    h = conv(h, p["w2"], p["b2"], 0)
    h = jax.lax.reduce_window(h, -jnp.inf, jax.lax.max,
                              (1, 2, 2, 1), (1, 2, 2, 1), "VALID")
    h = conv(h, p["w3"], p["b3"], 1)
    h = jax.nn.relu(jnp.einsum("nhwc,cd->nhwd", h, p["w4"])
                    + p["b4"].reshape(1, 1, 1, -1))
    g = jnp.max(h, axis=(1, 2))                  # AdaptiveMaxPool2d(1) + flatten
    return g @ p["wl"] + p["bl"].reshape(1, -1)


if __name__ == "__main__":
    key = jax.random.PRNGKey(0)
    k_x, k_p = jax.random.split(key)

    N, C, H, W = 2, 4, 16, 16
    num_classes = 10
    x = jax.random.normal(k_x, (N, C, H, W), jnp.float32)
    params = init_params(k_p, num_channels=C, num_classes=num_classes)

    fwd = jax.jit(simple_cnn_forward)
    out = jax.block_until_ready(fwd(x, params))

    ref = jax.block_until_ready(reference_forward(x, params))
    assert out.shape == (N, num_classes), out.shape
    err = float(np.max(np.abs(np.asarray(out) - np.asarray(ref))))
    assert np.allclose(np.asarray(out), np.asarray(ref), atol=5e-2, rtol=5e-2), (
        "mismatch vs reference", err)

    print("KERNEL_OK")
</pallas_src>

<mosaic_0001>
module attributes {stable_mosaic.version = 11 : i64} {
  func.func @kernel(%arg0: i32, %arg1: memref<1x576x36xbf16, #tpu.memory_space<vmem>>, %arg2: memref<36x32xbf16, #tpu.memory_space<vmem>>, %arg3: memref<1x32xf32, #tpu.memory_space<vmem>>, %arg4: memref<3x96x32xbf16, #tpu.memory_space<vmem>>, %arg5: memref<1x32xf32, #tpu.memory_space<vmem>>, %arg6: memref<3x96x64xbf16, #tpu.memory_space<vmem>>, %arg7: memref<1x64xf32, #tpu.memory_space<vmem>>, %arg8: memref<64x64xbf16, #tpu.memory_space<vmem>>, %arg9: memref<1x64xf32, #tpu.memory_space<vmem>>, %arg10: memref<64x128xbf16, #tpu.memory_space<vmem>>, %arg11: memref<1x128xf32, #tpu.memory_space<vmem>>, %arg12: memref<162x1xf32, #tpu.memory_space<vmem>>, %arg13: memref<1x2x128xf32, #tpu.memory_space<vmem>>, %arg14: memref<616x32xbf16, #tpu.memory_space<vmem>>, %arg15: memref<600x32xf32, #tpu.memory_space<vmem>>, %arg16: memref<288x32xbf16, #tpu.memory_space<vmem>>, %arg17: memref<184x32xbf16, #tpu.memory_space<vmem>>, %arg18: memref<168x64xf32, #tpu.memory_space<vmem>>, %arg19: memref<8x64xf32, #tpu.memory_space<vmem>>) attributes {dimension_semantics = [#tpu.dimension_semantics<parallel>], iteration_bounds = array<i64: 1>, scalar_prefetch = 0 : i64, scratch_operands = 6 : i64, tpu.core_type = #tpu.core_type<tc>, window_params = [{transform_indices = @transform_0, window_bounds = array<i64: 1, 576, 36>}, {pipeline_mode = #tpu.pipeline_mode<synchronous>, transform_indices = @transform_1, window_bounds = array<i64: 36, 32>}, {pipeline_mode = #tpu.pipeline_mode<synchronous>, transform_indices = @transform_2, window_bounds = array<i64: 1, 32>}, {pipeline_mode = #tpu.pipeline_mode<synchronous>, transform_indices = @transform_3, window_bounds = array<i64: 3, 96, 32>}, {pipeline_mode = #tpu.pipeline_mode<synchronous>, transform_indices = @transform_4, window_bounds = array<i64: 1, 32>}, {pipeline_mode = #tpu.pipeline_mode<synchronous>, transform_indices = @transform_5, window_bounds = array<i64: 3, 96, 64>}, {pipeline_mode = #tpu.pipeline_mode<synchronous>, transform_indices = @transform_6, window_bounds = array<i64: 1, 64>}, {pipeline_mode = #tpu.pipeline_mode<synchronous>, transform_indices = @transform_7, window_bounds = array<i64: 64, 64>}, {pipeline_mode = #tpu.pipeline_mode<synchronous>, transform_indices = @transform_8, window_bounds = array<i64: 1, 64>}, {pipeline_mode = #tpu.pipeline_mode<synchronous>, transform_indices = @transform_9, window_bounds = array<i64: 64, 128>}, {pipeline_mode = #tpu.pipeline_mode<synchronous>, transform_indices = @transform_10, window_bounds = array<i64: 1, 128>}, {pipeline_mode = #tpu.pipeline_mode<synchronous>, transform_indices = @transform_11, window_bounds = array<i64: 162, 1>}, {transform_indices = @transform_12, window_bounds = array<i64: 1, 2, 128>}]} {
    %c0 = arith.constant 0 : index
    %c0_0 = arith.constant 0 : index
    %c0_1 = arith.constant 0 : index
    %0 = vector.load %arg1[%c0, %c0_0, %c0_1] : memref<1x576x36xbf16, #tpu.memory_space<vmem>>, vector<1x576x36xbf16>
    %1 = vector.shape_cast %0 : vector<1x576x36xbf16> to vector<576x36xbf16>
    %c0_2 = arith.constant 0 : index
    %c0_3 = arith.constant 0 : index
    %2 = vector.load %arg2[%c0_2, %c0_3] : memref<36x32xbf16, #tpu.memory_space<vmem>>, vector<36x32xbf16>
    %cst = arith.constant dense<0.000000e+00> : vector<576x32xf32>
    %3 = tpu.matmul %1, %2, %cst {dimension_numbers = #tpu.dot_dimension_numbers<[1], [0], [0], [1], [0, 0, 1, 1], [], []>} : vector<576x36xbf16>, vector<36x32xbf16>, vector<576x32xf32> -> vector<576x32xf32>
    %c0_4 = arith.constant 0 : index
    %c0_5 = arith.constant 0 : index
    %4 = vector.load %arg3[%c0_4, %c0_5] : memref<1x32xf32, #tpu.memory_space<vmem>>, vector<1x32xf32>
    %5 = vector.broadcast %4 : vector<1x32xf32> to vector<576x32xf32>
    %6 = arith.addf %3, %5 : vector<576x32xf32>
    %cst_6 = arith.constant 0.000000e+00 : f32
    %7 = vector.broadcast %cst_6 : f32 to vector<576x32xf32>
    %8 = arith.maximumf %6, %7 : vector<576x32xf32>
    %9 = arith.truncf %8 : vector<576x32xf32> to vector<576x32xbf16>
    %c0_7 = arith.constant 0 : index
    %c0_8 = arith.constant 0 : index
    %10 = vector.load %arg14[%c0_7, %c0_8] : memref<616x32xbf16, #tpu.memory_space<vmem>>, vector<576x32xbf16>
    tpu.vector_store %arg14[%c0_7, %c0_8], %9 {strides = array<i32>} : memref<616x32xbf16, #tpu.memory_space<vmem>>, vector<576x32xbf16>,
    %c0_9 = arith.constant 0 : index
    %c0_10 = arith.constant 0 : index
    %11 = vector.load %arg14[%c0_9, %c0_10] : memref<616x32xbf16, #tpu.memory_space<vmem>>, vector<576x32xbf16>
    %c1 = arith.constant 1 : index
    %c0_11 = arith.constant 0 : index
    %12 = vector.load %arg14[%c1, %c0_11] : memref<616x32xbf16, #tpu.memory_space<vmem>>, vector<576x32xbf16>
    %c2 = arith.constant 2 : index
    %c0_12 = arith.constant 0 : index
    %13 = vector.load %arg14[%c2, %c0_12] : memref<616x32xbf16, #tpu.memory_space<vmem>>, vector<576x32xbf16>
    %14 = tpu.concatenate %11, %12, %13 in 1 : vector<576x32xbf16>, vector<576x32xbf16>, vector<576x32xbf16> -> vector<576x96xbf16>
    %c0_13 = arith.constant 0 : index
    %c0_14 = arith.constant 0 : index
    %c0_15 = arith.constant 0 : index
    %15 = vector.load %arg4[%c0_13, %c0_14, %c0_15] : memref<3x96x32xbf16, #tpu.memory_space<vmem>>, vector<1x96x32xbf16>
    %16 = vector.shape_cast %15 : vector<1x96x32xbf16> to vector<96x32xbf16>
    %cst_16 = arith.constant dense<0.000000e+00> : vector<576x32xf32>
    %17 = tpu.matmul %14, %16, %cst_16 {dimension_numbers = #tpu.dot_dimension_numbers<[1], [0], [0], [1], [0, 0, 1, 1], [], []>} : vector<576x96xbf16>, vector<96x32xbf16>, vector<576x32xf32> -> vector<576x32xf32>
    %c18 = arith.constant 18 : index
    %c0_17 = arith.constant 0 : index
    %18 = vector.load %arg14[%c18, %c0_17] : memref<616x32xbf16, #tpu.memory_space<vmem>>, vector<576x32xbf16>
    %c19 = arith.constant 19 : index
    %c0_18 = arith.constant 0 : index
    %19 = vector.load %arg14[%c19, %c0_18] : memref<616x32xbf16, #tpu.memory_space<vmem>>, vector<576x32xbf16>
    %c20 = arith.constant 20 : index
    %c0_19 = arith.constant 0 : index
    %20 = vector.load %arg14[%c20, %c0_19] : memref<616x32xbf16, #tpu.memory_space<vmem>>, vector<576x32xbf16>
    %21 = tpu.concatenate %18, %19, %20 in 1 : vector<576x32xbf16>, vector<576x32xbf16>, vector<576x32xbf16> -> vector<576x96xbf16>
    %c1_20 = arith.constant 1 : index
    %c0_21 = arith.constant 0 : index
    %c0_22 = arith.constant 0 : index
    %22 = vector.load %arg4[%c1_20, %c0_21, %c0_22] : memref<3x96x32xbf16, #tpu.memory_space<vmem>>, vector<1x96x32xbf16>
    %23 = vector.shape_cast %22 : vector<1x96x32xbf16> to vector<96x32xbf16>
    %cst_23 = arith.constant dense<0.000000e+00> : vector<576x32xf32>
    %24 = tpu.matmul %21, %23, %cst_23 {dimension_numbers = #tpu.dot_dimension_numbers<[1], [0], [0], [1], [0, 0, 1, 1], [], []>} : vector<576x96xbf16>, vector<96x32xbf16>, vector<576x32xf32> -> vector<576x32xf32>
    %25 = arith.addf %17, %24 : vector<576x32xf32>
    %c36 = arith.constant 36 : index
    %c0_24 = arith.constant 0 : index
    %26 = vector.load %arg14[%c36, %c0_24] : memref<616x32xbf16, #tpu.memory_space<vmem>>, vector<576x32xbf16>
    %c37 = arith.constant 37 : index
    %c0_25 = arith.constant 0 : index
    %27 = vector.load %arg14[%c37, %c0_25] : memref<616x32xbf16, #tpu.memory_space<vmem>>, vector<576x32xbf16>
    %c38 = arith.constant 38 : index
    %c0_26 = arith.constant 0 : index
    %28 = vector.load %arg14[%c38, %c0_26] : memref<616x32xbf16, #tpu.memory_space<vmem>>, vector<576x32xbf16>
    %29 = tpu.concatenate %26, %27, %28 in 1 : vector<576x32xbf16>, vector<576x32xbf16>, vector<576x32xbf16> -> vector<576x96xbf16>
    %c2_27 = arith.constant 2 : index
    %c0_28 = arith.constant 0 : index
    %c0_29 = arith.constant 0 : index
    %30 = vector.load %arg4[%c2_27, %c0_28, %c0_29] : memref<3x96x32xbf16, #tpu.memory_space<vmem>>, vector<1x96x32xbf16>
    %31 = vector.shape_cast %30 : vector<1x96x32xbf16> to vector<96x32xbf16>
    %cst_30 = arith.constant dense<0.000000e+00> : vector<576x32xf32>
    %32 = tpu.matmul %29, %31, %cst_30 {dimension_numbers = #tpu.dot_dimension_numbers<[1], [0], [0], [1], [0, 0, 1, 1], [], []>} : vector<576x96xbf16>, vector<96x32xbf16>, vector<576x32xf32> -> vector<576x32xf32>
    %33 = arith.addf %25, %32 : vector<576x32xf32>
    %c0_31 = arith.constant 0 : index
    %c0_32 = arith.constant 0 : index
    %34 = vector.load %arg5[%c0_31, %c0_32] : memref<1x32xf32, #tpu.memory_space<vmem>>, vector<1x32xf32>
    %35 = vector.broadcast %34 : vector<1x32xf32> to vector<576x32xf32>
    %36 = arith.addf %33, %35 : vector<576x32xf32>
    %cst_33 = arith.constant 0.000000e+00 : f32
    %37 = vector.broadcast %cst_33 : f32 to vector<576x32xf32>
    %38 = arith.maximumf %36, %37 : vector<576x32xf32>
    %c0_34 = arith.constant 0 : index
    %c0_35 = arith.constant 0 : index
    %39 = vector.load %arg15[%c0_34, %c0_35] : memref<600x32xf32, #tpu.memory_space<vmem>>, vector<576x32xf32>
    tpu.vector_store %arg15[%c0_34, %c0_35], %38 {strides = array<i32>} : memref<600x32xf32, #tpu.memory_space<vmem>>, vector<576x32xf32>,
    %c0_36 = arith.constant 0 : index
    %c0_37 = arith.constant 0 : index
    %40 = tpu.strided_load %arg15[%c0_36, %c0_37] {strides = array<i32: 2, 1>} : memref<600x32xf32, #tpu.memory_space<vmem>>, vector<288x32xf32>
    %c1_38 = arith.constant 1 : index
    %c0_39 = arith.constant 0 : index
    %41 = tpu.strided_load %arg15[%c1_38, %c0_39] {strides = array<i32: 2, 1>} : memref<600x32xf32, #tpu.memory_space<vmem>>, vector<288x32xf32>
    %42 = arith.maximumf %40, %41 : vector<288x32xf32>
    %c18_40 = arith.constant 18 : index
    %c0_41 = arith.constant 0 : index
    %43 = tpu.strided_load %arg15[%c18_40, %c0_41] {strides = array<i32: 2, 1>} : memref<600x32xf32, #tpu.memory_space<vmem>>, vector<288x32xf32>
    %c19_42 = arith.constant 19 : index
    %c0_43 = arith.constant 0 : index
    %44 = tpu.strided_load %arg15[%c19_42, %c0_43] {strides = array<i32: 2, 1>} : memref<600x32xf32, #tpu.memory_space<vmem>>, vector<288x32xf32>
    %45 = arith.maximumf %43, %44 : vector<288x32xf32>
    %46 = arith.maximumf %42, %45 : vector<288x32xf32>
    %47 = arith.truncf %46 : vector<288x32xf32> to vector<288x32xbf16>
    %c0_44 = arith.constant 0 : index
    %c0_45 = arith.constant 0 : index
    %48 = vector.load %arg16[%c0_44, %c0_45] : memref<288x32xbf16, #tpu.memory_space<vmem>>, vector<288x32xbf16>
    tpu.vector_store %arg16[%c0_44, %c0_45], %47 {strides = array<i32>} : memref<288x32xbf16, #tpu.memory_space<vmem>>, vector<288x32xbf16>,
    %cst_46 = arith.constant 0.000000e+00 : bf16
    %49 = vector.broadcast %cst_46 : bf16 to vector<184x32xbf16>
    %c0_47 = arith.constant 0 : index
    %c0_48 = arith.constant 0 : index
    %50 = vector.load %arg17[%c0_47, %c0_48] : memref<184x32xbf16, #tpu.memory_space<vmem>>, vector<184x32xbf16>
    tpu.vector_store %arg17[%c0_47, %c0_48], %49 {strides = array<i32>} : memref<184x32xbf16, #tpu.memory_space<vmem>>, vector<184x32xbf16>,
    %c0_49 = arith.constant 0 : index
    %c0_50 = arith.constant 0 : index
    %51 = vector.load %arg16[%c0_49, %c0_50] : memref<288x32xbf16, #tpu.memory_space<vmem>>, vector<7x32xbf16>
    %c10 = arith.constant 10 : index
    %c0_51 = arith.constant 0 : index
    %52 = vector.load %arg17[%c10, %c0_51] : memref<184x32xbf16, #tpu.memory_space<vmem>>, vector<7x32xbf16>
    tpu.vector_store %arg17[%c10, %c0_51], %51 {strides = array<i32>} : memref<184x32xbf16, #tpu.memory_space<vmem>>, vector<7x32xbf16>,
    %c18_52 = arith.constant 18 : index
    %c0_53 = arith.constant 0 : index
    %53 = vector.load %arg16[%c18_52, %c0_53] : memref<288x32xbf16, #tpu.memory_space<vmem>>, vector<7x32xbf16>
    %c19_54 = arith.constant 19 : index
    %c0_55 = arith.constant 0 : index
    %54 = vector.load %arg17[%c19_54, %c0_55] : memref<184x32xbf16, #tpu.memory_space<vmem>>, vector<7x32xbf16>
    tpu.vector_store %arg17[%c19_54, %c0_55], %53 {strides = array<i32>} : memref<184x32xbf16, #tpu.memory_space<vmem>>, vector<7x32xbf16>,
    %c36_56 = arith.constant 36 : index
    %c0_57 = arith.constant 0 : index
    %55 = vector.load %arg16[%c36_56, %c0_57] : memref<288x32xbf16, #tpu.memory_space<vmem>>, vector<7x32xbf16>
    %c28 = arith.constant 28 : index
    %c0_58 = arith.constant 0 : index
    %56 = vector.load %arg17[%c28, %c0_58] : memref<184x32xbf16, #tpu.memory_space<vmem>>, vector<7x32xbf16>
    tpu.vector_store %arg17[%c28, %c0_58], %55 {strides = array<i32>} : memref<184x32xbf16, #tpu.memory_space<vmem>>, vector<7x32xbf16>,
    %c54 = arith.constant 54 : index
    %c0_59 = arith.constant 0 : index
    %57 = vector.load %arg16[%c54, %c0_59] : memref<288x32xbf16, #tpu.memory_space<vmem>>, vector<7x32xbf16>
    %c37_60 = arith.constant 37 : index
    %c0_61 = arith.constant 0 : index
    %58 = vector.load %arg17[%c37_60, %c0_61] : memref<184x32xbf16, #tpu.memory_space<vmem>>, vector<7x32xbf16>
    tpu.vector_store %arg17[%c37_60, %c0_61], %57 {strides = array<i32>} : memref<184x32xbf16, #tpu.memory_space<vmem>>, vector<7x32xbf16>,
    %c72 = arith.constant 72 : index
    %c0_62 = arith.constant 0 : index
    %59 = vector.load %arg16[%c72, %c0_62] : memref<288x32xbf16, #tpu.memory_space<vmem>>, vector<7x32xbf16>
    %c46 = arith.constant 46 : index
    %c0_63 = arith.constant 0 : index
    %60 = vector.load %arg17[%c46, %c0_63] : memref<184x32xbf16, #tpu.memory_space<vmem>>, vector<7x32xbf16>
    tpu.vector_store %arg17[%c46, %c0_63], %59 {strides = array<i32>} : memref<184x32xbf16, #tpu.memory_space<vmem>>, vector<7x32xbf16>,
    %c90 = arith.constant 90 : index
    %c0_64 = arith.constant 0 : index
    %61 = vector.load %arg16[%c90, %c0_64] : memref<288x32xbf16, #tpu.memory_space<vmem>>, vector<7x32xbf16>
    %c55 = arith.constant 55 : index
    %c0_65 = arith.constant 0 : index
    %62 = vector.load %arg17[%c55, %c0_65] : memref<184x32xbf16, #tpu.memory_space<vmem>>, vector<7x32xbf16>
    tpu.vector_store %arg17[%c55, %c0_65], %61 {strides = array<i32>} : memref<184x32xbf16, #tpu.memory_space<vmem>>, vector<7x32xbf16>,
    %c108 = arith.constant 108 : index
    %c0_66 = arith.constant 0 : index
    %63 = vector.load %arg16[%c108, %c0_66] : memref<288x32xbf16, #tpu.memory_space<vmem>>, vector<7x32xbf16>
    %c64 = arith.constant 64 : index
    %c0_67 = arith.constant 0 : index
    %64 = vector.load %arg17[%c64, %c0_67] : memref<184x32xbf16, #tpu.memory_space<vmem>>, vector<7x32xbf16>
    tpu.vector_store %arg17[%c64, %c0_67], %63 {strides = array<i32>} : memref<184x32xbf16, #tpu.memory_space<vmem>>, vector<7x32xbf16>,
    %c144 = arith.constant 144 : index
    %c0_68 = arith.constant 0 : index
    %65 = vector.load %arg16[%c144, %c0_68] : memref<288x32xbf16, #tpu.memory_space<vmem>>, vector<7x32xbf16>
    %c91 = arith.constant 91 : index
    %c0_69 = arith.constant 0 : index
    %66 = vector.load %arg17[%c91, %c0_69] : memref<184x32xbf16, #tpu.memory_space<vmem>>, vector<7x32xbf16>
    tpu.vector_store %arg17[%c91, %c0_69], %65 {strides = array<i32>} : memref<184x32xbf16, #tpu.memory_space<vmem>>, vector<7x32xbf16>,
    %c162 = arith.constant 162 : index
    %c0_70 = arith.constant 0 : index
    %67 = vector.load %arg16[%c162, %c0_70] : memref<288x32xbf16, #tpu.memory_space<vmem>>, vector<7x32xbf16>
    %c100 = arith.constant 100 : index
    %c0_71 = arith.constant 0 : index
    %68 = vector.load %arg17[%c100, %c0_71] : memref<184x32xbf16, #tpu.memory_space<vmem>>, vector<7x32xbf16>
    tpu.vector_store %arg17[%c100, %c0_71], %67 {strides = array<i32>} : memref<184x32xbf16, #tpu.memory_space<vmem>>, vector<7x32xbf16>,
    %c180 = arith.constant 180 : index
    %c0_72 = arith.constant 0 : index
    %69 = vector.load %arg16[%c180, %c0_72] : memref<288x32xbf16, #tpu.memory_space<vmem>>, vector<7x32xbf16>
    %c109 = arith.constant 109 : index
    %c0_73 = arith.constant 0 : index
    %70 = vector.load %arg17[%c109, %c0_73] : memref<184x32xbf16, #tpu.memory_space<vmem>>, vector<7x32xbf16>
    tpu.vector_store %arg17[%c109, %c0_73], %69 {strides = array<i32>} : memref<184x32xbf16, #tpu.memory_space<vmem>>, vector<7x32xbf16>,
    %c198 = arith.constant 198 : index
    %c0_74 = arith.constant 0 : index
    %71 = vector.load %arg16[%c198, %c0_74] : memref<288x32xbf16, #tpu.memory_space<vmem>>, vector<7x32xbf16>
    %c118 = arith.constant 118 : index
    %c0_75 = arith.constant 0 : index
    %72 = vector.load %arg17[%c118, %c0_75] : memref<184x32xbf16, #tpu.memory_space<vmem>>, vector<7x32xbf16>
    tpu.vector_store %arg17[%c118, %c0_75], %71 {strides = array<i32>} : memref<184x32xbf16, #tpu.memory_space<vmem>>, vector<7x32xbf16>,
    %c216 = arith.constant 216 : index
    %c0_76 = arith.constant 0 : index
    %73 = vector.load %arg16[%c216, %c0_76] : memref<288x32xbf16, #tpu.memory_space<vmem>>, vector<7x32xbf16>
    %c127 = arith.constant 127 : index
    %c0_77 = arith.constant 0 : index
    %74 = vector.load %arg17[%c127, %c0_77] : memref<184x32xbf16, #tpu.memory_space<vmem>>, vector<7x32xbf16>
    tpu.vector_store %arg17[%c127, %c0_77], %73 {strides = array<i32>} : memref<184x32xbf16, #tpu.memory_space<vmem>>, vector<7x32xbf16>,
    %c234 = arith.constant 234 : index
    %c0_78 = arith.constant 0 : index
    %75 = vector.load %arg16[%c234, %c0_78] : memref<288x32xbf16, #tpu.memory_space<vmem>>, vector<7x32xbf16>
    %c136 = arith.constant 136 : index
    %c0_79 = arith.constant 0 : index
    %76 = vector.load %arg17[%c136, %c0_79] : memref<184x32xbf16, #tpu.memory_space<vmem>>, vector<7x32xbf16>
    tpu.vector_store %arg17[%c136, %c0_79], %75 {strides = array<i32>} : memref<184x32xbf16, #tpu.memory_space<vmem>>, vector<7x32xbf16>,
    %c252 = arith.constant 252 : index
    %c0_80 = arith.constant 0 : index
    %77 = vector.load %arg16[%c252, %c0_80] : memref<288x32xbf16, #tpu.memory_space<vmem>>, vector<7x32xbf16>
    %c145 = arith.constant 145 : index
    %c0_81 = arith.constant 0 : index
    %78 = vector.load %arg17[%c145, %c0_81] : memref<184x32xbf16, #tpu.memory_space<vmem>>, vector<7x32xbf16>
    tpu.vector_store %arg17[%c145, %c0_81], %77 {strides = array<i32>} : memref<184x32xbf16, #tpu.memory_space<vmem>>, vector<7x32xbf16>,
    %c0_82 = arith.constant 0 : index
    %c0_83 = arith.constant 0 : index
    %79 = vector.load %arg17[%c0_82, %c0_83] : memref<184x32xbf16, #tpu.memory_space<vmem>>, vector<162x32xbf16>
    %c1_84 = arith.constant 1 : index
    %c0_85 = arith.constant 0 : index
    %80 = vector.load %arg17[%c1_84, %c0_85] : memref<184x32xbf16, #tpu.memory_space<vmem>>, vector<162x32xbf16>
    %c2_86 = arith.constant 2 : index
    %c0_87 = arith.constant 0 : index
    %81 = vector.load %arg17[%c2_86, %c0_87] : memref<184x32xbf16, #tpu.memory_space<vmem>>, vector<162x32xbf16>
    %82 = tpu.concatenate %79, %80, %81 in 1 : vector<162x32xbf16>, vector<162x32xbf16>, vector<162x32xbf16> -> vector<162x96xbf16>
    %c0_88 = arith.constant 0 : index
    %c0_89 = arith.constant 0 : index
    %c0_90 = arith.constant 0 : index
    %83 = vector.load %arg6[%c0_88, %c0_89, %c0_90] : memref<3x96x64xbf16, #tpu.memory_space<vmem>>, vector<1x96x64xbf16>
    %84 = vector.shape_cast %83 : vector<1x96x64xbf16> to vector<96x64xbf16>
    %cst_91 = arith.constant dense<0.000000e+00> : vector<162x64xf32>
    %85 = tpu.matmul %82, %84, %cst_91 {dimension_numbers = #tpu.dot_dimension_numbers<[1], [0], [0], [1], [0, 0, 1, 1], [], []>} : vector<162x96xbf16>, vector<96x64xbf16>, vector<162x64xf32> -> vector<162x64xf32>
    %c9 = arith.constant 9 : index
    %c0_92 = arith.constant 0 : index
    %86 = vector.load %arg17[%c9, %c0_92] : memref<184x32xbf16, #tpu.memory_space<vmem>>, vector<162x32xbf16>
    %c10_93 = arith.constant 10 : index
    %c0_94 = arith.constant 0 : index
    %87 = vector.load %arg17[%c10_93, %c0_94] : memref<184x32xbf16, #tpu.memory_space<vmem>>, vector<162x32xbf16>
    %c11 = arith.constant 11 : index
    %c0_95 = arith.constant 0 : index
    %88 = vector.load %arg17[%c11, %c0_95] : memref<184x32xbf16, #tpu.memory_space<vmem>>, vector<162x32xbf16>
    %89 = tpu.concatenate %86, %87, %88 in 1 : vector<162x32xbf16>, vector<162x32xbf16>, vector<162x32xbf16> -> vector<162x96xbf16>
    %c1_96 = arith.constant 1 : index
    %c0_97 = arith.constant 0 : index
    %c0_98 = arith.constant 0 : index
    %90 = vector.load %arg6[%c1_96, %c0_97, %c0_98] : memref<3x96x64xbf16, #tpu.memory_space<vmem>>, vector<1x96x64xbf16>
    %91 = vector.shape_cast %90 : vector<1x96x64xbf16> to vector<96x64xbf16>
    %cst_99 = arith.constant dense<0.000000e+00> : vector<162x64xf32>
    %92 = tpu.matmul %89, %91, %cst_99 {dimension_numbers = #tpu.dot_dimension_numbers<[1], [0], [0], [1], [0, 0, 1, 1], [], []>} : vector<162x96xbf16>, vector<96x64xbf16>, vector<162x64xf32> -> vector<162x64xf32>
    %93 = arith.addf %85, %92 : vector<162x64xf32>
    %c18_100 = arith.constant 18 : index
    %c0_101 = arith.constant 0 : index
    %94 = vector.load %arg17[%c18_100, %c0_101] : memref<184x32xbf16, #tpu.memory_space<vmem>>, vector<162x32xbf16>
    %c19_102 = arith.constant 19 : index
    %c0_103 = arith.constant 0 : index
    %95 = vector.load %arg17[%c19_102, %c0_103] : memref<184x32xbf16, #tpu.memory_space<vmem>>, vector<162x32xbf16>
    %c20_104 = arith.constant 20 : index
    %c0_105 = arith.constant 0 : index
    %96 = vector.load %arg17[%c20_104, %c0_105] : memref<184x32xbf16, #tpu.memory_space<vmem>>, vector<162x32xbf16>
    %97 = tpu.concatenate %94, %95, %96 in 1 : vector<162x32xbf16>, vector<162x32xbf16>, vector<162x32xbf16> -> vector<162x96xbf16>
    %c2_106 = arith.constant 2 : index
    %c0_107 = arith.constant 0 : index
    %c0_108 = arith.constant 0 : index
    %98 = vector.load %arg6[%c2_106, %c0_107, %c0_108] : memref<3x96x64xbf16, #tpu.memory_space<vmem>>, vector<1x96x64xbf16>
    %99 = vector.shape_cast %98 : vector<1x96x64xbf16> to vector<96x64xbf16>
    %cst_109 = arith.constant dense<0.000000e+00> : vector<162x64xf32>
    %100 = tpu.matmul %97, %99, %cst_109 {dimension_numbers = #tpu.dot_dimension_numbers<[1], [0], [0], [1], [0, 0, 1, 1], [], []>} : vector<162x96xbf16>, vector<96x64xbf16>, vector<162x64xf32> -> vector<162x64xf32>
    %101 = arith.addf %93, %100 : vector<162x64xf32>
    %c0_110 = arith.constant 0 : index
    %c0_111 = arith.constant 0 : index
    %102 = vector.load %arg7[%c0_110, %c0_111] : memref<1x64xf32, #tpu.memory_space<vmem>>, vector<1x64xf32>
    %103 = vector.broadcast %102 : vector<1x64xf32> to vector<162x64xf32>
    %104 = arith.addf %101, %103 : vector<162x64xf32>
    %cst_112 = arith.constant 0.000000e+00 : f32
    %105 = vector.broadcast %cst_112 : f32 to vector<162x64xf32>
    %106 = arith.maximumf %104, %105 : vector<162x64xf32>
    %107 = arith.truncf %106 : vector<162x64xf32> to vector<162x64xbf16>
    %c0_113 = arith.constant 0 : index
    %c0_114 = arith.constant 0 : index
    %108 = vector.load %arg8[%c0_113, %c0_114] : memref<64x64xbf16, #tpu.memory_space<vmem>>, vector<64x64xbf16>
    %cst_115 = arith.constant dense<0.000000e+00> : vector<162x64xf32>
    %109 = tpu.matmul %107, %108, %cst_115 {dimension_numbers = #tpu.dot_dimension_numbers<[1], [0], [0], [1], [0, 0, 1, 1], [], []>} : vector<162x64xbf16>, vector<64x64xbf16>, vector<162x64xf32> -> vector<162x64xf32>
    %c0_116 = arith.constant 0 : index
    %c0_117 = arith.constant 0 : index
    %110 = vector.load %arg9[%c0_116, %c0_117] : memref<1x64xf32, #tpu.memory_space<vmem>>, vector<1x64xf32>
    %111 = vector.broadcast %110 : vector<1x64xf32> to vector<162x64xf32>
    %112 = arith.addf %109, %111 : vector<162x64xf32>
    %cst_118 = arith.constant 0.000000e+00 : f32
    %113 = vector.broadcast %cst_118 : f32 to vector<162x64xf32>
    %114 = arith.maximumf %112, %113 : vector<162x64xf32>
    %c0_119 = arith.constant 0 : index
    %c0_120 = arith.constant 0 : index
    %115 = vector.load %arg12[%c0_119, %c0_120] : memref<162x1xf32, #tpu.memory_space<vmem>>, vector<162x1xf32>
    %cst_121 = arith.constant 0.000000e+00 : f32
    %116 = vector.broadcast %cst_121 : f32 to vector<162x1xf32>
    %117 = arith.cmpf ogt, %115, %116 : vector<162x1xf32>
    %cst_122 = arith.constant 0.000000e+00 : f32
    %118 = vector.shape_cast %117 : vector<162x1xi1> to vector<162x1xi1>
    %119 = vector.broadcast %118 : vector<162x1xi1> to vector<162x64xi1>
    %120 = vector.broadcast %cst_122 : f32 to vector<162x64xf32>
    %121 = arith.select %119, %114, %120 : vector<162x64xi1>, vector<162x64xf32>
    %c0_123 = arith.constant 0 : index
    %c0_124 = arith.constant 0 : index
    %122 = vector.load %arg18[%c0_123, %c0_124] : memref<168x64xf32, #tpu.memory_space<vmem>>, vector<162x64xf32>
    tpu.vector_store %arg18[%c0_123, %c0_124], %121 {strides = array<i32>} : memref<168x64xf32, #tpu.memory_space<vmem>>, vector<162x64xf32>,
    %c0_125 = arith.constant 0 : index
    %c0_126 = arith.constant 0 : index
    %123 = vector.load %arg18[%c0_125, %c0_126] : memref<168x64xf32, #tpu.memory_space<vmem>>, vector<81x64xf32>
    %cst_127 = arith.constant dense<0xFF800000> : vector<64xf32>
    %124 = vector.multi_reduction <maximumf>, %123, %cst_127 [0] : vector<81x64xf32> to vector<64xf32>
    %125 = vector.shape_cast %124 : vector<64xf32> to vector<1x64xf32>
    %c0_128 = arith.constant 0 : index
    %c0_129 = arith.constant 0 : index
    %126 = vector.load %arg19[%c0_128, %c0_129] : memref<8x64xf32, #tpu.memory_space<vmem>>, vector<1x64xf32>
    tpu.vector_store %arg19[%c0_128, %c0_129], %125 {strides = array<i32>} : memref<8x64xf32, #tpu.memory_space<vmem>>, vector<1x64xf32>,
    %c81 = arith.constant 81 : index
    %c0_130 = arith.constant 0 : index
    %127 = vector.load %arg18[%c81, %c0_130] : memref<168x64xf32, #tpu.memory_space<vmem>>, vector<81x64xf32>
    %cst_131 = arith.constant dense<0xFF800000> : vector<64xf32>
    %128 = vector.multi_reduction <maximumf>, %127, %cst_131 [0] : vector<81x64xf32> to vector<64xf32>
    %129 = vector.shape_cast %128 : vector<64xf32> to vector<1x64xf32>
    %c1_132 = arith.constant 1 : index
    %c0_133 = arith.constant 0 : index
    %130 = vector.load %arg19[%c1_132, %c0_133] : memref<8x64xf32, #tpu.memory_space<vmem>>, vector<1x64xf32>
    tpu.vector_store %arg19[%c1_132, %c0_133], %129 {strides = array<i32>} : memref<8x64xf32, #tpu.memory_space<vmem>>, vector<1x64xf32>,
    %c0_134 = arith.constant 0 : index
    %c0_135 = arith.constant 0 : index
    %131 = vector.load %arg19[%c0_134, %c0_135] : memref<8x64xf32, #tpu.memory_space<vmem>>, vector<2x64xf32>
    %132 = arith.truncf %131 : vector<2x64xf32> to vector<2x64xbf16>
    %c0_136 = arith.constant 0 : index
    %c0_137 = arith.constant 0 : index
    %133 = vector.load %arg10[%c0_136, %c0_137] : memref<64x128xbf16, #tpu.memory_space<vmem>>, vector<64x128xbf16>
    %cst_138 = arith.constant dense<0.000000e+00> : vector<2x128xf32>
    %134 = tpu.matmul %132, %133, %cst_138 {dimension_numbers = #tpu.dot_dimension_numbers<[1], [0], [0], [1], [0, 0, 1, 1], [], []>} : vector<2x64xbf16>, vector<64x128xbf16>, vector<2x128xf32> -> vector<2x128xf32>
    %c0_139 = arith.constant 0 : index
    %c0_140 = arith.constant 0 : index
    %135 = vector.load %arg11[%c0_139, %c0_140] : memref<1x128xf32, #tpu.memory_space<vmem>>, vector<1x128xf32>
    %136 = vector.broadcast %135 : vector<1x128xf32> to vector<2x128xf32>
    %137 = arith.addf %134, %136 : vector<2x128xf32>
    %c0_141 = arith.constant 0 : index
    %c0_142 = arith.constant 0 : index
    %c0_143 = arith.constant 0 : index
    %138 = vector.load %arg13[%c0_141, %c0_142, %c0_143] : memref<1x2x128xf32, #tpu.memory_space<vmem>>, vector<1x2x128xf32>
    %139 = vector.shape_cast %138 : vector<1x2x128xf32> to vector<2x128xf32>
    %140 = vector.shape_cast %137 : vector<2x128xf32> to vector<1x2x128xf32>
    tpu.vector_store %arg13[%c0_141, %c0_142, %c0_143], %140 {strides = array<i32>} : memref<1x2x128xf32, #tpu.memory_space<vmem>>, vector<1x2x128xf32>,
    return
  }
  func.func @transform_0(%arg0: i32) -> (i32, i32, i32) {
    %c0_i32 = arith.constant 0 : i32
    %c0_i32_0 = arith.constant 0 : i32
    %c0_i32_1 = arith.constant 0 : i32
    return %arg0, %c0_i32, %c0_i32_0 : i32, i32, i32
  }
  func.func @transform_1(%arg0: i32) -> (i32, i32) {
    %c0_i32 = arith.constant 0 : i32
    %c0_i32_0 = arith.constant 0 : i32
    %c0_i32_1 = arith.constant 0 : i32
    return %c0_i32, %c0_i32_0 : i32, i32
  }
  func.func @transform_2(%arg0: i32) -> (i32, i32) {
    %c0_i32 = arith.constant 0 : i32
    %c0_i32_0 = arith.constant 0 : i32
    %c0_i32_1 = arith.constant 0 : i32
    return %c0_i32, %c0_i32_0 : i32, i32
  }
  func.func @transform_3(%arg0: i32) -> (i32, i32, i32) {
    %c0_i32 = arith.constant 0 : i32
    %c0_i32_0 = arith.constant 0 : i32
    %c0_i32_1 = arith.constant 0 : i32
    %c0_i32_2 = arith.constant 0 : i32
    return %c0_i32, %c0_i32_0, %c0_i32_1 : i32, i32, i32
  }
  func.func @transform_4(%arg0: i32) -> (i32, i32) {
    %c0_i32 = arith.constant 0 : i32
    %c0_i32_0 = arith.constant 0 : i32
    %c0_i32_1 = arith.constant 0 : i32
    return %c0_i32, %c0_i32_0 : i32, i32
  }
  func.func @transform_5(%arg0: i32) -> (i32, i32, i32) {
    %c0_i32 = arith.constant 0 : i32
    %c0_i32_0 = arith.constant 0 : i32
    %c0_i32_1 = arith.constant 0 : i32
    %c0_i32_2 = arith.constant 0 : i32
    return %c0_i32, %c0_i32_0, %c0_i32_1 : i32, i32, i32
  }
  func.func @transform_6(%arg0: i32) -> (i32, i32) {
    %c0_i32 = arith.constant 0 : i32
    %c0_i32_0 = arith.constant 0 : i32
    %c0_i32_1 = arith.constant 0 : i32
    return %c0_i32, %c0_i32_0 : i32, i32
  }
  func.func @transform_7(%arg0: i32) -> (i32, i32) {
    %c0_i32 = arith.constant 0 : i32
    %c0_i32_0 = arith.constant 0 : i32
    %c0_i32_1 = arith.constant 0 : i32
    return %c0_i32, %c0_i32_0 : i32, i32
  }
  func.func @transform_8(%arg0: i32) -> (i32, i32) {
    %c0_i32 = arith.constant 0 : i32
    %c0_i32_0 = arith.constant 0 : i32
    %c0_i32_1 = arith.constant 0 : i32
    return %c0_i32, %c0_i32_0 : i32, i32
  }
  func.func @transform_9(%arg0: i32) -> (i32, i32) {
    %c0_i32 = arith.constant 0 : i32
    %c0_i32_0 = arith.constant 0 : i32
    %c0_i32_1 = arith.constant 0 : i32
    return %c0_i32, %c0_i32_0 : i32, i32
  }
  func.func @transform_10(%arg0: i32) -> (i32, i32) {
    %c0_i32 = arith.constant 0 : i32
    %c0_i32_0 = arith.constant 0 : i32
    %c0_i32_1 = arith.constant 0 : i32
    return %c0_i32, %c0_i32_0 : i32, i32
  }
  func.func @transform_11(%arg0: i32) -> (i32, i32) {
    %c0_i32 = arith.constant 0 : i32
    %c0_i32_0 = arith.constant 0 : i32
    %c0_i32_1 = arith.constant 0 : i32
    return %c0_i32, %c0_i32_0 : i32, i32
  }
  func.func @transform_12(%arg0: i32) -> (i32, i32, i32) {
    %c0_i32 = arith.constant 0 : i32
    %c0_i32_0 = arith.constant 0 : i32
    %c0_i32_1 = arith.constant 0 : i32
    return %arg0, %c0_i32, %c0_i32_0 : i32, i32, i32
  }
}

</mosaic_0001>

<bundles_post_ra>
// kernel: simple_cnn_forward.1
= control target key start
LH: loop header
LB: loop body
LE: loop exit
PB: predicated region body
PF: predicated region fallthrough
CT: control target
= control target key end

     0   :  { %17 = vsyncpa [#allocation9], 0  ;;  %s13240_s0 = inlined_call_operand.hbm [shape: bf16[1,576,36], index: 0, kind: input, shape index: {}]   ;;  %s13241_s1 = inlined_call_operand.hbm [shape: bf16[36,32], index: 1, kind: input, shape index: {}]   ;;  %s13242_s2 = inlined_call_operand.hbm [shape: f32[1,32], index: 2, kind: input, shape index: {}]   ;;  %s13243_s3 = inlined_call_operand.hbm [shape: bf16[3,96,32], index: 3, kind: input, shape index: {}]   ;;  %s13244_s4 = inlined_call_operand.hbm [shape: f32[1,32], index: 4, kind: input, shape index: {}]   ;;  %s13245_s5 = inlined_call_operand.hbm [shape: bf16[3,96,64], index: 5, kind: input, shape index: {}]   ;;  %s13246_s6 = inlined_call_operand.hbm [shape: f32[1,64], index: 6, kind: input, shape index: {}]   ;;  %s13247_s7 = inlined_call_operand.hbm [shape: bf16[64,64], index: 7, kind: input, shape index: {}]   ;;  %s13248_s8 = inlined_call_operand.hbm [shape: f32[1,64], index: 8, kind: input, shape index: {}]   ;;  %s13249_s9 = inlined_call_operand.hbm [shape: bf16[64,128], index: 9, kind: input, shape index: {}]   ;;  %s13250_s10 = inlined_call_operand.hbm [shape: f32[1,128], index: 10, kind: input, shape index: {}]   ;;  %s13251_s11 = inlined_call_operand.hbm [shape: f32[162,1], index: 11, kind: input, shape index: {}]   ;;  %s13252_s12 = inlined_call_operand.hbm [shape: f32[1,2,128], index: 12, kind: output, shape index: {}]  }
   0x1   :  { %18 = vsyncpa [#allocation12], 0 }
   0x2   :  { %19 = vsyncpa [#allocation15], 0 }
   0x3   :  { %20 = vsyncpa [#allocation18], 0 }
   0x4   :  { %21 = vsyncpa [#allocation21], 0 }
   0x5   :  { %22 = vsyncpa [#allocation24], 0 }
   0x6   :  { %23 = vsyncpa [#allocation27], 0 }
   0x7   :  { %24 = vsyncpa [#allocation10], 0  ;;  %s10228_s21 = smov [#allocation11]   ;;  %s10229_s23 = smov [#allocation14]  }
   0x8   :  { %s42_s22 = sshll.u32 %s10228_s21, 4  ;;  %s64_s24 = sshll.u32 %s10229_s23, 4  ;;  %s43_s22 = int_to_ptr.vmem [resolvable:$true] %s42_s22  ;;  %s10314_s24 = int_to_ptr.vmem [resolvable:$true] %s64_s24 }
   0x9   :  { %s9926_s27 = scalar_lea.hbm %s13241_s1, 320 }
   0xa   :  { %p9927_p0 = scmp.ne.s32.totalorder %s13241_s1, %s9926_s27  ;;  %p9930_p1 = scmp.lt.u32.totalorder %s9926_s27, %s13241_s1 }
   0xc   :  { %p9932_p2 = pnand %p9930_p1, %p9927_p0 }
   0xe   :  { %9935 = shalt.err (!%p9932_p2)
}
   0xf   :  { %s9936_s14 = scalar_lea.vmem %s43_s22, 320  ;;  %p9941_p4 = scmp.lt.s32.totalorder %s43_s22, %s43_s22 }
  0x10   :  { %p9937_p3 = scmp.ne.s32.totalorder %s43_s22, %s9936_s14  ;;  %p9942_p5 = scmp.lt.s32.totalorder %s9936_s14, %s9936_s14 }
  0x12   :  { %p9943_p6 = por %p9942_p5, %p9941_p4 }
  0x14   :  { %p9944_p7 = pnand %p9943_p6, %p9937_p3 }
  0x16   :  { %9947 = shalt.err (!%p9944_p7)
}
  0x17   :  { %s10230_s15 = smov 64   ;;  %s10231_s16 = smov 4  }
  0x18   :  { %48 = dma.hbm_to_vmem [thread:$0]  %s13241_s1, 320, %s43_s22, [#allocation12], %s10230_s15, %s10230_s15, %s10231_s16  }
  0x19   :  { %s9948_s21 = scalar_lea.hbm %s13243_s3, 2304 }
  0x1a   :  { %p9949_p8 = scmp.ne.s32.totalorder %s13243_s3, %s9948_s21  ;;  %p9952_p9 = scmp.lt.u32.totalorder %s9948_s21, %s13243_s3 }
  0x1c   :  { %p9954_p10 = pnand %p9952_p9, %p9949_p8 }
  0x1e   :  { %9957 = shalt.err (!%p9954_p10)
}
  0x1f   :  { %s9958_s28 = scalar_lea.vmem %s10314_s24, 2304  ;;  %p9963_p12 = scmp.lt.s32.totalorder %s10314_s24, %s10314_s24 }
  0x20   :  { %p9959_p11 = scmp.ne.s32.totalorder %s10314_s24, %s9958_s28  ;;  %p9964_p13 = scmp.lt.s32.totalorder %s9958_s28, %s9958_s28 }
  0x22   :  { %p9965_p0 = por %p9964_p13, %p9963_p12 }
  0x24   :  { %p9966_p1 = pnand %p9965_p0, %p9959_p11 }
  0x26   :  { %9969 = shalt.err (!%p9966_p1)
}
  0x27   :  { %70 = dma.hbm_to_vmem [thread:$0]  %s13243_s3, 2304, %s10314_s24, [#allocation15], %s10230_s15, %s10230_s15, %s10231_s16  }
  0x28   :  { %s10232_s29 = smov [#allocation17]   ;;  %s10233_s13 = smov [#allocation20]  }
  0x29   :  { %s86_s30 = sshll.u32 %s10232_s29, 4  ;;  %s108_s14 = sshll.u32 %s10233_s13, 4  ;;  %s87_s30 = int_to_ptr.vmem [resolvable:$true] %s86_s30  ;;  %s10351_s14 = int_to_ptr.vmem [resolvable:$true] %s108_s14 }
  0x2a   :  { %s9970_s19 = scalar_lea.hbm %s13245_s5, 2304 }
  0x2b   :  { %p9971_p2 = scmp.ne.s32.totalorder %s13245_s5, %s9970_s19  ;;  %p9974_p3 = scmp.lt.u32.totalorder %s9970_s19, %s13245_s5 }
  0x2d   :  { %p9976_p4 = pnand %p9974_p3, %p9971_p2 }
  0x2f   :  { %9979 = shalt.err (!%p9976_p4)
}
  0x30   :  { %s9980_s3 = scalar_lea.vmem %s87_s30, 2304  ;;  %p9985_p6 = scmp.lt.s32.totalorder %s87_s30, %s87_s30 }
  0x31   :  { %p9981_p5 = scmp.ne.s32.totalorder %s87_s30, %s9980_s3  ;;  %p9986_p7 = scmp.lt.s32.totalorder %s9980_s3, %s9980_s3 }
  0x33   :  { %p9987_p8 = por %p9986_p7, %p9985_p6 }
  0x35   :  { %p9988_p9 = pnand %p9987_p8, %p9981_p5 }
  0x37   :  { %9991 = shalt.err (!%p9988_p9)
}
  0x38   :  { %92 = dma.hbm_to_vmem [thread:$0]  %s13245_s5, 2304, %s87_s30, [#allocation18], %s10230_s15, %s10230_s15, %s10231_s16  }
  0x39   :  { %s9992_s1 = scalar_lea.hbm %s13247_s7, 512 }
  0x3a   :  { %p9993_p10 = scmp.ne.s32.totalorder %s13247_s7, %s9992_s1  ;;  %p9996_p11 = scmp.lt.u32.totalorder %s9992_s1, %s13247_s7 }
  0x3c   :  { %p9998_p12 = pnand %p9996_p11, %p9993_p10 }
  0x3e   :  { %10001 = shalt.err (!%p9998_p12)
}
  0x3f   :  { %s10002_s18 = scalar_lea.vmem %s10351_s14, 512  ;;  %p10007_p0 = scmp.lt.s32.totalorder %s10351_s14, %s10351_s14 }
  0x40   :  { %p10003_p13 = scmp.ne.s32.totalorder %s10351_s14, %s10002_s18  ;;  %p10008_p1 = scmp.lt.s32.totalorder %s10002_s18, %s10002_s18 }
  0x42   :  { %p10009_p2 = por %p10008_p1, %p10007_p0 }
  0x44   :  { %p10010_p3 = pnand %p10009_p2, %p10003_p13 }
  0x46   :  { %10013 = shalt.err (!%p10010_p3)
}
  0x47   :  { %114 = dma.hbm_to_vmem [thread:$0]  %s13247_s7, 512, %s10351_s14, [#allocation21], %s10230_s15, %s10230_s15, %s10231_s16  }
  0x48   :  { %s10234_s19 = smov [#allocation23]   ;;  %s10235_s21 = smov [#allocation8]  }
  0x49   :  { %s130_s20 = sshll.u32 %s10234_s19, 4  ;;  %s30_s23 = sshll.u32 %s10235_s21, 4  ;;  %s131_s20 = int_to_ptr.vmem [resolvable:$true] %s130_s20  ;;  %s10388_s23 = int_to_ptr.vmem [resolvable:$true] %s30_s23 }
  0x4a   :  { %s10014_s24 = scalar_lea.hbm %s13249_s9, 512 }
  0x4b   :  { %p10015_p4 = scmp.ne.s32.totalorder %s13249_s9, %s10014_s24  ;;  %p10018_p5 = scmp.lt.u32.totalorder %s10014_s24, %s13249_s9 }
  0x4d   :  { %p10020_p6 = pnand %p10018_p5, %p10015_p4 }
  0x4f   :  { %10023 = shalt.err (!%p10020_p6)
}
  0x50   :  { %s10024_s7 = scalar_lea.vmem %s131_s20, 512  ;;  %p10029_p8 = scmp.lt.s32.totalorder %s131_s20, %s131_s20 }
  0x51   :  { %p10025_p7 = scmp.ne.s32.totalorder %s131_s20, %s10024_s7  ;;  %p10030_p9 = scmp.lt.s32.totalorder %s10024_s7, %s10024_s7 }
  0x53   :  { %p10031_p10 = por %p10030_p9, %p10029_p8 }
  0x55   :  { %p10032_p11 = pnand %p10031_p10, %p10025_p7 }
  0x57   :  { %10035 = shalt.err (!%p10032_p11)
}
  0x58   :  { %136 = dma.hbm_to_vmem [thread:$0]  %s13249_s9, 512, %s131_s20, [#allocation24], %s10230_s15, %s10230_s15, %s10231_s16  }
  0x59   :  { %s10036_s17 = scalar_lea.hbm %s13240_s0, 4608 }
  0x5a   :  { %p10037_p12 = scmp.ne.s32.totalorder %s13240_s0, %s10036_s17  ;;  %p10040_p13 = scmp.lt.u32.totalorder %s10036_s17, %s13240_s0 }
  0x5c   :  { %p10042_p0 = pnand %p10040_p13, %p10037_p12 }
  0x5e   :  { %10045 = shalt.err (!%p10042_p0)
}
  0x5f   :  { %s10046_s21 = scalar_lea.vmem %s10388_s23, 4608  ;;  %p10051_p2 = scmp.lt.s32.totalorder %s10388_s23, %s10388_s23 }
  0x60   :  { %p10047_p1 = scmp.ne.s32.totalorder %s10388_s23, %s10046_s21  ;;  %p10052_p3 = scmp.lt.s32.totalorder %s10046_s21, %s10046_s21 }
  0x62   :  { %p10053_p4 = por %p10052_p3, %p10051_p2 }
  0x64   :  { %p10054_p5 = pnand %p10053_p4, %p10047_p1 }
  0x66   :  { %10057 = shalt.err (!%p10054_p5)
}
  0x67   :  { %36 = dma.hbm_to_vmem [thread:$0]  %s13240_s0, 4608, %s10388_s23, [#allocation9], %s10230_s15, %s10230_s15, %s10231_s16  }
  0x68   :  { %s10236_s25 = smov [#allocation13]   ;;  %s10237_s24 = smov [#allocation16]  }
  0x69   :  { %s55_s3 = sshll.u32 %s10236_s25, 4  ;;  %s77_s26 = sshll.u32 %s10237_s24, 4  ;;  %s56_s3 = int_to_ptr.vmem [resolvable:$true] %s55_s3  ;;  %s78_s26 = int_to_ptr.vmem [resolvable:$true] %s77_s26 }
  0x6a   :  { %s10058_s1 = scalar_lea.hbm %s13242_s2, 16 }
  0x6b   :  { %p10059_p6 = scmp.ne.s32.totalorder %s13242_s2, %s10058_s1  ;;  %p10062_p7 = scmp.lt.u32.totalorder %s10058_s1, %s13242_s2 }
  0x6d   :  { %p10064_p8 = pnand %p10062_p7, %p10059_p6 }
  0x6f   :  { %10067 = shalt.err (!%p10064_p8)
}
  0x70   :  { %s10068_s0 = scalar_lea.vmem %s56_s3, 16  ;;  %s10072_s16 = scalar_lea.vmem %s56_s3, 32 }
  0x71   :  { %p10069_p9 = scmp.ne.s32.totalorder %s56_s3, %s10068_s0  ;;  %p10073_p10 = scmp.lt.s32.totalorder %s56_s3, %s56_s3 }
  0x72   :  { %p10074_p11 = scmp.lt.s32.totalorder %s10072_s16, %s10068_s0 }
  0x74   :  { %p10075_p12 = por %p10074_p11, %p10073_p10 }
  0x76   :  { %p10076_p13 = pnand %p10075_p12, %p10069_p9 }
  0x78   :  { %10079 = shalt.err (!%p10076_p13)
}
  0x79   :  { %58 = dma.hbm_to_vmem [thread:$0]  %s13242_s2, 16, %s56_s3, [#allocation12]  }
  0x7a   :  { %s10080_s5 = scalar_lea.hbm %s13244_s4, 16 }
  0x7b   :  { %p10081_p0 = scmp.ne.s32.totalorder %s13244_s4, %s10080_s5  ;;  %p10084_p1 = scmp.lt.u32.totalorder %s10080_s5, %s13244_s4 }
  0x7d   :  { %p10086_p2 = pnand %p10084_p1, %p10081_p0 }
  0x7f   :  { %10089 = shalt.err (!%p10086_p2)
}
  0x80   :  { %s10090_s20 = scalar_lea.vmem %s78_s26, 16  ;;  %s10094_s25 = scalar_lea.vmem %s78_s26, 32 }
  0x81   :  { %p10091_p3 = scmp.ne.s32.totalorder %s78_s26, %s10090_s20  ;;  %p10095_p4 = scmp.lt.s32.totalorder %s78_s26, %s78_s26 }
  0x82   :  { %p10096_p5 = scmp.lt.s32.totalorder %s10094_s25, %s10090_s20 }
  0x84   :  { %p10097_p6 = por %p10096_p5, %p10095_p4 }
  0x86   :  { %p10098_p7 = pnand %p10097_p6, %p10091_p3 }
  0x88   :  { %10101 = shalt.err (!%p10098_p7)
}
  0x89   :  { %80 = dma.hbm_to_vmem [thread:$0]  %s13244_s4, 16, %s78_s26, [#allocation15]  }
  0x8a   :  { %s10238_s24 = smov [#allocation19]   ;;  %s10239_s28 = smov [#allocation22]  }
  0x8b   :  { %s99_s27 = sshll.u32 %s10238_s24, 4  ;;  %s121_s1 = sshll.u32 %s10239_s28, 4  ;;  %s100_s27 = int_to_ptr.vmem [resolvable:$true] %s99_s27  ;;  %s122_s1 = int_to_ptr.vmem [resolvable:$true] %s121_s1 }
  0x8c   :  { %s10102_s22 = scalar_lea.hbm %s13246_s6, 16 }
  0x8d   :  { %p10103_p8 = scmp.ne.s32.totalorder %s13246_s6, %s10102_s22  ;;  %p10106_p9 = scmp.lt.u32.totalorder %s10102_s22, %s13246_s6 }
  0x8f   :  { %p10108_p10 = pnand %p10106_p9, %p10103_p8 }
  0x91   :  { %10111 = shalt.err (!%p10108_p10)
}
  0x92   :  { %s10112_s4 = scalar_lea.vmem %s100_s27, 16  ;;  %s10116_s26 = scalar_lea.vmem %s100_s27, 32 }
  0x93   :  { %p10113_p11 = scmp.ne.s32.totalorder %s100_s27, %s10112_s4  ;;  %p10117_p12 = scmp.lt.s32.totalorder %s100_s27, %s100_s27 }
  0x94   :  { %p10118_p13 = scmp.lt.s32.totalorder %s10116_s26, %s10112_s4 }
  0x96   :  { %p10119_p0 = por %p10118_p13, %p10117_p12 }
  0x98   :  { %p10120_p1 = pnand %p10119_p0, %p10113_p11 }
  0x9a   :  { %10123 = shalt.err (!%p10120_p1)
}
  0x9b   :  { %102 = dma.hbm_to_vmem [thread:$0]  %s13246_s6, 16, %s100_s27, [#allocation18]  }
  0x9c   :  { %s10124_s30 = scalar_lea.hbm %s13248_s8, 16 }
  0x9d   :  { %p10125_p2 = scmp.ne.s32.totalorder %s13248_s8, %s10124_s30  ;;  %p10128_p3 = scmp.lt.u32.totalorder %s10124_s30, %s13248_s8 }
  0x9f   :  { %p10130_p4 = pnand %p10128_p3, %p10125_p2 }
  0xa1   :  { %10133 = shalt.err (!%p10130_p4)
}
  0xa2   :  { %s10134_s25 = scalar_lea.vmem %s122_s1, 16  ;;  %s10138_s2 = scalar_lea.vmem %s122_s1, 32 }
  0xa3   :  { %p10135_p5 = scmp.ne.s32.totalorder %s122_s1, %s10134_s25  ;;  %p10139_p6 = scmp.lt.s32.totalorder %s122_s1, %s122_s1 }
  0xa4   :  { %p10140_p7 = scmp.lt.s32.totalorder %s10138_s2, %s10134_s25 }
  0xa6   :  { %p10141_p8 = por %p10140_p7, %p10139_p6 }
  0xa8   :  { %p10142_p9 = pnand %p10141_p8, %p10135_p5 }
  0xaa   :  { %10145 = shalt.err (!%p10142_p9)
}
  0xab   :  { %124 = dma.hbm_to_vmem [thread:$0]  %s13248_s8, 16, %s122_s1, [#allocation21]  }
  0xac   :  { %s10240_s24 = smov [#allocation25]   ;;  %s10241_s28 = smov [#allocation26]  }
  0xad   :  { %s143_s27 = sshll.u32 %s10240_s24, 4  ;;  %s152_s7 = sshll.u32 %s10241_s28, 4  ;;  %s144_s27 = int_to_ptr.vmem [resolvable:$true] %s143_s27  ;;  %s10473_s7 = int_to_ptr.vmem [resolvable:$true] %s152_s7 }
  0xae   :  { %s10146_s29 = scalar_lea.hbm %s13250_s10, 16 }
  0xaf   :  { %p10147_p10 = scmp.ne.s32.totalorder %s13250_s10, %s10146_s29  ;;  %p10150_p11 = scmp.lt.u32.totalorder %s10146_s29, %s13250_s10 }
  0xb1   :  { %p10152_p12 = pnand %p10150_p11, %p10147_p10 }
  0xb3   :  { %10155 = shalt.err (!%p10152_p12)
}
  0xb4   :  { %s10156_s8 = scalar_lea.vmem %s144_s27, 16  ;;  %s10160_s1 = scalar_lea.vmem %s144_s27, 32 }
  0xb5   :  { %p10157_p13 = scmp.ne.s32.totalorder %s144_s27, %s10156_s8  ;;  %p10161_p0 = scmp.lt.s32.totalorder %s144_s27, %s144_s27 }
  0xb6   :  { %p10162_p1 = scmp.lt.s32.totalorder %s10160_s1, %s10156_s8 }
  0xb8   :  { %p10163_p2 = por %p10162_p1, %p10161_p0 }
  0xba   :  { %p10164_p3 = pnand %p10163_p2, %p10157_p13 }
  0xbc   :  { %10167 = shalt.err (!%p10164_p3)
}
  0xbd   :  { %146 = dma.hbm_to_vmem [thread:$0]  %s13250_s10, 16, %s144_s27, [#allocation24]  }
  0xbe   :  { %s10168_s5 = scalar_lea.hbm %s13251_s11, 2688 }
  0xbf   :  { %p10169_p4 = scmp.ne.s32.totalorder %s13251_s11, %s10168_s5  ;;  %p10172_p5 = scmp.lt.u32.totalorder %s10168_s5, %s13251_s11 }
  0xc1   :  { %p10174_p6 = pnand %p10172_p5, %p10169_p4 }
  0xc3   :  { %10177 = shalt.err (!%p10174_p6)
}
  0xc4   :  { %s10178_s20 = scalar_lea.vmem %s10473_s7, 2688  ;;  %p10183_p8 = scmp.lt.s32.totalorder %s10473_s7, %s10473_s7 }
  0xc5   :  { %p10179_p7 = scmp.ne.s32.totalorder %s10473_s7, %s10178_s20  ;;  %p10184_p9 = scmp.lt.s32.totalorder %s10178_s20, %s10178_s20 }
  0xc7   :  { %p10185_p10 = por %p10184_p9, %p10183_p8 }
  0xc9   :  { %p10186_p11 = pnand %p10185_p10, %p10179_p7 }
  0xcb   :  { %10189 = shalt.err (!%p10186_p11)
}
  0xcc   :  { %s10242_s10 = smov 128   ;;  %s10243_s25 = smov 8  }
  0xcd   :  { %158 = dma.hbm_to_vmem [thread:$0]  %s13251_s11, 2688, %s10473_s7, [#allocation27], %s10242_s10, %s10242_s10, %s10243_s25  }
  0xce   :  { %10212 = dma.done.wait [#allocation9], 4608  }
  0xcf   :  { %10213 = vsyncadd [#allocation9], 4294962688 }
  0xd0   :  { %10214 = dma.done.wait [#allocation12], 336  }
  0xd1   :  { %10215 = vsyncadd [#allocation12], 4294966960 }
  0xd2   :  { %10216 = dma.done.wait [#allocation15], 2320  }
  0xd3   :  { %10217 = vsyncadd [#allocation15], 4294964976 }
  0xd4   :  { %10218 = dma.done.wait [#allocation18], 2320  }
  0xd5   :  { %10219 = vsyncadd [#allocation18], 4294964976 }
  0xd6   :  { %10220 = dma.done.wait [#allocation21], 528  }
  0xd7   :  { %10221 = vsyncadd [#allocation21], 4294966768 }
  0xd8   :  { %10222 = dma.done.wait [#allocation24], 528  }
  0xd9   :  { %10223 = vsyncadd [#allocation24], 4294966768 }
  0xda   :  { %10224 = dma.done.wait [#allocation27], 2688  }
  0xdb   :  { %10225 = vsyncadd [#allocation27], 4294964608  ;;  %v9653_v0 = vld [vmem:[#allocation11] sm:$0xff]   ;;  %v9654_v1 = vld [vmem:[#allocation11 + $0x8] sm:$0xff]   ;;  %vm475_vm0 = vcmask 293888   ;;  %vm13264_vm1 = vcmask 1041408  }
  0xdc   :  { %8916 = vmatprep.subr.bf16.mxu0 %v9653_v0  ;;  %v9655_v2 = vld [vmem:[#allocation11 + $0x10] ss:$0 sps:$4 sm:$0x33]   ;;  %v9656_v3 = vld [vmem:[#allocation8] sm:$0xff]   ;;  %9478 = vmatprep.subr.bf16.mxu1 %v9653_v0  ;;  %v9657_v5 = vld [vmem:[#allocation8 + $0x8] sm:$0xff]   ;;  %vm13263_vm2 = vcmask 257024  }
  0xdd   :  { %8917 = vmatpush3.bf16.msra.mxu0 %v9653_v0  ;;  %9481 = vmatpush3.bf16.msra.mxu1 %v9653_v0  ;;  %v586_v4 = vsel %vm13264_vm1, %v9655_v2, 0  ;;  %v9658_v6 = vld [vmem:[#allocation8 + $0x10] sm:$0xff]   ;;  %v9659_v7 = vld [vmem:[#allocation8 + $0x18] sm:$0xff]   ;;  %v9660_v8 = vld [vmem:[#allocation8 + $0x20] sm:$0xff]   ;;  %vm1967_vm3 = vcmask 1046528   ;;  %s10244_s11 = smov 32  }
  0xde   :  { %8918 = vmatprep.subr.bf16.mxu0 %v9654_v1  ;;  %8922 = vmatprep.mubr.msk.bf16.mxu0 %vm475_vm0, %v9656_v3  ;;  %v9661_v9 = vld [vmem:[#allocation8 + $0x28] sm:$0xff]   ;;  %v9662_v10 = vld [vmem:[#allocation8 + $0x30] sm:$0xff]   ;;  %v9685_v12 = vld [vmem:[#allocation8 + $0xf8] sm:$0xff]   ;;  %vm1599_vm4 = vsmask.f32 7424  ;;  %vm2113_vm5 = vcmask 261120  }
  0xdf   :  { %9479 = vmatprep.subr.bf16.mxu1 %v9654_v1  ;;  %v9684_v11 = vld [vmem:[#allocation8 + $0xf0] sm:$0xff]   ;;  %v9663_v13 = vld [vmem:[#allocation8 + $0x38] sm:$0xff]   ;;  %v9664_v14 = vld [vmem:[#allocation8 + $0x40] sm:$0xff]   ;;  %vm13261_vm6 = vcmask 523264   ;;  %vm13260_vm7 = vcmask 785408   ;;  %vm4354_vm8 = vcmask 1045504  }
  0xe0   :  { %8982 = vmatprep.mubr.msk.bf16.mxu1 %vm475_vm0, %v9684_v11  ;;  %v9688_v15 = vld [vmem:[#allocation8 + $0x100] sm:$0xff]   ;;  %v9689_v16 = vld [vmem:[#allocation8 + $0x108] sm:$0xff]   ;;  %v9690_v17 = vld [vmem:[#allocation8 + $0x110] sm:$0xff]   ;;  %vm13262_vm9 = vcmask 253952   ;;  %vm5653_vm10 = vsmask.f32 256 }
  0xe1   :  { %8919 = vmatpush3.bf16.msra.mxu0 %v9654_v1  ;;  %9482 = vmatpush3.bf16.msra.mxu1 %v9654_v1  ;;  %v9665_v18 = vld [vmem:[#allocation8 + $0x48] sm:$0xff]   ;;  %v9666_v19 = vld [vmem:[#allocation8 + $0x50] sm:$0xff]   ;;  %v9691_v20 = vld [vmem:[#allocation8 + $0x118] sm:$0xff]   ;;  %vm5650_vm11 = vcmask 257025   ;;  %vm5664_vm13 = vsmask.f32 4368 }
  0xe2   :  { %9628 = vmatprep.subr.msk.bf16.mxu0 %vm13264_vm1, %v9655_v2  ;;  %9629 = vmatprep.subr.msk.bf16.mxu1 %vm13264_vm1, %v9655_v2  ;;  %v9667_v21 = vld [vmem:[#allocation8 + $0x58] sm:$0xff]   ;;  %v9668_v22 = vld [vmem:[#allocation8 + $0x60] sm:$0xff]   ;;  %v9669_v23 = vld [vmem:[#allocation8 + $0x68] sm:$0xff]   ;;  %vm5681_vm14 = vsmask.f32 7942 }
  0xe3   :  { %v9670_v24 = vld [vmem:[#allocation8 + $0x70] sm:$0xff]   ;;  %v9671_v25 = vld [vmem:[#allocation8 + $0x78] sm:$0xff]   ;;  %v9672_v26 = vld [vmem:[#allocation8 + $0x80] sm:$0xff]  }
  0xe4   :  { %v9673_v27 = vld [vmem:[#allocation8 + $0x88] sm:$0xff]   ;;  %v9674_v28 = vld [vmem:[#allocation8 + $0x90] sm:$0xff]   ;;  %v9675_v29 = vld [vmem:[#allocation8 + $0x98] sm:$0xff]  }
  0xe5   :  { %8921 = vmatpush3.bf16.msra.mxu0 %v586_v4  ;;  %9483 = vmatpush3.bf16.msra.mxu1 %v586_v4  ;;  %v9676_v30 = vld [vmem:[#allocation8 + $0xa0] sm:$0xff]   ;;  %v9677_v31 = vld [vmem:[#allocation8 + $0xa8] sm:$0xff]   ;;  %v9678_v32 = vld [vmem:[#allocation8 + $0xb0] sm:$0xff]  }
  0xe6   :  { %v9679_v33 = vld [vmem:[#allocation8 + $0xb8] sm:$0xff]   ;;  %v9680_v34 = vld [vmem:[#allocation8 + $0xc0] sm:$0xff]   ;;  %v9681_v35 = vld [vmem:[#allocation8 + $0xc8] sm:$0xff]  }
  0xe7   :  { %v9682_v36 = vld [vmem:[#allocation8 + $0xd0] sm:$0xff]   ;;  %v9683_v37 = vld [vmem:[#allocation8 + $0xd8] sm:$0xff]   ;;  %v9686_v38 = vld [vmem:[#allocation8 + $0xe0] sm:$0xff]  }
  0xe8   :  { %8923 = vmatmul.mubr.msk.bf16.vlgmr.msra.gmra.mrb[0].mxu0 %vm475_vm0, %v9657_v5  ;;  %8983 = vmatmul.mubr.msk.bf16.vlgmr.msra.gmra.mrb[0].mxu1 %vm475_vm0, %v9685_v12  ;;  %v9687_v39 = vld [vmem:[#allocation8 + $0xe8] sm:$0xff]   ;;  %v10543_v40 = vld [vmem:[#allocation13] ss:$0 sm:$0xff]  ;;  %vm12064_vm12 = vmand %vm13262_vm9, %vm5653_vm10 }
  0xe9   :  { %8926 = vmatprep.mubr.msk.bf16.mxu0 %vm475_vm0, %v9658_v6  ;;  %8986 = vmatprep.mubr.msk.bf16.mxu1 %vm475_vm0, %v9688_v15  ;;  %v9720_v58 = vld [vmem:[#allocation14 + $0x30] sm:$0xff]   ;;  %v9722_v4 = vld [vmem:[#allocation14 + $0x38] sm:$0xff]   ;;  %vm12085_vm15 = vmand %vm5650_vm11, %vm5681_vm14  ;;  %vm5711_vm14 = vsmask.f32 7440 }
  0xea   :  { %8994 = vmatprep.subr.bf16.mxu1 %v9720_v58 }
  0xeb   :  { %8995 = vmatpush3.bf16.msra.mxu1 %v9720_v58 }
  0xec   :  { %8996 = vmatprep.subr.bf16.mxu1 %v9722_v4 }
  0xef   :  { %8997 = vmatpush3.bf16.msra.mxu1 %v9722_v4 }
  0xf0   :  { %8927 = vmatmul.mubr.msk.bf16.gmra.mrb[4].mxu0 %vm475_vm0, %v9659_v7  ;;  %8987 = vmatmul.mubr.msk.bf16.gmra.mrb[4].mxu1 %vm475_vm0, %v9689_v16 }
  0xf1   :  { %8930 = vmatprep.mubr.msk.bf16.mxu0 %vm475_vm0, %v9660_v8  ;;  %8990 = vmatprep.mubr.msk.bf16.mxu1 %vm475_vm0, %v9690_v17 }
  0xf8   :  { %8931 = vmatmul.mubr.msk.bf16.gmra.mrb[8].mxu0 %vm475_vm0, %v9661_v9  ;;  %8991 = vmatmul.mubr.msk.bf16.gmra.mrb[8].mxu1 %vm475_vm0, %v9691_v20 }
  0xf9   :  { %8934 = vmatprep.mubr.msk.bf16.mxu0 %vm475_vm0, %v9662_v10 }
 0x100   :  { %8935 = vmatmul.mubr.msk.bf16.gmra.mrb[12].mxu0 %vm475_vm0, %v9663_v13 }
 0x101   :  { %8938 = vmatprep.mubr.msk.bf16.mxu0 %vm475_vm0, %v9664_v14  ;;  %v9724_v14 = vld [vmem:[#allocation14 + $0x40] sm:$0xff]  }
 0x102   :  { %8998 = vmatprep.subr.bf16.mxu1 %v9724_v14 }
 0x103   :  { %8999 = vmatpush3.bf16.msra.mxu1 %v9724_v14 }
 0x108   :  { %8939 = vmatmul.mubr.msk.bf16.gmra.mrb[16].mxu0 %vm475_vm0, %v9665_v18 }
 0x109   :  { %8942 = vmatprep.mubr.msk.bf16.mxu0 %vm475_vm0, %v9666_v19 }
 0x110   :  { %8943 = vmatmul.mubr.msk.bf16.gmra.mrb[20].mxu0 %vm475_vm0, %v9667_v21 }
 0x111   :  { %8946 = vmatprep.mubr.msk.bf16.mxu0 %vm475_vm0, %v9668_v22 }
 0x118   :  { %8947 = vmatmul.mubr.msk.bf16.gmra.mrb[24].mxu0 %vm475_vm0, %v9669_v23 }
 0x119   :  { %8950 = vmatprep.mubr.msk.bf16.mxu0 %vm475_vm0, %v9670_v24 }
 0x120   :  { %8951 = vmatmul.mubr.msk.bf16.gmra.mrb[28].mxu0 %vm475_vm0, %v9671_v25 }
 0x121   :  { %8954 = vmatprep.mubr.msk.bf16.mxu0 %vm475_vm0, %v9672_v26 }
 0x128   :  { %8955 = vmatmul.mubr.msk.bf16.gmra.mrb[32].mxu0 %vm475_vm0, %v9673_v27 }
 0x129   :  { %8958 = vmatprep.mubr.msk.bf16.mxu0 %vm475_vm0, %v9674_v28 }
 0x130   :  { %8959 = vmatmul.mubr.msk.bf16.gmra.mrb[36].mxu0 %vm475_vm0, %v9675_v29  ;;  %v9726_v29 = vld [vmem:[#allocation14 + $0x48] sm:$0xff]  }
 0x131   :  { %8962 = vmatprep.mubr.msk.bf16.mxu0 %vm475_vm0, %v9676_v30  ;;  %9000 = vmatprep.subr.bf16.mxu1 %v9726_v29 }
 0x132   :  { %9001 = vmatpush3.bf16.msra.mxu1 %v9726_v29 }
 0x138   :  { %8963 = vmatmul.mubr.msk.bf16.gmra.mrb[40].mxu0 %vm475_vm0, %v9677_v31 }
 0x139   :  { %8966 = vmatprep.mubr.msk.bf16.mxu0 %vm475_vm0, %v9678_v32 }
 0x140   :  { %8967 = vmatmul.mubr.msk.bf16.gmra.mrb[44].mxu0 %vm475_vm0, %v9679_v33 }
 0x141   :  { %8970 = vmatprep.mubr.msk.bf16.mxu0 %vm475_vm0, %v9680_v34 }
 0x148   :  { %8971 = vmatmul.mubr.msk.bf16.gmra.mrb[48].mxu0 %vm475_vm0, %v9681_v35 }
 0x149   :  { %8974 = vmatprep.mubr.msk.bf16.mxu0 %vm475_vm0, %v9682_v36 }
 0x150   :  { %8975 = vmatmul.mubr.msk.bf16.gmra.mrb[52].mxu0 %vm475_vm0, %v9683_v37 }
 0x151   :  { %8978 = vmatprep.mubr.msk.bf16.mxu0 %vm475_vm0, %v9686_v38 }
 0x158   :  { %8979 = vmatmul.mubr.msk.bf16.gmra.mrb[56].mxu0 %vm475_vm0, %v9687_v39  ;;  %vm13266_vm0 = vcmask 254976  }
 0x1bb   :  { %v8924_v41 = vpop.f32.mrb[0].mxu0  ;;  %v8984_v28 = vpop.f32.mrb[0].mxu1 }
 0x1bc   :  { %v631_v42 = vadd.f32 %v8924_v41, %v10543_v40  ;;  %v622_v43 = vpop.f32.mrb[1].mxu0  ;;  %v871_v33 = vadd.f32 %v8984_v28, %v10543_v40  ;;  %v862_v34 = vpop.f32.mrb[1].mxu1 }
 0x1bd   :  { %v623_v44 = vadd.f32 %v10543_v40, %v622_v43  ;;  %v8925_v45 = vpop.f32.mrb[2].mxu0  ;;  %v863_v38 = vadd.f32 %v10543_v40, %v862_v34  ;;  %v8985_v39 = vpop.f32.mrb[2].mxu1 }
 0x1be   :  { %v911_v46 = vmax.f32 %v631_v42, 0.0  ;;  %v634_v47 = vadd.f32 %v8925_v45, %v10543_v40  ;;  %v625_v48 = vpop.f32.mrb[3].mxu0  ;;  %v971_v42 = vmax.f32 %v871_v33, 0.0  ;;  %v874_v43 = vadd.f32 %v8985_v39, %v10543_v40 }
 0x1bf   :  { %v909_v49 = vmax.f32 %v623_v44, 0.0  ;;  %v626_v50 = vadd.f32 %v10543_v40, %v625_v48  ;;  %v865_v44 = vpop.f32.mrb[3].mxu1 }
 0x1c0   :  { %v8610_v51 = vpack.c.bf16 %v911_v46, %v911_v46  ;;  %v912_v52 = vmax.f32 %v634_v47, 0.0 }
 0x1c1   :  { %v8608_v53 = vpack.c.bf16 %v909_v49, %v909_v49  ;;  %v910_v54 = vmax.f32 %v626_v50, 0.0  ;;  %v969_v50 = vmax.f32 %v863_v38, 0.0 }
 0x1c2   :  { %1272 = vst.msk [vmem:[#allocation2 + $0x8] sm:$0xf] %vm13263_vm2, %v8610_v51  ;;  %v8611_v55 = vpack.c.bf16 %v912_v52, %v912_v52 }
 0x1c3   :  { %1270 = vst.msk [vmem:[#allocation2] sm:$0xf] %vm13263_vm2, %v8608_v53  ;;  %v8609_v56 = vpack.c.bf16 %v910_v54, %v910_v54  ;;  %v8928_v57 = vpop.f32.mrb[4].mxu0  ;;  %v8670_v54 = vpack.c.bf16 %v971_v42, %v971_v42 }
 0x1c4   :  { %1273 = vst.msk [vmem:[#allocation2 + $0xc] sm:$0xf] %vm13263_vm2, %v8611_v55  ;;  %v647_v59 = vadd.f32 %v8928_v57, %v10543_v40  ;;  %v638_v60 = vpop.f32.mrb[5].mxu0  ;;  %v972_v55 = vmax.f32 %v874_v43, 0.0  ;;  %v9728_v57 = vld [vmem:[#allocation14 + $0x50] sm:$0xff]  }
 0x1c5   :  { %1271 = vst.msk [vmem:[#allocation2 + $0x4] sm:$0xf] %vm13263_vm2, %v8609_v56  ;;  %v639_v61 = vadd.f32 %v10543_v40, %v638_v60  ;;  %v8929_v62 = vpop.f32.mrb[6].mxu0  ;;  %v10579_v56 = vadd.f32 %v10543_v40, %v865_v44  ;;  %1332 = vst.msk [vmem:[#allocation2 + $0xf8] sm:$0xf] %vm13263_vm2, %v8670_v54  ;;  %9002 = vmatprep.subr.bf16.mxu1 %v9728_v57 }
 0x1c6   :  { %v915_v63 = vmax.f32 %v647_v59, 0.0  ;;  %v650_v0 = vadd.f32 %v8929_v62, %v10543_v40  ;;  %v641_v1 = vpop.f32.mrb[7].mxu0  ;;  %9003 = vmatpush3.bf16.msra.mxu1 %v9728_v57 }
 0x1c7   :  { %v913_v2 = vmax.f32 %v639_v61, 0.0  ;;  %v642_v3 = vadd.f32 %v10543_v40, %v641_v1  ;;  %v970_v28 = vmax.f32 %v10579_v56, 0.0 }
 0x1c8   :  { %v8614_v5 = vpack.c.bf16 %v915_v63, %v915_v63  ;;  %v916_v6 = vmax.f32 %v650_v0, 0.0 }
 0x1c9   :  { %v8612_v7 = vpack.c.bf16 %v913_v2, %v913_v2  ;;  %v914_v8 = vmax.f32 %v642_v3, 0.0  ;;  %v2271_v13 = vld [vmem:[#allocation2 + $0x8] sm:$0xe] }
 0x1ca   :  { %1276 = vst.msk [vmem:[#allocation2 + $0x18] sm:$0xf] %vm13263_vm2, %v8614_v5  ;;  %v8615_v9 = vpack.c.bf16 %v916_v6, %v916_v6  ;;  %v2276_v24 = vld [vmem:[#allocation2 + $0x8] sm:$0xc] }
 0x1cb   :  { %1274 = vst.msk [vmem:[#allocation2 + $0x10] sm:$0xf] %vm13263_vm2, %v8612_v7  ;;  %v8613_v10 = vpack.c.bf16 %v914_v8, %v914_v8  ;;  %v8932_v11 = vpop.f32.mrb[8].mxu0  ;;  %v1345_v12 = vld [vmem:[#allocation2 + $0xc] sm:$0xf]  ;;  %v8988_v8 = vpop.f32.mrb[4].mxu1 }
 0x1cc   :  { %1277 = vst.msk [vmem:[#allocation2 + $0x1c] sm:$0xf] %vm13263_vm2, %v8615_v9  ;;  %v663_v15 = vadd.f32 %v8932_v11, %v10543_v40  ;;  %v654_v16 = vpop.f32.mrb[9].mxu0  ;;  %v10561_v17 = vcombine.low %v2271_v13, %v1345_v12  ;;  %v8302_v27 = vcombine.low %v2276_v24, %v1345_v12  ;;  %v9730_v9 = vld [vmem:[#allocation14 + $0x58] sm:$0xff]   ;;  %v878_v14 = vpop.f32.mrb[5].mxu1  ;;  %v10615_v34 = vadd.f32 %v8988_v8, %v10543_v40 }
 0x1cd   :  { %1275 = vst.msk [vmem:[#allocation2 + $0x14] sm:$0xf] %vm13263_vm2, %v8613_v10  ;;  %v655_v18 = vadd.f32 %v10543_v40, %v654_v16  ;;  %v8933_v19 = vpop.f32.mrb[10].mxu0  ;;  %9004 = vmatprep.subr.bf16.mxu1 %v9730_v9  ;;  %v10623_v39 = vadd.f32 %v10543_v40, %v878_v14 }
 0x1ce   :  { %v919_v20 = vmax.f32 %v663_v15, 0.0  ;;  %v666_v21 = vadd.f32 %v8933_v19, %v10543_v40  ;;  %v657_v22 = vpop.f32.mrb[11].mxu0  ;;  %v2294_v23 = vshll.u32 %v10561_v17, 16  ;;  %v2292_v37 = vshrl.u32 %v10561_v17, 16  ;;  %9005 = vmatpush3.bf16.msra.mxu1 %v9730_v9 }
 0x1cf   :  { %v917_v25 = vmax.f32 %v655_v18, 0.0  ;;  %v658_v26 = vadd.f32 %v10543_v40, %v657_v22  ;;  %v2326_v49 = vrot.slane %v8302_v27, 1  ;;  %v8989_v18 = vpop.f32.mrb[6].mxu1  ;;  %v8668_v22 = vpack.c.bf16 %v969_v50, %v969_v50 }
 0x1d0   :  { %v8618_v30 = vpack.c.bf16 %v919_v20, %v919_v20  ;;  %v920_v31 = vmax.f32 %v666_v21, 0.0  ;;  %v2296_v32 = vrot.slane %v2294_v23, 1  ;;  %v10602_v23 = vpop.f32.mrb[7].mxu1  ;;  %v8671_v27 = vpack.c.bf16 %v972_v55, %v972_v55 }
 0x1d1   :  { %v8616_v35 = vpack.c.bf16 %v917_v25, %v917_v25  ;;  %v918_v36 = vmax.f32 %v658_v26, 0.0  ;;  %1330 = vst.msk [vmem:[#allocation2 + $0xf0] sm:$0xf] %vm13263_vm2, %v8668_v22 }
 0x1d2   :  { %1280 = vst.msk [vmem:[#allocation2 + $0x28] sm:$0xf] %vm13263_vm2, %v8618_v30  ;;  %v8619_v41 = vpack.c.bf16 %v920_v31, %v920_v31  ;;  %v2297_v48 = vor.u32 %v2296_v32, %v2292_v37  ;;  %1333 = vst.msk [vmem:[#allocation2 + $0xfc] sm:$0xf] %vm13263_vm2, %v8671_v27 }
 0x1d3   :  { %1278 = vst.msk [vmem:[#allocation2 + $0x20] sm:$0xf] %vm13263_vm2, %v8616_v35  ;;  %v8617_v45 = vpack.c.bf16 %v918_v36, %v918_v36  ;;  %v8936_v46 = vpop.f32.mrb[12].mxu0  ;;  %v10574_v47 = vld [vmem:[#allocation2 + $0x18] sm:$0xff]  }
 0x1d4   :  { %1281 = vst.msk [vmem:[#allocation2 + $0x2c] sm:$0xf] %vm13263_vm2, %v8619_v41  ;;  %v679_v51 = vadd.f32 %v8936_v46, %v10543_v40  ;;  %v670_v52 = vpop.f32.mrb[13].mxu0  ;;  %v9692_v53 = vld [vmem:[#allocation2 + $0x10] sm:$0xff]   ;;  %v1973_v60 = vrot.slane %v10574_v47, 1  ;;  %v1624_v61 = vshll.u32 %v10574_v47, 16 }
 0x1d5   :  { %1279 = vst.msk [vmem:[#allocation2 + $0x24] sm:$0xf] %vm13263_vm2, %v8617_v45  ;;  %v671_v58 = vadd.f32 %v10543_v40, %v670_v52  ;;  %v8937_v59 = vpop.f32.mrb[14].mxu0  ;;  %v1628_v62 = vshrl.u32 %v10574_v47, 16  ;;  %v10587_v2 = vrot.slane %v9692_v53, 1  ;;  %v1616_v3 = vshll.u32 %v9692_v53, 16 }
 0x1d6   :  { %v923_v63 = vmax.f32 %v679_v51, 0.0  ;;  %v682_v0 = vadd.f32 %v8937_v59, %v10543_v40  ;;  %v673_v1 = vpop.f32.mrb[15].mxu0  ;;  %v1620_v6 = vshrl.u32 %v9692_v53, 16  ;;  %v1626_v7 = vrot.slane %v1624_v61, 1  ;;  %v9732_v46 = vld [vmem:[#allocation14] sm:$0xff]   ;;  %v8992_v52 = vpop.f32.mrb[8].mxu1 }
 0x1d7   :  { %v921_v4 = vmax.f32 %v671_v58, 0.0  ;;  %v674_v5 = vadd.f32 %v10543_v40, %v673_v1  ;;  %v1974_v12 = vsel %vm1967_vm3, %v10587_v2, %v1973_v60  ;;  %v10595_v13 = vrot.slane %v1616_v3, 1  ;;  %v10629_v57 = vpop.f32.mrb[9].mxu1  ;;  %9078 = vmatprep.subr.bf16.mxu1 %v9732_v46 }
 0x1d8   :  { %v8622_v10 = vpack.c.bf16 %v923_v63, %v923_v63  ;;  %v924_v11 = vmax.f32 %v682_v0, 0.0  ;;  %2045 = vrot.lane.b32.xlu1 %v1974_v12, %s10230_s15  ;;  %v1630_v32 = vor.u32 %v1628_v62, %v1626_v7  ;;  %v2327_v33 = vsel %vm1967_vm3, %v2326_v49, %v10587_v2  ;;  %v10635_v63 = vpop.f32.mrb[10].mxu1 }
 0x1d9   :  { %v8620_v15 = vpack.c.bf16 %v921_v4, %v921_v4  ;;  %v922_v16 = vmax.f32 %v674_v5, 0.0  ;;  %v2298_v20 = vsel %vm1599_vm4, %v2297_v48, %v10595_v13  ;;  %v1622_v21 = vor.u32 %v1620_v6, %v10595_v13  ;;  %v10639_v5 = vpop.f32.mrb[11].mxu1 }
 0x1da   :  { %1284 = vst.msk [vmem:[#allocation2 + $0x38] sm:$0xf] %vm13263_vm2, %v8622_v10  ;;  %v8623_v19 = vpack.c.bf16 %v924_v11, %v924_v11  ;;  %2315 = vrot.lane.b32.xlu0 %v2298_v20, %s10244_s11  ;;  %v10633_v62 = vadd.f32 %v8989_v18, %v10543_v40  ;;  %v8669_v4 = vpack.c.bf16 %v970_v28, %v970_v28  ;;  %v975_v47 = vmax.f32 %v10615_v34, 0.0 }
 0x1db   :  { %1282 = vst.msk [vmem:[#allocation2 + $0x30] sm:$0xf] %vm13263_vm2, %v8620_v15  ;;  %v8621_v24 = vpack.c.bf16 %v922_v16, %v922_v16  ;;  %v8940_v25 = vpop.f32.mrb[16].mxu0  ;;  %v10606_v26 = vld [vmem:[#allocation2 + $0x28] sm:$0xff]   ;;  %v1627_v37 = vsel %vm1599_vm4, %v1622_v21, %v1626_v7 }
 0x1dc   :  { %1285 = vst.msk [vmem:[#allocation2 + $0x3c] sm:$0xf] %vm13263_vm2, %v8623_v19  ;;  %v695_v29 = vadd.f32 %v8940_v25, %v10543_v40  ;;  %v686_v30 = vpop.f32.mrb[17].mxu0  ;;  %v9695_v31 = vld [vmem:[#allocation2 + $0x20] sm:$0xff]   ;;  %v1640_v38 = vshll.u32 %v10606_v26, 16  ;;  %v1977_v45 = vrot.slane %v10606_v26, 1  ;;  %v8674_v46 = vpack.c.bf16 %v975_v47, %v975_v47 }
 0x1dd   :  { %1283 = vst.msk [vmem:[#allocation2 + $0x34] sm:$0xf] %vm13263_vm2, %v8621_v24  ;;  %v687_v35 = vadd.f32 %v10543_v40, %v686_v30  ;;  %v8941_v36 = vpop.f32.mrb[18].mxu0  ;;  %v1632_v44 = vshll.u32 %v9695_v31, 16  ;;  %v1975_v50 = vrot.slane %v9695_v31, 1  ;;  %v1636_v56 = vshrl.u32 %v9695_v31, 16 }
 0x1de   :  { %v927_v41 = vmax.f32 %v695_v29, 0.0  ;;  %v698_v42 = vadd.f32 %v8941_v36, %v10543_v40  ;;  %v689_v43 = vpop.f32.mrb[19].mxu0  ;;  %1896 = vrot.lane.b32.xlu0 %v1627_v37, %s10244_s11  ;;  %v1642_v51 = vrot.slane %v1640_v38, 1  ;;  %v1644_v61 = vshrl.u32 %v10606_v26, 16  ;;  %1331 = vst.msk [vmem:[#allocation2 + $0xf4] sm:$0xf] %vm13263_vm2, %v8669_v4 }
 0x1df   :  { %v925_v48 = vmax.f32 %v687_v35, 0.0  ;;  %v690_v49 = vadd.f32 %v10543_v40, %v689_v43  ;;  %v1634_v55 = vrot.slane %v1632_v44, 1  ;;  %v1976_v8 = vsel %vm1967_vm3, %v1973_v60, %v1975_v50  ;;  %1336 = vst.msk [vmem:[#allocation2 + $0x108] sm:$0xf] %vm13263_vm2, %v8674_v46 }
 0x1e0   :  { %v8626_v53 = vpack.c.bf16 %v927_v41, %v927_v41  ;;  %v928_v54 = vmax.f32 %v698_v42, 0.0  ;;  %v1646_v9 = vor.u32 %v1644_v61, %v1642_v51  ;;  %v1978_v15 = vsel %vm1967_vm3, %v1975_v50, %v1977_v45 }
 0x1e1   :  { %v8624_v58 = vpack.c.bf16 %v925_v48, %v925_v48  ;;  %v926_v59 = vmax.f32 %v690_v49, 0.0  ;;  %v1635_v1 = vsel %vm1599_vm4, %v1630_v32, %v1634_v55  ;;  %v1638_v3 = vor.u32 %v1636_v56, %v1634_v55 }
 0x1e2   :  { %1288 = vst.msk [vmem:[#allocation2 + $0x48] sm:$0xf] %vm13263_vm2, %v8626_v53  ;;  %v8627_v0 = vpack.c.bf16 %v928_v54, %v928_v54  ;;  %1898 = vrot.lane.b32.xlu1 %v1635_v1, %s10244_s11  ;;  %2332 = vrot.lane.b32.xlu0 %v2327_v33, %s10230_s15  ;;  %v973_v60 = vmax.f32 %v10623_v39, 0.0  ;;  %v976_v21 = vmax.f32 %v10633_v62, 0.0  ;;  %v882_v36 = vadd.f32 %v10543_v40, %v10602_v23 }
 0x1e3   :  { %1286 = vst.msk [vmem:[#allocation2 + $0x40] sm:$0xf] %vm13263_vm2, %v8624_v58  ;;  %v8625_v6 = vpack.c.bf16 %v926_v59, %v926_v59  ;;  %v8944_v7 = vpop.f32.mrb[20].mxu0  ;;  %v10647_v10 = vld [vmem:[#allocation2 + $0x38] sm:$0xff]   ;;  %v1643_v19 = vsel %vm1599_vm4, %v1638_v3, %v1642_v51  ;;  %v10675_v41 = vadd.f32 %v8992_v52, %v10543_v40 }
 0x1e4   :  { %1289 = vst.msk [vmem:[#allocation2 + $0x4c] sm:$0xf] %vm13263_vm2, %v8627_v0  ;;  %v711_v11 = vadd.f32 %v8944_v7, %v10543_v40  ;;  %v702_v12 = vpop.f32.mrb[21].mxu0  ;;  %v10651_v14 = vld [vmem:[#allocation2 + $0x30] sm:$0xff]   ;;  %v1656_v20 = vshll.u32 %v10647_v10, 16  ;;  %v1660_v39 = vshrl.u32 %v10647_v10, 16  ;;  %v8672_v51 = vpack.c.bf16 %v973_v60, %v973_v60 }
 0x1e5   :  { %1287 = vst.msk [vmem:[#allocation2 + $0x44] sm:$0xf] %vm13263_vm2, %v8625_v6  ;;  %v703_v16 = vadd.f32 %v10543_v40, %v702_v12  ;;  %v8945_v18 = vpop.f32.mrb[22].mxu0  ;;  %v1648_v27 = vshll.u32 %v10651_v14, 16  ;;  %v1979_v28 = vrot.slane %v10651_v14, 1  ;;  %v1652_v31 = vshrl.u32 %v10651_v14, 16 }
 0x1e6   :  { %v931_v22 = vmax.f32 %v711_v11, 0.0  ;;  %v714_v24 = vadd.f32 %v8945_v18, %v10543_v40  ;;  %v705_v25 = vpop.f32.mrb[23].mxu0  ;;  %2047 = vrot.lane.b32.xlu1 %v1976_v8, %s10230_s15  ;;  %1900 = vrot.lane.b32.xlu0 %v1643_v19, %s10244_s11  ;;  %v1658_v32 = vrot.slane %v1656_v20, 1  ;;  %v1981_v23 = vrot.slane %v10647_v10, 1  ;;  %1334 = vst.msk [vmem:[#allocation2 + $0x100] sm:$0xf] %vm13263_vm2, %v8672_v51 }
 0x1e7   :  { %v929_v29 = vmax.f32 %v703_v16, 0.0  ;;  %v706_v30 = vadd.f32 %v10543_v40, %v705_v25  ;;  %v1650_v35 = vrot.slane %v1648_v27, 1  ;;  %v8675_v52 = vpack.c.bf16 %v976_v21, %v976_v21 }
 0x1e8   :  { %v8630_v33 = vpack.c.bf16 %v931_v22, %v931_v22  ;;  %v932_v34 = vmax.f32 %v714_v24, 0.0  ;;  %v1980_v55 = vsel %vm1967_vm3, %v1977_v45, %v1979_v28  ;;  %v1662_v58 = vor.u32 %v1660_v39, %v1658_v32 }
 0x1e9   :  { %v8628_v37 = vpack.c.bf16 %v929_v29, %v929_v29  ;;  %v930_v38 = vmax.f32 %v706_v30, 0.0  ;;  %v1651_v43 = vsel %vm1599_vm4, %v1646_v9, %v1650_v35  ;;  %v1654_v44 = vor.u32 %v1652_v31, %v1650_v35  ;;  %1337 = vst.msk [vmem:[#allocation2 + $0x10c] sm:$0xf] %vm13263_vm2, %v8675_v52 }
 0x1ea   :  { %1292 = vst.msk [vmem:[#allocation2 + $0x58] sm:$0xf] %vm13263_vm2, %v8630_v33  ;;  %v8631_v42 = vpack.c.bf16 %v932_v34, %v932_v34  ;;  %1902 = vrot.lane.b32.xlu1 %v1651_v43, %s10244_s11  ;;  %2049 = vrot.lane.b32.xlu0 %v1978_v15, %s10230_s15  ;;  %v974_v59 = vmax.f32 %v882_v36, 0.0  ;;  %v979_v26 = vmax.f32 %v10675_v41, 0.0  ;;  %v1982_v47 = vsel %vm1967_vm3, %v1979_v28, %v1981_v23 }
 0x1eb   :  { %1290 = vst.msk [vmem:[#allocation2 + $0x50] sm:$0xf] %vm13263_vm2, %v8628_v37  ;;  %v8629_v48 = vpack.c.bf16 %v930_v38, %v930_v38  ;;  %v8948_v49 = vpop.f32.mrb[24].mxu0  ;;  %v10683_v50 = vld [vmem:[#allocation2 + $0x48] sm:$0xff]   ;;  %v1659_v0 = vsel %vm1599_vm4, %v1654_v44, %v1658_v32  ;;  %v895_v19 = vadd.f32 %v10543_v40, %v10629_v57 }
 0x1ec   :  { %1293 = vst.msk [vmem:[#allocation2 + $0x5c] sm:$0xf] %vm13263_vm2, %v8631_v42  ;;  %v727_v53 = vadd.f32 %v8948_v49, %v10543_v40  ;;  %v718_v54 = vpop.f32.mrb[25].mxu0  ;;  %v9699_v56 = vld [vmem:[#allocation2 + $0x40] sm:$0xff]   ;;  %v1672_v1 = vshll.u32 %v10683_v50, 16  ;;  %v1985_v7 = vrot.slane %v10683_v50, 1  ;;  %v8673_v24 = vpack.c.bf16 %v974_v59, %v974_v59 }
 0x1ed   :  { %1291 = vst.msk [vmem:[#allocation2 + $0x54] sm:$0xf] %vm13263_vm2, %v8629_v48  ;;  %v719_v61 = vadd.f32 %v10543_v40, %v718_v54  ;;  %v8949_v62 = vpop.f32.mrb[26].mxu0  ;;  %v1664_v6 = vshll.u32 %v9699_v56, 16  ;;  %v1983_v10 = vrot.slane %v9699_v56, 1  ;;  %v1668_v11 = vshrl.u32 %v9699_v56, 16 }
 0x1ee   :  { %v935_v45 = vmax.f32 %v727_v53, 0.0  ;;  %v730_v3 = vadd.f32 %v8949_v62, %v10543_v40  ;;  %v721_v4 = vpop.f32.mrb[27].mxu0  ;;  %2051 = vrot.lane.b32.xlu1 %v1980_v55, %s10230_s15  ;;  %1904 = vrot.lane.b32.xlu0 %v1659_v0, %s10244_s11  ;;  %v1674_v18 = vrot.slane %v1672_v1, 1  ;;  %v1676_v28 = vshrl.u32 %v10683_v50, 16  ;;  %1335 = vst.msk [vmem:[#allocation2 + $0x104] sm:$0xf] %vm13263_vm2, %v8673_v24 }
 0x1ef   :  { %v933_v8 = vmax.f32 %v719_v61, 0.0  ;;  %v722_v9 = vadd.f32 %v10543_v40, %v721_v4  ;;  %v1666_v15 = vrot.slane %v1664_v6, 1  ;;  %v8678_v57 = vpack.c.bf16 %v979_v26, %v979_v26 }
 0x1f0   :  { %v8634_v12 = vpack.c.bf16 %v935_v45, %v935_v45  ;;  %v936_v14 = vmax.f32 %v730_v3, 0.0  ;;  %v1984_v32 = vsel %vm1967_vm3, %v1981_v23, %v1983_v10  ;;  %v1678_v36 = vor.u32 %v1676_v28, %v1674_v18 }
 0x1f1   :  { %v8632_v60 = vpack.c.bf16 %v933_v8, %v933_v8  ;;  %v934_v16 = vmax.f32 %v722_v9, 0.0  ;;  %v1667_v21 = vsel %vm1599_vm4, %v1662_v58, %v1666_v15  ;;  %v1670_v22 = vor.u32 %v1668_v11, %v1666_v15  ;;  %1340 = vst.msk [vmem:[#allocation2 + $0x118] sm:$0xf] %vm13263_vm2, %v8678_v57 }
 0x1f2   :  { %1296 = vst.msk [vmem:[#allocation2 + $0x68] sm:$0xf] %vm13263_vm2, %v8634_v12  ;;  %v8635_v20 = vpack.c.bf16 %v936_v14, %v936_v14  ;;  %1906 = vrot.lane.b32.xlu1 %v1667_v21, %s10244_s11  ;;  %2053 = vrot.lane.b32.xlu0 %v1982_v47, %s10230_s15  ;;  %v1986_v37 = vsel %vm1967_vm3, %v1983_v10, %v1985_v7  ;;  %v977_v38 = vmax.f32 %v895_v19, 0.0 }
 0x1f3   :  { %1294 = vst.msk [vmem:[#allocation2 + $0x60] sm:$0xf] %vm13263_vm2, %v8632_v60  ;;  %v8633_v25 = vpack.c.bf16 %v934_v16, %v934_v16  ;;  %v8952_v27 = vpop.f32.mrb[28].mxu0  ;;  %v10712_v29 = vld [vmem:[#allocation2 + $0x58] sm:$0xff]   ;;  %v1675_v43 = vsel %vm1599_vm4, %v1670_v22, %v1674_v18  ;;  %v906_v23 = vadd.f32 %v10635_v63, %v10543_v40  ;;  %v898_v59 = vadd.f32 %v10543_v40, %v10639_v5 }
 0x1f4   :  { %1297 = vst.msk [vmem:[#allocation2 + $0x6c] sm:$0xf] %vm13263_vm2, %v8635_v20  ;;  %v743_v30 = vadd.f32 %v8952_v27, %v10543_v40  ;;  %v734_v31 = vpop.f32.mrb[29].mxu0  ;;  %v10717_v33 = vld [vmem:[#allocation2 + $0x50] sm:$0xff]   ;;  %v1688_v49 = vshll.u32 %v10712_v29, 16  ;;  %v8676_v1 = vpack.c.bf16 %v977_v38, %v977_v38  ;;  %v1692_v45 = vshrl.u32 %v10712_v29, 16 }
 0x1f5   :  { %1295 = vst.msk [vmem:[#allocation2 + $0x64] sm:$0xf] %vm13263_vm2, %v8633_v25  ;;  %v735_v34 = vadd.f32 %v10543_v40, %v734_v31  ;;  %v8953_v35 = vpop.f32.mrb[30].mxu0  ;;  %v1680_v44 = vshll.u32 %v10717_v33, 16  ;;  %v1684_v54 = vshrl.u32 %v10717_v33, 16  ;;  %v1987_v58 = vrot.slane %v10717_v33, 1 }
 0x1f6   :  { %v939_v39 = vmax.f32 %v743_v30, 0.0  ;;  %v746_v41 = vadd.f32 %v8953_v35, %v10543_v40  ;;  %v737_v42 = vpop.f32.mrb[31].mxu0  ;;  %2055 = vrot.lane.b32.xlu1 %v1984_v32, %s10230_s15  ;;  %1908 = vrot.lane.b32.xlu0 %v1675_v43, %s10244_s11  ;;  %v1690_v6 = vrot.slane %v1688_v49, 1  ;;  %v1989_v9 = vrot.slane %v10712_v29, 1  ;;  %1338 = vst.msk [vmem:[#allocation2 + $0x110] sm:$0xf] %vm13263_vm2, %v8676_v1 }
 0x1f7   :  { %v937_v46 = vmax.f32 %v735_v34, 0.0  ;;  %v738_v48 = vadd.f32 %v10543_v40, %v737_v42  ;;  %v1682_v53 = vrot.slane %v1680_v44, 1  ;;  %v1988_v12 = vsel %vm1967_vm3, %v1985_v7, %v1987_v58 }
 0x1f8   :  { %v8638_v51 = vpack.c.bf16 %v939_v39, %v939_v39  ;;  %v940_v52 = vmax.f32 %v746_v41, 0.0  ;;  %v980_v14 = vmax.f32 %v906_v23, 0.0  ;;  %v978_v15 = vmax.f32 %v898_v59, 0.0 }
 0x1f9   :  { %v8636_v55 = vpack.c.bf16 %v937_v46, %v937_v46  ;;  %v938_v56 = vmax.f32 %v738_v48, 0.0  ;;  %v1683_v62 = vsel %vm1599_vm4, %v1678_v36, %v1682_v53  ;;  %v1686_v0 = vor.u32 %v1684_v54, %v1682_v53 }
 0x1fa   :  { %1300 = vst.msk [vmem:[#allocation2 + $0x78] sm:$0xf] %vm13263_vm2, %v8638_v51  ;;  %v8639_v61 = vpack.c.bf16 %v940_v52, %v940_v52  ;;  %1910 = vrot.lane.b32.xlu1 %v1683_v62, %s10244_s11  ;;  %2057 = vrot.lane.b32.xlu0 %v1986_v37, %s10230_s15  ;;  %v1694_v25 = vor.u32 %v1692_v45, %v1690_v6 }
 0x1fb   :  { %1298 = vst.msk [vmem:[#allocation2 + $0x70] sm:$0xf] %vm13263_vm2, %v8636_v55  ;;  %v8637_v63 = vpack.c.bf16 %v938_v56, %v938_v56  ;;  %v8956_v26 = vpop.f32.mrb[32].mxu0  ;;  %v10745_v3 = vld [vmem:[#allocation2 + $0x68] sm:$0xff]   ;;  %v1691_v18 = vsel %vm1599_vm4, %v1686_v0, %v1690_v6  ;;  %v1990_v57 = vsel %vm1967_vm3, %v1987_v58, %v1989_v9  ;;  %v8679_v34 = vpack.c.bf16 %v980_v14, %v980_v14 }
 0x1fc   :  { %1301 = vst.msk [vmem:[#allocation2 + $0x7c] sm:$0xf] %vm13263_vm2, %v8639_v61  ;;  %v759_v5 = vadd.f32 %v8956_v26, %v10543_v40  ;;  %v750_v4 = vpop.f32.mrb[33].mxu0  ;;  %v10749_v8 = vld [vmem:[#allocation2 + $0x60] sm:$0xff]   ;;  %v1704_v7 = vshll.u32 %v10745_v3, 16  ;;  %v8677_v39 = vpack.c.bf16 %v978_v15, %v978_v15  ;;  %v1708_v49 = vshrl.u32 %v10745_v3, 16 }
 0x1fd   :  { %1299 = vst.msk [vmem:[#allocation2 + $0x74] sm:$0xf] %vm13263_vm2, %v8637_v63  ;;  %v751_v10 = vadd.f32 %v10543_v40, %v750_v4  ;;  %v8957_v11 = vpop.f32.mrb[34].mxu0  ;;  %v1696_v19 = vshll.u32 %v10749_v8, 16  ;;  %v1700_v50 = vshrl.u32 %v10749_v8, 16  ;;  %v1991_v30 = vrot.slane %v10749_v8, 1 }
 0x1fe   :  { %v943_v47 = vmax.f32 %v759_v5, 0.0  ;;  %v762_v60 = vadd.f32 %v8957_v11, %v10543_v40  ;;  %v753_v16 = vpop.f32.mrb[35].mxu0  ;;  %2059 = vrot.lane.b32.xlu1 %v1988_v12, %s10230_s15  ;;  %1912 = vrot.lane.b32.xlu0 %v1691_v18, %s10244_s11  ;;  %v1706_v37 = vrot.slane %v1704_v7, 1  ;;  %1341 = vst.msk [vmem:[#allocation2 + $0x11c] sm:$0xf] %vm13263_vm2, %v8679_v34  ;;  %v1993_v23 = vrot.slane %v10745_v3, 1 }
 0x1ff   :  { %v941_v20 = vmax.f32 %v751_v10, 0.0  ;;  %v754_v21 = vadd.f32 %v10543_v40, %v753_v16  ;;  %v1698_v27 = vrot.slane %v1696_v19, 1  ;;  %v1992_v48 = vsel %vm1967_vm3, %v1989_v9, %v1991_v30  ;;  %1339 = vst.msk [vmem:[#allocation2 + $0x114] sm:$0xf] %vm13263_vm2, %v8677_v39 }
 0x200   :  { %v8642_v22 = vpack.c.bf16 %v943_v47, %v943_v47  ;;  %v944_v24 = vmax.f32 %v762_v60, 0.0  ;;  %v1710_v59 = vor.u32 %v1708_v49, %v1706_v37  ;;  %v1994_v6 = vsel %vm1967_vm3, %v1991_v30, %v1993_v23 }
 0x201   :  { %v8640_v28 = vpack.c.bf16 %v941_v20, %v941_v20  ;;  %v942_v29 = vmax.f32 %v754_v21, 0.0  ;;  %v1699_v32 = vsel %vm1599_vm4, %v1694_v25, %v1698_v27  ;;  %v1702_v33 = vor.u32 %v1700_v50, %v1698_v27  ;;  %v10812_v50 = vld [vmem:[#allocation13] ss:$0 sm:$0xff] }
 0x202   :  { %1304 = vst.msk [vmem:[#allocation2 + $0x88] sm:$0xf] %vm13263_vm2, %v8642_v22  ;;  %v8643_v31 = vpack.c.bf16 %v944_v24, %v944_v24  ;;  %1914 = vrot.lane.b32.xlu1 %v1699_v32, %s10244_s11  ;;  %2061 = vrot.lane.b32.xlu0 %v1990_v57, %s10230_s15 }
 0x203   :  { %1302 = vst.msk [vmem:[#allocation2 + $0x80] sm:$0xf] %vm13263_vm2, %v8640_v28  ;;  %v8641_v35 = vpack.c.bf16 %v942_v29, %v942_v29  ;;  %v8960_v36 = vpop.f32.mrb[36].mxu0  ;;  %v10773_v38 = vld [vmem:[#allocation2 + $0x78] sm:$0xff]   ;;  %v1707_v54 = vsel %vm1599_vm4, %v1702_v33, %v1706_v37 }
 0x204   :  { %1305 = vst.msk [vmem:[#allocation2 + $0x8c] sm:$0xf] %vm13263_vm2, %v8643_v31  ;;  %v775_v41 = vadd.f32 %v8960_v36, %v10543_v40  ;;  %v766_v42 = vpop.f32.mrb[37].mxu0  ;;  %v10777_v43 = vld [vmem:[#allocation2 + $0x70] sm:$0xff]   ;;  %v1720_v61 = vshll.u32 %v10773_v38, 16  ;;  %v1724_v19 = vshrl.u32 %v10773_v38, 16 }
 0x205   :  { %1303 = vst.msk [vmem:[#allocation2 + $0x84] sm:$0xf] %vm13263_vm2, %v8641_v35  ;;  %v767_v44 = vadd.f32 %v10543_v40, %v766_v42  ;;  %v8961_v46 = vpop.f32.mrb[38].mxu0  ;;  %v1712_v55 = vshll.u32 %v10777_v43, 16  ;;  %v1716_v63 = vshrl.u32 %v10777_v43, 16  ;;  %v1995_v3 = vrot.slane %v10777_v43, 1 }
 0x206   :  { %v947_v51 = vmax.f32 %v775_v41, 0.0  ;;  %v778_v52 = vadd.f32 %v8961_v46, %v10543_v40  ;;  %v769_v53 = vpop.f32.mrb[39].mxu0  ;;  %2063 = vrot.lane.b32.xlu1 %v1992_v48, %s10230_s15  ;;  %1916 = vrot.lane.b32.xlu0 %v1707_v54, %s10244_s11  ;;  %v1722_v11 = vrot.slane %v1720_v61, 1  ;;  %v1997_v20 = vrot.slane %v10773_v38, 1 }
 0x207   :  { %v945_v56 = vmax.f32 %v767_v44, 0.0  ;;  %v770_v58 = vadd.f32 %v10543_v40, %v769_v53  ;;  %v1714_v1 = vrot.slane %v1712_v55, 1  ;;  %v1996_v18 = vsel %vm1967_vm3, %v1993_v23, %v1995_v3 }
 0x208   :  { %v8646_v62 = vpack.c.bf16 %v947_v51, %v947_v51  ;;  %v948_v0 = vmax.f32 %v778_v52, 0.0  ;;  %v1726_v28 = vor.u32 %v1724_v19, %v1722_v11  ;;  %v1998_v38 = vsel %vm1967_vm3, %v1995_v3, %v1997_v20 }
 0x209   :  { %v8644_v26 = vpack.c.bf16 %v945_v56, %v945_v56  ;;  %v946_v45 = vmax.f32 %v770_v58, 0.0  ;;  %v1715_v4 = vsel %vm1599_vm4, %v1710_v59, %v1714_v1  ;;  %v1718_v8 = vor.u32 %v1716_v63, %v1714_v1 }
 0x20a   :  { %1308 = vst.msk [vmem:[#allocation2 + $0x98] sm:$0xf] %vm13263_vm2, %v8646_v62  ;;  %v8647_v5 = vpack.c.bf16 %v948_v0, %v948_v0  ;;  %1918 = vrot.lane.b32.xlu1 %v1715_v4, %s10244_s11  ;;  %2065 = vrot.lane.b32.xlu0 %v1994_v6, %s10230_s15 }
 0x20b   :  { %1306 = vst.msk [vmem:[#allocation2 + $0x90] sm:$0xf] %vm13263_vm2, %v8644_v26  ;;  %v8645_v9 = vpack.c.bf16 %v946_v45, %v946_v45  ;;  %v8964_v10 = vpop.f32.mrb[40].mxu0  ;;  %v10801_v12 = vld [vmem:[#allocation2 + $0x88] sm:$0xff]   ;;  %v1723_v24 = vsel %vm1599_vm4, %v1718_v8, %v1722_v11 }
 0x20c   :  { %1309 = vst.msk [vmem:[#allocation2 + $0x9c] sm:$0xf] %vm13263_vm2, %v8647_v5  ;;  %v791_v14 = vadd.f32 %v8964_v10, %v10543_v40  ;;  %v782_v15 = vpop.f32.mrb[41].mxu0  ;;  %v10805_v47 = vld [vmem:[#allocation2 + $0x80] sm:$0xff]   ;;  %v1736_v29 = vshll.u32 %v10801_v12, 16  ;;  %v1740_v53 = vshrl.u32 %v10801_v12, 16 }
 0x20d   :  { %1307 = vst.msk [vmem:[#allocation2 + $0x94] sm:$0xf] %vm13263_vm2, %v8645_v9  ;;  %v783_v60 = vadd.f32 %v10543_v40, %v782_v15  ;;  %v8965_v16 = vpop.f32.mrb[42].mxu0  ;;  %v1728_v25 = vshll.u32 %v10805_v47, 16  ;;  %v1732_v32 = vshrl.u32 %v10805_v47, 16  ;;  %v1999_v35 = vrot.slane %v10805_v47, 1 }
 0x20e   :  { %v951_v21 = vmax.f32 %v791_v14, 0.0  ;;  %v794_v7 = vadd.f32 %v10812_v50, %v8965_v16  ;;  %v785_v22 = vpop.f32.mrb[43].mxu0  ;;  %2067 = vrot.lane.b32.xlu1 %v1996_v18, %s10230_s15  ;;  %1920 = vrot.lane.b32.xlu0 %v1723_v24, %s10244_s11  ;;  %v1738_v48 = vrot.slane %v1736_v29, 1  ;;  %v2001_v54 = vrot.slane %v10801_v12, 1 }
 0x20f   :  { %v949_v27 = vmax.f32 %v783_v60, 0.0  ;;  %v786_v40 = vadd.f32 %v10812_v50, %v785_v22  ;;  %v1730_v31 = vrot.slane %v1728_v25, 1  ;;  %v2000_v52 = vsel %vm1967_vm3, %v1997_v20, %v1999_v35 }
 0x210   :  { %v8650_v57 = vpack.c.bf16 %v951_v21, %v951_v21  ;;  %v952_v30 = vmax.f32 %v794_v7, 0.0  ;;  %v1742_v3 = vor.u32 %v1740_v53, %v1738_v48  ;;  %v2002_v11 = vsel %vm1967_vm3, %v1999_v35, %v2001_v54 }
 0x211   :  { %v8648_v33 = vpack.c.bf16 %v949_v27, %v949_v27  ;;  %v950_v34 = vmax.f32 %v786_v40, 0.0  ;;  %v1731_v37 = vsel %vm1599_vm4, %v1726_v28, %v1730_v31  ;;  %v1734_v39 = vor.u32 %v1732_v32, %v1730_v31 }
 0x212   :  { %1312 = vst.msk [vmem:[#allocation2 + $0xa8] sm:$0xf] %vm13263_vm2, %v8650_v57  ;;  %v8651_v36 = vpack.c.bf16 %v952_v30, %v952_v30  ;;  %1922 = vrot.lane.b32.xlu1 %v1731_v37, %s10244_s11  ;;  %2069 = vrot.lane.b32.xlu0 %v1998_v38, %s10230_s15 }
 0x213   :  { %1310 = vst.msk [vmem:[#allocation2 + $0xa0] sm:$0xf] %vm13263_vm2, %v8648_v33  ;;  %v8649_v41 = vpack.c.bf16 %v950_v34, %v950_v34  ;;  %v8968_v42 = vpop.f32.mrb[44].mxu0  ;;  %v10829_v43 = vld [vmem:[#allocation2 + $0x98] sm:$0xff]   ;;  %v1739_v59 = vsel %vm1599_vm4, %v1734_v39, %v1738_v48 }
 0x214   :  { %1313 = vst.msk [vmem:[#allocation2 + $0xac] sm:$0xf] %vm13263_vm2, %v8651_v36  ;;  %v807_v44 = vadd.f32 %v10812_v50, %v8968_v42  ;;  %v798_v46 = vpop.f32.mrb[45].mxu0  ;;  %v10833_v49 = vld [vmem:[#allocation2 + $0x90] sm:$0xff]   ;;  %v1752_v63 = vshll.u32 %v10829_v43, 16  ;;  %v1756_v22 = vshrl.u32 %v10829_v43, 16 }
 0x215   :  { %1311 = vst.msk [vmem:[#allocation2 + $0xa4] sm:$0xf] %vm13263_vm2, %v8649_v41  ;;  %v799_v23 = vadd.f32 %v10812_v50, %v798_v46  ;;  %v8969_v51 = vpop.f32.mrb[46].mxu0  ;;  %v1744_v61 = vshll.u32 %v10833_v49, 16  ;;  %v1748_v1 = vshrl.u32 %v10833_v49, 16  ;;  %v2003_v8 = vrot.slane %v10833_v49, 1 }
 0x216   :  { %v955_v55 = vmax.f32 %v807_v44, 0.0  ;;  %v810_v56 = vadd.f32 %v10812_v50, %v8969_v51  ;;  %v801_v58 = vpop.f32.mrb[47].mxu0  ;;  %2071 = vrot.lane.b32.xlu1 %v2000_v52, %s10230_s15  ;;  %1924 = vrot.lane.b32.xlu0 %v1739_v59, %s10244_s11  ;;  %v1754_v18 = vrot.slane %v1752_v63, 1  ;;  %v2005_v24 = vrot.slane %v10829_v43, 1 }
 0x217   :  { %v953_v62 = vmax.f32 %v799_v23, 0.0  ;;  %v802_v0 = vadd.f32 %v10812_v50, %v801_v58  ;;  %v1746_v5 = vrot.slane %v1744_v61, 1  ;;  %v2004_v7 = vsel %vm1967_vm3, %v2001_v54, %v2003_v8 }
 0x218   :  { %v8654_v26 = vpack.c.bf16 %v955_v55, %v955_v55  ;;  %v956_v45 = vmax.f32 %v810_v56, 0.0  ;;  %v1758_v35 = vor.u32 %v1756_v22, %v1754_v18  ;;  %v2006_v43 = vsel %vm1967_vm3, %v2003_v8, %v2005_v24 }
 0x219   :  { %v8652_v4 = vpack.c.bf16 %v953_v62, %v953_v62  ;;  %v954_v6 = vmax.f32 %v802_v0, 0.0  ;;  %v1747_v10 = vsel %vm1599_vm4, %v1742_v3, %v1746_v5  ;;  %v1750_v12 = vor.u32 %v1748_v1, %v1746_v5 }
 0x21a   :  { %1316 = vst.msk [vmem:[#allocation2 + $0xb8] sm:$0xf] %vm13263_vm2, %v8654_v26  ;;  %v8655_v9 = vpack.c.bf16 %v956_v45, %v956_v45  ;;  %1926 = vrot.lane.b32.xlu1 %v1747_v10, %s10244_s11  ;;  %2073 = vrot.lane.b32.xlu0 %v2002_v11, %s10230_s15 }
 0x21b   :  { %1314 = vst.msk [vmem:[#allocation2 + $0xb0] sm:$0xf] %vm13263_vm2, %v8652_v4  ;;  %v8653_v14 = vpack.c.bf16 %v954_v6, %v954_v6  ;;  %v8972_v15 = vpop.f32.mrb[48].mxu0  ;;  %v10855_v47 = vld [vmem:[#allocation2 + $0xa8] sm:$0xff]   ;;  %v1755_v28 = vsel %vm1599_vm4, %v1750_v12, %v1754_v18 }
 0x21c   :  { %1317 = vst.msk [vmem:[#allocation2 + $0xbc] sm:$0xf] %vm13263_vm2, %v8655_v9  ;;  %v823_v60 = vadd.f32 %v10812_v50, %v8972_v15  ;;  %v814_v16 = vpop.f32.mrb[49].mxu0  ;;  %v10859_v19 = vld [vmem:[#allocation2 + $0xa0] sm:$0xff]   ;;  %v1768_v32 = vshll.u32 %v10855_v47, 16  ;;  %v1772_v58 = vshrl.u32 %v10855_v47, 16 }
 0x21d   :  { %1315 = vst.msk [vmem:[#allocation2 + $0xb4] sm:$0xf] %vm13263_vm2, %v8653_v14  ;;  %v815_v20 = vadd.f32 %v10812_v50, %v814_v16  ;;  %v8973_v21 = vpop.f32.mrb[50].mxu0  ;;  %v1760_v29 = vshll.u32 %v10859_v19, 16  ;;  %v1764_v31 = vshrl.u32 %v10859_v19, 16  ;;  %v2007_v39 = vrot.slane %v10859_v19, 1 }
 0x21e   :  { %v959_v25 = vmax.f32 %v823_v60, 0.0  ;;  %v826_v27 = vadd.f32 %v10812_v50, %v8973_v21  ;;  %v817_v40 = vpop.f32.mrb[51].mxu0  ;;  %2075 = vrot.lane.b32.xlu1 %v2004_v7, %s10230_s15  ;;  %1928 = vrot.lane.b32.xlu0 %v1755_v28, %s10244_s11  ;;  %v1770_v49 = vrot.slane %v1768_v32, 1  ;;  %v2009_v59 = vrot.slane %v10855_v47, 1 }
 0x21f   :  { %v957_v57 = vmax.f32 %v815_v20, 0.0  ;;  %v818_v30 = vadd.f32 %v10812_v50, %v817_v40  ;;  %v1762_v36 = vrot.slane %v1760_v29, 1  ;;  %v2008_v56 = vsel %vm1967_vm3, %v2005_v24, %v2007_v39 }
 0x220   :  { %v8658_v33 = vpack.c.bf16 %v959_v25, %v959_v25  ;;  %v960_v34 = vmax.f32 %v826_v27, 0.0  ;;  %v1774_v3 = vor.u32 %v1772_v58, %v1770_v49  ;;  %v2010_v47 = vsel %vm1967_vm3, %v2007_v39, %v2009_v59 }
 0x221   :  { %v8656_v37 = vpack.c.bf16 %v957_v57, %v957_v57  ;;  %v958_v38 = vmax.f32 %v818_v30, 0.0  ;;  %v1763_v42 = vsel %vm1599_vm4, %v1758_v35, %v1762_v36  ;;  %v1766_v44 = vor.u32 %v1764_v31, %v1762_v36 }
 0x222   :  { %1320 = vst.msk [vmem:[#allocation2 + $0xc8] sm:$0xf] %vm13263_vm2, %v8658_v33  ;;  %v8659_v41 = vpack.c.bf16 %v960_v34, %v960_v34  ;;  %1930 = vrot.lane.b32.xlu1 %v1763_v42, %s10244_s11  ;;  %2077 = vrot.lane.b32.xlu0 %v2006_v43, %s10230_s15 }
 0x223   :  { %1318 = vst.msk [vmem:[#allocation2 + $0xc0] sm:$0xf] %vm13263_vm2, %v8656_v37  ;;  %v8657_v46 = vpack.c.bf16 %v958_v38, %v958_v38  ;;  %v8976_v48 = vpop.f32.mrb[52].mxu0  ;;  %v10881_v23 = vld [vmem:[#allocation2 + $0xb8] sm:$0xff]   ;;  %v1771_v1 = vsel %vm1599_vm4, %v1766_v44, %v1770_v49 }
 0x224   :  { %1321 = vst.msk [vmem:[#allocation2 + $0xcc] sm:$0xf] %vm13263_vm2, %v8659_v41  ;;  %v839_v51 = vadd.f32 %v10812_v50, %v8976_v48  ;;  %v830_v52 = vpop.f32.mrb[53].mxu0  ;;  %v10885_v53 = vld [vmem:[#allocation2 + $0xb0] sm:$0xff]   ;;  %v1784_v5 = vshll.u32 %v10881_v23, 16  ;;  %v1788_v40 = vshrl.u32 %v10881_v23, 16 }
 0x225   :  { %1319 = vst.msk [vmem:[#allocation2 + $0xc4] sm:$0xf] %vm13263_vm2, %v8657_v46  ;;  %v831_v54 = vadd.f32 %v10812_v50, %v830_v52  ;;  %v8977_v55 = vpop.f32.mrb[54].mxu0  ;;  %v1776_v63 = vshll.u32 %v10885_v53, 16  ;;  %v1780_v9 = vshrl.u32 %v10885_v53, 16  ;;  %v2011_v12 = vrot.slane %v10885_v53, 1 }
 0x226   :  { %v963_v61 = vmax.f32 %v839_v51, 0.0  ;;  %v842_v62 = vadd.f32 %v10812_v50, %v8977_v55  ;;  %v833_v0 = vpop.f32.mrb[55].mxu0  ;;  %2079 = vrot.lane.b32.xlu1 %v2008_v56, %s10230_s15  ;;  %1932 = vrot.lane.b32.xlu0 %v1771_v1, %s10244_s11  ;;  %v1786_v19 = vrot.slane %v1784_v5, 1  ;;  %v2013_v28 = vrot.slane %v10881_v23, 1 }
 0x227   :  { %v961_v26 = vmax.f32 %v831_v54, 0.0  ;;  %v834_v45 = vadd.f32 %v10812_v50, %v833_v0  ;;  %v1778_v8 = vrot.slane %v1776_v63, 1  ;;  %v2012_v27 = vsel %vm1967_vm3, %v2009_v59, %v2011_v12 }
 0x228   :  { %v8662_v4 = vpack.c.bf16 %v963_v61, %v963_v61  ;;  %v964_v6 = vmax.f32 %v842_v62, 0.0  ;;  %v1790_v35 = vor.u32 %v1788_v40, %v1786_v19  ;;  %v2014_v44 = vsel %vm1967_vm3, %v2011_v12, %v2013_v28 }
 0x229   :  { %v8660_v10 = vpack.c.bf16 %v961_v26, %v961_v26  ;;  %v962_v11 = vmax.f32 %v834_v45, 0.0  ;;  %v1779_v15 = vsel %vm1599_vm4, %v1774_v3, %v1778_v8  ;;  %v1782_v60 = vor.u32 %v1780_v9, %v1778_v8 }
 0x22a   :  { %1324 = vst.msk [vmem:[#allocation2 + $0xd8] sm:$0xf] %vm13263_vm2, %v8662_v4  ;;  %v8663_v14 = vpack.c.bf16 %v964_v6, %v964_v6  ;;  %1934 = vrot.lane.b32.xlu1 %v1779_v15, %s10244_s11  ;;  %2081 = vrot.lane.b32.xlu0 %v2010_v47, %s10230_s15  ;;  %v9723_v15 = vld [vmem:[#allocation2 + $0xf0] sm:$0xff]  }
 0x22b   :  { %1322 = vst.msk [vmem:[#allocation2 + $0xd0] sm:$0xf] %vm13263_vm2, %v8660_v10  ;;  %v8661_v16 = vpack.c.bf16 %v962_v11, %v962_v11  ;;  %v8980_v18 = vpop.f32.mrb[56].mxu0  ;;  %v10907_v20 = vld [vmem:[#allocation2 + $0xc8] sm:$0xff]   ;;  %v1787_v31 = vsel %vm1599_vm4, %v1782_v60, %v1786_v19  ;;  %v1840_v19 = vshll.u32 %v9723_v15, 16  ;;  %v1844_v40 = vshrl.u32 %v9723_v15, 16 }
 0x22c   :  { %1325 = vst.msk [vmem:[#allocation2 + $0xdc] sm:$0xf] %vm13263_vm2, %v8663_v14  ;;  %v855_v21 = vadd.f32 %v10812_v50, %v8980_v18  ;;  %v846_v7 = vpop.f32.mrb[57].mxu0  ;;  %v9715_v22 = vld [vmem:[#allocation2 + $0xc0] sm:$0xff]   ;;  %v1800_v36 = vshll.u32 %v10907_v20, 16  ;;  %v1804_v54 = vshrl.u32 %v10907_v20, 16 }
 0x22d   :  { %1323 = vst.msk [vmem:[#allocation2 + $0xd4] sm:$0xf] %vm13263_vm2, %v8661_v16  ;;  %v847_v24 = vadd.f32 %v10812_v50, %v846_v7  ;;  %v8981_v25 = vpop.f32.mrb[58].mxu0  ;;  %v1792_v32 = vshll.u32 %v9715_v22, 16  ;;  %v1796_v41 = vshrl.u32 %v9715_v22, 16  ;;  %v2015_v48 = vrot.slane %v9715_v22, 1 }
 0x22e   :  { %v967_v29 = vmax.f32 %v855_v21, 0.0  ;;  %v858_v57 = vadd.f32 %v10812_v50, %v8981_v25  ;;  %v849_v30 = vpop.f32.mrb[59].mxu0  ;;  %2083 = vrot.lane.b32.xlu1 %v2012_v27, %s10230_s15  ;;  %1936 = vrot.lane.b32.xlu0 %v1787_v31, %s10244_s11  ;;  %v1802_v51 = vrot.slane %v1800_v36, 1  ;;  %v2017_v59 = vrot.slane %v10907_v20, 1  ;;  %v9725_v20 = vld [vmem:[#allocation2 + $0xf8] sm:$0xff]   ;;  %v10955_v36 = vld [vmem:[#allocation2 + $0x108] sm:$0xff]  }
 0x22f   :  { %v965_v33 = vmax.f32 %v847_v24, 0.0  ;;  %v850_v34 = vadd.f32 %v10812_v50, %v849_v30  ;;  %v1794_v39 = vrot.slane %v1792_v32, 1  ;;  %v2016_v55 = vsel %vm1967_vm3, %v2013_v28, %v2015_v48 }
 0x230   :  { %v8666_v37 = vpack.c.bf16 %v967_v29, %v967_v29  ;;  %v968_v38 = vmax.f32 %v858_v57, 0.0  ;;  %v1806_v61 = vor.u32 %v1804_v54, %v1802_v51  ;;  %v2018_v26 = vsel %vm1967_vm3, %v2015_v48, %v2017_v59  ;;  %v10948_v29 = vld [vmem:[#allocation2 + $0x100] sm:$0xff]  }
 0x231   :  { %v8664_v42 = vpack.c.bf16 %v965_v33, %v965_v33  ;;  %v966_v43 = vmax.f32 %v850_v34, 0.0  ;;  %v1795_v50 = vsel %vm1599_vm4, %v1790_v35, %v1794_v39  ;;  %v1798_v49 = vor.u32 %v1796_v41, %v1794_v39 }
 0x232   :  { %1328 = vst.msk [vmem:[#allocation2 + $0xe8] sm:$0xf] %vm13263_vm2, %v8666_v37  ;;  %v8667_v46 = vpack.c.bf16 %v968_v38, %v968_v38  ;;  %1938 = vrot.lane.b32.xlu1 %v1795_v50, %s10244_s11  ;;  %2085 = vrot.lane.b32.xlu0 %v2014_v44, %s10230_s15  ;;  %v1842_v27 = vrot.slane %v1840_v19, 1  ;;  %v1848_v28 = vshll.u32 %v9725_v20, 16  ;;  %v2027_v33 = vrot.slane %v9723_v15, 1 }
 0x233   :  { %1326 = vst.msk [vmem:[#allocation2 + $0xe0] sm:$0xf] %vm13263_vm2, %v8664_v42  ;;  %v8665_v23 = vpack.c.bf16 %v966_v43, %v966_v43  ;;  %v9718_v53 = vld [vmem:[#allocation2 + $0xd8] sm:$0xff]   ;;  %v1803_v56 = vsel %vm1599_vm4, %v1798_v49, %v1802_v51  ;;  %v1852_v34 = vshrl.u32 %v9725_v20, 16  ;;  %v1856_v35 = vshll.u32 %v10948_v29, 16  ;;  %v10965_v51 = vld [vmem:[#allocation2 + $0x110] sm:$0xff]  }
 0x234   :  { %1329 = vst.msk [vmem:[#allocation2 + $0xec] sm:$0xf] %vm13263_vm2, %v8667_v46  ;;  %v9717_v52 = vld [vmem:[#allocation2 + $0xd0] sm:$0xff]   ;;  %v1816_v1 = vshll.u32 %v9718_v53, 16  ;;  %v1820_v8 = vshrl.u32 %v9718_v53, 16  ;;  %v2021_v9 = vrot.slane %v9718_v53, 1  ;;  %v1846_v39 = vor.u32 %v1844_v40, %v1842_v27 }
 0x235   :  { %1327 = vst.msk [vmem:[#allocation2 + $0xe4] sm:$0xf] %vm13263_vm2, %v8665_v23  ;;  %v1808_v58 = vshll.u32 %v9717_v52, 16  ;;  %v1812_v0 = vshrl.u32 %v9717_v52, 16  ;;  %v2019_v45 = vrot.slane %v9717_v52, 1  ;;  %v1850_v41 = vrot.slane %v1848_v28, 1 }
 0x236   :  { %2087 = vrot.lane.b32.xlu1 %v2016_v55, %s10230_s15  ;;  %1940 = vrot.lane.b32.xlu0 %v1803_v56, %s10244_s11  ;;  %v1818_v4 = vrot.slane %v1816_v1, 1  ;;  %v1858_v43 = vrot.slane %v1856_v35, 1  ;;  %v1860_v44 = vshrl.u32 %v10948_v29, 16  ;;  %v1864_v46 = vshll.u32 %v10955_v36, 16 }
 0x237   :  { %v1810_v62 = vrot.slane %v1808_v58, 1  ;;  %v2020_v10 = vsel %vm1967_vm3, %v2017_v59, %v2019_v45  ;;  %v2022_v18 = vsel %vm1967_vm3, %v2019_v45, %v2021_v9  ;;  %v1851_v48 = vsel %vm1599_vm4, %v1846_v39, %v1850_v41  ;;  %v9870_v59 = vld [vmem:[#allocation2 + $0x10] sm:$0xff]   ;;  %v1342_v39 = vld [vmem:[#allocation2] sm:$0xf] }
 0x238   :  { %v1822_v47 = vor.u32 %v1820_v8, %v1818_v4  ;;  %v1854_v49 = vor.u32 %v1852_v34, %v1850_v41  ;;  %v2029_v23 = vrot.slane %v9725_v20, 1  ;;  %v2031_v54 = vrot.slane %v10948_v29, 1 }
 0x239   :  { %v1811_v63 = vsel %vm1599_vm4, %v1806_v61, %v1810_v62  ;;  %v1814_v3 = vor.u32 %v1812_v0, %v1810_v62  ;;  %v1862_v55 = vor.u32 %v1860_v44, %v1858_v43  ;;  %v1866_v56 = vrot.slane %v1864_v46, 1 }
 0x23a   :  { %1942 = vrot.lane.b32.xlu1 %v1811_v63, %s10244_s11  ;;  %2089 = vrot.lane.b32.xlu0 %v2018_v26, %s10230_s15  ;;  %v1868_v58 = vshrl.u32 %v10955_v36, 16  ;;  %v1859_v62 = vsel %vm1599_vm4, %v1854_v49, %v1858_v43  ;;  %v2030_v0 = vsel %vm1967_vm3, %v2027_v33, %v2029_v23  ;;  %v1872_v1 = vshll.u32 %v10965_v51, 16  ;;  %v9733_v63 = vld [vmem:[#allocation2 + $0x118] sm:$0xff]  }
 0x23b   :  { %v9721_v5 = vld [vmem:[#allocation2 + $0xe8] sm:$0xff]   ;;  %v1819_v11 = vsel %vm1599_vm4, %v1814_v3, %v1818_v4  ;;  %v2032_v4 = vsel %vm1967_vm3, %v2029_v23, %v2031_v54  ;;  %v1884_v29 = vshrl.u32 %v9733_v63, 16  ;;  %v11018_v43 = vrot.slane %v9733_v63, 1 }
 0x23c   :  { %v9719_v6 = vld [vmem:[#allocation2 + $0xe0] sm:$0xff]   ;;  %v1832_v14 = vshll.u32 %v9721_v5, 16  ;;  %v1836_v25 = vshrl.u32 %v9721_v5, 16  ;;  %v2025_v32 = vrot.slane %v9721_v5, 1  ;;  %v1870_v8 = vor.u32 %v1868_v58, %v1866_v56 }
 0x23d   :  { %v1824_v12 = vshll.u32 %v9719_v6, 16  ;;  %v1828_v16 = vshrl.u32 %v9719_v6, 16  ;;  %v2023_v7 = vrot.slane %v9719_v6, 1  ;;  %v1867_v6 = vsel %vm1599_vm4, %v1862_v55, %v1866_v56 }
 0x23e   :  { %2091 = vrot.lane.b32.xlu1 %v2020_v10, %s10230_s15  ;;  %1944 = vrot.lane.b32.xlu0 %v1819_v11, %s10244_s11  ;;  %v1834_v24 = vrot.slane %v1832_v14, 1  ;;  %v2028_v50 = vsel %vm1967_vm3, %v2025_v32, %v2027_v33  ;;  %v1874_v10 = vrot.slane %v1872_v1, 1  ;;  %v2033_v11 = vrot.slane %v10955_v36, 1  ;;  %v9872_v33 = vld [vmem:[#allocation2 + $0x20] sm:$0xff]  }
 0x23f   :  { %v1826_v60 = vrot.slane %v1824_v12, 1  ;;  %v2024_v57 = vsel %vm1967_vm3, %v2021_v9, %v2023_v7  ;;  %v2026_v38 = vsel %vm1967_vm3, %v2023_v7, %v2025_v32  ;;  %v1876_v12 = vshrl.u32 %v10965_v51, 16  ;;  %v10995_v7 = vld [vmem:[#allocation2 + $0x128] ss:$0 sps:$4 sm:$0x33]  }
 0x240   :  { %v1838_v31 = vor.u32 %v1836_v25, %v1834_v24  ;;  %v2034_v25 = vsel %vm1967_vm3, %v2031_v54, %v2033_v11 }
 0x241   :  { %v1827_v21 = vsel %vm1599_vm4, %v1822_v47, %v1826_v60  ;;  %v1830_v22 = vor.u32 %v1828_v16, %v1826_v60  ;;  %v10990_v47 = vld [vmem:[#allocation2 + $0x120] sm:$0xff]   ;;  %v9871_v60 = vld [vmem:[#allocation2 + $0x18] sm:$0xff]  }
 0x242   :  { %1946 = vrot.lane.b32.xlu1 %v1827_v21, %s10244_s11  ;;  %2093 = vrot.lane.b32.xlu0 %v2022_v18, %s10230_s15  ;;  %v1843_v37 = vsel %vm1599_vm4, %v1838_v31, %v1842_v27  ;;  %v2035_v21 = vrot.slane %v10965_v51, 1  ;;  %v1878_v27 = vor.u32 %v1876_v12, %v1874_v10  ;;  %v9738_v31 = vld [vmem:[#allocation14 + $0x8] sm:$0xff]   ;;  %v9747_v51 = vld [vmem:[#allocation14 + $0x10] sm:$0xff]  }
 0x243   :  { %v1835_v30 = vsel %vm1599_vm4, %v1830_v22, %v1834_v24  ;;  %v1875_v24 = vsel %vm1599_vm4, %v1870_v8, %v1874_v10  ;;  %v9754_v8 = vld [vmem:[#allocation14 + $0x18] sm:$0xff]  }
 0x246   :  { %2095 = vrot.lane.b32.xlu1 %v2024_v57, %s10230_s15  ;;  %1948 = vrot.lane.b32.xlu0 %v1835_v30, %s10244_s11  ;;  %v2300_v57 = vshll.u32 %v10990_v47, 16  ;;  %v11007_v30 = vld [vmem:[#allocation2 + $0x4] sm:$0xf] }
 0x247   :  { %v11021_v44 = vcombine.low %v1342_v39, %v11007_v30 }
 0x248   :  { %v2302_v23 = vrot.slane %v2300_v57, 1 }
 0x249   :  { %v1601_v57 = vshrl.u32 %v11021_v44, 16 }
 0x24a   :  { %1950 = vrot.lane.b32.xlu1 %v1843_v37, %s10244_s11  ;;  %2097 = vrot.lane.b32.xlu0 %v2026_v38, %s10230_s15  ;;  %v2046_v52 = vpop.permute.xlu1 %2045  ;;  %v2304_v37 = vshrl.u32 %v10990_v47, 16  ;;  %v2308_v38 = vshll.u32 %v10995_v7, 16 }
 0x24c   :  { %v2316_v42 = vpop.permute.xlu0 %2315  ;;  %v2306_v58 = vor.u32 %v2304_v37, %v2302_v23  ;;  %v11074_v37 = vld [vmem:[#allocation2 + $0x120] ss:$0 sps:$4 sm:$0x11]  }
 0x24d   :  { %v2341_v45 = vsel %vm2113_vm5, %v10561_v17, %v2316_v42  ;;  %v1880_v17 = vshll.u32 %v9733_v63, 16  ;;  %v2036_v42 = vsel %vm1967_vm3, %v2033_v11, %v2035_v21 }
 0x24e   :  { %2099 = vrot.lane.b32.xlu1 %v2028_v50, %s10230_s15  ;;  %1952 = vrot.lane.b32.xlu0 %v1851_v48, %s10244_s11  ;;  %v9873_v50 = vld [vmem:[#allocation14] sm:$0xff]  }
 0x24f   :  { %v1882_v28 = vrot.slane %v1880_v17, 1  ;;  %v2330_v17 = vrot.slane %v10995_v7, 1 }
 0x250   :  { %v1897_v53 = vpop.permute.xlu0 %1896 }
 0x251   :  { %v2119_v61 = vsel %vm2113_vm5, %v9870_v59, %v1897_v53  ;;  %v1883_v48 = vsel %vm1599_vm4, %v1878_v27, %v1882_v28  ;;  %v11026_v49 = vor.u32 %v1884_v29, %v1882_v28  ;;  %v2310_v59 = vrot.slane %v2308_v38, 1 }
 0x252   :  { %1954 = vrot.lane.b32.xlu1 %v1859_v62, %s10244_s11  ;;  %2101 = vrot.lane.b32.xlu0 %v2030_v0, %s10230_s15  ;;  %v10978_v26 = vsel %vm13261_vm6, %v2119_v61, %v2046_v52  ;;  %v9874_v52 = vld [vmem:[#allocation2 + $0x28] sm:$0xff]   ;;  %v2038_v62 = vsel %vm1967_vm3, %v2035_v21, %v11018_v43  ;;  %v2328_v0 = vrot.slane %v10990_v47, 1  ;;  %v11061_v21 = vld [vmem:[#allocation2 + $0x14] sm:$0xf] }
 0x253   :  { %v2408_v14 = vrot.slane %v10978_v26, 1  ;;  %v2303_v63 = vsel %vm1599_vm4, %v11026_v49, %v2302_v23 }
 0x254   :  { %v1899_v3 = vpop.permute.xlu1 %1898  ;;  %v2333_v5 = vpop.permute.xlu0 %2332  ;;  %v2331_v29 = vsel %vm1967_vm3, %v2328_v0, %v2330_v17 }
 0x255   :  { %v2350_v9 = vsel %vm13261_vm6, %v2341_v45, %v2333_v5  ;;  %v2121_v16 = vsel %vm2113_vm5, %v9871_v60, %v1899_v3  ;;  %v2312_v45 = vshrl.u32 %v10995_v7, 16  ;;  %v1344_v3 = vld [vmem:[#allocation2 + $0x8] sm:$0xf]  ;;  %v1603_v5 = vshll.u32 %v11021_v44, 16  ;;  %v9761_v7 = vld [vmem:[#allocation14 + $0x20] sm:$0xff]  }
 0x256   :  { %v2407_v15 = vrot.slane %v2350_v9, 1  ;;  %2103 = vrot.lane.b32.xlu1 %v2032_v4, %s10230_s15  ;;  %1956 = vrot.lane.b32.xlu0 %v1867_v6, %s10244_s11  ;;  %v9875_v4 = vld [vmem:[#allocation2 + $0xc] sm:$0xf]  ;;  %v9876_v9 = vld [vmem:[#allocation2 + $0x30] sm:$0xff]   ;;  %v2329_v60 = vsel %vm1967_vm3, %v11018_v43, %v2328_v0 }
 0x257   :  { %v11045_v6 = vcombine.low %v1344_v3, %v9875_v4 }
 0x258   :  { %v2048_v18 = vpop.permute.xlu1 %2047  ;;  %v1901_v19 = vpop.permute.xlu0 %1900  ;;  %v2409_v20 = vsel %vm1967_vm3, %v2407_v15, %v2408_v14  ;;  %v2311_v15 = vsel %vm1599_vm4, %v2306_v58, %v2310_v59  ;;  %v1888_v58 = vshll.u32 %v11074_v37, 16 }
 0x259   :  { %v10998_v22 = vsel %vm13261_vm6, %v2121_v16, %v2048_v18  ;;  %9006 = vmatprep.mubr.msk.bf16.mxu1 %vm13260_vm7, %v2409_v20  ;;  %v2123_v34 = vsel %vm2113_vm5, %v9872_v33, %v1901_v19  ;;  %v2314_v18 = vor.u32 %v2312_v45, %v2310_v59  ;;  %v1605_v19 = vrot.slane %v1603_v5, 1  ;;  %v9879_v45 = vld [vmem:[#allocation2 + $0x48] sm:$0xff]  }
 0x25a   :  { %v2410_v40 = vrot.slane %v10998_v22, 1  ;;  %1958 = vrot.lane.b32.xlu1 %v1875_v24, %s10244_s11  ;;  %2105 = vrot.lane.b32.xlu0 %v2034_v25, %s10230_s15  ;;  %v1608_v20 = vshll.u32 %v11045_v6, 16  ;;  %v9877_v24 = vld [vmem:[#allocation2 + $0x38] sm:$0xff]  }
 0x25c   :  { %v2411_v32 = vsel %vm1967_vm3, %v2408_v14, %v2410_v40  ;;  %v1903_v35 = vpop.permute.xlu1 %1902  ;;  %v2050_v36 = vpop.permute.xlu0 %2049  ;;  %v1610_v39 = vrot.slane %v1608_v20, 1 }
 0x25d   :  { %v11014_v41 = vsel %vm13261_vm6, %v2123_v34, %v2050_v36  ;;  %9007 = vmatmul.mubr.msk.bf16.vlgmr.msra.gmra.mrb[12].mxu1 %vm13260_vm7, %v2411_v32  ;;  %v2125_v53 = vsel %vm2113_vm5, %v9874_v52, %v1903_v35  ;;  %v3375_v34 = vld [vmem:[#allocation2 + $0x10] sm:$0xc]  ;;  %v1606_v36 = vor.u32 %v1605_v19, %v1601_v57  ;;  %v1612_v52 = vshrl.u32 %v11045_v6, 16 }
 0x25e   :  { %v2412_v46 = vrot.slane %v11014_v41, 1  ;;  %9079 = vmatpush3.bf16.msra.mxu1 %v9873_v50  ;;  %2107 = vrot.lane.b32.xlu1 %v2036_v42, %s10230_s15  ;;  %v11077_v38 = vcombine.low %v3375_v34, %v11061_v21  ;;  %v9768_v42 = vld [vmem:[#allocation14 + $0x28] sm:$0xff]   ;;  %v9881_v34 = vld [vmem:[#allocation2 + $0x58] sm:$0xff]  }
 0x25f   :  { %1960 = vrot.lane.b32.xlu0 %v1883_v48, %s10244_s11  ;;  %9080 = vmatprep.subr.bf16.mxu1 %v9738_v31  ;;  %v1614_v0 = vor.u32 %v1612_v52, %v1610_v39 }
 0x260   :  { %v2052_v54 = vpop.permute.xlu1 %2051  ;;  %v1905_v55 = vpop.permute.xlu0 %1904  ;;  %v2413_v56 = vsel %vm1967_vm3, %v2410_v40, %v2412_v46  ;;  %v3639_v59 = vshll.u32 %v11077_v38, 16 }
 0x261   :  { %v11032_v61 = vsel %vm13261_vm6, %v2125_v53, %v2052_v54  ;;  %9010 = vmatprep.mubr.msk.bf16.mxu1 %vm13260_vm7, %v2413_v56  ;;  %v2127_v10 = vsel %vm2113_vm5, %v9876_v9, %v1905_v55  ;;  %v1969_v54 = vrot.slane %v11045_v6, 1  ;;  %v1611_v56 = vsel %vm1599_vm4, %v1606_v36, %v1610_v39 }
 0x262   :  { %v2414_v1 = vrot.slane %v11032_v61, 1  ;;  %2109 = vrot.lane.b32.xlu1 %v2038_v62, %s10230_s15  ;;  %9081 = vmatpush3.bf16.msra.mxu1 %v9738_v31  ;;  %v1415_v31 = vld [vmem:[#allocation2] sm:$0xe] }
 0x263   :  { %2317 = vrot.lane.b32.xlu0 %v2303_v63, %s10244_s11  ;;  %9082 = vmatprep.subr.bf16.mxu1 %v9747_v51  ;;  %v8297_v33 = vcombine.low %v1415_v31, %v11007_v30  ;;  %v11093_v62 = vld [vmem:[#allocation2 + $0x20] sm:$0xff]  }
 0x264   :  { %v1907_v11 = vpop.permute.xlu1 %1906  ;;  %v2054_v12 = vpop.permute.xlu0 %2053  ;;  %v2415_v14 = vsel %vm1967_vm3, %v2412_v46, %v2414_v1  ;;  %v9878_v46 = vld [vmem:[#allocation2 + $0x40] sm:$0xff]  }
 0x265   :  { %v11052_v47 = vsel %vm13261_vm6, %v2127_v10, %v2054_v12  ;;  %9011 = vmatmul.mubr.msk.bf16.gmra.mrb[16].mxu1 %vm13260_vm7, %v2415_v14  ;;  %v2129_v25 = vsel %vm2113_vm5, %v9877_v24, %v1907_v11  ;;  %v1968_v53 = vrot.slane %v8297_v33, 1  ;;  %v9776_v63 = vld [vmem:[#allocation14 + $0x60] sm:$0xff]   ;;  %v1619_v10 = vsel %vm1599_vm4, %v1614_v0, %v10595_v13  ;;  %v11115_v24 = vld [vmem:[#allocation2 + $0x28] sm:$0xff]  }
 0x266   :  { %v2416_v16 = vrot.slane %v11052_v47, 1  ;;  %2334 = vrot.lane.b32.xlu1 %v2329_v60, %s10230_s15  ;;  %9083 = vmatpush3.bf16.msra.mxu1 %v9747_v51  ;;  %v1890_v14 = vrot.slane %v1888_v58, 1 }
 0x267   :  { %2319 = vrot.lane.b32.xlu0 %v2311_v15, %s10244_s11  ;;  %9084 = vmatprep.subr.bf16.mxu1 %v9754_v8  ;;  %v1970_v11 = vsel %vm1967_vm3, %v1968_v53, %v1969_v54  ;;  %v3641_v15 = vrot.slane %v3639_v59, 1 }
 0x268   :  { %v2056_v27 = vpop.permute.xlu1 %2055  ;;  %v1909_v40 = vpop.permute.xlu0 %1908  ;;  %v2417_v28 = vsel %vm1967_vm3, %v2414_v1, %v2416_v16  ;;  %v11096_v1 = vld [vmem:[#allocation2 + $0x18] sm:$0xff]  }
 0x269   :  { %v11068_v32 = vsel %vm13261_vm6, %v2129_v25, %v2056_v27  ;;  %9014 = vmatprep.mubr.msk.bf16.mxu1 %vm13260_vm7, %v2417_v28  ;;  %v2131_v30 = vsel %vm2113_vm5, %v9878_v46, %v1909_v40  ;;  %v3644_v60 = vshll.u32 %v11096_v1, 16  ;;  %v1972_v27 = vsel %vm1967_vm3, %v1969_v54, %v10587_v2  ;;  %v3449_v46 = vld [vmem:[#allocation2 + $0x10] sm:$0x8] }
 0x26a   :  { %v2418_v35 = vrot.slane %v11068_v32, 1  ;;  %2321 = vrot.lane.b32.xlu1 %v2314_v18, %s10244_s11  ;;  %9085 = vmatpush3.bf16.msra.mxu1 %v9754_v8  ;;  %v2039_v40 = vrot.slane %v11074_v37, 1  ;;  %v3656_v37 = vshrl.u32 %v11093_v62, 16 }
 0x26b   :  { %2336 = vrot.lane.b32.xlu0 %v2331_v29, %s10230_s15  ;;  %9086 = vmatprep.subr.bf16.mxu1 %v9761_v7  ;;  %v1891_v29 = vsel %vm1599_vm4, %v11026_v49, %v1890_v14  ;;  %v3646_v33 = vrot.slane %v3644_v60, 1  ;;  %v9883_v14 = vld [vmem:[#allocation2 + $0x68] sm:$0xff]  }
 0x26c   :  { %v1911_v50 = vpop.permute.xlu1 %1910  ;;  %v2058_v48 = vpop.permute.xlu0 %2057  ;;  %v2419_v23 = vsel %vm1967_vm3, %v2416_v16, %v2418_v35  ;;  %v9880_v16 = vld [vmem:[#allocation2 + $0x50] sm:$0xff]   ;;  %v2040_v49 = vsel %vm1967_vm3, %v11018_v43, %v2039_v40 }
 0x26d   :  { %v11083_v51 = vsel %vm13261_vm6, %v2131_v30, %v2058_v48  ;;  %9015 = vmatmul.mubr.msk.bf16.gmra.mrb[20].mxu1 %vm13260_vm7, %v2419_v23  ;;  %v2133_v3 = vsel %vm2113_vm5, %v9879_v45, %v1911_v50  ;;  %v3648_v50 = vshrl.u32 %v11096_v1, 16  ;;  %v8425_v48 = vcombine.low %v3449_v46, %v11061_v21  ;;  %v11141_v23 = vld [vmem:[#allocation2 + $0x30] sm:$0xff]  }
 0x26e   :  { %v2420_v55 = vrot.slane %v11083_v51, 1  ;;  %2338 = vrot.lane.b32.xlu1 %v2330_v17, %s10230_s15  ;;  %9087 = vmatpush3.bf16.msra.mxu1 %v9761_v7  ;;  %v3652_v17 = vshll.u32 %v11093_v62, 16  ;;  %v3637_v7 = vshrl.u32 %v11077_v38, 16  ;;  %v3672_v40 = vshrl.u32 %v11141_v23, 16 }
 0x26f   :  { %1892 = vrot.lane.b32.xlu0 %v1611_v56, %s10244_s11  ;;  %9088 = vmatprep.subr.bf16.mxu1 %v9768_v42  ;;  %v9882_v56 = vld [vmem:[#allocation2 + $0x60] sm:$0xff]   ;;  %v4015_v46 = vrot.slane %v11141_v23, 1 }
 0x270   :  { %v2060_v5 = vpop.permute.xlu1 %2059  ;;  %v1913_v4 = vpop.permute.xlu0 %1912  ;;  %v2421_v8 = vsel %vm1967_vm3, %v2418_v35, %v2420_v55  ;;  %v3642_v57 = vor.u32 %v3641_v15, %v3637_v7  ;;  %v3654_v31 = vrot.slane %v3652_v17, 1 }
 0x271   :  { %v11101_v9 = vsel %vm13261_vm6, %v2133_v3, %v2060_v5  ;;  %9018 = vmatprep.mubr.msk.bf16.mxu1 %vm13260_vm7, %v2421_v8  ;;  %v2135_v18 = vsel %vm2113_vm5, %v9880_v16, %v1913_v4  ;;  %v4008_v3 = vrot.slane %v8425_v48, 1  ;;  %v3668_v5 = vshll.u32 %v11141_v23, 16  ;;  %v9885_v48 = vld [vmem:[#allocation2 + $0x78] sm:$0xff]  }
 0x272   :  { %v2422_v12 = vrot.slane %v11101_v9, 1  ;;  %1894 = vrot.lane.b32.xlu1 %v1619_v10, %s10244_s11  ;;  %9089 = vmatpush3.bf16.msra.mxu1 %v9768_v42  ;;  %v3660_v42 = vshll.u32 %v11115_v24, 16  ;;  %v3647_v53 = vsel %vm1599_vm4, %v3642_v57, %v3646_v33  ;;  %v3658_v54 = vor.u32 %v3656_v37, %v3654_v31 }
 0x273   :  { %2041 = vrot.lane.b32.xlu0 %v1970_v11, %s10230_s15  ;;  %9162 = vmatprep.subr.bf16.mxu1 %v9776_v63  ;;  %v4011_v10 = vrot.slane %v11093_v62, 1  ;;  %v4009_v11 = vrot.slane %v11096_v1, 1  ;;  %v11171_v1 = vld [vmem:[#allocation2 + $0x40] sm:$0xff]  }
 0x274   :  { %v1915_v13 = vpop.permute.xlu1 %1914  ;;  %v2062_v19 = vpop.permute.xlu0 %2061  ;;  %v2423_v20 = vsel %vm1967_vm3, %v2420_v55, %v2422_v12  ;;  %v3650_v55 = vor.u32 %v3648_v50, %v3646_v33  ;;  %v3662_v21 = vrot.slane %v3660_v42, 1  ;;  %v11193_v50 = vld [vmem:[#allocation2 + $0x48] sm:$0xff]  }
 0x275   :  { %v11118_v25 = vsel %vm13261_vm6, %v2135_v18, %v2062_v19  ;;  %9019 = vmatmul.mubr.msk.bf16.gmra.mrb[24].mxu1 %vm13260_vm7, %v2423_v20  ;;  %v2137_v35 = vsel %vm2113_vm5, %v9881_v34, %v1915_v13  ;;  %v4010_v62 = vsel %vm1967_vm3, %v4008_v3, %v4009_v11  ;;  %v4013_v13 = vrot.slane %v11115_v24, 1 }
 0x276   :  { %v2424_v28 = vrot.slane %v11118_v25, 1  ;;  %2043 = vrot.lane.b32.xlu1 %v1972_v27, %s10230_s15  ;;  %v3655_v45 = vsel %vm1599_vm4, %v3650_v55, %v3654_v31  ;;  %v3663_v8 = vsel %vm1599_vm4, %v3658_v54, %v3662_v21  ;;  %v3670_v19 = vrot.slane %v3668_v5, 1 }
 0x277   :  { %1962 = vrot.lane.b32.xlu0 %v1891_v29, %s10244_s11  ;;  %v4012_v7 = vsel %vm1967_vm3, %v4009_v11, %v4011_v10  ;;  %v3664_v27 = vshrl.u32 %v11115_v24, 16  ;;  %v9884_v29 = vld [vmem:[#allocation2 + $0x70] sm:$0xff]   ;;  %v4014_v24 = vsel %vm1967_vm3, %v4011_v10, %v4013_v13  ;;  %v3688_v3 = vshrl.u32 %v11171_v1, 16 }
 0x278   :  { %v2064_v36 = vpop.permute.xlu1 %2063  ;;  %v1917_v39 = vpop.permute.xlu0 %1916  ;;  %v2425_v2 = vsel %vm1967_vm3, %v2422_v12, %v2424_v28  ;;  %v11161_v12 = vld [vmem:[#allocation2 + $0x38] sm:$0xff]   ;;  %v3692_v5 = vshll.u32 %v11193_v50, 16 }
 0x279   :  { %v11134_v30 = vsel %vm13261_vm6, %v2137_v35, %v2064_v36  ;;  %9022 = vmatprep.mubr.msk.bf16.mxu1 %vm13260_vm7, %v2425_v2  ;;  %v2139_v58 = vsel %vm2113_vm5, %v9882_v56, %v1917_v39  ;;  %v3666_v35 = vor.u32 %v3664_v27, %v3662_v21  ;;  %v3674_v39 = vor.u32 %v3672_v40, %v3670_v19  ;;  %v9887_v27 = vld [vmem:[#allocation2 + $0x88] sm:$0xff]  }
 0x27a   :  { %v2426_v52 = vrot.slane %v11134_v30, 1  ;;  %2111 = vrot.lane.b32.xlu1 %v2040_v49, %s10230_s15  ;;  %v3684_v2 = vshll.u32 %v11171_v1, 16  ;;  %v4017_v23 = vrot.slane %v11161_v12, 1  ;;  %v4016_v21 = vsel %vm1967_vm3, %v4013_v13, %v4015_v46 }
 0x27b   :  { %3931 = vrot.lane.b32.xlu0 %v3647_v53, %s10244_s11  ;;  %v3671_v42 = vsel %vm1599_vm4, %v3666_v35, %v3670_v19  ;;  %v4019_v19 = vrot.slane %v11171_v1, 1  ;;  %v4021_v1 = vrot.slane %v11193_v50, 1  ;;  %v11235_v35 = vld [vmem:[#allocation2 + $0x60] sm:$0xff]  }
 0x27c   :  { %v1919_v43 = vpop.permute.xlu1 %1918  ;;  %v2066_v59 = vpop.permute.xlu0 %2065  ;;  %v2427_v0 = vsel %vm1967_vm3, %v2424_v28, %v2426_v52  ;;  %v3676_v28 = vshll.u32 %v11161_v12, 16 }
 0x27d   :  { %v11150_v63 = vsel %vm13261_vm6, %v2139_v58, %v2066_v59  ;;  %9023 = vmatmul.mubr.msk.bf16.gmra.mrb[28].mxu1 %vm13260_vm7, %v2427_v0  ;;  %v2141_v15 = vsel %vm2113_vm5, %v9883_v14, %v1919_v43  ;;  %v3686_v43 = vrot.slane %v3684_v2, 1  ;;  %v11203_v59 = vld [vmem:[#allocation2 + $0x50] sm:$0xff]   ;;  %v3696_v2 = vshrl.u32 %v11193_v50, 16 }
 0x27e   :  { %v2428_v4 = vrot.slane %v11150_v63, 1  ;;  %3933 = vrot.lane.b32.xlu1 %v3655_v45, %s10244_s11  ;;  %v3678_v49 = vrot.slane %v3676_v28, 1  ;;  %v3680_v45 = vshrl.u32 %v11161_v12, 16  ;;  %v4018_v12 = vsel %vm1967_vm3, %v4015_v46, %v4017_v23  ;;  %v9888_v46 = vld [vmem:[#allocation2 + $0x90] sm:$0xff]  }
 0x27f   :  { %3935 = vrot.lane.b32.xlu0 %v3663_v8, %s10244_s11  ;;  %v4022_v50 = vsel %vm1967_vm3, %v4019_v19, %v4021_v1 }
 0x280   :  { %v2068_v17 = vpop.permute.xlu1 %2067  ;;  %v1921_v60 = vpop.permute.xlu0 %1920  ;;  %v2429_v16 = vsel %vm1967_vm3, %v2426_v52, %v2428_v4  ;;  %v3679_v58 = vsel %vm1599_vm4, %v3674_v39, %v3678_v49  ;;  %v4020_v39 = vsel %vm1967_vm3, %v4017_v23, %v4019_v19  ;;  %v3716_v23 = vshll.u32 %v11235_v35, 16 }
 0x281   :  { %v11166_v18 = vsel %vm13261_vm6, %v2141_v15, %v2068_v17  ;;  %9026 = vmatprep.mubr.msk.bf16.mxu1 %vm13260_vm7, %v2429_v16  ;;  %v2143_v57 = vsel %vm2113_vm5, %v9884_v29, %v1921_v60  ;;  %v3682_v15 = vor.u32 %v3680_v45, %v3678_v49  ;;  %v3690_v60 = vor.u32 %v3688_v3, %v3686_v43  ;;  %v11257_v3 = vld [vmem:[#allocation2 + $0x68] sm:$0xff]  }
 0x282   :  { %v2430_v20 = vrot.slane %v11166_v18, 1  ;;  %4081 = vrot.lane.b32.xlu1 %v4010_v62, %s10230_s15  ;;  %v3700_v16 = vshll.u32 %v11203_v59, 16  ;;  %v3720_v19 = vshrl.u32 %v11235_v35, 16 }
 0x283   :  { %4083 = vrot.lane.b32.xlu0 %v4012_v7, %s10230_s15  ;;  %v3687_v13 = vsel %vm1599_vm4, %v3682_v15, %v3686_v43  ;;  %v11225_v7 = vld [vmem:[#allocation2 + $0x58] sm:$0xff]  }
 0x284   :  { %v1923_v31 = vpop.permute.xlu1 %1922  ;;  %v2070_v33 = vpop.permute.xlu0 %2069  ;;  %v2431_v34 = vsel %vm1967_vm3, %v2428_v4, %v2430_v20  ;;  %v9886_v4 = vld [vmem:[#allocation2 + $0x80] sm:$0xff]  }
 0x285   :  { %v11183_v36 = vsel %vm13261_vm6, %v2143_v57, %v2070_v33  ;;  %9027 = vmatmul.mubr.msk.bf16.gmra.mrb[32].mxu1 %vm13260_vm7, %v2431_v34  ;;  %v2145_v52 = vsel %vm2113_vm5, %v9885_v48, %v1923_v31  ;;  %v3702_v34 = vrot.slane %v3700_v16, 1 }
 0x286   :  { %v2432_v37 = vrot.slane %v11183_v36, 1  ;;  %4085 = vrot.lane.b32.xlu1 %v4014_v24, %s10230_s15 }
 0x287   :  { %3937 = vrot.lane.b32.xlu0 %v3671_v42, %s10244_s11  ;;  %v3708_v42 = vshll.u32 %v11225_v7, 16 }
 0x288   :  { %v2072_v53 = vpop.permute.xlu1 %2071  ;;  %v1925_v54 = vpop.permute.xlu0 %1924  ;;  %v2433_v55 = vsel %vm1967_vm3, %v2430_v20, %v2432_v37  ;;  %v3694_v20 = vrot.slane %v3692_v5, 1  ;;  %v9889_v5 = vld [vmem:[#allocation2 + $0x98] sm:$0xff]  }
 0x289   :  { %v11198_v56 = vsel %vm13261_vm6, %v2145_v52, %v2072_v53  ;;  %9030 = vmatprep.mubr.msk.bf16.mxu1 %vm13260_vm7, %v2433_v55  ;;  %v2147_v8 = vsel %vm2113_vm5, %v9886_v4, %v1925_v54  ;;  %v3710_v45 = vrot.slane %v3708_v42, 1 }
 0x28a   :  { %v2434_v0 = vrot.slane %v11198_v56, 1  ;;  %3939 = vrot.lane.b32.xlu1 %v3679_v58, %s10244_s11  ;;  %v3695_v33 = vsel %vm1599_vm4, %v3690_v60, %v3694_v20  ;;  %v3698_v54 = vor.u32 %v3696_v2, %v3694_v20  ;;  %v11267_v60 = vld [vmem:[#allocation2 + $0x70] sm:$0xff]   ;;  %v3724_v20 = vshll.u32 %v11257_v3, 16 }
 0x28b   :  { %4087 = vrot.lane.b32.xlu0 %v4016_v21, %s10230_s15  ;;  %v4023_v21 = vrot.slane %v11203_v59, 1 }
 0x28c   :  { %v1927_v10 = vpop.permute.xlu1 %1926  ;;  %v2074_v11 = vpop.permute.xlu0 %2073  ;;  %v2435_v14 = vsel %vm1967_vm3, %v2432_v37, %v2434_v0  ;;  %v3704_v37 = vshrl.u32 %v11203_v59, 16  ;;  %v4025_v59 = vrot.slane %v11225_v7, 1  ;;  %v3726_v42 = vrot.slane %v3724_v20, 1 }
 0x28d   :  { %v11215_v17 = vsel %vm13261_vm6, %v2147_v8, %v2074_v11  ;;  %9031 = vmatmul.mubr.msk.bf16.gmra.mrb[36].mxu1 %vm13260_vm7, %v2435_v14  ;;  %v2149_v40 = vsel %vm2113_vm5, %v9887_v27, %v1927_v10  ;;  %v9890_v27 = vld [vmem:[#allocation2 + $0xa0] sm:$0xff]  }
 0x28e   :  { %v2436_v62 = vrot.slane %v11215_v17, 1  ;;  %4089 = vrot.lane.b32.xlu1 %v4018_v12, %s10230_s15  ;;  %v3706_v58 = vor.u32 %v3704_v37, %v3702_v34  ;;  %v3718_v12 = vrot.slane %v3716_v23, 1  ;;  %v4027_v37 = vrot.slane %v11235_v35, 1 }
 0x28f   :  { %3941 = vrot.lane.b32.xlu0 %v3687_v13, %s10244_s11  ;;  %v3712_v13 = vshrl.u32 %v11225_v7, 16  ;;  %v4026_v7 = vsel %vm1967_vm3, %v4023_v21, %v4025_v59  ;;  %v4029_v35 = vrot.slane %v11257_v3, 1 }
 0x290   :  { %v2076_v28 = vpop.permute.xlu1 %2075  ;;  %v1929_v29 = vpop.permute.xlu0 %1928  ;;  %v2437_v57 = vsel %vm1967_vm3, %v2434_v0, %v2436_v62  ;;  %v3703_v0 = vsel %vm1599_vm4, %v3698_v54, %v3702_v34  ;;  %v3711_v15 = vsel %vm1599_vm4, %v3706_v58, %v3710_v45 }
 0x291   :  { %v11230_v31 = vsel %vm13261_vm6, %v2149_v40, %v2076_v28  ;;  %9034 = vmatprep.mubr.msk.bf16.mxu1 %vm13260_vm7, %v2437_v57  ;;  %v2151_v49 = vsel %vm2113_vm5, %v9888_v46, %v1929_v29  ;;  %v11289_v46 = vld [vmem:[#allocation2 + $0x78] sm:$0xff]  }
 0x292   :  { %v2438_v24 = vrot.slane %v11230_v31, 1  ;;  %3943 = vrot.lane.b32.xlu1 %v3695_v33, %s10244_s11  ;;  %v3714_v33 = vor.u32 %v3712_v13, %v3710_v45  ;;  %v3728_v45 = vshrl.u32 %v11257_v3, 16  ;;  %v4030_v3 = vsel %vm1967_vm3, %v4027_v37, %v4029_v35 }
 0x293   :  { %4091 = vrot.lane.b32.xlu0 %v4020_v39, %s10230_s15 }
 0x294   :  { %v1931_v48 = vpop.permute.xlu1 %1930  ;;  %v2078_v52 = vpop.permute.xlu0 %2077  ;;  %v2439_v53 = vsel %vm1967_vm3, %v2436_v62, %v2438_v24  ;;  %v4024_v62 = vsel %vm1967_vm3, %v4021_v1, %v4023_v21  ;;  %v3722_v1 = vor.u32 %v3720_v19, %v3718_v12  ;;  %v3719_v2 = vsel %vm1599_vm4, %v3714_v33, %v3718_v12 }
 0x295   :  { %v11247_v55 = vsel %vm13261_vm6, %v2151_v49, %v2078_v52  ;;  %9035 = vmatmul.mubr.msk.bf16.gmra.mrb[40].mxu1 %vm13260_vm7, %v2439_v53  ;;  %v2153_v4 = vsel %vm2113_vm5, %v9889_v5, %v1931_v48  ;;  %v9891_v49 = vld [vmem:[#allocation2 + $0xa8] sm:$0xff]   ;;  %v4028_v21 = vsel %vm1967_vm3, %v4025_v59, %v4027_v37  ;;  %v3736_v5 = vshrl.u32 %v11267_v60, 16  ;;  %v11331_v37 = vld [vmem:[#allocation2 + $0x90] sm:$0xff]  }
 0x296   :  { %v2440_v43 = vrot.slane %v11247_v55, 1  ;;  %4093 = vrot.lane.b32.xlu1 %v4022_v50, %s10230_s15  ;;  %v3727_v58 = vsel %vm1599_vm4, %v3722_v1, %v3726_v42 }
 0x297   :  { %3945 = vrot.lane.b32.xlu0 %v3703_v0, %s10244_s11 }
 0x298   :  { %v2080_v8 = vpop.permute.xlu1 %2079  ;;  %v1933_v10 = vpop.permute.xlu0 %1932  ;;  %v2441_v11 = vsel %vm1967_vm3, %v2438_v24, %v2440_v43  ;;  %v3732_v24 = vshll.u32 %v11267_v60, 16 }
 0x299   :  { %v11262_v14 = vsel %vm13261_vm6, %v2153_v4, %v2080_v8  ;;  %9038 = vmatprep.mubr.msk.bf16.mxu1 %vm13260_vm7, %v2441_v11  ;;  %v2155_v40 = vsel %vm2113_vm5, %v9890_v27, %v1933_v10  ;;  %v3740_v4 = vshll.u32 %v11289_v46, 16  ;;  %v9892_v8 = vld [vmem:[#allocation2 + $0xb0] sm:$0xff]   ;;  %v4031_v27 = vrot.slane %v11267_v60, 1 }
 0x29a   :  { %v2442_v16 = vrot.slane %v11262_v14, 1  ;;  %3947 = vrot.lane.b32.xlu1 %v3711_v15, %s10244_s11  ;;  %v3734_v23 = vrot.slane %v3732_v24, 1  ;;  %v4033_v60 = vrot.slane %v11289_v46, 1 }
 0x29b   :  { %4095 = vrot.lane.b32.xlu0 %v4024_v62, %s10230_s15 }
 0x29c   :  { %v1935_v28 = vpop.permute.xlu1 %1934  ;;  %v2082_v29 = vpop.permute.xlu0 %2081  ;;  %v2443_v57 = vsel %vm1967_vm3, %v2440_v43, %v2442_v16  ;;  %v11299_v43 = vld [vmem:[#allocation2 + $0x80] sm:$0xff]   ;;  %v3738_v59 = vor.u32 %v3736_v5, %v3734_v23 }
 0x29d   :  { %v11279_v34 = vsel %vm13261_vm6, %v2155_v40, %v2082_v29  ;;  %9039 = vmatmul.mubr.msk.bf16.gmra.mrb[44].mxu1 %vm13260_vm7, %v2443_v57  ;;  %v2157_v48 = vsel %vm2113_vm5, %v9891_v49, %v1935_v28  ;;  %v3748_v13 = vshll.u32 %v11299_v43, 16  ;;  %v3742_v40 = vrot.slane %v3740_v4, 1  ;;  %v11321_v28 = vld [vmem:[#allocation2 + $0x88] sm:$0xff]   ;;  %v9893_v29 = vld [vmem:[#allocation2 + $0xb8] sm:$0xff]  }
 0x29e   :  { %v2444_v39 = vrot.slane %v11279_v34, 1  ;;  %4097 = vrot.lane.b32.xlu1 %v4026_v7, %s10230_s15  ;;  %v4032_v49 = vsel %vm1967_vm3, %v4029_v35, %v4031_v27  ;;  %v3764_v4 = vshll.u32 %v11331_v37, 16 }
 0x29f   :  { %3949 = vrot.lane.b32.xlu0 %v3719_v2, %s10244_s11  ;;  %v3750_v2 = vrot.slane %v3748_v13, 1 }
 0x2a0   :  { %v2084_v52 = vpop.permute.xlu1 %2083  ;;  %v1937_v53 = vpop.permute.xlu0 %1936  ;;  %v2445_v54 = vsel %vm1967_vm3, %v2442_v16, %v2444_v39  ;;  %v3730_v16 = vor.u32 %v3728_v45, %v3726_v42 }
 0x2a1   :  { %v11294_v50 = vsel %vm13261_vm6, %v2157_v48, %v2084_v52  ;;  %9042 = vmatprep.mubr.msk.bf16.mxu1 %vm13260_vm7, %v2445_v54  ;;  %v2159_v10 = vsel %vm2113_vm5, %v9892_v8, %v1937_v53  ;;  %v3744_v48 = vshrl.u32 %v11289_v46, 16  ;;  %v3752_v52 = vshrl.u32 %v11299_v43, 16  ;;  %v9894_v54 = vld [vmem:[#allocation2 + $0xc0] sm:$0xff]  }
 0x2a2   :  { %v2446_v0 = vrot.slane %v11294_v50, 1  ;;  %3951 = vrot.lane.b32.xlu1 %v3727_v58, %s10244_s11  ;;  %v3735_v20 = vsel %vm1599_vm4, %v3730_v16, %v3734_v23  ;;  %v3756_v53 = vshll.u32 %v11321_v28, 16  ;;  %v4034_v46 = vsel %vm1967_vm3, %v4031_v27, %v4033_v60  ;;  %v9895_v16 = vld [vmem:[#allocation2 + $0xc8] sm:$0xff]  }
 0x2a3   :  { %4099 = vrot.lane.b32.xlu0 %v4028_v21, %s10230_s15  ;;  %v3746_v45 = vor.u32 %v3744_v48, %v3742_v40  ;;  %v3754_v35 = vor.u32 %v3752_v52, %v3750_v2 }
 0x2a4   :  { %v1939_v11 = vpop.permute.xlu1 %1938  ;;  %v2086_v15 = vpop.permute.xlu0 %2085  ;;  %v2447_v12 = vsel %vm1967_vm3, %v2444_v39, %v2446_v0  ;;  %v3743_v39 = vsel %vm1599_vm4, %v3738_v59, %v3742_v40  ;;  %v3766_v40 = vrot.slane %v3764_v4, 1 }
 0x2a5   :  { %v11311_v62 = vsel %vm13261_vm6, %v2159_v10, %v2086_v15  ;;  %9043 = vmatmul.mubr.msk.bf16.gmra.mrb[48].mxu1 %vm13260_vm7, %v2447_v12  ;;  %v2161_v57 = vsel %vm2113_vm5, %v9893_v29, %v1939_v11  ;;  %v3751_v10 = vsel %vm1599_vm4, %v3746_v45, %v3750_v2  ;;  %v4035_v11 = vrot.slane %v11299_v43, 1  ;;  %v11353_v12 = vld [vmem:[#allocation2 + $0x98] sm:$0xff]   ;;  %v11363_v29 = vld [vmem:[#allocation2 + $0xa0] sm:$0xff]   ;;  %v9896_v2 = vld [vmem:[#allocation2 + $0xd0] sm:$0xff]  }
 0x2a6   :  { %v2448_v19 = vrot.slane %v11311_v62, 1  ;;  %4101 = vrot.lane.b32.xlu1 %v4030_v3, %s10230_s15  ;;  %v3758_v15 = vrot.slane %v3756_v53, 1  ;;  %v4037_v43 = vrot.slane %v11321_v28, 1 }
 0x2a7   :  { %3953 = vrot.lane.b32.xlu0 %v3735_v20, %s10244_s11 }
 0x2a8   :  { %v2088_v33 = vpop.permute.xlu1 %2087  ;;  %v1941_v7 = vpop.permute.xlu0 %1940  ;;  %v2449_v1 = vsel %vm1967_vm3, %v2446_v0, %v2448_v19  ;;  %v3759_v27 = vsel %vm1599_vm4, %v3754_v35, %v3758_v15  ;;  %v9897_v35 = vld [vmem:[#allocation2 + $0xd8] sm:$0xff]  }
 0x2a9   :  { %v11326_v24 = vsel %vm13261_vm6, %v2161_v57, %v2088_v33  ;;  %9046 = vmatprep.mubr.msk.bf16.mxu1 %vm13260_vm7, %v2449_v1  ;;  %v2163_v58 = vsel %vm2113_vm5, %v9894_v54, %v1941_v7  ;;  %v4036_v33 = vsel %vm1967_vm3, %v4033_v60, %v4035_v11  ;;  %v3760_v7 = vshrl.u32 %v11321_v28, 16 }
 0x2aa   :  { %v2450_v42 = vrot.slane %v11326_v24, 1  ;;  %3955 = vrot.lane.b32.xlu1 %v3743_v39, %s10244_s11  ;;  %v3768_v1 = vshrl.u32 %v11331_v37, 16  ;;  %v3772_v39 = vshll.u32 %v11353_v12, 16  ;;  %v4038_v28 = vsel %vm1967_vm3, %v4035_v11, %v4037_v43 }
 0x2ab   :  { %4103 = vrot.lane.b32.xlu0 %v4032_v49, %s10230_s15  ;;  %v3762_v53 = vor.u32 %v3760_v7, %v3758_v15 }
 0x2ac   :  { %v1943_v23 = vpop.permute.xlu1 %1942  ;;  %v2090_v0 = vpop.permute.xlu0 %2089  ;;  %v2451_v21 = vsel %vm1967_vm3, %v2448_v19, %v2450_v42  ;;  %v3770_v60 = vor.u32 %v3768_v1, %v3766_v40  ;;  %v3774_v45 = vrot.slane %v3772_v39, 1 }
 0x2ad   :  { %v11343_v5 = vsel %vm13261_vm6, %v2163_v58, %v2090_v0  ;;  %9047 = vmatmul.mubr.msk.bf16.gmra.mrb[52].mxu1 %vm13260_vm7, %v2451_v21  ;;  %v2165_v3 = vsel %vm2113_vm5, %v9895_v16, %v1943_v23  ;;  %v3780_v58 = vshll.u32 %v11363_v29, 16  ;;  %v3767_v0 = vsel %vm1599_vm4, %v3762_v53, %v3766_v40 }
 0x2ae   :  { %v2452_v8 = vrot.slane %v11343_v5, 1  ;;  %4105 = vrot.lane.b32.xlu1 %v4034_v46, %s10230_s15  ;;  %v4039_v21 = vrot.slane %v11331_v37, 1  ;;  %v11385_v46 = vld [vmem:[#allocation2 + $0xa8] sm:$0xff]   ;;  %v3775_v16 = vsel %vm1599_vm4, %v3770_v60, %v3774_v45  ;;  %v4041_v37 = vrot.slane %v11353_v12, 1 }
 0x2af   :  { %3957 = vrot.lane.b32.xlu0 %v3751_v10, %s10244_s11  ;;  %v3784_v40 = vshrl.u32 %v11363_v29, 16  ;;  %v4043_v60 = vrot.slane %v11363_v29, 1 }
 0x2b0   :  { %v2092_v59 = vpop.permute.xlu1 %2091  ;;  %v1945_v13 = vpop.permute.xlu0 %1944  ;;  %v2453_v19 = vsel %vm1967_vm3, %v2450_v42, %v2452_v8 }
 0x2b1   :  { %v11358_v20 = vsel %vm13261_vm6, %v2165_v3, %v2092_v59  ;;  %9050 = vmatprep.mubr.msk.bf16.mxu1 %vm13260_vm7, %v2453_v19  ;;  %v2167_v42 = vsel %vm2113_vm5, %v9896_v2, %v1945_v13  ;;  %v3782_v3 = vrot.slane %v3780_v58, 1  ;;  %v11395_v59 = vld [vmem:[#allocation2 + $0xb0] sm:$0xff]   ;;  %v4040_v19 = vsel %vm1967_vm3, %v4037_v43, %v4039_v21 }
 0x2b2   :  { %v2454_v57 = vrot.slane %v11358_v20, 1  ;;  %3959 = vrot.lane.b32.xlu1 %v3759_v27, %s10244_s11  ;;  %13267 = vst [vmem:[#allocation37_spill] sm:$0xff] %v11395_v59  ;;  %v3776_v27 = vshrl.u32 %v11353_v12, 16  ;;  %v4042_v43 = vsel %vm1967_vm3, %v4039_v21, %v4041_v37 }
 0x2b3   :  { %4107 = vrot.lane.b32.xlu0 %v4036_v33, %s10230_s15  ;;  %v9898_v33 = vld [vmem:[#allocation2 + $0xe0] sm:$0xff]  }
 0x2b4   :  { %v1947_v49 = vpop.permute.xlu1 %1946  ;;  %v2094_v48 = vpop.permute.xlu0 %2093  ;;  %v2455_v52 = vsel %vm1967_vm3, %v2452_v8, %v2454_v57 }
 0x2b5   :  { %v11375_v54 = vsel %vm13261_vm6, %v2167_v42, %v2094_v48  ;;  %9051 = vmatmul.mubr.msk.bf16.gmra.mrb[56].mxu1 %vm13260_vm7, %v2455_v52  ;;  %v2169_v4 = vsel %vm2113_vm5, %v9897_v35, %v1947_v49  ;;  %v3778_v42 = vor.u32 %v3776_v27, %v3774_v45  ;;  %v3786_v48 = vor.u32 %v3784_v40, %v3782_v3 }
 0x2b6   :  { %v2456_v23 = vrot.slane %v11375_v54, 1  ;;  %4109 = vrot.lane.b32.xlu1 %v4038_v28, %s10230_s15  ;;  %v3796_v52 = vshll.u32 %v11395_v59, 16  ;;  %v4044_v27 = vsel %vm1967_vm3, %v4041_v37, %v4043_v60  ;;  %v3800_v40 = vshrl.u32 %v11395_v59, 16 }
 0x2b7   :  { %3961 = vrot.lane.b32.xlu0 %v3767_v0, %s10244_s11  ;;  %v3783_v28 = vsel %vm1599_vm4, %v3778_v42, %v3782_v3  ;;  %v9899_v0 = vld [vmem:[#allocation2 + $0xe8] sm:$0xff]   ;;  %v11427_v3 = vld [vmem:[#allocation2 + $0xc0] sm:$0xff]  }
 0x2b8   :  { %v2096_v8 = vpop.permute.xlu1 %2095  ;;  %v1949_v10 = vpop.permute.xlu0 %1948  ;;  %v2457_v11 = vsel %vm1967_vm3, %v2454_v57, %v2456_v23  ;;  %v3788_v57 = vshll.u32 %v11385_v46, 16  ;;  %13269 = vst [vmem:[#allocation39_spill] sm:$0xff] %v11427_v3 }
 0x2b9   :  { %v11390_v15 = vsel %vm13261_vm6, %v2169_v4, %v2096_v8  ;;  %9054 = vmatprep.mubr.msk.bf16.mxu1 %vm13260_vm7, %v2457_v11  ;;  %v2171_v7 = vsel %vm2113_vm5, %v9898_v33, %v1949_v10  ;;  %v4045_v11 = vrot.slane %v11385_v46, 1  ;;  %v9900_v33 = vld [vmem:[#allocation2 + $0xf0] sm:$0xff]  }
 0x2ba   :  { %v2458_v13 = vrot.slane %v11390_v15, 1  ;;  %3963 = vrot.lane.b32.xlu1 %v3775_v16, %s10244_s11  ;;  %v3790_v58 = vrot.slane %v3788_v57, 1  ;;  %v3798_v16 = vrot.slane %v3796_v52, 1  ;;  %v3812_v52 = vshll.u32 %v11427_v3, 16 }
 0x2bb   :  { %4111 = vrot.lane.b32.xlu0 %v4040_v19, %s10230_s15  ;;  %v4046_v37 = vsel %vm1967_vm3, %v4043_v60, %v4045_v11 }
 0x2bc   :  { %v1951_v1 = vpop.permute.xlu1 %1950  ;;  %v2098_v39 = vpop.permute.xlu0 %2097  ;;  %v2459_v2 = vsel %vm1967_vm3, %v2456_v23, %v2458_v13  ;;  %v11417_v23 = vld [vmem:[#allocation2 + $0xb8] sm:$0xff]   ;;  %v3791_v10 = vsel %vm1599_vm4, %v3786_v48, %v3790_v58  ;;  %v3802_v48 = vor.u32 %v3800_v40, %v3798_v16  ;;  %v3814_v40 = vrot.slane %v3812_v52, 1 }
 0x2bd   :  { %v11407_v49 = vsel %vm13261_vm6, %v2171_v7, %v2098_v39  ;;  %9055 = vmatmul.mubr.msk.bf16.gmra.mrb[60].mxu1 %vm13260_vm7, %v2459_v2  ;;  %13268 = vst [vmem:[#allocation38_spill] sm:$0xff] %v11417_v23  ;;  %v2173_v45 = vsel %vm2113_vm5, %v9899_v0, %v1951_v1  ;;  %v3804_v57 = vshll.u32 %v11417_v23, 16 }
 0x2be   :  { %v2460_v53 = vrot.slane %v11407_v49, 1  ;;  %4113 = vrot.lane.b32.xlu1 %v4042_v43, %s10230_s15 }
 0x2bf   :  { %3965 = vrot.lane.b32.xlu0 %v3783_v28, %s10244_s11 }
 0x2c0   :  { %v2100_v21 = vpop.permute.xlu1 %2099  ;;  %v1953_v35 = vpop.permute.xlu0 %1952  ;;  %v2461_v4 = vsel %vm1967_vm3, %v2458_v13, %v2460_v53  ;;  %v3792_v13 = vshrl.u32 %v11385_v46, 16 }
 0x2c1   :  { %v11422_v8 = vsel %vm13261_vm6, %v2173_v45, %v2100_v21  ;;  %9058 = vmatprep.mubr.msk.bf16.mxu1 %vm13260_vm7, %v2461_v4  ;;  %v2175_v7 = vsel %vm2113_vm5, %v9900_v33, %v1953_v35  ;;  %v4047_v45 = vrot.slane %v11395_v59, 1  ;;  %v9901_v21 = vld [vmem:[#allocation2 + $0xf8] sm:$0xff]  }
 0x2c2   :  { %v2462_v19 = vrot.slane %v11422_v8, 1  ;;  %3967 = vrot.lane.b32.xlu1 %v3791_v10, %s10244_s11  ;;  %v3794_v42 = vor.u32 %v3792_v13, %v3790_v58  ;;  %v11449_v58 = vld [vmem:[#allocation2 + $0xc8] sm:$0xff]   ;;  %v4049_v13 = vrot.slane %v11417_v23, 1 }
 0x2c3   :  { %4115 = vrot.lane.b32.xlu0 %v4044_v27, %s10230_s15  ;;  %13270 = vst [vmem:[#allocation40_spill] sm:$0xff] %v11449_v58 }
 0x2c4   :  { %v1955_v1 = vpop.permute.xlu1 %1954  ;;  %v2102_v39 = vpop.permute.xlu0 %2101  ;;  %v2463_v2 = vsel %vm1967_vm3, %v2460_v53, %v2462_v19  ;;  %v3799_v0 = vsel %vm1599_vm4, %v3794_v42, %v3798_v16  ;;  %v3806_v53 = vrot.slane %v3804_v57, 1  ;;  %v11459_v57 = vld [vmem:[#allocation2 + $0xd0] sm:$0xff]  }
 0x2c5   :  { %v11439_v43 = vsel %vm13261_vm6, %v2175_v7, %v2102_v39  ;;  %9059 = vmatmul.mubr.msk.bf16.gmra.mrb[64].mxu1 %vm13260_vm7, %v2463_v2  ;;  %v2177_v35 = vsel %vm2113_vm5, %v9901_v21, %v1955_v1  ;;  %13271 = vst [vmem:[#allocation41_spill] sm:$0xff] %v11459_v57  ;;  %v4048_v7 = vsel %vm1967_vm3, %v4045_v11, %v4047_v45  ;;  %v3816_v1 = vshrl.u32 %v11427_v3, 16  ;;  %v9902_v2 = vld [vmem:[#allocation2 + $0x100] sm:$0xff]  }
 0x2c6   :  { %v2464_v28 = vrot.slane %v11439_v43, 1  ;;  %4117 = vrot.lane.b32.xlu1 %v4046_v37, %s10230_s15  ;;  %v3807_v16 = vsel %vm1599_vm4, %v3802_v48, %v3806_v53  ;;  %v3820_v39 = vshll.u32 %v11449_v58, 16  ;;  %v4050_v11 = vsel %vm1967_vm3, %v4047_v45, %v4049_v13 }
 0x2c7   :  { %3969 = vrot.lane.b32.xlu0 %v3799_v0, %s10244_s11 }
 0x2c8   :  { %v2104_v60 = vpop.permute.xlu1 %2103  ;;  %v1957_v4 = vpop.permute.xlu0 %1956  ;;  %v2465_v10 = vsel %vm1967_vm3, %v2462_v19, %v2464_v28  ;;  %v3808_v19 = vshrl.u32 %v11417_v23, 16  ;;  %v11533_v23 = vld [vmem:[#allocation2 + $0xf0] sm:$0xff]  }
 0x2c9   :  { %v11454_v27 = vsel %vm13261_vm6, %v2177_v35, %v2104_v60  ;;  %9062 = vmatprep.mubr.msk.bf16.mxu1 %vm13260_vm7, %v2465_v10  ;;  %v2179_v42 = vsel %vm2113_vm5, %v9902_v2, %v1957_v4  ;;  %v3818_v35 = vor.u32 %v3816_v1, %v3814_v40  ;;  %v3828_v60 = vshll.u32 %v11459_v57, 16 }
 0x2ca   :  { %v2466_v33 = vrot.slane %v11454_v27, 1  ;;  %3971 = vrot.lane.b32.xlu1 %v3807_v16, %s10244_s11  ;;  %v3810_v0 = vor.u32 %v3808_v19, %v3806_v53  ;;  %v4051_v16 = vrot.slane %v11427_v3, 1  ;;  %v11481_v53 = vld [vmem:[#allocation2 + $0xd8] sm:$0xff]  }
 0x2cb   :  { %4119 = vrot.lane.b32.xlu0 %v4048_v7, %s10230_s15  ;;  %13272 = vst [vmem:[#allocation42_spill] sm:$0xff] %v11481_v53  ;;  %v9903_v7 = vld [vmem:[#allocation2 + $0x108] sm:$0xff]  }
 0x2cc   :  { %v1959_v37 = vpop.permute.xlu1 %1958  ;;  %v2106_v48 = vpop.permute.xlu0 %2105  ;;  %v2467_v52 = vsel %vm1967_vm3, %v2464_v28, %v2466_v33  ;;  %v3815_v4 = vsel %vm1599_vm4, %v3810_v0, %v3814_v40  ;;  %v3822_v28 = vrot.slane %v3820_v39, 1  ;;  %v11491_v39 = vld [vmem:[#allocation2 + $0xe0] sm:$0xff]  }
 0x2cd   :  { %v11471_v21 = vsel %vm13261_vm6, %v2179_v42, %v2106_v48  ;;  %9063 = vmatmul.mubr.msk.bf16.gmra.mrb[68].mxu1 %vm13260_vm7, %v2467_v52  ;;  %v2181_v19 = vsel %vm2113_vm5, %v9903_v7, %v1959_v37  ;;  %v4053_v48 = vrot.slane %v11449_v58, 1  ;;  %v3830_v52 = vrot.slane %v3828_v60, 1  ;;  %13273 = vst [vmem:[#allocation43_spill] sm:$0xff] %v11491_v39 }
 0x2ce   :  { %v2468_v10 = vrot.slane %v11471_v21, 1  ;;  %4121 = vrot.lane.b32.xlu1 %v4050_v11, %s10230_s15  ;;  %v3823_v40 = vsel %vm1599_vm4, %v3818_v35, %v3822_v28  ;;  %v4052_v37 = vsel %vm1967_vm3, %v4049_v13, %v4051_v16  ;;  %v3832_v11 = vshrl.u32 %v11459_v57, 16  ;;  %v9904_v35 = vld [vmem:[#allocation2 + $0x110] sm:$0xff]  }
 0x2cf   :  { %3973 = vrot.lane.b32.xlu0 %v3815_v4, %s10244_s11  ;;  %v3836_v4 = vshll.u32 %v11481_v53, 16  ;;  %v4054_v13 = vsel %vm1967_vm3, %v4051_v16, %v4053_v48 }
 0x2d0   :  { %v2108_v45 = vpop.permute.xlu1 %2107  ;;  %v2469_v1 = vsel %vm1967_vm3, %v2466_v33, %v2468_v10  ;;  %v3824_v33 = vshrl.u32 %v11449_v58, 16  ;;  %v3844_v58 = vshll.u32 %v11491_v39, 16 }
 0x2d1   :  { %v11486_v2 = vsel %vm13261_vm6, %v2181_v19, %v2108_v45  ;;  %v1961_v42 = vpop.permute.xlu0 %1960  ;;  %9066 = vmatprep.mubr.msk.bf16.mxu1 %vm13260_vm7, %v2469_v1 }
 0x2d2   :  { %v2470_v0 = vrot.slane %v11486_v2, 1  ;;  %3975 = vrot.lane.b32.xlu1 %v3823_v40, %s10244_s11  ;;  %v2183_v7 = vsel %vm2113_vm5, %v9904_v35, %v1961_v42  ;;  %v3826_v45 = vor.u32 %v3824_v33, %v3822_v28  ;;  %v11512_v28 = vld [vmem:[#allocation2 + $0xe8] sm:$0xff]   ;;  %v3838_v33 = vrot.slane %v3836_v4, 1  ;;  %v11515_v35 = vld [vmem:[#allocation2 + $0x118] sm:$0xff]  }
 0x2d3   :  { %4123 = vrot.lane.b32.xlu0 %v4052_v37, %s10230_s15  ;;  %v3834_v37 = vor.u32 %v3832_v11, %v3830_v52 }
 0x2d4   :  { %v2110_v60 = vpop.permute.xlu1 %2109  ;;  %v2471_v19 = vsel %vm1967_vm3, %v2468_v10, %v2470_v0  ;;  %v3831_v42 = vsel %vm1599_vm4, %v3826_v45, %v3830_v52  ;;  %v4055_v10 = vrot.slane %v11459_v57, 1  ;;  %v4057_v45 = vrot.slane %v11481_v53, 1 }
 0x2d5   :  { %v11503_v1 = vsel %vm13261_vm6, %v2183_v7, %v2110_v60  ;;  %v2318_v40 = vpop.permute.xlu0 %2317  ;;  %9067 = vmatmul.mubr.msk.bf16.gmra.mrb[72].mxu1 %vm13260_vm7, %v2471_v19  ;;  %v3839_v52 = vsel %vm1599_vm4, %v3834_v37, %v3838_v33  ;;  %v3852_v57 = vshll.u32 %v11512_v28, 16  ;;  %v9771_v37 = vld [vmem:[#allocation2 + $0x128] ss:$0 sps:$4 sm:$0x11]  }
 0x2d6   :  { %v2472_v3 = vrot.slane %v11503_v1, 1  ;;  %4125 = vrot.lane.b32.xlu1 %v4054_v13, %s10230_s15  ;;  %v2343_v16 = vsel %vm2113_vm5, %v11515_v35, %v2318_v40  ;;  %v3846_v13 = vrot.slane %v3844_v58, 1  ;;  %v4056_v4 = vsel %vm1967_vm3, %v4053_v48, %v4055_v10 }
 0x2d7   :  { %3977 = vrot.lane.b32.xlu0 %v3831_v42, %s10244_s11  ;;  %v3840_v40 = vshrl.u32 %v11481_v53, 16  ;;  %v4058_v53 = vsel %vm1967_vm3, %v4055_v10, %v4057_v45 }
 0x2d8   :  { %v2335_v11 = vpop.permute.xlu1 %2334  ;;  %v2473_v7 = vsel %vm1967_vm3, %v2470_v0, %v2472_v3  ;;  %v9906_v0 = vld [vmem:[#allocation2 + $0x120] sm:$0xff]  }
 0x2d9   :  { %v2352_v60 = vsel %vm13261_vm6, %v2343_v16, %v2335_v11  ;;  %v2320_v19 = vpop.permute.xlu0 %2319  ;;  %9070 = vmatprep.mubr.msk.bf16.mxu1 %vm13260_vm7, %v2473_v7  ;;  %v3848_v11 = vshrl.u32 %v11491_v39, 16 }
 0x2da   :  { %v2474_v42 = vrot.slane %v2352_v60, 1  ;;  %3979 = vrot.lane.b32.xlu1 %v3839_v52, %s10244_s11  ;;  %v2345_v16 = vsel %vm2113_vm5, %v9906_v0, %v2320_v19  ;;  %v3842_v60 = vor.u32 %v3840_v40, %v3838_v33  ;;  %v4059_v52 = vrot.slane %v11491_v39, 1  ;;  %v11541_v33 = vld [vmem:[#allocation2 + $0xf8] sm:$0xff]  }
 0x2db   :  { %4127 = vrot.lane.b32.xlu0 %v4056_v4, %s10230_s15  ;;  %v3850_v59 = vor.u32 %v3848_v11, %v3846_v13  ;;  %v3854_v0 = vrot.slane %v3852_v57, 1  ;;  %v4061_v11 = vrot.slane %v11512_v28, 1 }
 0x2dc   :  { %v2322_v7 = vpop.permute.xlu1 %2321  ;;  %v2475_v58 = vsel %vm1967_vm3, %v2472_v3, %v2474_v42  ;;  %v3847_v4 = vsel %vm1599_vm4, %v3842_v60, %v3846_v13  ;;  %v3860_v3 = vshll.u32 %v11533_v23, 16  ;;  %v4060_v10 = vsel %vm1967_vm3, %v4057_v45, %v4059_v52 }
 0x2dd   :  { %v2337_v48 = vpop.permute.xlu0 %2336  ;;  %9071 = vmatmul.mubr.msk.bf16.gmra.mrb[76].mxu1 %vm13260_vm7, %v2475_v58  ;;  %v2348_v39 = vsel %vm2113_vm5, %v9771_v37, %v2322_v7  ;;  %v3855_v60 = vsel %vm1599_vm4, %v3850_v59, %v3854_v0  ;;  %v3868_v7 = vshll.u32 %v11541_v33, 16  ;;  %v4062_v59 = vsel %vm1967_vm3, %v4059_v52, %v4061_v11 }
 0x2de   :  { %v2354_v19 = vsel %vm13261_vm6, %v2345_v16, %v2337_v48  ;;  %4129 = vrot.lane.b32.xlu1 %v4058_v53, %s10230_s15  ;;  %v3856_v16 = vshrl.u32 %v11512_v28, 16  ;;  %v3864_v48 = vshrl.u32 %v11533_v23, 16  ;;  %v3862_v45 = vrot.slane %v3860_v3, 1 }
 0x2df   :  { %v2476_v40 = vrot.slane %v2354_v19, 1  ;;  %3981 = vrot.lane.b32.xlu0 %v3847_v4, %s10244_s11  ;;  %v11555_v4 = vld [vmem:[#allocation2 + $0x100] sm:$0xff]   ;;  %v3872_v3 = vshrl.u32 %v11541_v33, 16 }
 0x2e0   :  { %v2339_v58 = vpop.permute.xlu1 %2338  ;;  %v3858_v37 = vor.u32 %v3856_v16, %v3854_v0  ;;  %v4063_v0 = vrot.slane %v11533_v23, 1  ;;  %v3876_v52 = vshll.u32 %v11555_v4, 16 }
 0x2e1   :  { %v2356_v53 = vsel %vm13261_vm6, %v2348_v39, %v2339_v58  ;;  %v1893_v13 = vpop.permute.xlu0 %1892  ;;  %v2477_v57 = vsel %vm1967_vm3, %v2474_v42, %v2476_v40 }
 0x2e2   :  { %v2478_v19 = vrot.slane %v2356_v53, 1  ;;  %9074 = vmatprep.mubr.msk.bf16.mxu1 %vm13260_vm7, %v2477_v57  ;;  %3983 = vrot.lane.b32.xlu1 %v3855_v60, %s10244_s11  ;;  %v2115_v58 = vsel %vm2113_vm5, %v11021_v44, %v1893_v13  ;;  %v3866_v57 = vor.u32 %v3864_v48, %v3862_v45  ;;  %v11569_v60 = vld [vmem:[#allocation2 + $0x108] sm:$0xff]   ;;  %v4065_v48 = vrot.slane %v11541_v33, 1 }
 0x2e3   :  { %4131 = vrot.lane.b32.xlu0 %v4060_v10, %s10230_s15  ;;  %v3863_v10 = vsel %vm1599_vm4, %v3858_v37, %v3862_v45  ;;  %v4064_v37 = vsel %vm1967_vm3, %v4061_v11, %v4063_v0  ;;  %v4067_v11 = vrot.slane %v11555_v4, 1 }
 0x2e4   :  { %v1895_v39 = vpop.permute.xlu1 %1894  ;;  %v2479_v42 = vsel %vm1967_vm3, %v2476_v40, %v2478_v19  ;;  %v3870_v40 = vrot.slane %v3868_v7, 1  ;;  %v3880_v19 = vshrl.u32 %v11555_v4, 16  ;;  %v3878_v7 = vrot.slane %v3876_v52, 1 }
 0x2e5   :  { %v2042_v53 = vpop.permute.xlu0 %2041  ;;  %9075 = vmatmul.mubr.msk.bf16.gmra.mrb[80].mxu1 %vm13260_vm7, %v2479_v42  ;;  %v3884_v42 = vshll.u32 %v11569_v60, 16 }
 0x2e6   :  { %v2188_v16 = vsel %vm13261_vm6, %v2115_v58, %v2042_v53  ;;  %4133 = vrot.lane.b32.xlu1 %v4062_v59, %s10230_s15  ;;  %v3871_v13 = vsel %vm1599_vm4, %v3866_v57, %v3870_v40  ;;  %v3874_v45 = vor.u32 %v3872_v3, %v3870_v40  ;;  %v11579_v59 = vld [vmem:[#allocation2 + $0x110] sm:$0xff]   ;;  %v2117_v58 = vsel %vm2113_vm5, %v11045_v6, %v1895_v39  ;;  %v9783_v57 = vld [vmem:[#allocation14 + $0x68] sm:$0xff]   ;;  %v9907_v3 = vld [vmem:[#allocation14 + $0x60] sm:$0xff]  }
 0x2e7   :  { %3985 = vrot.lane.b32.xlu0 %v3863_v10, %s10244_s11  ;;  %9090 = vmatprep.mubr.msk.bf16.mxu1 %vm13260_vm7, %v2188_v16  ;;  %v4066_v16 = vsel %vm1967_vm3, %v4063_v0, %v4065_v48  ;;  %v3882_v10 = vor.u32 %v3880_v19, %v3878_v7  ;;  %v3886_v52 = vrot.slane %v3884_v42, 1  ;;  %v3888_v6 = vshrl.u32 %v11569_v60, 16  ;;  %v9784_v0 = vld [vmem:[#allocation14 + $0x70] sm:$0xff]  }
 0x2e8   :  { %v2044_v44 = vpop.permute.xlu1 %2043  ;;  %v3879_v40 = vsel %vm1599_vm4, %v3874_v45, %v3878_v7  ;;  %v3892_v39 = vshll.u32 %v11579_v59, 16  ;;  %v4069_v19 = vrot.slane %v11569_v60, 1  ;;  %v11600_v45 = vld [vmem:[#allocation2 + $0x120] sm:$0xff]   ;;  %v4068_v7 = vsel %vm1967_vm3, %v4065_v48, %v4067_v11 }
 0x2e9   :  { %v2190_v53 = vsel %vm13261_vm6, %v2117_v58, %v2044_v44  ;;  %v11592_v44 = vld [vmem:[#allocation2 + $0x118] sm:$0xff]   ;;  %v3890_v42 = vor.u32 %v3888_v6, %v3886_v52 }
 0x2ea   :  { %3987 = vrot.lane.b32.xlu1 %v3871_v13, %s10244_s11  ;;  %v3887_v13 = vsel %vm1599_vm4, %v3882_v10, %v3886_v52  ;;  %v3894_v58 = vrot.slane %v3892_v39, 1  ;;  %v4070_v10 = vsel %vm1967_vm3, %v4067_v11, %v4069_v19  ;;  %v4071_v52 = vrot.slane %v11579_v59, 1  ;;  %v9786_v39 = vld [vmem:[#allocation14 + $0x80] sm:$0xff]  }
 0x2eb   :  { %4135 = vrot.lane.b32.xlu0 %v4064_v37, %s10230_s15  ;;  %v3896_v37 = vshrl.u32 %v11579_v59, 16  ;;  %v3904_v6 = vshrl.u32 %v11592_v44, 16 }
 0x2ec   :  { %v3895_v48 = vsel %vm1599_vm4, %v3890_v42, %v3894_v58 }
 0x2ed   :  { %9091 = vmatmul.mubr.msk.bf16.vlgmr.msra.gmra.mrb[12].mxu1 %vm13260_vm7, %v2190_v53  ;;  %v3900_v53 = vshll.u32 %v11592_v44, 16 }
 0x2ee   :  { %9163 = vmatpush3.bf16.msra.mxu1 %v9907_v3  ;;  %4137 = vrot.lane.b32.xlu1 %v4066_v16, %s10230_s15  ;;  %v9785_v16 = vld [vmem:[#allocation14 + $0x78] sm:$0xff]   ;;  %v3898_v3 = vor.u32 %v3896_v37, %v3894_v58  ;;  %v4073_v37 = vrot.slane %v11592_v44, 1 }
 0x2ef   :  { %3989 = vrot.lane.b32.xlu0 %v3879_v40, %s10244_s11  ;;  %9094 = vmatprep.mubr.msk.bf16.mxu1 %vm13260_vm7, %v10978_v26  ;;  %v11606_v26 = vld [vmem:[#allocation2 + $0x128] sm:$0xff]   ;;  %v3908_v40 = vshll.u32 %v11600_v45, 16 }
 0x2f0   :  { %9164 = vmatprep.subr.bf16.mxu1 %v9783_v57  ;;  %v3916_v11 = vshll.u32 %v11606_v26, 16 }
 0x2f2   :  { %3991 = vrot.lane.b32.xlu1 %v3887_v13, %s10244_s11  ;;  %9165 = vmatpush3.bf16.msra.mxu1 %v9783_v57  ;;  %v3902_v57 = vrot.slane %v3900_v53, 1  ;;  %v3918_v53 = vrot.slane %v3916_v11, 1 }
 0x2f3   :  { %4139 = vrot.lane.b32.xlu0 %v4068_v7, %s10230_s15  ;;  %9166 = vmatprep.subr.bf16.mxu1 %v9784_v0  ;;  %v3910_v7 = vrot.slane %v3908_v40, 1  ;;  %v9788_v40 = vld [vmem:[#allocation2 + $0x130] ss:$0 sps:$4 sm:$0x77]  }
 0x2f4   :  { %v3903_v13 = vsel %vm1599_vm4, %v3898_v3, %v3902_v57  ;;  %v3906_v42 = vor.u32 %v3904_v6, %v3902_v57 }
 0x2f5   :  { %9095 = vmatmul.mubr.msk.bf16.gmra.mrb[16].mxu1 %vm13260_vm7, %v10998_v22  ;;  %v3912_v22 = vshrl.u32 %v11600_v45, 16 }
 0x2f6   :  { %4141 = vrot.lane.b32.xlu1 %v4070_v10, %s10230_s15  ;;  %9098 = vmatprep.mubr.msk.bf16.mxu1 %vm13260_vm7, %v11014_v41  ;;  %v4072_v41 = vsel %vm1967_vm3, %v4069_v19, %v4071_v52  ;;  %v9787_v10 = vld [vmem:[#allocation14 + $0x88] sm:$0xff]   ;;  %v3911_v3 = vsel %vm1599_vm4, %v3906_v42, %v3910_v7  ;;  %v4075_v19 = vrot.slane %v11600_v45, 1 }
 0x2f7   :  { %3993 = vrot.lane.b32.xlu0 %v3895_v48, %s10244_s11  ;;  %9167 = vmatpush3.bf16.msra.mxu1 %v9784_v0  ;;  %v3914_v58 = vor.u32 %v3912_v22, %v3910_v7  ;;  %v4074_v0 = vsel %vm1967_vm3, %v4071_v52, %v4073_v37  ;;  %v3920_v48 = vshrl.u32 %v11606_v26, 16  ;;  %v3924_v52 = vshll.u32 %v9788_v40, 16 }
 0x2f8   :  { %9168 = vmatprep.subr.bf16.mxu1 %v9785_v16  ;;  %v4076_v6 = vsel %vm1967_vm3, %v4073_v37, %v4075_v19 }
 0x2f9   :  { %v3922_v57 = vor.u32 %v3920_v48, %v3918_v53 }
 0x2fa   :  { %3995 = vrot.lane.b32.xlu1 %v3903_v13, %s10244_s11  ;;  %v4079_v13 = vrot.slane %v9788_v40, 1 }
 0x2fb   :  { %4143 = vrot.lane.b32.xlu0 %v4072_v41, %s10230_s15  ;;  %9169 = vmatpush3.bf16.msra.mxu1 %v9785_v16  ;;  %v3919_v16 = vsel %vm1599_vm4, %v3914_v58, %v3918_v53  ;;  %v2112_v41 = vpop.permute.xlu1 %2111 }
 0x2fc   :  { %9170 = vmatprep.subr.bf16.mxu1 %v9786_v39 }
 0x2fd   :  { %9099 = vmatmul.mubr.msk.bf16.gmra.mrb[20].mxu1 %vm13260_vm7, %v11032_v61  ;;  %v4077_v61 = vrot.slane %v11606_v26, 1 }
 0x2fe   :  { %4145 = vrot.lane.b32.xlu1 %v4074_v0, %s10230_s15  ;;  %9102 = vmatprep.mubr.msk.bf16.mxu1 %vm13260_vm7, %v11052_v47  ;;  %v3926_v47 = vrot.slane %v3924_v52, 1 }
 0x2ff   :  { %3997 = vrot.lane.b32.xlu0 %v3911_v3, %s10244_s11  ;;  %9171 = vmatpush3.bf16.msra.mxu1 %v9786_v39  ;;  %v4078_v22 = vsel %vm1967_vm3, %v4075_v19, %v4077_v61  ;;  %v3928_v39 = vshrl.u32 %v9788_v40, 16  ;;  %v4080_v7 = vsel %vm1967_vm3, %v4077_v61, %v4079_v13  ;;  %v3934_v42 = vpop.permute.xlu1 %3933  ;;  %v9908_v3 = vld [vmem:[#allocation2 + $0x18] sm:$0xff]  }
 0x300   :  { %9172 = vmatprep.subr.bf16.mxu1 %v9787_v10  ;;  %v3927_v11 = vsel %vm1599_vm4, %v3922_v57, %v3926_v47  ;;  %v4158_v19 = vsel %vm2113_vm5, %v9908_v3, %v3934_v42 }
 0x301   :  { %v3930_v37 = vor.u32 %v3928_v39, %v3926_v47  ;;  %v9910_v47 = vld [vmem:[#allocation2 + $0x28] sm:$0xff]  }
 0x302   :  { %3999 = vrot.lane.b32.xlu1 %v3919_v16, %s10244_s11 }
 0x303   :  { %4147 = vrot.lane.b32.xlu0 %v4076_v6, %s10230_s15  ;;  %9173 = vmatpush3.bf16.msra.mxu1 %v9787_v10 }
 0x305   :  { %9103 = vmatmul.mubr.msk.bf16.gmra.mrb[24].mxu1 %vm13260_vm7, %v11068_v32  ;;  %v1963_v32 = vpop.permute.xlu0 %1962 }
 0x306   :  { %4149 = vrot.lane.b32.xlu1 %v4078_v22, %s10230_s15  ;;  %9106 = vmatprep.mubr.msk.bf16.mxu1 %vm13260_vm7, %v11083_v51 }
 0x307   :  { %4001 = vrot.lane.b32.xlu0 %v3927_v11, %s10244_s11 }
 0x309   :  { %v3932_v51 = vpop.permute.xlu0 %3931 }
 0x30a   :  { %4003 = vrot.lane.b32.xlu1 %v3930_v37, %s10244_s11 }
 0x30b   :  { %4151 = vrot.lane.b32.xlu0 %v4080_v7, %s10230_s15 }
 0x30d   :  { %9107 = vmatmul.mubr.msk.bf16.gmra.mrb[28].mxu1 %vm13260_vm7, %v11101_v9  ;;  %v3936_v9 = vpop.permute.xlu0 %3935 }
 0x30e   :  { %9110 = vmatprep.mubr.msk.bf16.mxu1 %vm13260_vm7, %v11118_v25  ;;  %4153 = vrot.lane.b32.xlu1 %v4079_v13, %s10230_s15 }
 0x311   :  { %v4084_v25 = vpop.permute.xlu0 %4083 }
 0x312   :  { %v4233_v40 = vsel %vm13261_vm6, %v4158_v19, %v4084_v25 }
 0x313   :  { %v4356_v48 = vrot.slane %v4233_v40, 2 }
 0x315   :  { %9111 = vmatmul.mubr.msk.bf16.gmra.mrb[32].mxu1 %vm13260_vm7, %v11134_v30  ;;  %v4082_v30 = vpop.permute.xlu1 %4081 }
 0x316   :  { %9114 = vmatprep.mubr.msk.bf16.mxu1 %vm13260_vm7, %v11150_v63  ;;  %v3938_v63 = vpop.permute.xlu0 %3937 }
 0x31a   :  { %v4088_v58 = vpop.permute.xlu0 %4087 }
 0x31d   :  { %9115 = vmatmul.mubr.msk.bf16.gmra.mrb[36].mxu1 %vm13260_vm7, %v11166_v18  ;;  %v4086_v18 = vpop.permute.xlu1 %4085 }
 0x31e   :  { %9118 = vmatprep.mubr.msk.bf16.mxu1 %vm13260_vm7, %v11183_v36 }
 0x321   :  { %v3940_v36 = vpop.permute.xlu1 %3939 }
 0x325   :  { %9119 = vmatmul.mubr.msk.bf16.gmra.mrb[40].mxu1 %vm13260_vm7, %v11198_v56  ;;  %v11677_v56 = vpop.permute.xlu0 %3941 }
 0x326   :  { %9122 = vmatprep.mubr.msk.bf16.mxu1 %vm13260_vm7, %v11215_v17  ;;  %v4090_v17 = vpop.permute.xlu1 %4089 }
 0x32d   :  { %9123 = vmatmul.mubr.msk.bf16.gmra.mrb[44].mxu1 %vm13260_vm7, %v11230_v31  ;;  %v11683_v31 = vpop.permute.xlu0 %4091 }
 0x32e   :  { %9126 = vmatprep.mubr.msk.bf16.mxu1 %vm13260_vm7, %v11247_v55  ;;  %v11685_v55 = vpop.permute.xlu1 %3943 }
 0x335   :  { %9127 = vmatmul.mubr.msk.bf16.gmra.mrb[48].mxu1 %vm13260_vm7, %v11262_v14  ;;  %v11691_v14 = vpop.permute.xlu0 %3945 }
 0x336   :  { %9130 = vmatprep.mubr.msk.bf16.mxu1 %vm13260_vm7, %v11279_v34  ;;  %v11693_v34 = vpop.permute.xlu1 %4093 }
 0x339   :  { %v11695_v53 = vpop.permute.xlu0 %4095 }
 0x33d   :  { %9131 = vmatmul.mubr.msk.bf16.gmra.mrb[52].mxu1 %vm13260_vm7, %v11294_v50  ;;  %v11699_v50 = vpop.permute.xlu1 %3947 }
 0x33e   :  { %9134 = vmatprep.mubr.msk.bf16.mxu1 %vm13260_vm7, %v11311_v62  ;;  %v11703_v62 = vpop.permute.xlu0 %3949 }
 0x345   :  { %9135 = vmatmul.mubr.msk.bf16.gmra.mrb[56].mxu1 %vm13260_vm7, %v11326_v24  ;;  %v11705_v24 = vpop.permute.xlu1 %4097 }
 0x346   :  { %9138 = vmatprep.mubr.msk.bf16.mxu1 %vm13260_vm7, %v11343_v5  ;;  %v11711_v5 = vpop.permute.xlu0 %4099 }
 0x349   :  { %v11713_v10 = vpop.permute.xlu1 %3951 }
 0x34d   :  { %9139 = vmatmul.mubr.msk.bf16.gmra.mrb[60].mxu1 %vm13260_vm7, %v11358_v20  ;;  %v11719_v20 = vpop.permute.xlu0 %3953 }
 0x34e   :  { %9142 = vmatprep.mubr.msk.bf16.mxu1 %vm13260_vm7, %v11375_v54  ;;  %v11721_v54 = vpop.permute.xlu1 %4101 }
 0x351   :  { %v11723_v0 = vpop.permute.xlu0 %4103 }
 0x355   :  { %9143 = vmatmul.mubr.msk.bf16.gmra.mrb[64].mxu1 %vm13260_vm7, %v11390_v15  ;;  %v11727_v15 = vpop.permute.xlu1 %3955 }
 0x356   :  { %9146 = vmatprep.mubr.msk.bf16.mxu1 %vm13260_vm7, %v11407_v49  ;;  %v11731_v49 = vpop.permute.xlu0 %3957 }
 0x35a   :  { %v11744_v16 = vpop.permute.xlu0 %4107 }
 0x35d   :  { %9147 = vmatmul.mubr.msk.bf16.gmra.mrb[68].mxu1 %vm13260_vm7, %v11422_v8  ;;  %v11733_v8 = vpop.permute.xlu1 %4105 }
 0x35e   :  { %9150 = vmatprep.mubr.msk.bf16.mxu1 %vm13260_vm7, %v11439_v43  ;;  %v4156_v43 = vsel %vm2113_vm5, %v11077_v38, %v3932_v51  ;;  %v2185_v38 = vsel %vm2113_vm5, %v11515_v35, %v1963_v32  ;;  %v11758_v13 = vpop.permute.xlu0 %3961  ;;  %v9911_v32 = vld [vmem:[#allocation2 + $0x30] sm:$0xff]  }
 0x35f   :  { %v2258_v57 = vsel %vm13261_vm6, %v2185_v38, %v2112_v41  ;;  %v4164_v51 = vsel %vm2113_vm5, %v9911_v32, %v3940_v36 }
 0x360   :  { %v4239_v41 = vsel %vm13261_vm6, %v4164_v51, %v4090_v17  ;;  %v9918_v51 = vld [vmem:[#allocation2 + $0x68] sm:$0xff]  }
 0x361   :  { %v11746_v61 = vpop.permute.xlu1 %3959 }
 0x362   :  { %v11767_v25 = vpop.permute.xlu0 %4111 }
 0x365   :  { %9151 = vmatmul.mubr.msk.bf16.gmra.mrb[72].mxu1 %vm13260_vm7, %v11454_v27  ;;  %v4231_v27 = vsel %vm13261_vm6, %v4156_v43, %v4082_v30  ;;  %v11760_v39 = vpop.permute.xlu1 %4109  ;;  %v9913_v43 = vld [vmem:[#allocation2 + $0x40] sm:$0xff]  }
 0x366   :  { %9154 = vmatprep.mubr.msk.bf16.mxu1 %vm13260_vm7, %v11471_v21  ;;  %v4355_v21 = vrot.slane %v4231_v27, 2  ;;  %v11776_v17 = vpop.permute.xlu0 %3965 }
 0x368   :  { %v4357_v22 = vsel %vm4354_vm8, %v4355_v21, %v4356_v48 }
 0x36d   :  { %9155 = vmatmul.mubr.msk.bf16.gmra.mrb[76].mxu1 %vm13260_vm7, %v11486_v2  ;;  %v9909_v2 = vld [vmem:[#allocation2 + $0x20] sm:$0xff]  }
 0x36e   :  { %9158 = vmatprep.mubr.msk.bf16.mxu1 %vm13260_vm7, %v11503_v1  ;;  %v4160_v52 = vsel %vm2113_vm5, %v9909_v2, %v3936_v9  ;;  %v4162_v1 = vsel %vm2113_vm5, %v9910_v47, %v3938_v63  ;;  %v9912_v9 = vld [vmem:[#allocation2 + $0x38] sm:$0xff]  }
 0x36f   :  { %v4235_v6 = vsel %vm13261_vm6, %v4160_v52, %v4086_v18  ;;  %v4237_v11 = vsel %vm13261_vm6, %v4162_v1, %v4088_v58  ;;  %v4166_v42 = vsel %vm2113_vm5, %v9912_v9, %v11677_v56  ;;  %v11773_v18 = vpop.permute.xlu1 %3963  ;;  %v4362_v58 = vrot.slane %v4239_v41, 2  ;;  %v9916_v47 = vld [vmem:[#allocation2 + $0x58] sm:$0xff]  }
 0x370   :  { %v4358_v35 = vrot.slane %v4235_v6, 2  ;;  %v4360_v37 = vrot.slane %v4237_v11, 2  ;;  %v4241_v63 = vsel %vm13261_vm6, %v4166_v42, %v11683_v31  ;;  %v4168_v56 = vsel %vm2113_vm5, %v9913_v43, %v11685_v55  ;;  %v9914_v31 = vld [vmem:[#allocation2 + $0x48] sm:$0xff]  }
 0x371   :  { %v4364_v36 = vrot.slane %v4241_v63, 2  ;;  %v4243_v27 = vsel %vm13261_vm6, %v4168_v56, %v11693_v34  ;;  %v4170_v40 = vsel %vm2113_vm5, %v9914_v31, %v11691_v14  ;;  %v9915_v34 = vld [vmem:[#allocation2 + $0x50] sm:$0xff]  }
 0x372   :  { %v4359_v7 = vsel %vm4354_vm8, %v4356_v48, %v4358_v35  ;;  %v4361_v30 = vsel %vm4354_vm8, %v4358_v35, %v4360_v37  ;;  %v4363_v19 = vsel %vm4354_vm8, %v4360_v37, %v4362_v58  ;;  %v4245_v48 = vsel %vm13261_vm6, %v4170_v40, %v11695_v53 }
 0x373   :  { %v11780_v3 = vpop.permute.xlu1 %4113  ;;  %v4365_v21 = vsel %vm4354_vm8, %v4362_v58, %v4364_v36  ;;  %v4366_v55 = vrot.slane %v4243_v27, 2  ;;  %v4368_v38 = vrot.slane %v4245_v48, 2  ;;  %v4172_v52 = vsel %vm2113_vm5, %v9915_v34, %v11699_v50  ;;  %v9922_v34 = vld [vmem:[#allocation2 + $0x88] sm:$0xff]  }
 0x374   :  { %v4247_v6 = vsel %vm13261_vm6, %v4172_v52, %v11705_v24  ;;  %v4174_v53 = vsel %vm2113_vm5, %v9916_v47, %v11703_v62  ;;  %v9917_v24 = vld [vmem:[#allocation2 + $0x60] sm:$0xff]   ;;  %v4186_v52 = vsel %vm2113_vm5, %v9922_v34, %v11758_v13 }
 0x375   :  { %9159 = vmatmul.mubr.msk.bf16.gmra.mrb[80].mxu1 %vm13260_vm7, %v2258_v57  ;;  %v11792_v57 = vpop.permute.xlu0 %4115  ;;  %v4367_v14 = vsel %vm4354_vm8, %v4364_v36, %v4366_v55  ;;  %v4369_v1 = vsel %vm4354_vm8, %v4366_v55, %v4368_v38  ;;  %v4370_v50 = vrot.slane %v4247_v6, 2  ;;  %v9919_v36 = vld [vmem:[#allocation2 + $0x70] sm:$0xff]   ;;  %v9921_v55 = vld [vmem:[#allocation2 + $0x80] sm:$0xff]  }
 0x376   :  { %9174 = vmatprep.mubr.msk.bf16.mxu1 %vm13260_vm7, %v4357_v22  ;;  %v4249_v22 = vsel %vm13261_vm6, %v4174_v53, %v11711_v5  ;;  %v4178_v5 = vsel %vm2113_vm5, %v9918_v51, %v11719_v20 }
 0x377   :  { %v11794_v2 = vpop.permute.xlu1 %3967  ;;  %v4372_v37 = vrot.slane %v4249_v22, 2  ;;  %v4371_v62 = vsel %vm4354_vm8, %v4368_v38, %v4370_v50  ;;  %v4253_v42 = vsel %vm13261_vm6, %v4178_v5, %v11723_v0 }
 0x378   :  { %v4376_v63 = vrot.slane %v4253_v42, 2 }
 0x379   :  { %v11808_v11 = vpop.permute.xlu0 %3969  ;;  %v4373_v9 = vsel %vm4354_vm8, %v4370_v50, %v4372_v37  ;;  %v4190_v50 = vsel %vm2113_vm5, %v11353_v12, %v11776_v17 }
 0x37b   :  { %v11810_v35 = vpop.permute.xlu1 %4117 }
 0x37d   :  { %9175 = vmatmul.mubr.msk.bf16.vlgmr.msra.gmra.mrb[12].mxu1 %vm13260_vm7, %v4359_v7  ;;  %v4176_v7 = vsel %vm2113_vm5, %v9917_v24, %v11713_v10  ;;  %v4120_v41 = vpop.permute.xlu0 %4119  ;;  %v4265_v24 = vsel %vm13261_vm6, %v4190_v50, %v11792_v57  ;;  %v4194_v57 = vsel %vm2113_vm5, %v11385_v46, %v11808_v11  ;;  %v13275_v46 = vld [vmem:[#allocation38_spill] sm:$0xff] }
 0x37e   :  { %9178 = vmatprep.mubr.msk.bf16.mxu1 %vm13260_vm7, %v4361_v30  ;;  %v4251_v32 = vsel %vm13261_vm6, %v4176_v7, %v11721_v54  ;;  %v4180_v54 = vsel %vm2113_vm5, %v9919_v36, %v11727_v15 }
 0x37f   :  { %v3972_v30 = vpop.permute.xlu1 %3971  ;;  %v4374_v10 = vrot.slane %v4251_v32, 2  ;;  %v4255_v56 = vsel %vm13261_vm6, %v4180_v54, %v11733_v8  ;;  %v4184_v8 = vsel %vm2113_vm5, %v9921_v55, %v11746_v61 }
 0x380   :  { %v4378_v15 = vrot.slane %v4255_v56, 2 }
 0x381   :  { %v3974_v58 = vpop.permute.xlu0 %3973  ;;  %v4375_v20 = vsel %vm4354_vm8, %v4372_v37, %v4374_v10  ;;  %v4377_v27 = vsel %vm4354_vm8, %v4374_v10, %v4376_v63 }
 0x382   :  { %v4379_v38 = vsel %vm4354_vm8, %v4376_v63, %v4378_v15  ;;  %v13274_v63 = vld [vmem:[#allocation37_spill] sm:$0xff]  ;;  %v4198_v11 = vsel %vm2113_vm5, %v13275_v46, %v3974_v58  ;;  %v13277_v58 = vld [vmem:[#allocation40_spill] sm:$0xff] }
 0x383   :  { %v4122_v43 = vpop.permute.xlu1 %4121  ;;  %v4196_v36 = vsel %vm2113_vm5, %v13274_v63, %v3972_v30  ;;  %v13276_v30 = vld [vmem:[#allocation39_spill] sm:$0xff] }
 0x384   :  { %v4271_v54 = vsel %vm13261_vm6, %v4196_v36, %v4122_v43 }
 0x385   :  { %9179 = vmatmul.mubr.msk.bf16.gmra.mrb[16].mxu1 %vm13260_vm7, %v4363_v19  ;;  %v9920_v19 = vld [vmem:[#allocation2 + $0x78] sm:$0xff]  }
 0x386   :  { %9182 = vmatprep.mubr.msk.bf16.mxu1 %vm13260_vm7, %v4365_v21  ;;  %v4182_v0 = vsel %vm2113_vm5, %v9920_v19, %v11731_v49  ;;  %v4124_v21 = vpop.permute.xlu0 %4123  ;;  %v4259_v49 = vsel %vm13261_vm6, %v4184_v8, %v11760_v39  ;;  %v4394_v19 = vrot.slane %v4271_v54, 2 }
 0x387   :  { %v4257_v31 = vsel %vm13261_vm6, %v4182_v0, %v11744_v16  ;;  %v3976_v48 = vpop.permute.xlu1 %3975  ;;  %v4382_v61 = vrot.slane %v4259_v49, 2 }
 0x388   :  { %v4380_v40 = vrot.slane %v4257_v31, 2  ;;  %v4200_v31 = vsel %vm2113_vm5, %v13276_v30, %v3976_v48 }
 0x38a   :  { %v4381_v16 = vsel %vm4354_vm8, %v4378_v15, %v4380_v40  ;;  %v3978_v6 = vpop.permute.xlu0 %3977  ;;  %v4383_v22 = vsel %vm4354_vm8, %v4380_v40, %v4382_v61 }
 0x38b   :  { %v4126_v47 = vpop.permute.xlu1 %4125  ;;  %v4202_v40 = vsel %vm2113_vm5, %v13277_v58, %v3978_v6 }
 0x38c   :  { %v4275_v15 = vsel %vm13261_vm6, %v4200_v31, %v4126_v47  ;;  %v13279_v47 = vld [vmem:[#allocation42_spill] sm:$0xff] }
 0x38d   :  { %9183 = vmatmul.mubr.msk.bf16.gmra.mrb[20].mxu1 %vm13260_vm7, %v4367_v14  ;;  %v4261_v14 = vsel %vm13261_vm6, %v4186_v52, %v11767_v25  ;;  %v4398_v49 = vrot.slane %v4275_v15, 2  ;;  %v13278_v52 = vld [vmem:[#allocation41_spill] sm:$0xff] }
 0x38e   :  { %9186 = vmatprep.mubr.msk.bf16.mxu1 %vm13260_vm7, %v4369_v1  ;;  %v4384_v53 = vrot.slane %v4261_v14, 2  ;;  %v9923_v1 = vld [vmem:[#allocation2 + $0x90] sm:$0xff]   ;;  %v4128_v25 = vpop.permute.xlu0 %4127 }
 0x38f   :  { %v4188_v39 = vsel %vm2113_vm5, %v9923_v1, %v11773_v18  ;;  %v3980_v7 = vpop.permute.xlu1 %3979  ;;  %v4277_v8 = vsel %vm13261_vm6, %v4202_v40, %v4128_v25 }
 0x390   :  { %v4263_v13 = vsel %vm13261_vm6, %v4188_v39, %v11780_v3  ;;  %v4385_v37 = vsel %vm4354_vm8, %v4382_v61, %v4384_v53  ;;  %v4192_v3 = vsel %vm2113_vm5, %v11363_v29, %v11794_v2  ;;  %v4400_v34 = vrot.slane %v4277_v8, 2 }
 0x391   :  { %v4386_v18 = vrot.slane %v4263_v13, 2  ;;  %v4267_v17 = vsel %vm13261_vm6, %v4192_v3, %v11810_v35 }
 0x392   :  { %v3982_v32 = vpop.permute.xlu0 %3981  ;;  %v4390_v42 = vrot.slane %v4267_v17, 2  ;;  %v4401_v1 = vsel %vm4354_vm8, %v4398_v49, %v4400_v34 }
 0x393   :  { %v4130_v51 = vpop.permute.xlu1 %4129  ;;  %v4387_v12 = vsel %vm4354_vm8, %v4384_v53, %v4386_v18  ;;  %v4206_v53 = vsel %vm2113_vm5, %v13279_v47, %v3982_v32 }
 0x395   :  { %9187 = vmatmul.mubr.msk.bf16.gmra.mrb[24].mxu1 %vm13260_vm7, %v4371_v62  ;;  %v4388_v62 = vrot.slane %v4265_v24, 2 }
 0x396   :  { %9190 = vmatprep.mubr.msk.bf16.mxu1 %vm13260_vm7, %v4373_v9  ;;  %v4269_v9 = vsel %vm13261_vm6, %v4194_v57, %v4120_v41  ;;  %v4132_v2 = vpop.permute.xlu0 %4131 }
 0x397   :  { %v4389_v5 = vsel %vm4354_vm8, %v4386_v18, %v4388_v62  ;;  %v4392_v29 = vrot.slane %v4269_v9, 2  ;;  %v3984_v10 = vpop.permute.xlu1 %3983  ;;  %v4391_v35 = vsel %vm4354_vm8, %v4388_v62, %v4390_v42  ;;  %v4281_v39 = vsel %vm13261_vm6, %v4206_v53, %v4132_v2 }
 0x398   :  { %v4404_v13 = vrot.slane %v4281_v39, 2 }
 0x399   :  { %v4393_v41 = vsel %vm4354_vm8, %v4390_v42, %v4392_v29  ;;  %v4395_v43 = vsel %vm4354_vm8, %v4392_v29, %v4394_v19 }
 0x39a   :  { %v3986_v56 = vpop.permute.xlu0 %3985 }
 0x39b   :  { %v4134_v0 = vpop.permute.xlu1 %4133  ;;  %v4210_v62 = vsel %vm2113_vm5, %v11512_v28, %v3986_v56 }
 0x39d   :  { %9191 = vmatmul.mubr.msk.bf16.gmra.mrb[28].mxu1 %vm13260_vm7, %v4375_v20  ;;  %v4273_v20 = vsel %vm13261_vm6, %v4198_v11, %v4124_v21 }
 0x39e   :  { %9194 = vmatprep.mubr.msk.bf16.mxu1 %vm13260_vm7, %v4377_v27  ;;  %v4396_v27 = vrot.slane %v4273_v20, 2  ;;  %v4136_v55 = vpop.permute.xlu0 %4135 }
 0x39f   :  { %v4285_v3 = vsel %vm13261_vm6, %v4210_v62, %v4136_v55 }
 0x3a0   :  { %v4397_v21 = vsel %vm4354_vm8, %v4394_v19, %v4396_v27  ;;  %v4399_v61 = vsel %vm4354_vm8, %v4396_v27, %v4398_v49  ;;  %v4408_v57 = vrot.slane %v4285_v3, 2 }
 0x3a2   :  { %v3990_v48 = vpop.permute.xlu0 %3989 }
 0x3a3   :  { %v4214_v28 = vsel %vm2113_vm5, %v11541_v33, %v3990_v48 }
 0x3a5   :  { %9195 = vmatmul.mubr.msk.bf16.gmra.mrb[32].mxu1 %vm13260_vm7, %v4379_v38  ;;  %v3988_v38 = vpop.permute.xlu1 %3987 }
 0x3a6   :  { %9198 = vmatprep.mubr.msk.bf16.mxu1 %vm13260_vm7, %v4381_v16  ;;  %v4204_v16 = vsel %vm2113_vm5, %v13278_v52, %v3980_v7  ;;  %v4140_v50 = vpop.permute.xlu0 %4139 }
 0x3a7   :  { %v4279_v6 = vsel %vm13261_vm6, %v4204_v16, %v4130_v51 }
 0x3a9   :  { %v4138_v14 = vpop.permute.xlu1 %4137 }
 0x3aa   :  { %v3994_v51 = vpop.permute.xlu0 %3993 }
 0x3ad   :  { %9199 = vmatmul.mubr.msk.bf16.gmra.mrb[36].mxu1 %vm13260_vm7, %v4383_v22  ;;  %v4402_v22 = vrot.slane %v4279_v6, 2  ;;  %v3992_v25 = vpop.permute.xlu1 %3991 }
 0x3ae   :  { %9202 = vmatprep.mubr.msk.bf16.mxu1 %vm13260_vm7, %v4385_v37  ;;  %v13280_v37 = vld [vmem:[#allocation43_spill] sm:$0xff]  ;;  %v4144_v29 = vpop.permute.xlu0 %4143  ;;  %v4216_v54 = vsel %vm2113_vm5, %v11555_v4, %v3992_v25 }
 0x3af   :  { %v4208_v24 = vsel %vm2113_vm5, %v13280_v37, %v3984_v10  ;;  %v4403_v7 = vsel %vm4354_vm8, %v4400_v34, %v4402_v22  ;;  %v4405_v32 = vsel %vm4354_vm8, %v4402_v22, %v4404_v13  ;;  %v4289_v10 = vsel %vm13261_vm6, %v4214_v28, %v4140_v50  ;;  %v12010_v50 = vld [vmem:[#allocation16] ss:$0 sm:$0xff] }
 0x3b0   :  { %v4283_v18 = vsel %vm13261_vm6, %v4208_v24, %v4134_v0 }
 0x3b1   :  { %v4142_v17 = vpop.permute.xlu1 %4141 }
 0x3b2   :  { %v4291_v33 = vsel %vm13261_vm6, %v4216_v54, %v4142_v17 }
 0x3b3   :  { %v4414_v19 = vrot.slane %v4291_v33, 2 }
 0x3b5   :  { %9203 = vmatmul.mubr.msk.bf16.gmra.mrb[40].mxu1 %vm13260_vm7, %v4387_v12  ;;  %v4406_v12 = vrot.slane %v4283_v18, 2  ;;  %v3996_v63 = vpop.permute.xlu1 %3995 }
 0x3b6   :  { %9206 = vmatprep.mubr.msk.bf16.mxu1 %vm13260_vm7, %v4389_v5  ;;  %v4212_v5 = vsel %vm2113_vm5, %v11533_v23, %v3988_v38  ;;  %v3998_v23 = vpop.permute.xlu0 %3997  ;;  %v4220_v30 = vsel %vm2113_vm5, %v11579_v59, %v3996_v63 }
 0x3b7   :  { %v4407_v9 = vsel %vm4354_vm8, %v4404_v13, %v4406_v12  ;;  %v4287_v42 = vsel %vm13261_vm6, %v4212_v5, %v4138_v14  ;;  %v4409_v2 = vsel %vm4354_vm8, %v4406_v12, %v4408_v57  ;;  %v9789_v14 = vld [vmem:[#allocation2 + $0x130] ss:$0 sps:$4 sm:$0x33]   ;;  %v10245_v13 = vmov 0  }
 0x3b8   :  { %v4410_v36 = vrot.slane %v4287_v42, 2  ;;  %5620 = vst.msk [vmem:[#allocation5 + $0x4] sm:$0xf] %vm13263_vm2, %v10245_v13  ;;  %5621 = vst.msk [vmem:[#allocation5 + $0x8] sm:$0xf] %vm13263_vm2, %v10245_v13  ;;  %9652 = vset.pattern.permute.xlu1 %v10245_v13  ;;  %9651 = vset.pattern.permute.xlu0 %v10245_v13 }
 0x3b9   :  { %v4146_v46 = vpop.permute.xlu1 %4145  ;;  %5622 = vst.msk [vmem:[#allocation5 + $0xc] sm:$0xf] %vm13263_vm2, %v10245_v13  ;;  %5623 = vst.msk [vmem:[#allocation5 + $0x10] sm:$0xf] %vm13263_vm2, %v10245_v13 }
 0x3ba   :  { %v4411_v11 = vsel %vm4354_vm8, %v4408_v57, %v4410_v36  ;;  %v4148_v27 = vpop.permute.xlu0 %4147  ;;  %5619 = vst.msk [vmem:[#allocation5] sm:$0xf] %vm13263_vm2, %v10245_v13  ;;  %5624 = vst.msk [vmem:[#allocation5 + $0x14] sm:$0xf] %vm13263_vm2, %v10245_v13 }
 0x3bb   :  { %5625 = vst.msk [vmem:[#allocation5 + $0x18] sm:$0xf] %vm13263_vm2, %v10245_v13  ;;  %5626 = vst.msk [vmem:[#allocation5 + $0x1c] sm:$0xf] %vm13263_vm2, %v10245_v13 }
 0x3bc   :  { %5627 = vst.msk [vmem:[#allocation5 + $0x20] sm:$0xf] %vm13263_vm2, %v10245_v13  ;;  %5628 = vst.msk [vmem:[#allocation5 + $0x24] sm:$0xf] %vm13263_vm2, %v10245_v13 }
 0x3bd   :  { %9207 = vmatmul.mubr.msk.bf16.gmra.mrb[44].mxu1 %vm13260_vm7, %v4391_v35  ;;  %v4412_v35 = vrot.slane %v4289_v10, 2  ;;  %v4000_v4 = vpop.permute.xlu1 %3999  ;;  %5629 = vst.msk [vmem:[#allocation5 + $0x28] sm:$0xf] %vm13263_vm2, %v10245_v13  ;;  %5630 = vst.msk [vmem:[#allocation5 + $0x2c] sm:$0xf] %vm13263_vm2, %v10245_v13 }
 0x3be   :  { %9210 = vmatprep.mubr.msk.bf16.mxu1 %vm13260_vm7, %v4393_v41  ;;  %v4218_v41 = vsel %vm2113_vm5, %v11569_v60, %v3994_v51  ;;  %v4222_v60 = vsel %vm2113_vm5, %v11592_v44, %v3998_v23  ;;  %v4002_v58 = vpop.permute.xlu0 %4001  ;;  %v4224_v59 = vsel %vm2113_vm5, %v11600_v45, %v4000_v4  ;;  %5631 = vst.msk [vmem:[#allocation5 + $0x30] sm:$0xf] %vm13263_vm2, %v10245_v13  ;;  %5632 = vst.msk [vmem:[#allocation5 + $0x34] sm:$0xf] %vm13263_vm2, %v10245_v13 }
 0x3bf   :  { %v4413_v20 = vsel %vm4354_vm8, %v4410_v36, %v4412_v35  ;;  %v4293_v56 = vsel %vm13261_vm6, %v4218_v41, %v4144_v29  ;;  %v4415_v31 = vsel %vm4354_vm8, %v4412_v35, %v4414_v19  ;;  %v4297_v40 = vsel %vm13261_vm6, %v4222_v60, %v4148_v27  ;;  %5633 = vst.msk [vmem:[#allocation5 + $0x38] sm:$0xf] %vm13263_vm2, %v10245_v13 }
 0x3c0   :  { %v4416_v0 = vrot.slane %v4293_v56, 2  ;;  %v4420_v8 = vrot.slane %v4297_v40, 2  ;;  %v4226_v38 = vsel %vm2113_vm5, %v11606_v26, %v4002_v58  ;;  %5634 = vst.msk [vmem:[#allocation5 + $0x3c] sm:$0xf] %vm13263_vm2, %v10245_v13  ;;  %5635 = vst.msk [vmem:[#allocation5 + $0x40] sm:$0xf] %vm13263_vm2, %v10245_v13 }
 0x3c1   :  { %5636 = vst.msk [vmem:[#allocation5 + $0x44] sm:$0xf] %vm13263_vm2, %v10245_v13  ;;  %5637 = vst.msk [vmem:[#allocation5 + $0x48] sm:$0xf] %vm13263_vm2, %v10245_v13 }
 0x3c2   :  { %v4417_v15 = vsel %vm4354_vm8, %v4414_v19, %v4416_v0  ;;  %v4152_v49 = vpop.permute.xlu0 %4151  ;;  %5638 = vst.msk [vmem:[#allocation5 + $0x4c] sm:$0xf] %vm13263_vm2, %v10245_v13  ;;  %5639 = vst.msk [vmem:[#allocation5 + $0x50] sm:$0xf] %vm13263_vm2, %v10245_v13 }
 0x3c3   :  { %v4301_v16 = vsel %vm13261_vm6, %v4226_v38, %v4152_v49  ;;  %5640 = vst.msk [vmem:[#allocation5 + $0x54] sm:$0xf] %vm13263_vm2, %v10245_v13  ;;  %5641 = vst.msk [vmem:[#allocation5 + $0x58] sm:$0xf] %vm13263_vm2, %v10245_v13 }
 0x3c4   :  { %v4424_v45 = vrot.slane %v4301_v16, 2 }
 0x3c5   :  { %9211 = vmatmul.mubr.msk.bf16.gmra.mrb[48].mxu1 %vm13260_vm7, %v4395_v43  ;;  %v4295_v43 = vsel %vm13261_vm6, %v4220_v30, %v4146_v46 }
 0x3c6   :  { %9214 = vmatprep.mubr.msk.bf16.mxu1 %vm13260_vm7, %v4397_v21  ;;  %v4418_v55 = vrot.slane %v4295_v43, 2  ;;  %v4150_v21 = vpop.permute.xlu1 %4149 }
 0x3c7   :  { %v4299_v48 = vsel %vm13261_vm6, %v4224_v59, %v4150_v21 }
 0x3c8   :  { %v4419_v44 = vsel %vm4354_vm8, %v4416_v0, %v4418_v55  ;;  %v4421_v52 = vsel %vm4354_vm8, %v4418_v55, %v4420_v8 }
 0x3ca   :  { %v4004_v34 = vpop.permute.xlu1 %4003 }
 0x3cb   :  { %v4229_v6 = vsel %vm2113_vm5, %v9789_v14, %v4004_v34 }
 0x3cd   :  { %9215 = vmatmul.mubr.msk.bf16.gmra.mrb[52].mxu1 %vm13260_vm7, %v4399_v61  ;;  %v4422_v61 = vrot.slane %v4299_v48, 2 }
 0x3ce   :  { %9218 = vmatprep.mubr.msk.bf16.mxu1 %vm13260_vm7, %v4401_v1  ;;  %v4154_v26 = vpop.permute.xlu1 %4153 }
 0x3cf   :  { %v4423_v47 = vsel %vm4354_vm8, %v4420_v8, %v4422_v61  ;;  %v4303_v53 = vsel %vm13261_vm6, %v4229_v6, %v4154_v26  ;;  %v4425_v1 = vsel %vm4354_vm8, %v4422_v61, %v4424_v45  ;;  %vm5753_vm6 = vsmask.f32 2304 }
 0x3d0   :  { %v4426_v39 = vrot.slane %v4303_v53, 2 }
 0x3d2   :  { %v4427_v22 = vsel %vm4354_vm8, %v4424_v45, %v4426_v39  ;;  %vm5699_vm8 = vsmask.f32 1280 }
 0x3d5   :  { %9219 = vmatmul.mubr.msk.bf16.gmra.mrb[56].mxu1 %vm13260_vm7, %v4403_v7 }
 0x3d6   :  { %9222 = vmatprep.mubr.msk.bf16.mxu1 %vm13260_vm7, %v4405_v32 }
 0x3dd   :  { %9223 = vmatmul.mubr.msk.bf16.gmra.mrb[60].mxu1 %vm13260_vm7, %v4407_v9 }
 0x3de   :  { %9226 = vmatprep.mubr.msk.bf16.mxu1 %vm13260_vm7, %v4409_v2 }
 0x3e5   :  { %9227 = vmatmul.mubr.msk.bf16.gmra.mrb[64].mxu1 %vm13260_vm7, %v4411_v11 }
 0x3e6   :  { %9230 = vmatprep.mubr.msk.bf16.mxu1 %vm13260_vm7, %v4413_v20 }
 0x3ed   :  { %9231 = vmatmul.mubr.msk.bf16.gmra.mrb[68].mxu1 %vm13260_vm7, %v4415_v31 }
 0x3ee   :  { %9234 = vmatprep.mubr.msk.bf16.mxu1 %vm13260_vm7, %v4417_v15 }
 0x3f5   :  { %9235 = vmatmul.mubr.msk.bf16.gmra.mrb[72].mxu1 %vm13260_vm7, %v4419_v44 }
 0x3f6   :  { %9238 = vmatprep.mubr.msk.bf16.mxu1 %vm13260_vm7, %v4421_v52 }
 0x3fd   :  { %9239 = vmatmul.mubr.msk.bf16.gmra.mrb[76].mxu1 %vm13260_vm7, %v4423_v47 }
 0x3fe   :  { %9242 = vmatprep.mubr.msk.bf16.mxu1 %vm13260_vm7, %v4425_v1 }
 0x405   :  { %9243 = vmatmul.mubr.msk.bf16.gmra.mrb[80].mxu1 %vm13260_vm7, %v4427_v22  ;;  %vm13265_vm7 = vcmask 257027  }
 0x450   :  { %v9176_v25 = vpop.f32.mrb[12].mxu1 }
 0x451   :  { %v4974_v37 = vadd.f32 %v9176_v25, %v12010_v50  ;;  %v4606_v24 = vpop.f32.mrb[13].mxu1 }
 0x452   :  { %v4972_v7 = vadd.f32 %v12010_v50, %v4606_v24  ;;  %v9177_v18 = vpop.f32.mrb[14].mxu1 }
 0x453   :  { %v5046_v62 = vmax.f32 %v4974_v37, 0.0  ;;  %v4975_v32 = vadd.f32 %v9177_v18, %v12010_v50  ;;  %v4609_v3 = vpop.f32.mrb[15].mxu1 }
 0x454   :  { %v5044_v51 = vmax.f32 %v4972_v7, 0.0  ;;  %v4973_v12 = vadd.f32 %v12010_v50, %v4609_v3 }
 0x455   :  { %5118 = vst.msk [vmem:[#allocation3 + $0x10] sm:$0xff] %vm2113_vm5, %v5046_v62  ;;  %v5047_v17 = vmax.f32 %v4975_v32, 0.0 }
 0x456   :  { %5116 = vst.msk [vmem:[#allocation3] sm:$0xff] %vm2113_vm5, %v5044_v51  ;;  %v5045_v57 = vmax.f32 %v4973_v12, 0.0 }
 0x457   :  { %5119 = vst.msk [vmem:[#allocation3 + $0x18] sm:$0xff] %vm2113_vm5, %v5047_v17 }
 0x458   :  { %5117 = vst.msk [vmem:[#allocation3 + $0x8] sm:$0xff] %vm2113_vm5, %v5045_v57  ;;  %v9180_v5 = vpop.f32.mrb[16].mxu1 }
 0x459   :  { %v4978_v9 = vadd.f32 %v9180_v5, %v12010_v50  ;;  %v4622_v42 = vpop.f32.mrb[17].mxu1 }
 0x45a   :  { %v4976_v28 = vadd.f32 %v12010_v50, %v4622_v42  ;;  %v9181_v29 = vpop.f32.mrb[18].mxu1 }
 0x45b   :  { %v5050_v2 = vmax.f32 %v4978_v9, 0.0  ;;  %v4979_v10 = vadd.f32 %v9181_v29, %v12010_v50  ;;  %v4625_v63 = vpop.f32.mrb[19].mxu1  ;;  %v9811_v29 = vld [vmem:[#allocation17 + $0x30] sm:$0xff]  }
 0x45c   :  { %v5048_v36 = vmax.f32 %v4976_v28, 0.0  ;;  %v4977_v35 = vadd.f32 %v12010_v50, %v4625_v63  ;;  %v10246_v63 = vmov 0.0  }
 0x45d   :  { %5122 = vst.msk [vmem:[#allocation3 + $0x30] sm:$0xff] %vm2113_vm5, %v5050_v2  ;;  %v5051_v23 = vmax.f32 %v4979_v10, 0.0  ;;  %9246 = vmatprep.subr.bf16.mxu0 %v10246_v63  ;;  %9466 = vmatprep.subr.bf16.mxu1 %v10246_v63 }
 0x45e   :  { %5120 = vst.msk [vmem:[#allocation3 + $0x20] sm:$0xff] %vm2113_vm5, %v5048_v36  ;;  %v5049_v54 = vmax.f32 %v4977_v35, 0.0  ;;  %v5190_v27 = vld [vmem:[#allocation3 + $0x10] ss:$2 sm:$0xff]  ;;  %v5262_v4 = vld [vmem:[#allocation3 + $0x11] ss:$2 sm:$0xff]  ;;  %9247 = vmatpush3.bf16.msra.mxu0 %v9811_v29 }
 0x45f   :  { %5123 = vst.msk [vmem:[#allocation3 + $0x38] sm:$0xff] %vm2113_vm5, %v5051_v23  ;;  %v5188_v58 = vld [vmem:[#allocation3] ss:$2 sm:$0xff]  ;;  %v5260_v40 = vld [vmem:[#allocation3 + $0x1] ss:$2 sm:$0xff]  ;;  %v5332_v49 = vmax.f32 %v5190_v27, %v5262_v4  ;;  %9248 = vmatprep.subr.bf16.mxu0 %v10246_v63 }
 0x460   :  { %5121 = vst.msk [vmem:[#allocation3 + $0x28] sm:$0xff] %vm2113_vm5, %v5049_v54  ;;  %v9184_v46 = vpop.f32.mrb[20].mxu1  ;;  %v5331_v44 = vmax.f32 %v5188_v58, %v5260_v40 }
 0x461   :  { %v4982_v11 = vadd.f32 %v9184_v46, %v12010_v50  ;;  %v4638_v33 = vpop.f32.mrb[21].mxu1 }
 0x462   :  { %v4980_v41 = vadd.f32 %v12010_v50, %v4638_v33  ;;  %v9185_v20 = vpop.f32.mrb[22].mxu1 }
 0x463   :  { %v5054_v56 = vmax.f32 %v4982_v11, 0.0  ;;  %v4983_v19 = vadd.f32 %v9185_v20, %v12010_v50  ;;  %v4641_v0 = vpop.f32.mrb[23].mxu1  ;;  %v9816_v11 = vld [vmem:[#allocation17 + $0x38] sm:$0xff]  }
 0x464   :  { %v5052_v30 = vmax.f32 %v4980_v41, 0.0  ;;  %v4981_v31 = vadd.f32 %v12010_v50, %v4641_v0  ;;  %9249 = vmatpush3.bf16.msra.mxu0 %v9816_v11 }
 0x465   :  { %v5368_v43 = vld [vmem:[#allocation3 + $0x12] ss:$2 sm:$0xff]  ;;  %v5440_v60 = vld [vmem:[#allocation3 + $0x13] ss:$2 sm:$0xff]  ;;  %5126 = vst.msk [vmem:[#allocation3 + $0x50] sm:$0xff] %vm2113_vm5, %v5054_v56  ;;  %v5055_v15 = vmax.f32 %v4983_v19, 0.0  ;;  %9250 = vmatprep.subr.bf16.mxu0 %v10246_v63 }
 0x466   :  { %5124 = vst.msk [vmem:[#allocation3 + $0x40] sm:$0xff] %vm2113_vm5, %v5052_v30  ;;  %v5053_v55 = vmax.f32 %v4981_v31, 0.0  ;;  %v5511_v21 = vmax.f32 %v5368_v43, %v5440_v60  ;;  %v5194_v53 = vld [vmem:[#allocation3 + $0x30] ss:$2 sm:$0xff]  ;;  %v5266_v1 = vld [vmem:[#allocation3 + $0x31] ss:$2 sm:$0xff] }
 0x467   :  { %v5370_v8 = vld [vmem:[#allocation3 + $0x22] ss:$2 sm:$0xff]  ;;  %5127 = vst.msk [vmem:[#allocation3 + $0x58] sm:$0xff] %vm2113_vm5, %v5055_v15  ;;  %v5442_v59 = vld [vmem:[#allocation3 + $0x23] ss:$2 sm:$0xff]  ;;  %v5334_v12 = vmax.f32 %v5194_v53, %v5266_v1 }
 0x468   :  { %5125 = vst.msk [vmem:[#allocation3 + $0x48] sm:$0xff] %vm2113_vm5, %v5053_v55  ;;  %v9188_v38 = vpop.f32.mrb[24].mxu1  ;;  %v5512_v34 = vmax.f32 %v5370_v8, %v5442_v59  ;;  %v5547_v61 = vmax.f32 %v5331_v44, %v5511_v21  ;;  %v5192_v18 = vld [vmem:[#allocation3 + $0x20] ss:$2 sm:$0xff]  ;;  %v5264_v62 = vld [vmem:[#allocation3 + $0x21] ss:$2 sm:$0xff] }
 0x469   :  { %v4986_v48 = vadd.f32 %v9188_v38, %v12010_v50  ;;  %v4654_v52 = vpop.f32.mrb[25].mxu1  ;;  %v5333_v5 = vmax.f32 %v5192_v18, %v5264_v62 }
 0x46a   :  { %v4984_v16 = vadd.f32 %v12010_v50, %v4654_v52  ;;  %v9189_v14 = vpop.f32.mrb[26].mxu1  ;;  %v5548_v45 = vmax.f32 %v5332_v49, %v5512_v34 }
 0x46b   :  { %v5058_v6 = vmax.f32 %v4986_v48, 0.0  ;;  %v4987_v26 = vadd.f32 %v9189_v14, %v12010_v50  ;;  %v4657_v47 = vpop.f32.mrb[27].mxu1 }
 0x46c   :  { %v5056_v39 = vmax.f32 %v4984_v16, 0.0  ;;  %v4985_v22 = vadd.f32 %v12010_v50, %v4657_v47  ;;  %v5583_v25 = vpack.c.bf16 %v5548_v45, %v5547_v61 }
 0x46d   :  { %v5372_v37 = vld [vmem:[#allocation3 + $0x32] ss:$2 sm:$0xff]  ;;  %v5444_v24 = vld [vmem:[#allocation3 + $0x33] ss:$2 sm:$0xff]  ;;  %5130 = vst.msk [vmem:[#allocation3 + $0x70] sm:$0xff] %vm2113_vm5, %v5058_v6  ;;  %v5059_v7 = vmax.f32 %v4987_v26, 0.0 }
 0x46e   :  { %5128 = vst.msk [vmem:[#allocation3 + $0x60] sm:$0xff] %vm2113_vm5, %v5056_v39  ;;  %v5057_v32 = vmax.f32 %v4985_v22, 0.0  ;;  %5601 = vst.msk [vmem:[#allocation4] sm:$0xff] %vm2113_vm5, %v5583_v25  ;;  %v5513_v3 = vmax.f32 %v5372_v37, %v5444_v24  ;;  %v5198_v30 = vld [vmem:[#allocation3 + $0x50] ss:$2 sm:$0xff] }
 0x46f   :  { %v5374_v51 = vld [vmem:[#allocation3 + $0x42] ss:$2 sm:$0xff]  ;;  %5131 = vst.msk [vmem:[#allocation3 + $0x78] sm:$0xff] %vm2113_vm5, %v5059_v7  ;;  %v5446_v17 = vld [vmem:[#allocation3 + $0x43] ss:$2 sm:$0xff] }
 0x470   :  { %5129 = vst.msk [vmem:[#allocation3 + $0x68] sm:$0xff] %vm2113_vm5, %v5057_v32  ;;  %v9192_v57 = vpop.f32.mrb[28].mxu1  ;;  %v5514_v9 = vmax.f32 %v5374_v51, %v5446_v17  ;;  %v5549_v36 = vmax.f32 %v5333_v5, %v5513_v3  ;;  %v5196_v33 = vld [vmem:[#allocation3 + $0x40] ss:$2 sm:$0xff]  ;;  %v5268_v41 = vld [vmem:[#allocation3 + $0x41] ss:$2 sm:$0xff] }
 0x471   :  { %v4990_v42 = vadd.f32 %v9192_v57, %v12010_v50  ;;  %v4670_v28 = vpop.f32.mrb[29].mxu1  ;;  %v5270_v31 = vld [vmem:[#allocation3 + $0x51] ss:$2 sm:$0xff]  ;;  %v5335_v58 = vmax.f32 %v5196_v33, %v5268_v41  ;;  %v5655_v6 = vld [vmem:[#allocation5 + $0x8] sm:$0x1] }
 0x472   :  { %v4988_v2 = vadd.f32 %v12010_v50, %v4670_v28  ;;  %v9193_v10 = vpop.f32.mrb[30].mxu1  ;;  %v5550_v35 = vmax.f32 %v5334_v12, %v5514_v9  ;;  %v5336_v21 = vmax.f32 %v5198_v30, %v5270_v31  ;;  %v9819_v26 = vld [vmem:[#allocation17 + $0x40] sm:$0xff]  }
 0x473   :  { %v5062_v23 = vmax.f32 %v4990_v42, 0.0  ;;  %v4991_v54 = vadd.f32 %v9193_v10, %v12010_v50  ;;  %v4673_v46 = vpop.f32.mrb[31].mxu1  ;;  %9251 = vmatpush3.bf16.msra.mxu0 %v9819_v26 }
 0x474   :  { %v5060_v20 = vmax.f32 %v4988_v2, 0.0  ;;  %v4989_v56 = vadd.f32 %v12010_v50, %v4673_v46  ;;  %v5584_v19 = vpack.c.bf16 %v5550_v35, %v5549_v36  ;;  %9252 = vmatprep.subr.bf16.mxu0 %v10246_v63 }
 0x475   :  { %v5376_v0 = vld [vmem:[#allocation3 + $0x52] ss:$2 sm:$0xff]  ;;  %v5448_v27 = vld [vmem:[#allocation3 + $0x53] ss:$2 sm:$0xff]  ;;  %5134 = vst.msk [vmem:[#allocation3 + $0x90] sm:$0xff] %vm2113_vm5, %v5062_v23  ;;  %v5063_v4 = vmax.f32 %v4991_v54, 0.0 }
 0x476   :  { %v5515_v43 = vmax.f32 %v5376_v0, %v5448_v27  ;;  %5132 = vst.msk [vmem:[#allocation3 + $0x80] sm:$0xff] %vm2113_vm5, %v5060_v20  ;;  %v5061_v60 = vmax.f32 %v4989_v56, 0.0  ;;  %5602 = vst.msk [vmem:[#allocation4 + $0x8] sm:$0xff] %vm2113_vm5, %v5584_v19  ;;  %v9790_v49 = vld [vmem:[#allocation4] ss:$0 sps:$4 sm:$0xff]  }
 0x477   :  { %v5378_v15 = vld [vmem:[#allocation3 + $0x62] ss:$2 sm:$0xff]  ;;  %5135 = vst.msk [vmem:[#allocation3 + $0x98] sm:$0xff] %vm2113_vm5, %v5063_v4  ;;  %v5450_v40 = vld [vmem:[#allocation3 + $0x63] ss:$2 sm:$0xff]  ;;  %v5646_v45 = vrot.slane %v9790_v49, 7 }
 0x478   :  { %5133 = vst.msk [vmem:[#allocation3 + $0x88] sm:$0xff] %vm2113_vm5, %v5061_v60  ;;  %v9196_v55 = vpop.f32.mrb[32].mxu1  ;;  %v5516_v8 = vmax.f32 %v5378_v15, %v5450_v40  ;;  %v5551_v44 = vmax.f32 %v5335_v58, %v5515_v43  ;;  %v5200_v47 = vld [vmem:[#allocation3 + $0x60] ss:$2 sm:$0xff]  ;;  %v5272_v53 = vld [vmem:[#allocation3 + $0x61] ss:$2 sm:$0xff] }
 0x479   :  { %v4994_v59 = vadd.f32 %v9196_v55, %v12010_v50  ;;  %v4686_v38 = vpop.f32.mrb[33].mxu1  ;;  %v5647_v18 = vrot.slane %v5646_v45, 4  ;;  %5651 = vst.msk [vmem:[#allocation5 + $0x4] sm:$0xe] %vm5650_vm11, %v5646_v45  ;;  %v5202_v62 = vld [vmem:[#allocation3 + $0x70] ss:$2 sm:$0xff]  ;;  %v5337_v57 = vmax.f32 %v5200_v47, %v5272_v53 }
 0x47a   :  { %v4992_v34 = vadd.f32 %v12010_v50, %v4686_v38  ;;  %v9197_v48 = vpop.f32.mrb[34].mxu1  ;;  %v5552_v52 = vmax.f32 %v5336_v21, %v5516_v8  ;;  %v5274_v32 = vld [vmem:[#allocation3 + $0x71] ss:$2 sm:$0xff]  ;;  %vm5696_vm11 = vcmask 257026  }
 0x47b   :  { %v5066_v16 = vmax.f32 %v4994_v59, 0.0  ;;  %v4995_v14 = vadd.f32 %v9197_v48, %v12010_v50  ;;  %v4689_v61 = vpop.f32.mrb[35].mxu1  ;;  %v5656_v17 = vsel %vm12064_vm12, %v5647_v18, %v5655_v6  ;;  %v5338_v28 = vmax.f32 %v5202_v62, %v5274_v32  ;;  %v5683_v59 = vld [vmem:[#allocation5 + $0x8] sm:$0xe]  ;;  %vm12093_vm12 = vmor %vm5653_vm10, %vm5664_vm13 }
 0x47c   :  { %v5064_v1 = vmax.f32 %v4992_v34, 0.0  ;;  %v4993_v39 = vadd.f32 %v12010_v50, %v4689_v61  ;;  %v5585_v25 = vpack.c.bf16 %v5552_v52, %v5551_v44  ;;  %5657 = vst [vmem:[#allocation5 + $0x8] sm:$0x1] %v5656_v17  ;;  %vm12103_vm10 = vmand %vm13266_vm0, %vm5699_vm8  ;;  %vm5710_vm13 = vsmask.f32 3328 }
 0x47d   :  { %v5380_v37 = vld [vmem:[#allocation3 + $0x72] ss:$2 sm:$0xff]  ;;  %v5452_v24 = vld [vmem:[#allocation3 + $0x73] ss:$2 sm:$0xff]  ;;  %5138 = vst.msk [vmem:[#allocation3 + $0xb0] sm:$0xff] %vm2113_vm5, %v5066_v16  ;;  %v5067_v7 = vmax.f32 %v4995_v14, 0.0  ;;  %vm12144_vm2 = vmor %vm5710_vm13, %vm5711_vm14 }
 0x47e   :  { %v5517_v3 = vmax.f32 %v5380_v37, %v5452_v24  ;;  %5136 = vst.msk [vmem:[#allocation3 + $0xa0] sm:$0xff] %vm2113_vm5, %v5064_v1  ;;  %v5065_v51 = vmax.f32 %v4993_v39, 0.0  ;;  %5603 = vst.msk [vmem:[#allocation4 + $0x10] sm:$0xff] %vm2113_vm5, %v5585_v25  ;;  %v5658_v42 = vld [vmem:[#allocation4 + $0x8] sm:$0x1e] }
 0x47f   :  { %v5382_v12 = vld [vmem:[#allocation3 + $0x82] ss:$2 sm:$0xff]  ;;  %5139 = vst.msk [vmem:[#allocation3 + $0xb8] sm:$0xff] %vm2113_vm5, %v5067_v7  ;;  %v5454_v5 = vld [vmem:[#allocation3 + $0x83] ss:$2 sm:$0xff]  ;;  %v8470_v36 = vcombine.low %v5658_v42, %v5658_v42  ;;  %v8471_v46 = vcombine.high %v5658_v42, %v5658_v42 }
 0x480   :  { %5137 = vst.msk [vmem:[#allocation3 + $0xa8] sm:$0xff] %vm2113_vm5, %v5065_v51  ;;  %v9200_v9 = vpop.f32.mrb[36].mxu1  ;;  %v5518_v29 = vmax.f32 %v5382_v12, %v5454_v5  ;;  %v5553_v35 = vmax.f32 %v5337_v57, %v5517_v3  ;;  %v5206_v11 = vld [vmem:[#allocation3 + $0x90] ss:$2 sm:$0xff]  ;;  %v5278_v33 = vld [vmem:[#allocation3 + $0x91] ss:$2 sm:$0xff] }
 0x481   :  { %v4998_v2 = vadd.f32 %v9200_v9, %v12010_v50  ;;  %v4702_v10 = vpop.f32.mrb[37].mxu1  ;;  %v5667_v0 = vshrl.u32 %v8470_v36, 16  ;;  %v5204_v27 = vld [vmem:[#allocation3 + $0x80] ss:$2 sm:$0xff]  ;;  %v5276_v4 = vld [vmem:[#allocation3 + $0x81] ss:$2 sm:$0xff]  ;;  %v5340_v52 = vmax.f32 %v5206_v11, %v5278_v33 }
 0x482   :  { %v4996_v23 = vadd.f32 %v12010_v50, %v4702_v10  ;;  %v9201_v54 = vpop.f32.mrb[38].mxu1  ;;  %v5554_v41 = vmax.f32 %v5338_v28, %v5518_v29  ;;  %v5670_v43 = vshll.u32 %v8470_v36, 16  ;;  %v5675_v48 = vshll.u32 %v8471_v46, 16  ;;  %v5701_v25 = vld [vmem:[#allocation5 + $0x10] sm:$0x3] }
 0x483   :  { %v5070_v20 = vmax.f32 %v4998_v2, 0.0  ;;  %v4999_v56 = vadd.f32 %v9201_v54, %v12010_v50  ;;  %v4705_v19 = vpop.f32.mrb[39].mxu1  ;;  %v5669_v55 = vrot.slane %v5667_v0, 7  ;;  %v5339_v16 = vmax.f32 %v5204_v27, %v5276_v4 }
 0x484   :  { %v5068_v30 = vmax.f32 %v4996_v23, 0.0  ;;  %v4997_v31 = vadd.f32 %v12010_v50, %v4705_v19  ;;  %v5586_v60 = vpack.c.bf16 %v5554_v41, %v5553_v35  ;;  %vm5735_vm8 = vsmask.f32 7946 }
 0x485   :  { %v5384_v15 = vld [vmem:[#allocation3 + $0x92] ss:$2 sm:$0xff]  ;;  %v5456_v58 = vld [vmem:[#allocation3 + $0x93] ss:$2 sm:$0xff]  ;;  %5142 = vst.msk [vmem:[#allocation3 + $0xd0] sm:$0xff] %vm2113_vm5, %v5070_v20  ;;  %v5071_v40 = vmax.f32 %v4999_v56, 0.0  ;;  %v5672_v34 = vor.u32 %v5670_v43, %v5669_v55  ;;  %vm12151_vm1 = vmand %vm5696_vm11, %vm5735_vm8 }
 0x486   :  { %5140 = vst.msk [vmem:[#allocation3 + $0xc0] sm:$0xff] %vm2113_vm5, %v5068_v30  ;;  %v5069_v21 = vmax.f32 %v4997_v31, 0.0  ;;  %5604 = vst.msk [vmem:[#allocation4 + $0x18] sm:$0xff] %vm2113_vm5, %v5586_v60  ;;  %v5519_v38 = vmax.f32 %v5384_v15, %v5456_v58  ;;  %v5673_v45 = vrot.slane %v5669_v55, 4  ;;  %v5688_v6 = vld [vmem:[#allocation4 + $0x10] sm:$0x3c] }
 0x487   :  { %v5386_v49 = vld [vmem:[#allocation3 + $0xa2] ss:$2 sm:$0xff]  ;;  %5143 = vst.msk [vmem:[#allocation3 + $0xd8] sm:$0xff] %vm2113_vm5, %v5071_v40  ;;  %v5458_v14 = vld [vmem:[#allocation3 + $0xa3] ss:$2 sm:$0xff]  ;;  %v5684_v1 = vsel %vm12085_vm15, %v5672_v34, %v5683_v59  ;;  %v8472_v39 = vcombine.low %v5688_v6, %v5688_v6  ;;  %v8473_v18 = vcombine.high %v5688_v6, %v5688_v6 }
 0x488   :  { %5141 = vst.msk [vmem:[#allocation3 + $0xc8] sm:$0xff] %vm2113_vm5, %v5069_v21  ;;  %v9204_v61 = vpop.f32.mrb[40].mxu1  ;;  %v5520_v26 = vmax.f32 %v5386_v49, %v5458_v14  ;;  %v5677_v7 = vsel %vm12093_vm12, %v5673_v45, %v5675_v48  ;;  %5685 = vst [vmem:[#allocation5 + $0x8] sm:$0xe] %v5684_v1  ;;  %v5555_v62 = vmax.f32 %v5339_v16, %v5519_v38  ;;  %v5210_v32 = vld [vmem:[#allocation3 + $0xb0] ss:$2 sm:$0xff] }
 0x489   :  { %v5002_v47 = vadd.f32 %v9204_v61, %v12010_v50  ;;  %v4718_v53 = vpop.f32.mrb[41].mxu1  ;;  %v5282_v3 = vld [vmem:[#allocation3 + $0xb1] ss:$2 sm:$0xff]  ;;  %5687 = vst.msk [vmem:[#allocation5 + $0xc] sm:$0x1] %vm13262_vm9, %v5677_v7  ;;  %v5702_v29 = vsel %vm12103_vm10, %v8473_v18, %v5701_v25  ;;  %vm5752_vm9 = vcmask 256000  }
 0x48a   :  { %v5000_v37 = vadd.f32 %v12010_v50, %v4718_v53  ;;  %v9205_v24 = vpop.f32.mrb[42].mxu1  ;;  %v5556_v51 = vmax.f32 %v5340_v52, %v5520_v26  ;;  %5697 = vst.msk [vmem:[#allocation5 + $0xc] sm:$0xc] %vm5696_vm11, %v8472_v39  ;;  %v5208_v5 = vld [vmem:[#allocation3 + $0xa0] ss:$2 sm:$0xff]  ;;  %v5342_v11 = vmax.f32 %v5210_v32, %v5282_v3  ;;  %vm12166_vm14 = vmand %vm5752_vm9, %vm5753_vm6 }
 0x48b   :  { %v5074_v12 = vmax.f32 %v5002_v47, 0.0  ;;  %v5003_v17 = vadd.f32 %v9205_v24, %v12010_v50  ;;  %v4721_v57 = vpop.f32.mrb[43].mxu1  ;;  %v5280_v9 = vld [vmem:[#allocation3 + $0xa1] ss:$2 sm:$0xff]  ;;  %5703 = vst [vmem:[#allocation5 + $0x10] sm:$0x3] %v5702_v29 }
 0x48c   :  { %v5072_v42 = vmax.f32 %v5000_v37, 0.0  ;;  %v5001_v28 = vadd.f32 %v12010_v50, %v4721_v57  ;;  %v5587_v2 = vpack.c.bf16 %v5556_v51, %v5555_v62  ;;  %v5341_v33 = vmax.f32 %v5208_v5, %v5280_v9 }
 0x48d   :  { %v5388_v10 = vld [vmem:[#allocation3 + $0xb2] ss:$2 sm:$0xff]  ;;  %v5460_v36 = vld [vmem:[#allocation3 + $0xb3] ss:$2 sm:$0xff]  ;;  %5146 = vst.msk [vmem:[#allocation3 + $0xf0] sm:$0xff] %vm2113_vm5, %v5074_v12  ;;  %v5075_v35 = vmax.f32 %v5003_v17, 0.0 }
 0x48e   :  { %v5521_v23 = vmax.f32 %v5388_v10, %v5460_v36  ;;  %5144 = vst.msk [vmem:[#allocation3 + $0xe0] sm:$0xff] %vm2113_vm5, %v5072_v42  ;;  %v5073_v54 = vmax.f32 %v5001_v28, 0.0  ;;  %5605 = vst.msk [vmem:[#allocation4 + $0x20] sm:$0xff] %vm2113_vm5, %v5587_v2  ;;  %v5704_v56 = vld [vmem:[#allocation4 + $0x18] sm:$0x78] }
 0x48f   :  { %v5390_v46 = vld [vmem:[#allocation3 + $0xc2] ss:$2 sm:$0xff]  ;;  %5147 = vst.msk [vmem:[#allocation3 + $0xf8] sm:$0xff] %vm2113_vm5, %v5075_v35  ;;  %v5462_v41 = vld [vmem:[#allocation3 + $0xc3] ss:$2 sm:$0xff]  ;;  %v8474_v4 = vcombine.low %v5704_v56, %v5704_v56  ;;  %v12122_v30 = vcombine.high %v5704_v56, %v5704_v56 }
 0x490   :  { %5145 = vst.msk [vmem:[#allocation3 + $0xe8] sm:$0xff] %vm2113_vm5, %v5073_v54  ;;  %v9208_v20 = vpop.f32.mrb[44].mxu1  ;;  %v5522_v19 = vmax.f32 %v5390_v46, %v5462_v41  ;;  %v5557_v31 = vmax.f32 %v5341_v33, %v5521_v23  ;;  %v5212_v43 = vld [vmem:[#allocation3 + $0xc0] ss:$2 sm:$0xff]  ;;  %v12125_v58 = vld [vmem:[#allocation5 + $0x8] sm:$0xf] }
 0x491   :  { %v5006_v0 = vadd.f32 %v9208_v20, %v12010_v50  ;;  %v4734_v27 = vpop.f32.mrb[45].mxu1  ;;  %v5714_v38 = vshrl.u32 %v8474_v4, 16  ;;  %v12128_v49 = vld [vmem:[#allocation5 + $0xc] sm:$0xf]  ;;  %v5284_v34 = vld [vmem:[#allocation3 + $0xc1] ss:$2 sm:$0xff] }
 0x492   :  { %v5004_v60 = vadd.f32 %v12010_v50, %v4734_v27  ;;  %v9209_v15 = vpop.f32.mrb[46].mxu1  ;;  %v5558_v40 = vmax.f32 %v5342_v11, %v5522_v19  ;;  %v5717_v16 = vshll.u32 %v8474_v4, 16  ;;  %v5723_v14 = vshll.u32 %v12122_v30, 16  ;;  %v5214_v53 = vld [vmem:[#allocation3 + $0xd0] ss:$2 sm:$0xff] }
 0x493   :  { %v5078_v55 = vmax.f32 %v5006_v0, 0.0  ;;  %v5007_v21 = vadd.f32 %v9209_v15, %v12010_v50  ;;  %v4737_v59 = vpop.f32.mrb[47].mxu1  ;;  %v5716_v47 = vrot.slane %v5714_v38, 4  ;;  %v5286_v1 = vld [vmem:[#allocation3 + $0xd1] ss:$2 sm:$0xff]  ;;  %v12136_v24 = vcombine.low %v12125_v58, %v12128_v49 }
 0x494   :  { %v5076_v48 = vmax.f32 %v5004_v60, 0.0  ;;  %v5005_v52 = vadd.f32 %v12010_v50, %v4737_v59  ;;  %v5588_v61 = vpack.c.bf16 %v5558_v40, %v5557_v31  ;;  %v5719_v37 = vrot.slane %v5717_v16, 5  ;;  %v5737_v35 = vld [vmem:[#allocation5 + $0x10] sm:$0xc]  ;;  %v6254_v41 = vld [vmem:[#allocation5 + $0x4] sm:$0xe] }
 0x495   :  { %v5392_v45 = vld [vmem:[#allocation3 + $0xd2] ss:$2 sm:$0xff]  ;;  %v5464_v6 = vld [vmem:[#allocation3 + $0xd3] ss:$2 sm:$0xff]  ;;  %5150 = vst.msk [vmem:[#allocation3 + $0x110] sm:$0xff] %vm2113_vm5, %v5078_v55  ;;  %v5079_v26 = vmax.f32 %v5007_v21, 0.0  ;;  %v5343_v7 = vmax.f32 %v5212_v43, %v5284_v34  ;;  %v5344_v51 = vmax.f32 %v5214_v53, %v5286_v1 }
 0x496   :  { %v5523_v39 = vmax.f32 %v5392_v45, %v5464_v6  ;;  %5148 = vst.msk [vmem:[#allocation3 + $0x100] sm:$0xff] %vm2113_vm5, %v5076_v48  ;;  %v5077_v25 = vmax.f32 %v5005_v52, 0.0  ;;  %5606 = vst.msk [vmem:[#allocation4 + $0x28] sm:$0xff] %vm2113_vm5, %v5588_v61  ;;  %v5720_v3 = vor.u32 %v5719_v37, %v5716_v47  ;;  %v9799_v42 = vld [vmem:[#allocation4 + $0x24] ss:$0 sps:$4 sm:$0xff]   ;;  %v5725_v10 = vrot.slane %v5723_v14, 5 }
 0x497   :  { %v5394_v18 = vld [vmem:[#allocation3 + $0xe2] ss:$2 sm:$0xff]  ;;  %5151 = vst.msk [vmem:[#allocation3 + $0x118] sm:$0xff] %vm2113_vm5, %v5079_v26  ;;  %v5466_v62 = vld [vmem:[#allocation3 + $0xe3] ss:$2 sm:$0xff]  ;;  %v5727_v23 = vshrl.u32 %v12122_v30, 16  ;;  %v12172_v52 = vcombine.low %v6254_v41, %v12125_v58 }
 0x498   :  { %5149 = vst.msk [vmem:[#allocation3 + $0x108] sm:$0xff] %vm2113_vm5, %v5077_v25  ;;  %v9212_v32 = vpop.f32.mrb[48].mxu1  ;;  %v5559_v12 = vmax.f32 %v5343_v7, %v5523_v39  ;;  %v5524_v17 = vmax.f32 %v5394_v18, %v5466_v62  ;;  %v5721_v2 = vrot.slane %v5720_v3, 4  ;;  %v5746_v20 = vrot.slane %v9799_v42, 5  ;;  %v5755_v56 = vld [vmem:[#allocation5 + $0x18] sm:$0x7] }
 0x499   :  { %v5010_v57 = vadd.f32 %v9212_v32, %v12010_v50  ;;  %v4750_v5 = vpop.f32.mrb[49].mxu1  ;;  %v5216_v19 = vld [vmem:[#allocation3 + $0xe0] ss:$2 sm:$0xff]  ;;  %v5288_v0 = vld [vmem:[#allocation3 + $0xe1] ss:$2 sm:$0xff]  ;;  %v5729_v55 = vrot.slane %v5727_v23, 4 }
 0x49a   :  { %v5008_v28 = vadd.f32 %v12010_v50, %v4750_v5  ;;  %v9213_v29 = vpop.f32.mrb[50].mxu1  ;;  %v5560_v54 = vmax.f32 %v5344_v51, %v5524_v17  ;;  %v5726_v31 = vsel %vm12144_vm2, %v5721_v2, %v5725_v10  ;;  %5751 = vst.msk [vmem:[#allocation5 + $0x14] sm:$0x8] %vm13265_vm7, %v5746_v20  ;;  %v5218_v59 = vld [vmem:[#allocation3 + $0xf0] ss:$2 sm:$0xff]  ;;  %v5747_v16 = vrot.slane %v5746_v20, 4 }
 0x49b   :  { %v5082_v46 = vmax.f32 %v5010_v57, 0.0  ;;  %v5011_v11 = vadd.f32 %v9213_v29, %v12010_v50  ;;  %v4753_v33 = vpop.f32.mrb[51].mxu1  ;;  %v5738_v40 = vsel %vm12151_vm1, %v5726_v31, %v5737_v35  ;;  %v5290_v38 = vld [vmem:[#allocation3 + $0xf1] ss:$2 sm:$0xff]  ;;  %v5730_v61 = vor.u32 %v5729_v55, %v5725_v10  ;;  %v5787_v5 = vld [vmem:[#allocation5 + $0x18] sm:$0x8] }
 0x49c   :  { %v5080_v27 = vmax.f32 %v5008_v28, 0.0  ;;  %v5009_v4 = vadd.f32 %v12010_v50, %v4753_v33  ;;  %v5589_v43 = vpack.c.bf16 %v5560_v54, %v5559_v12  ;;  %5739 = vst [vmem:[#allocation5 + $0x10] sm:$0xc] %v5738_v40  ;;  %vm5785_vm2 = vsmask.f32 7950 }
 0x49d   :  { %v5396_v60 = vld [vmem:[#allocation3 + $0xf2] ss:$2 sm:$0xff]  ;;  %v5468_v15 = vld [vmem:[#allocation3 + $0xf3] ss:$2 sm:$0xff]  ;;  %5154 = vst.msk [vmem:[#allocation3 + $0x130] sm:$0xff] %vm2113_vm5, %v5082_v46  ;;  %v5083_v30 = vmax.f32 %v5011_v11, 0.0  ;;  %v5345_v45 = vmax.f32 %v5216_v19, %v5288_v0  ;;  %v5756_v47 = vsel %vm12166_vm14, %v5747_v16, %v5755_v56  ;;  %v5346_v53 = vmax.f32 %v5218_v59, %v5290_v38  ;;  %vm12187_vm8 = vmand %vm13265_vm7, %vm5785_vm2 }
 0x49e   :  { %v5525_v34 = vmax.f32 %v5396_v60, %v5468_v15  ;;  %5152 = vst.msk [vmem:[#allocation3 + $0x120] sm:$0xff] %vm2113_vm5, %v5080_v27  ;;  %v5081_v48 = vmax.f32 %v5009_v4, 0.0  ;;  %5607 = vst.msk [vmem:[#allocation4 + $0x30] sm:$0xff] %vm2113_vm5, %v5589_v43  ;;  %v5731_v25 = vrot.slane %v5730_v61, 4  ;;  %v6277_v32 = vshll.u32 %v12172_v52, 16  ;;  %v9829_v38 = vld [vmem:[#allocation17 + $0x48] sm:$0xff]  }
 0x49f   :  { %v5398_v14 = vld [vmem:[#allocation3 + $0x102] ss:$2 sm:$0xff]  ;;  %5155 = vst.msk [vmem:[#allocation3 + $0x138] sm:$0xff] %vm2113_vm5, %v5083_v30  ;;  %v5470_v6 = vld [vmem:[#allocation3 + $0x103] ss:$2 sm:$0xff]  ;;  %v6386_v46 = vrot.slane %v12172_v52, 1  ;;  %9253 = vmatpush3.bf16.msra.mxu0 %v9829_v38 }
 0x4a0   :  { %5153 = vst.msk [vmem:[#allocation3 + $0x128] sm:$0xff] %vm2113_vm5, %v5081_v48  ;;  %v9216_v26 = vpop.f32.mrb[52].mxu1  ;;  %v5526_v1 = vmax.f32 %v5398_v14, %v5470_v6  ;;  %5757 = vst [vmem:[#allocation5 + $0x18] sm:$0x7] %v5756_v47  ;;  %v5561_v7 = vmax.f32 %v5345_v45, %v5525_v34  ;;  %vm5766_vm2 = vsmask.f32 6416  ;;  %9254 = vmatprep.subr.bf16.mxu0 %v10246_v63 }
 0x4a1   :  { %v5014_v58 = vadd.f32 %v9216_v26, %v12010_v50  ;;  %v4766_v39 = vpop.f32.mrb[53].mxu1  ;;  %v9800_v37 = vld [vmem:[#allocation4 + $0x2c] ss:$0 sps:$4 sm:$0xee]   ;;  %5741 = vst.msk [vmem:[#allocation5 + $0x14] sm:$0x3] %vm13266_vm0, %v5731_v25  ;;  %vm12227_vm0 = vmor %vm5753_vm6, %vm5766_vm2 }
 0x4a2   :  { %v5012_v18 = vadd.f32 %v12010_v50, %v4766_v39  ;;  %v9217_v62 = vpop.f32.mrb[54].mxu1  ;;  %v5562_v3 = vmax.f32 %v5346_v53, %v5526_v1  ;;  %v5769_v57 = vshll.u32 %v9800_v37, 16  ;;  %v5772_v29 = vshrl.u32 %v9800_v37, 16  ;;  %v12253_v38 = vld [vmem:[#allocation16] ss:$0 sm:$0xff] }
 0x4a3   :  { %v5086_v51 = vmax.f32 %v5014_v58, 0.0  ;;  %v5015_v12 = vadd.f32 %v9217_v62, %v12010_v50  ;;  %v4769_v17 = vpop.f32.mrb[55].mxu1  ;;  %v5965_v33 = vld [vmem:[#allocation5 + $0x10] sm:$0xf]  ;;  %v6279_v20 = vrot.slane %v6277_v32, 1  ;;  %v6275_v4 = vshrl.u32 %v12172_v52, 16 }
 0x4a4   :  { %v5084_v9 = vmax.f32 %v5012_v18, 0.0  ;;  %v5013_v42 = vadd.f32 %v12010_v50, %v4769_v17  ;;  %v5590_v2 = vpack.c.bf16 %v5562_v3, %v5561_v7  ;;  %v5771_v35 = vrot.slane %v5769_v57, 6  ;;  %v9826_v3 = vld [vmem:[#allocation5 + $0x54] ss:$0 sps:$4 sm:$0x77]  }
 0x4a5   :  { %5158 = vst.msk [vmem:[#allocation3 + $0x150] sm:$0xff] %vm2113_vm5, %v5086_v51  ;;  %v5087_v10 = vmax.f32 %v5015_v12, 0.0  ;;  %v5774_v54 = vrot.slane %v5772_v29, 5  ;;  %v12200_v56 = vcombine.low %v12128_v49, %v5965_v33  ;;  %v9802_v27 = vld [vmem:[#allocation4 + $0x30] ss:$0 sps:$4 sm:$0x11]   ;;  %v6280_v14 = vor.u32 %v6279_v20, %v6275_v4 }
 0x4a6   :  { %5156 = vst.msk [vmem:[#allocation3 + $0x140] sm:$0xff] %vm2113_vm5, %v5084_v9  ;;  %v5085_v23 = vmax.f32 %v5013_v42, 0.0  ;;  %5608 = vst.msk [vmem:[#allocation4 + $0x38] sm:$0xff] %vm2113_vm5, %v5590_v2  ;;  %v5788_v11 = vsel %vm12187_vm8, %v5771_v35, %v5787_v5  ;;  %v5226_v49 = vld [vmem:[#allocation3 + $0x130] ss:$2 sm:$0xff]  ;;  %v5778_v1 = vshll.u32 %v9802_v27, 16 }
 0x4a7   :  { %5159 = vst.msk [vmem:[#allocation3 + $0x158] sm:$0xff] %vm2113_vm5, %v5087_v10  ;;  %5789 = vst [vmem:[#allocation5 + $0x18] sm:$0x8] %v5788_v11  ;;  %v5775_v15 = vor.u32 %v5774_v54, %v5771_v35  ;;  %v6387_v30 = vrot.slane %v12200_v56, 1  ;;  %v6282_v55 = vshll.u32 %v12200_v56, 16  ;;  %vm5801_vm7 = vcmask 1045508  }
 0x4a8   :  { %5157 = vst.msk [vmem:[#allocation3 + $0x148] sm:$0xff] %vm2113_vm5, %v5085_v23  ;;  %v9220_v41 = vpop.f32.mrb[56].mxu1  ;;  %v5966_v60 = vld [vmem:[#allocation5 + $0x14] sm:$0xf]  ;;  %v5224_v48 = vld [vmem:[#allocation3 + $0x120] ss:$2 sm:$0xff] }
 0x4a9   :  { %v5018_v19 = vadd.f32 %v9220_v41, %v12010_v50  ;;  %v4782_v0 = vpop.f32.mrb[57].mxu1  ;;  %v5298_v34 = vld [vmem:[#allocation3 + $0x131] ss:$2 sm:$0xff]  ;;  %v5296_v16 = vld [vmem:[#allocation3 + $0x121] ss:$2 sm:$0xff]  ;;  %v6388_v47 = vsel %vm1967_vm3, %v6386_v46, %v6387_v30  ;;  %v12213_v53 = vrot.slane %v6282_v55, 1  ;;  %v12219_v7 = vcombine.low %v5965_v33, %v5966_v60 }
 0x4aa   :  { %v5016_v31 = vadd.f32 %v12010_v50, %v4782_v0  ;;  %v9221_v43 = vpop.f32.mrb[58].mxu1  ;;  %6407 = vrot.lane.b32.xlu1 %v6388_v47, %s10230_s15  ;;  %v12217_v37 = vld [vmem:[#allocation4 + $0x34] ss:$0 sps:$4 sm:$0xcc]   ;;  %v6286_v32 = vshrl.u32 %v12200_v56, 16  ;;  %v5776_v51 = vrot.slane %v5775_v15, 4  ;;  %v5349_v12 = vmax.f32 %v5224_v48, %v5296_v16 }
 0x4ab   :  { %v5090_v40 = vmax.f32 %v5018_v19, 0.0  ;;  %v4785_v59 = vpop.f32.mrb[59].mxu1  ;;  %v5019_v52 = vadd.f32 %v9221_v43, %v12010_v50  ;;  %v6285_v62 = vsel %vm1599_vm4, %v6280_v14, %v12213_v53  ;;  %v5780_v9 = vrot.slane %v5778_v1, 6  ;;  %v5810_v20 = vld [vmem:[#allocation5 + $0x20] sm:$0xf]  ;;  %v9831_v19 = vld [vmem:[#allocation17 + $0x50] sm:$0xff]  }
 0x4ac   :  { %v5088_v61 = vmax.f32 %v5016_v31, 0.0  ;;  %v5017_v45 = vadd.f32 %v12010_v50, %v4785_v59  ;;  %6361 = vrot.lane.b32.xlu0 %v6285_v62, %s10244_s11  ;;  %v5350_v42 = vmax.f32 %v5226_v49, %v5298_v34  ;;  %v8481_v41 = vrot.slane %v12217_v37, 10  ;;  %9255 = vmatpush3.bf16.msra.mxu0 %v9831_v19  ;;  %v12281_v37 = vld [vmem:[#allocation5 + $0x24] sm:$0xf] }
 0x4ad   :  { %v5404_v6 = vld [vmem:[#allocation3 + $0x132] ss:$2 sm:$0xff]  ;;  %v5476_v26 = vld [vmem:[#allocation3 + $0x133] ss:$2 sm:$0xff]  ;;  %5162 = vst.msk [vmem:[#allocation3 + $0x170] sm:$0xff] %vm2113_vm5, %v5090_v40  ;;  %v5091_v39 = vmax.f32 %v5019_v52, 0.0  ;;  %v5781_v33 = vsel %vm12227_vm0, %v5776_v51, %v5780_v9  ;;  %9256 = vmatprep.subr.bf16.mxu0 %v10246_v63  ;;  %v6288_v1 = vor.u32 %v6286_v32, %v12213_v53 }
 0x4ae   :  { %v5529_v58 = vmax.f32 %v5404_v6, %v5476_v26  ;;  %5160 = vst.msk [vmem:[#allocation3 + $0x160] sm:$0xff] %vm2113_vm5, %v5088_v61  ;;  %v5089_v25 = vmax.f32 %v5017_v45, 0.0  ;;  %v12234_v5 = vld [vmem:[#allocation5 + $0x18] sm:$0xf]  ;;  %vm13299_vm6 = vcmask 1041408  }
 0x4af   :  { %v5406_v18 = vld [vmem:[#allocation3 + $0x142] ss:$2 sm:$0xff]  ;;  %v5478_v17 = vld [vmem:[#allocation3 + $0x143] ss:$2 sm:$0xff]  ;;  %5163 = vst.msk [vmem:[#allocation3 + $0x178] sm:$0xff] %vm2113_vm5, %v5091_v39  ;;  %v12238_v35 = vcombine.low %v5966_v60, %v12234_v5  ;;  %vm12246_vm2 = vmor %vm13299_vm6, %vm5801_vm7  ;;  %vm13302_vm7 = vcmask 257024  }
 0x4b0   :  { %5161 = vst.msk [vmem:[#allocation3 + $0x168] sm:$0xff] %vm2113_vm5, %v5089_v25  ;;  %v9224_v57 = vpop.f32.mrb[60].mxu1  ;;  %v5530_v29 = vmax.f32 %v5406_v18, %v5478_v17  ;;  %v9804_v23 = vld [vmem:[#allocation4 + $0x38] ss:$0 sps:$4 sm:$0x33]   ;;  %v5565_v54 = vmax.f32 %v5349_v12, %v5529_v58  ;;  %vm12259_vm6 = vmand %vm13302_vm7, %vm5710_vm13  ;;  %vm5838_vm13 = vcmask 1040384  }
 0x4b1   :  { %v5022_v2 = vadd.f32 %v9224_v57, %v12010_v50  ;;  %v4798_v10 = vpop.f32.mrb[61].mxu1  ;;  %v6389_v31 = vrot.slane %v12238_v35, 1  ;;  %5791 = vst.msk [vmem:[#allocation5 + $0x1c] sm:$0x7] %vm5752_vm9, %v5781_v33  ;;  %v5230_v15 = vld [vmem:[#allocation3 + $0x150] ss:$2 sm:$0xff] }
 0x4b2   :  { %v5020_v46 = vadd.f32 %v12010_v50, %v4798_v10  ;;  %v9225_v11 = vpop.f32.mrb[62].mxu1  ;;  %v5566_v27 = vmax.f32 %v5350_v42, %v5530_v29  ;;  %v5302_v40 = vld [vmem:[#allocation3 + $0x151] ss:$2 sm:$0xff]  ;;  %v5228_v55 = vld [vmem:[#allocation3 + $0x140] ss:$2 sm:$0xff]  ;;  %v6290_v34 = vshll.u32 %v12238_v35, 16 }
 0x4b3   :  { %v5094_v4 = vmax.f32 %v5022_v2, 0.0  ;;  %v5023_v43 = vadd.f32 %v9225_v11, %v12010_v50  ;;  %v4801_v60 = vpop.f32.mrb[63].mxu1  ;;  %v5805_v48 = vrot.slane %v9804_v23, 6  ;;  %v9832_v50 = vld [vmem:[#allocation17 + $0x58] sm:$0xff]   ;;  %v6390_v45 = vsel %vm1967_vm3, %v6387_v30, %v6389_v31  ;;  %v5300_v26 = vld [vmem:[#allocation3 + $0x141] ss:$2 sm:$0xff] }
 0x4b4   :  { %v5092_v59 = vmax.f32 %v5020_v46, 0.0  ;;  %v5021_v49 = vadd.f32 %v12253_v38, %v4801_v60  ;;  %v5592_v14 = vpack.c.bf16 %v5566_v27, %v5565_v54  ;;  %6409 = vrot.lane.b32.xlu1 %v6390_v45, %s10230_s15  ;;  %v12273_v58 = vrot.slane %v6290_v34, 1  ;;  %v12286_v32 = vld [vmem:[#allocation5 + $0x28] sm:$0xf]  ;;  %9257 = vmatpush3.bf16.msra.mxu0 %v9832_v50 }
 0x4b5   :  { %v5408_v61 = vld [vmem:[#allocation3 + $0x152] ss:$2 sm:$0xff]  ;;  %v5480_v52 = vld [vmem:[#allocation3 + $0x153] ss:$2 sm:$0xff]  ;;  %5166 = vst.msk [vmem:[#allocation3 + $0x190] sm:$0xff] %vm2113_vm5, %v5094_v4  ;;  %v5095_v6 = vmax.f32 %v5023_v43, 0.0  ;;  %v5806_v39 = vsel %vm12246_vm2, %v8481_v41, %v5805_v48  ;;  %v5352_v51 = vmax.f32 %v5230_v15, %v5302_v40  ;;  %v5351_v12 = vmax.f32 %v5228_v55, %v5300_v26  ;;  %9302 = vmatprep.subr.bf16.mxu0 %v10246_v63 }
 0x4b6   :  { %5164 = vst.msk [vmem:[#allocation3 + $0x180] sm:$0xff] %vm2113_vm5, %v5092_v59  ;;  %v5093_v47 = vmax.f32 %v5021_v49, 0.0  ;;  %5610 = vst.msk [vmem:[#allocation4 + $0x48] sm:$0xff] %vm2113_vm5, %v5592_v14  ;;  %v5531_v25 = vmax.f32 %v5408_v61, %v5480_v52  ;;  %v5811_v30 = vsel %vm12259_vm6, %v5806_v39, %v5810_v20  ;;  %v6293_v53 = vsel %vm1599_vm4, %v6288_v1, %v12273_v58  ;;  %v5234_v15 = vld [vmem:[#allocation3 + $0x170] ss:$2 sm:$0xff] }
 0x4b7   :  { %5167 = vst.msk [vmem:[#allocation3 + $0x198] sm:$0xff] %vm2113_vm5, %v5095_v6  ;;  %v5410_v18 = vld [vmem:[#allocation3 + $0x162] ss:$2 sm:$0xff]  ;;  %v5482_v62 = vld [vmem:[#allocation3 + $0x163] ss:$2 sm:$0xff]  ;;  %6363 = vrot.lane.b32.xlu0 %v6293_v53, %s10244_s11  ;;  %v12294_v46 = vcombine.low %v12281_v37, %v12286_v32  ;;  %vm5839_vm2 = vcmask 1044484  }
 0x4b8   :  { %5165 = vst.msk [vmem:[#allocation3 + $0x188] sm:$0xff] %vm2113_vm5, %v5093_v47  ;;  %5812 = vst [vmem:[#allocation5 + $0x20] sm:$0xf] %v5811_v30  ;;  %v5532_v17 = vmax.f32 %v5410_v18, %v5482_v62  ;;  %v9228_v57 = vpop.f32.mrb[64].mxu1  ;;  %v5567_v29 = vmax.f32 %v5351_v12, %v5531_v25  ;;  %v5968_v54 = vld [vmem:[#allocation5 + $0x1c] sm:$0xf] }
 0x4b9   :  { %v5026_v9 = vadd.f32 %v12253_v38, %v9228_v57  ;;  %v4814_v42 = vpop.f32.mrb[65].mxu1  ;;  %v5232_v11 = vld [vmem:[#allocation3 + $0x160] ss:$2 sm:$0xff]  ;;  %v5304_v33 = vld [vmem:[#allocation3 + $0x161] ss:$2 sm:$0xff]  ;;  %v6306_v49 = vshll.u32 %v12294_v46, 16  ;;  %v12301_v34 = vcombine.low %v12234_v5, %v5968_v54  ;;  %vm12346_vm7 = vmor %vm5838_vm13, %vm5839_vm2 }
 0x4ba   :  { %v5568_v2 = vmax.f32 %v5352_v51, %v5532_v17  ;;  %v5024_v10 = vadd.f32 %v12253_v38, %v4814_v42  ;;  %v9229_v23 = vpop.f32.mrb[66].mxu1  ;;  %v5306_v40 = vld [vmem:[#allocation3 + $0x171] ss:$2 sm:$0xff]  ;;  %v6393_v50 = vrot.slane %v12294_v46, 1  ;;  %v5353_v14 = vmax.f32 %v5232_v11, %v5304_v33 }
 0x4bb   :  { %v5098_v41 = vmax.f32 %v5026_v9, 0.0  ;;  %v5027_v20 = vadd.f32 %v12253_v38, %v9229_v23  ;;  %v4817_v19 = vpop.f32.mrb[67].mxu1  ;;  %v5354_v26 = vmax.f32 %v5234_v15, %v5306_v40  ;;  %v12315_v62 = vrot.slane %v6306_v49, 1 }
 0x4bc   :  { %v5593_v0 = vpack.c.bf16 %v5568_v2, %v5567_v29  ;;  %v5096_v43 = vmax.f32 %v5024_v10, 0.0  ;;  %v5025_v60 = vadd.f32 %v12253_v38, %v4817_v19  ;;  %v6294_v29 = vshrl.u32 %v12238_v35, 16 }
 0x4bd   :  { %v5412_v27 = vld [vmem:[#allocation3 + $0x172] ss:$2 sm:$0xff]  ;;  %v5484_v4 = vld [vmem:[#allocation3 + $0x173] ss:$2 sm:$0xff]  ;;  %5170 = vst.msk [vmem:[#allocation3 + $0x1b0] sm:$0xff] %vm2113_vm5, %v5098_v41  ;;  %v5099_v59 = vmax.f32 %v5027_v20, 0.0 }
 0x4be   :  { %v5533_v55 = vmax.f32 %v5412_v27, %v5484_v4  ;;  %5611 = vst.msk [vmem:[#allocation4 + $0x50] sm:$0xff] %vm2113_vm5, %v5593_v0  ;;  %5168 = vst.msk [vmem:[#allocation3 + $0x1a0] sm:$0xff] %vm2113_vm5, %v5096_v43  ;;  %v5097_v52 = vmax.f32 %v5025_v60, 0.0  ;;  %v9807_v9 = vld [vmem:[#allocation4 + $0x48] ss:$0 sps:$4 sm:$0xff]   ;;  %v6296_v27 = vor.u32 %v6294_v29, %v12273_v58 }
 0x4bf   :  { %v5414_v48 = vld [vmem:[#allocation3 + $0x182] ss:$2 sm:$0xff]  ;;  %v5486_v61 = vld [vmem:[#allocation3 + $0x183] ss:$2 sm:$0xff]  ;;  %5171 = vst.msk [vmem:[#allocation3 + $0x1b8] sm:$0xff] %vm2113_vm5, %v5099_v59 }
 0x4c0   :  { %v9232_v45 = vpop.f32.mrb[68].mxu1  ;;  %v12307_v6 = vld [vmem:[#allocation5 + $0x20] sm:$0xf]  ;;  %v5534_v47 = vmax.f32 %v5414_v48, %v5486_v61  ;;  %v5569_v25 = vmax.f32 %v5353_v14, %v5533_v55  ;;  %5169 = vst.msk [vmem:[#allocation3 + $0x1a8] sm:$0xff] %vm2113_vm5, %v5097_v52  ;;  %v5238_v60 = vld [vmem:[#allocation3 + $0x190] ss:$2 sm:$0xff] }
 0x4c1   :  { %v5030_v5 = vadd.f32 %v12253_v38, %v9232_v45  ;;  %v12311_v1 = vcombine.low %v5968_v54, %v12307_v6  ;;  %v4830_v39 = vpop.f32.mrb[69].mxu1  ;;  %v5236_v23 = vld [vmem:[#allocation3 + $0x180] ss:$2 sm:$0xff]  ;;  %v5308_v54 = vld [vmem:[#allocation3 + $0x181] ss:$2 sm:$0xff]  ;;  %v5821_v55 = vshll.u32 %v9807_v9, 16 }
 0x4c2   :  { %v5028_v30 = vadd.f32 %v12253_v38, %v4830_v39  ;;  %v9233_v18 = vpop.f32.mrb[70].mxu1  ;;  %v5570_v53 = vmax.f32 %v5354_v26, %v5534_v47  ;;  %v5310_v15 = vld [vmem:[#allocation3 + $0x191] ss:$2 sm:$0xff]  ;;  %v5355_v59 = vmax.f32 %v5236_v23, %v5308_v54 }
 0x4c3   :  { %v5102_v51 = vmax.f32 %v5030_v5, 0.0  ;;  %v6391_v12 = vrot.slane %v12311_v1, 1  ;;  %v5031_v17 = vadd.f32 %v12253_v38, %v9233_v18  ;;  %v4833_v57 = vpop.f32.mrb[71].mxu1  ;;  %v6298_v2 = vshll.u32 %v12311_v1, 16  ;;  %v5828_v26 = vld [vmem:[#allocation5 + $0x2c] sm:$0xe] }
 0x4c4   :  { %v5100_v42 = vmax.f32 %v5028_v30, 0.0  ;;  %v5029_v10 = vadd.f32 %v12253_v38, %v4833_v57  ;;  %v5594_v11 = vpack.c.bf16 %v5570_v53, %v5569_v25  ;;  %v6302_v20 = vshrl.u32 %v12311_v1, 16 }
 0x4c5   :  { %5174 = vst.msk [vmem:[#allocation3 + $0x1d0] sm:$0xff] %vm2113_vm5, %v5102_v51  ;;  %v6392_v33 = vsel %vm1967_vm3, %v6389_v31, %v6391_v12  ;;  %v5103_v41 = vmax.f32 %v5031_v17, 0.0  ;;  %v5416_v19 = vld [vmem:[#allocation3 + $0x192] ss:$2 sm:$0xff]  ;;  %v5488_v0 = vld [vmem:[#allocation3 + $0x193] ss:$2 sm:$0xff]  ;;  %v6394_v52 = vsel %vm1967_vm3, %v6391_v12, %v6393_v50  ;;  %v5356_v39 = vmax.f32 %v5238_v60, %v5310_v15 }
 0x4c6   :  { %6411 = vrot.lane.b32.xlu1 %v6392_v33, %s10230_s15  ;;  %5172 = vst.msk [vmem:[#allocation3 + $0x1c0] sm:$0xff] %vm2113_vm5, %v5100_v42  ;;  %v6300_v4 = vrot.slane %v6298_v2, 1  ;;  %v5101_v43 = vmax.f32 %v5029_v10, 0.0  ;;  %5612 = vst.msk [vmem:[#allocation4 + $0x58] sm:$0xff] %vm2113_vm5, %v5594_v11  ;;  %v5535_v40 = vmax.f32 %v5416_v19, %v5488_v0  ;;  %v5818_v31 = vshrl.u32 %v9807_v9, 16 }
 0x4c7   :  { %5175 = vst.msk [vmem:[#allocation3 + $0x1d8] sm:$0xff] %vm2113_vm5, %v5103_v41  ;;  %v5832_v61 = vld [vmem:[#allocation4 + $0x50] sm:$0x1e]  ;;  %v5823_v51 = vrot.slane %v5821_v55, 7  ;;  %v5242_v17 = vld [vmem:[#allocation3 + $0x1b0] ss:$2 sm:$0xff] }
 0x4c8   :  { %v6301_v49 = vsel %vm1599_vm4, %v6296_v27, %v6300_v4  ;;  %5173 = vst.msk [vmem:[#allocation3 + $0x1c8] sm:$0xff] %vm2113_vm5, %v5101_v43  ;;  %v6304_v48 = vor.u32 %v6302_v20, %v6300_v4  ;;  %v9236_v14 = vpop.f32.mrb[72].mxu1  ;;  %v5418_v58 = vld [vmem:[#allocation3 + $0x1a2] ss:$2 sm:$0xff]  ;;  %v8483_v47 = vcombine.low %v5832_v61, %v5832_v61  ;;  %v8484_v5 = vcombine.high %v5832_v61, %v5832_v61  ;;  %v5490_v30 = vld [vmem:[#allocation3 + $0x1a3] ss:$2 sm:$0xff] }
 0x4c9   :  { %6365 = vrot.lane.b32.xlu0 %v6301_v49, %s10244_s11  ;;  %v5034_v45 = vadd.f32 %v12253_v38, %v9236_v14  ;;  %v5571_v25 = vmax.f32 %v5355_v59, %v5535_v40  ;;  %v4846_v18 = vpop.f32.mrb[73].mxu1  ;;  %v5820_v53 = vrot.slane %v5818_v31, 6  ;;  %v5314_v57 = vld [vmem:[#allocation3 + $0x1b1] ss:$2 sm:$0xff]  ;;  %v5536_v9 = vmax.f32 %v5418_v58, %v5490_v30  ;;  %v5240_v23 = vld [vmem:[#allocation3 + $0x1a0] ss:$2 sm:$0xff] }
 0x4ca   :  { %6413 = vrot.lane.b32.xlu1 %v6394_v52, %s10230_s15  ;;  %v5032_v29 = vadd.f32 %v12253_v38, %v4846_v18  ;;  %v9237_v12 = vpop.f32.mrb[74].mxu1  ;;  %v5841_v2 = vrot.slane %v8483_v47, 7  ;;  %v5848_v10 = vld [vmem:[#allocation5 + $0x34] sm:$0x3]  ;;  %v5312_v54 = vld [vmem:[#allocation3 + $0x1a1] ss:$2 sm:$0xff]  ;;  %v6309_v11 = vsel %vm1599_vm4, %v6304_v48, %v12315_v62  ;;  %v5358_v58 = vmax.f32 %v5242_v17, %v5314_v57 }
 0x4cb   :  { %v5106_v42 = vmax.f32 %v5034_v45, 0.0  ;;  %v5035_v33 = vadd.f32 %v12253_v38, %v9237_v12  ;;  %v4849_v41 = vpop.f32.mrb[75].mxu1  ;;  %v5824_v20 = vor.u32 %v5823_v51, %v5820_v53  ;;  %v5843_v0 = vrot.slane %v8484_v5, 7 }
 0x4cc   :  { %v5572_v27 = vmax.f32 %v5356_v39, %v5536_v9  ;;  %v5104_v60 = vmax.f32 %v5032_v29, 0.0  ;;  %v5033_v15 = vadd.f32 %v12253_v38, %v4849_v41  ;;  %5847 = vst.msk [vmem:[#allocation5 + $0x30] sm:$0xc] %vm5696_vm11, %v5841_v2  ;;  %v5842_v40 = vrot.slane %v5841_v2, 4  ;;  %v5875_v41 = vld [vmem:[#allocation5 + $0x34] sm:$0xc] }
 0x4cd   :  { %v5420_v4 = vld [vmem:[#allocation3 + $0x1b2] ss:$2 sm:$0xff]  ;;  %v5492_v43 = vld [vmem:[#allocation3 + $0x1b3] ss:$2 sm:$0xff]  ;;  %6367 = vrot.lane.b32.xlu0 %v6309_v11, %s10244_s11  ;;  %5178 = vst.msk [vmem:[#allocation3 + $0x1f0] sm:$0xff] %vm2113_vm5, %v5106_v42  ;;  %v5107_v55 = vmax.f32 %v5035_v33, 0.0  ;;  %v5829_v49 = vsel %vm12085_vm15, %v5824_v20, %v5828_v26  ;;  %v5357_v52 = vmax.f32 %v5240_v23, %v5312_v54 }
 0x4ce   :  { %v5537_v31 = vmax.f32 %v5420_v4, %v5492_v43  ;;  %v5825_v59 = vrot.slane %v5824_v20, 4  ;;  %v5595_v48 = vpack.c.bf16 %v5572_v27, %v5571_v25  ;;  %5176 = vst.msk [vmem:[#allocation3 + $0x1e0] sm:$0xff] %vm2113_vm5, %v5104_v60  ;;  %5830 = vst [vmem:[#allocation5 + $0x2c] sm:$0xe] %v5829_v49  ;;  %v5844_v61 = vsel %vm12346_vm7, %v5842_v40, %v5843_v0  ;;  %v5851_v26 = vld [vmem:[#allocation4 + $0x58] sm:$0x3c] }
 0x4cf   :  { %v5422_v14 = vld [vmem:[#allocation3 + $0x1c2] ss:$2 sm:$0xff]  ;;  %v5494_v45 = vld [vmem:[#allocation3 + $0x1c3] ss:$2 sm:$0xff]  ;;  %5179 = vst.msk [vmem:[#allocation3 + $0x1f8] sm:$0xff] %vm2113_vm5, %v5107_v55  ;;  %v5105_v47 = vmax.f32 %v5033_v15, 0.0  ;;  %v5849_v8 = vsel %vm12103_vm10, %v5844_v61, %v5848_v10  ;;  %v8485_v18 = vcombine.low %v5851_v26, %v5851_v26  ;;  %v8486_v53 = vcombine.high %v5851_v26, %v5851_v26 }
 0x4d0   :  { %v9240_v5 = vpop.f32.mrb[76].mxu1  ;;  %vm13307_vm11 = vcmask 253952   ;;  %5613 = vst.msk [vmem:[#allocation4 + $0x60] sm:$0xff] %vm2113_vm5, %v5595_v48  ;;  %v5538_v39 = vmax.f32 %v5422_v14, %v5494_v45  ;;  %5850 = vst [vmem:[#allocation5 + $0x34] sm:$0x3] %v5849_v8  ;;  %v5573_v51 = vmax.f32 %v5357_v52, %v5537_v31  ;;  %v6310_v9 = vshrl.u32 %v12294_v46, 16 }
 0x4d1   :  { %5831 = vst.msk [vmem:[#allocation5 + $0x30] sm:$0x1] %vm13307_vm11, %v5825_v59  ;;  %v5038_v25 = vadd.f32 %v12253_v38, %v9240_v5  ;;  %v4862_v30 = vpop.f32.mrb[77].mxu1  ;;  %v5858_v2 = vshrl.u32 %v8485_v18, 16  ;;  %v5246_v10 = vld [vmem:[#allocation3 + $0x1d0] ss:$2 sm:$0xff] }
 0x4d2   :  { %5177 = vst.msk [vmem:[#allocation3 + $0x1e8] sm:$0xff] %vm2113_vm5, %v5105_v47  ;;  %v5036_v17 = vadd.f32 %v12253_v38, %v4862_v30  ;;  %v9241_v57 = vpop.f32.mrb[78].mxu1  ;;  %v5574_v22 = vmax.f32 %v5358_v58, %v5538_v39  ;;  %v5861_v11 = vshll.u32 %v8485_v18, 16  ;;  %v5866_v33 = vshrl.u32 %v8486_v53, 16  ;;  %v5318_v20 = vld [vmem:[#allocation3 + $0x1d1] ss:$2 sm:$0xff] }
 0x4d3   :  { %v5110_v42 = vmax.f32 %v5038_v25, 0.0  ;;  %v5039_v29 = vadd.f32 %v12253_v38, %v9241_v57  ;;  %v4865_v12 = vpop.f32.mrb[79].mxu1  ;;  %v5860_v27 = vrot.slane %v5858_v2, 7  ;;  %v5869_v4 = vshll.u32 %v8486_v53, 16  ;;  %v5244_v31 = vld [vmem:[#allocation3 + $0x1c0] ss:$2 sm:$0xff] }
 0x4d4   :  { %v5108_v23 = vmax.f32 %v5036_v17, 0.0  ;;  %v5037_v54 = vadd.f32 %v12253_v38, %v4865_v12  ;;  %v5596_v19 = vpack.c.bf16 %v5574_v22, %v5573_v51  ;;  %v5868_v40 = vrot.slane %v5866_v33, 7  ;;  %v5316_v55 = vld [vmem:[#allocation3 + $0x1c1] ss:$2 sm:$0xff] }
 0x4d5   :  { %5182 = vst.msk [vmem:[#allocation3 + $0x210] sm:$0xff] %vm2113_vm5, %v5110_v42  ;;  %v5111_v0 = vmax.f32 %v5039_v29, 0.0  ;;  %v5424_v43 = vld [vmem:[#allocation3 + $0x1d2] ss:$2 sm:$0xff]  ;;  %v5496_v60 = vld [vmem:[#allocation3 + $0x1d3] ss:$2 sm:$0xff]  ;;  %v5863_v49 = vor.u32 %v5861_v11, %v5860_v27  ;;  %v6312_v58 = vor.u32 %v6310_v9, %v12315_v62  ;;  %v5360_v5 = vmax.f32 %v5246_v10, %v5318_v20 }
 0x4d6   :  { %5180 = vst.msk [vmem:[#allocation3 + $0x200] sm:$0xff] %vm2113_vm5, %v5108_v23  ;;  %v5109_v15 = vmax.f32 %v5037_v54, 0.0  ;;  %5614 = vst.msk [vmem:[#allocation4 + $0x68] sm:$0xff] %vm2113_vm5, %v5596_v19  ;;  %v12374_v59 = vld [vmem:[#allocation5 + $0x2c] sm:$0xf]  ;;  %v5539_v48 = vmax.f32 %v5424_v43, %v5496_v60  ;;  %v5864_v52 = vrot.slane %v5860_v27, 4  ;;  %v5871_v45 = vor.u32 %v5869_v4, %v5868_v40 }
 0x4d7   :  { %5183 = vst.msk [vmem:[#allocation3 + $0x218] sm:$0xff] %vm2113_vm5, %v5111_v0  ;;  %v5879_v47 = vld [vmem:[#allocation4 + $0x60] sm:$0x78]  ;;  %v5876_v25 = vsel %vm12151_vm1, %v5863_v49, %v5875_v41  ;;  %v5888_v30 = vld [vmem:[#allocation5 + $0x3c] sm:$0x7]  ;;  %v5359_v18 = vmax.f32 %v5244_v31, %v5316_v55  ;;  %vm13308_vm15 = vcmask 254976  }
 0x4d8   :  { %5181 = vst.msk [vmem:[#allocation3 + $0x208] sm:$0xff] %vm2113_vm5, %v5109_v15  ;;  %v12377_v14 = vld [vmem:[#allocation5 + $0x30] sm:$0xf]  ;;  %v9244_v61 = vpop.f32.mrb[80].mxu1  ;;  %v5872_v62 = vsel %vm12093_vm12, %v5864_v52, %v5871_v45  ;;  %5877 = vst [vmem:[#allocation5 + $0x34] sm:$0xc] %v5876_v25  ;;  %v8487_v17 = vcombine.low %v5879_v47, %v5879_v47  ;;  %v8488_v57 = vcombine.high %v5879_v47, %v5879_v47 }
 0x4d9   :  { %v5426_v8 = vld [vmem:[#allocation3 + $0x1e2] ss:$2 sm:$0xff]  ;;  %v12382_v26 = vcombine.low %v12374_v59, %v12377_v14  ;;  %v5042_v39 = vadd.f32 %v12253_v38, %v9244_v61  ;;  %v5498_v53 = vld [vmem:[#allocation3 + $0x1e3] ss:$2 sm:$0xff]  ;;  %v4878_v51 = vpop.f32.mrb[81].mxu1  ;;  %v5575_v36 = vmax.f32 %v5359_v18, %v5539_v48  ;;  %vm13309_vm1 = vcmask 257027  }
 0x4da   :  { %v5540_v9 = vmax.f32 %v5426_v8, %v5498_v53  ;;  %v9245_v12 = vpop.f32.mrb[82].mxu1  ;;  %5878 = vst.msk [vmem:[#allocation5 + $0x38] sm:$0x3] %vm13308_vm15, %v5872_v62  ;;  %v5250_v2 = vld [vmem:[#allocation3 + $0x1f0] ss:$2 sm:$0xff]  ;;  %v5040_v23 = vadd.f32 %v12253_v38, %v4878_v51  ;;  %v5889_v11 = vsel %vm12166_vm14, %v8488_v57, %v5888_v30  ;;  %vm10247_vm12 = vmmov 0  }
 0x4db   :  { %v6395_v22 = vrot.slane %v12382_v26, 1  ;;  %v5114_v42 = vmax.f32 %v5042_v39, 0.0  ;;  %v6314_v29 = vshll.u32 %v12382_v26, 16  ;;  %v5322_v10 = vld [vmem:[#allocation3 + $0x1f1] ss:$2 sm:$0xff]  ;;  %v5043_v44 = vadd.f32 %v12253_v38, %v9245_v12  ;;  %v4881_v54 = vpop.f32.mrb[83].mxu1  ;;  %9258 = vmatprep.mubr.msk.bf16.mxu0 %vm10247_vm12, %v10246_v63  ;;  %9474 = vmatprep.mubr.msk.bf16.mxu1 %vm10247_vm12, %v10246_v63 }
 0x4dc   :  { %5887 = vst.msk [vmem:[#allocation5 + $0x38] sm:$0x8] %vm13309_vm1, %v8487_v17  ;;  %v5576_v33 = vmax.f32 %v5360_v5, %v5540_v9  ;;  %v5041_v27 = vadd.f32 %v12253_v38, %v4881_v54  ;;  %5890 = vst [vmem:[#allocation5 + $0x3c] sm:$0x7] %v5889_v11  ;;  %v5248_v4 = vld [vmem:[#allocation3 + $0x1e0] ss:$2 sm:$0xff] }
 0x4dd   :  { %v5428_v41 = vld [vmem:[#allocation3 + $0x1f2] ss:$2 sm:$0xff]  ;;  %v5500_v20 = vld [vmem:[#allocation3 + $0x1f3] ss:$2 sm:$0xff]  ;;  %v6396_v19 = vsel %vm1967_vm3, %v6393_v50, %v6395_v22  ;;  %5186 = vst.msk [vmem:[#allocation3 + $0x230] sm:$0xff] %vm2113_vm5, %v5114_v42  ;;  %v6316_v0 = vrot.slane %v6314_v29, 1  ;;  %v5362_v50 = vmax.f32 %v5250_v2, %v5322_v10 }
 0x4de   :  { %v5320_v43 = vld [vmem:[#allocation3 + $0x1e1] ss:$2 sm:$0xff]  ;;  %6415 = vrot.lane.b32.xlu1 %v6396_v19, %s10230_s15  ;;  %v5112_v21 = vmax.f32 %v5040_v23, 0.0  ;;  %v5115_v60 = vmax.f32 %v5043_v44, 0.0  ;;  %v5597_v15 = vpack.c.bf16 %v5576_v33, %v5575_v36  ;;  %v5541_v40 = vmax.f32 %v5428_v41, %v5500_v20  ;;  %v9817_v45 = vld [vmem:[#allocation4 + $0x6c] ss:$0 sps:$4 sm:$0xff]  }
 0x4df   :  { %v5430_v31 = vld [vmem:[#allocation3 + $0x202] ss:$2 sm:$0xff]  ;;  %v6317_v55 = vsel %vm1599_vm4, %v6312_v58, %v6316_v0  ;;  %v5502_v49 = vld [vmem:[#allocation3 + $0x203] ss:$2 sm:$0xff]  ;;  %v5113_v38 = vmax.f32 %v5041_v27, 0.0  ;;  %v5361_v48 = vmax.f32 %v5248_v4, %v5320_v43  ;;  %v5896_v39 = vshll.u32 %v9817_v45, 16 }
 0x4e0   :  { %6369 = vrot.lane.b32.xlu0 %v6317_v55, %s10244_s11  ;;  %5184 = vst.msk [vmem:[#allocation3 + $0x220] sm:$0xff] %vm2113_vm5, %v5112_v21  ;;  %5187 = vst.msk [vmem:[#allocation3 + $0x238] sm:$0xff] %vm2113_vm5, %v5115_v60  ;;  %v5542_v61 = vmax.f32 %v5430_v31, %v5502_v49  ;;  %v5974_v52 = vld [vmem:[#allocation5 + $0x34] sm:$0xf]  ;;  %v5899_v25 = vshrl.u32 %v9817_v45, 16  ;;  %v6318_v51 = vshrl.u32 %v12382_v26, 16 }
 0x4e1   :  { %5615 = vst.msk [vmem:[#allocation4 + $0x70] sm:$0xff] %vm2113_vm5, %v5597_v15  ;;  %5185 = vst.msk [vmem:[#allocation3 + $0x228] sm:$0xff] %vm2113_vm5, %v5113_v38  ;;  %v12414_v58 = vcombine.low %v12377_v14, %v5974_v52  ;;  %v5577_v47 = vmax.f32 %v5361_v48, %v5541_v40  ;;  %v5906_v18 = vld [vmem:[#allocation5 + $0x3c] sm:$0x8]  ;;  %v5898_v62 = vrot.slane %v5896_v39, 5  ;;  %vm5918_vm10 = vcmask 1042432  }
 0x4e2   :  { %v5578_v5 = vmax.f32 %v5362_v50, %v5542_v61  ;;  %v5901_v17 = vrot.slane %v5899_v25, 4  ;;  %v5254_v14 = vld [vmem:[#allocation3 + $0x210] ss:$2 sm:$0xff]  ;;  %v5326_v57 = vld [vmem:[#allocation3 + $0x211] ss:$2 sm:$0xff]  ;;  %v6320_v41 = vor.u32 %v6318_v51, %v6316_v0  ;;  %vm5919_vm14 = vcmask 1046532  }
 0x4e3   :  { %v12418_v8 = vld [vmem:[#allocation5 + $0x38] sm:$0xf]  ;;  %v5907_v23 = vsel %vm12187_vm8, %v5898_v62, %v5906_v18  ;;  %v5364_v27 = vmax.f32 %v5254_v14, %v5326_v57  ;;  %vm5920_vm8 = vmor %vm5918_vm10, %vm5919_vm14  ;;  %v5926_v0 = vld [vmem:[#allocation5 + $0x44] sm:$0xf]  ;;  %vm13313_vm7 = vcmask 785408  }
 0x4e4   :  { %v12421_v30 = vcombine.low %v5974_v52, %v12418_v8  ;;  %v5598_v53 = vpack.c.bf16 %v5578_v5, %v5577_v47  ;;  %v5252_v9 = vld [vmem:[#allocation3 + $0x200] ss:$2 sm:$0xff]  ;;  %v5324_v42 = vld [vmem:[#allocation3 + $0x201] ss:$2 sm:$0xff]  ;;  %v5902_v10 = vor.u32 %v5901_v17, %v5898_v62  ;;  %5908 = vst [vmem:[#allocation5 + $0x3c] sm:$0x8] %v5907_v23  ;;  %vm13316_vm1 = vmmov %vm13313_vm7 }
 0x4e5   :  { %v5363_v4 = vmax.f32 %v5252_v9, %v5324_v42  ;;  %vm13317_vm10 = vmmov %vm13316_vm1 }
 0x4e6   :  { %v6397_v29 = vrot.slane %v12421_v30, 1  ;;  %v6322_v12 = vshll.u32 %v12421_v30, 16  ;;  %5616 = vst.msk [vmem:[#allocation4 + $0x78] sm:$0xff] %vm2113_vm5, %v5598_v53  ;;  %v5903_v19 = vrot.slane %v5902_v10, 4  ;;  %v6326_v5 = vshrl.u32 %v12421_v30, 16 }
 0x4e7   :  { %v5432_v36 = vld [vmem:[#allocation3 + $0x212] ss:$2 sm:$0xff]  ;;  %v5504_v2 = vld [vmem:[#allocation3 + $0x213] ss:$2 sm:$0xff] }
 0x4e8   :  { %v6398_v44 = vsel %vm1967_vm3, %v6395_v22, %v6397_v29  ;;  %v5543_v54 = vmax.f32 %v5432_v36, %v5504_v2  ;;  %v5434_v11 = vld [vmem:[#allocation3 + $0x222] ss:$2 sm:$0xff]  ;;  %v5506_v33 = vld [vmem:[#allocation3 + $0x223] ss:$2 sm:$0xff]  ;;  %v6324_v20 = vrot.slane %v6322_v12, 1 }
 0x4e9   :  { %6417 = vrot.lane.b32.xlu1 %v6398_v44, %s10230_s15  ;;  %v5544_v43 = vmax.f32 %v5434_v11, %v5506_v33  ;;  %5909 = vst.msk [vmem:[#allocation5 + $0x40] sm:$0x7] %vm5752_vm9, %v5903_v19  ;;  %v9820_v28 = vld [vmem:[#allocation4 + $0x74] ss:$0 sps:$4 sm:$0xee]  }
 0x4ea   :  { %v6325_v21 = vsel %vm1599_vm4, %v6320_v41, %v6324_v20  ;;  %v5579_v22 = vmax.f32 %v5363_v4, %v5543_v54  ;;  %v8492_v31 = vrot.slane %v9820_v28, 9  ;;  %v6328_v62 = vor.u32 %v6326_v5, %v6324_v20  ;;  %v12457_v54 = vld [vmem:[#allocation5 + $0x4c] sm:$0xf]  ;;  %v6252_v11 = vld [vmem:[#allocation5 + $0x50] sm:$0xf] }
 0x4eb   :  { %v5580_v60 = vmax.f32 %v5364_v27, %v5544_v43  ;;  %6371 = vrot.lane.b32.xlu0 %v6325_v21, %s10244_s11  ;;  %v12437_v61 = vld [vmem:[#allocation5 + $0x3c] sm:$0xf]  ;;  %vm5956_vm9 = vsmask.f32 7938  ;;  %v12466_v19 = vcombine.low %v12457_v54, %v6252_v11  ;;  %v6405_v5 = vrot.slane %v9826_v3, 1 }
 0x4ec   :  { %v12459_v33 = vld [vmem:[#allocation5 + $0x54] ss:$0 sps:$4 sm:$0x33]  }
 0x4ed   :  { %v9821_v15 = vld [vmem:[#allocation4 + $0x78] ss:$0 sps:$4 sm:$0x11]   ;;  %v5599_v40 = vpack.c.bf16 %v5580_v60, %v5579_v22  ;;  %v9822_v49 = vld [vmem:[#allocation4 + $0x7c] ss:$0 sps:$4 sm:$0xcc]  }
 0x4ee   :  { %v5923_v55 = vrot.slane %v9821_v15, 5  ;;  %v5938_v50 = vshrl.u32 %v9822_v49, 16  ;;  %v5941_v48 = vshll.u32 %v9822_v49, 16  ;;  %v6346_v28 = vshll.u32 %v12466_v19, 16  ;;  %v5961_v49 = vld [vmem:[#allocation5] sm:$0xf] }
 0x4ef   :  { %5617 = vst.msk [vmem:[#allocation4 + $0x80] sm:$0xff] %vm2113_vm5, %v5599_v40  ;;  %v6403_v22 = vrot.slane %v12466_v19, 1  ;;  %v6350_v60 = vshrl.u32 %v12466_v19, 16  ;;  %v6354_v15 = vshll.u32 %v12459_v33, 16 }
 0x4f0   :  { %v5924_v38 = vsel %vm5920_vm8, %v8492_v31, %v5923_v55  ;;  %v12439_v52 = vld [vmem:[#allocation5 + $0x40] sm:$0xf]  ;;  %v5940_v18 = vrot.slane %v5938_v50, 5  ;;  %v5943_v53 = vrot.slane %v5941_v48, 6  ;;  %vm13319_vm8 = vmmov %vm13316_vm1 }
 0x4f1   :  { %v5927_v45 = vsel %vm12259_vm6, %v5924_v38, %v5926_v0  ;;  %v12445_v47 = vcombine.low %v12437_v61, %v12439_v52  ;;  %vm13310_vm6 = vcmask 257024   ;;  %v5962_v38 = vld [vmem:[#allocation5 + $0x4] sm:$0xf] }
 0x4f2   :  { %5928 = vst [vmem:[#allocation5 + $0x44] sm:$0xf] %v5927_v45  ;;  %v5944_v57 = vor.u32 %v5943_v53, %v5940_v18  ;;  %vm5957_vm13 = vmand %vm13310_vm6, %vm5956_vm9  ;;  %v6348_v45 = vrot.slane %v6346_v28, 1  ;;  %v6356_v53 = vrot.slane %v6354_v15, 1  ;;  %v9925_v15 = vld [vmem:[#allocation5 + $0x8] sm:$0xf] }
 0x4f3   :  { %v6399_v39 = vrot.slane %v12445_v47, 1  ;;  %v6330_v25 = vshll.u32 %v12445_v47, 16  ;;  %v6334_v43 = vshrl.u32 %v12445_v47, 16  ;;  %vm13321_vm6 = vmmov %vm13316_vm1 }
 0x4f4   :  { %v5945_v2 = vrot.slane %v5944_v57, 4  ;;  %v6352_v18 = vor.u32 %v6350_v60, %v6348_v45  ;;  %v12510_v60 = vcombine.low %v12307_v6, %v12281_v37 }
 0x4f5   :  { %v6400_v51 = vsel %vm1967_vm3, %v6397_v29, %v6399_v39  ;;  %v6332_v17 = vrot.slane %v6330_v25, 1  ;;  %v5958_v29 = vld [vmem:[#allocation5 + $0x48] sm:$0xf] }
 0x4f6   :  { %v9823_v14 = vld [vmem:[#allocation4 + $0x80] ss:$0 sps:$4 sm:$0x33]   ;;  %6419 = vrot.lane.b32.xlu1 %v6400_v51, %s10230_s15 }
 0x4f7   :  { %v6333_v16 = vsel %vm1599_vm4, %v6328_v62, %v6332_v17  ;;  %v5947_v9 = vshrl.u32 %v9823_v14, 16  ;;  %v5950_v42 = vshll.u32 %v9823_v14, 16  ;;  %v6336_v0 = vor.u32 %v6334_v43, %v6332_v17  ;;  %v5983_v14 = vld [vmem:[#allocation5] sm:$0xe] }
 0x4f8   :  { %6373 = vrot.lane.b32.xlu0 %v6333_v16, %s10244_s11  ;;  %v6406_v62 = vsel %vm1967_vm3, %v6403_v22, %v6405_v5  ;;  %v6358_v17 = vshrl.u32 %v12459_v33, 16  ;;  %v6357_v16 = vsel %vm1599_vm4, %v6352_v18, %v6356_v53  ;;  %v6052_v43 = vshrl.u32 %v12136_v24, 16 }
 0x4f9   :  { %v5949_v12 = vrot.slane %v5947_v9, 5  ;;  %v5952_v36 = vrot.slane %v5950_v42, 6  ;;  %v12461_v41 = vld [vmem:[#allocation5 + $0x44] sm:$0xf]  ;;  %v8507_v9 = vcombine.low %v5983_v14, %v5962_v38  ;;  %v6048_v42 = vshll.u32 %v12136_v24, 16 }
 0x4fb   :  { %v5953_v10 = vor.u32 %v5952_v36, %v5949_v12  ;;  %v6360_v12 = vor.u32 %v6358_v17, %v6356_v53  ;;  %v6153_v36 = vrot.slane %v12136_v24, 1  ;;  %v6068_v17 = vshrl.u32 %v12301_v34, 16 }
 0x4fd   :  { %v5954_v23 = vsel %vm12227_vm0, %v5945_v2, %v5953_v10  ;;  %v6152_v10 = vrot.slane %v8507_v9, 1  ;;  %vm13311_vm0 = vcmask 523264  }
 0x4fe   :  { %v5959_v44 = vsel %vm5957_vm13, %v5954_v23, %v5958_v29  ;;  %v6050_v23 = vrot.slane %v6048_v42, 1  ;;  %vm13312_vm2 = vmmov %vm13311_vm0 }
 0x4ff   :  { %5960 = vst [vmem:[#allocation5 + $0x48] sm:$0xf] %v5959_v44  ;;  %v6056_v44 = vshll.u32 %v12219_v7, 16  ;;  %v6154_v11 = vsel %vm1967_vm3, %v6152_v10, %v6153_v36  ;;  %vm13314_vm11 = vmmov %vm13311_vm0 }
 0x500   :  { %vm13315_vm15 = vmmov %vm13311_vm0 }
 0x501   :  { %v6058_v28 = vrot.slane %v6056_v44, 1  ;;  %vm13318_vm14 = vmmov %vm13311_vm0 }
 0x502   :  { %vm13320_vm9 = vmmov %vm13311_vm0 }
 0x503   :  { %vm13322_vm13 = vmmov %vm13311_vm0 }
 0x506   :  { %v12463_v20 = vld [vmem:[#allocation5 + $0x48] sm:$0xf] }
 0x507   :  { %v12470_v27 = vcombine.low %v12461_v41, %v12463_v20 }
 0x509   :  { %v6401_v4 = vrot.slane %v12470_v27, 1  ;;  %v6338_v21 = vshll.u32 %v12470_v27, 16  ;;  %v6342_v55 = vshrl.u32 %v12470_v27, 16 }
 0x50b   :  { %v6402_v40 = vsel %vm1967_vm3, %v6399_v39, %v6401_v4  ;;  %v6340_v31 = vrot.slane %v6338_v21, 1  ;;  %v6404_v25 = vsel %vm1967_vm3, %v6401_v4, %v6403_v22  ;;  %v12485_v39 = vcombine.low %v5961_v49, %v5962_v38 }
 0x50c   :  { %6421 = vrot.lane.b32.xlu1 %v6402_v40, %s10230_s15  ;;  %v6155_v4 = vrot.slane %v12219_v7, 1  ;;  %v6064_v22 = vshll.u32 %v12301_v34, 16  ;;  %v8508_v40 = vcombine.low %v5962_v38, %v9925_v15  ;;  %v6157_v49 = vrot.slane %v12301_v34, 1 }
 0x50d   :  { %v6341_v50 = vsel %vm1599_vm4, %v6336_v0, %v6340_v31  ;;  %v6344_v48 = vor.u32 %v6342_v55, %v6340_v31  ;;  %v6043_v57 = vshll.u32 %v12485_v39, 16  ;;  %v6041_v29 = vshrl.u32 %v12485_v39, 16 }
 0x50e   :  { %6375 = vrot.lane.b32.xlu0 %v6341_v50, %s10244_s11  ;;  %v6156_v31 = vsel %vm1967_vm3, %v6153_v36, %v6155_v4  ;;  %v6054_v55 = vor.u32 %v6052_v43, %v6050_v23  ;;  %v6060_v38 = vshrl.u32 %v12219_v7, 16  ;;  %v6158_v18 = vsel %vm1967_vm3, %v6155_v4, %v6157_v49 }
 0x50f   :  { %v6349_v51 = vsel %vm1599_vm4, %v6344_v48, %v6348_v45  ;;  %v6045_v2 = vrot.slane %v6043_v57, 1  ;;  %v12519_v48 = vcombine.low %v12286_v32, %v12374_v59  ;;  %v6066_v45 = vrot.slane %v6064_v22, 1 }
 0x510   :  { %6423 = vrot.lane.b32.xlu1 %v6404_v25, %s10230_s15  ;;  %v6059_v6 = vsel %vm1599_vm4, %v6054_v55, %v6058_v28  ;;  %v6062_v53 = vor.u32 %v6060_v38, %v6058_v28  ;;  %v6163_v22 = vrot.slane %v12414_v58, 1  ;;  %v9842_v55 = vld [vmem:[#allocation17] sm:$0xff]   ;;  %v12571_v38 = vcombine.low %v12463_v20, %v12457_v54 }
 0x511   :  { %v6046_v3 = vor.u32 %v6045_v2, %v6041_v29  ;;  %v6080_v32 = vshll.u32 %v12519_v48, 16  ;;  %v6070_v57 = vor.u32 %v6068_v17, %v6066_v45  ;;  %v6161_v9 = vrot.slane %v12519_v48, 1  ;;  %v12587_v17 = vld [vmem:[#allocation5 + $0x50] ss:$0 sps:$4 sm:$0x33]  }
 0x512   :  { %6377 = vrot.lane.b32.xlu0 %v6349_v51, %s10244_s11  ;;  %v6159_v51 = vrot.slane %v12510_v60, 1  ;;  %v6088_v2 = vshll.u32 %v12414_v58, 16 }
 0x513   :  { %v6051_v21 = vsel %vm1599_vm4, %v6046_v3, %v6050_v23  ;;  %v6082_v36 = vrot.slane %v6080_v32, 1 }
 0x514   :  { %6425 = vrot.lane.b32.xlu1 %v6406_v62, %s10230_s15  ;;  %v6067_v62 = vsel %vm1599_vm4, %v6062_v53, %v6066_v45  ;;  %v6162_v28 = vsel %vm1967_vm3, %v6159_v51, %v6161_v9  ;;  %v6112_v53 = vshll.u32 %v12571_v38, 16 }
 0x516   :  { %6379 = vrot.lane.b32.xlu0 %v6357_v16, %s10244_s11  ;;  %v6160_v16 = vsel %vm1967_vm3, %v6157_v49, %v6159_v51 }
 0x518   :  { %6427 = vrot.lane.b32.xlu1 %v6405_v5, %s10230_s15  ;;  %v6072_v5 = vshll.u32 %v12510_v60, 16 }
 0x51a   :  { %6381 = vrot.lane.b32.xlu0 %v6360_v12, %s10244_s11  ;;  %v6074_v14 = vrot.slane %v6072_v5, 1  ;;  %v6076_v12 = vshrl.u32 %v12510_v60, 16 }
 0x51c   :  { %6173 = vrot.lane.b32.xlu1 %v6154_v11, %s10230_s15  ;;  %v6408_v37 = vpop.permute.xlu1 %6407  ;;  %v6075_v44 = vsel %vm1599_vm4, %v6070_v57, %v6074_v14  ;;  %v12543_v11 = vcombine.low %v12418_v8, %v12437_v61  ;;  %v6078_v4 = vor.u32 %v6076_v12, %v6074_v14  ;;  %v6084_v8 = vshrl.u32 %v12519_v48, 16  ;;  %v12592_v12 = vld [vmem:[#allocation5 + $0xc] sm:$0xf] }
 0x51d   :  { %v6090_v61 = vrot.slane %v6088_v2, 1 }
 0x51e   :  { %6127 = vrot.lane.b32.xlu0 %v6051_v21, %s10244_s11  ;;  %v6362_v0 = vpop.permute.xlu0 %6361  ;;  %v6100_v32 = vshrl.u32 %v12543_v11, 16 }
 0x51f   :  { %v6431_v50 = vsel %vm2113_vm5, %v8508_v40, %v6362_v0  ;;  %v6096_v0 = vshll.u32 %v12543_v11, 16 }
 0x520   :  { %6175 = vrot.lane.b32.xlu1 %v6156_v31, %s10230_s15  ;;  %v6453_v25 = vsel %vm13311_vm0, %v6431_v50, %v6408_v37  ;;  %v12560_v31 = vcombine.low %v12439_v52, %v12461_v41  ;;  %v6164_v50 = vsel %vm1967_vm3, %v6161_v9, %v6163_v22  ;;  %v6086_v37 = vor.u32 %v6084_v8, %v6082_v36  ;;  %vm13323_vm0 = vmmov %vm13316_vm1 }
 0x521   :  { %v6489_v59 = vshll.u32 %v6453_v25, 16  ;;  %v6487_v43 = vshrl.u32 %v6453_v25, 16  ;;  %v6092_v41 = vshrl.u32 %v12414_v58, 16  ;;  %v6098_v45 = vrot.slane %v6096_v0, 1  ;;  %v9846_v25 = vld [vmem:[#allocation17 + $0x8] sm:$0xff]  }
 0x522   :  { %6129 = vrot.lane.b32.xlu0 %v6059_v6, %s10244_s11  ;;  %v6165_v6 = vrot.slane %v12543_v11, 1  ;;  %v6091_v52 = vsel %vm1599_vm4, %v6086_v37, %v6090_v61  ;;  %v6104_v5 = vshll.u32 %v12560_v31, 16  ;;  %v6167_v20 = vrot.slane %v12560_v31, 1 }
 0x523   :  { %v6491_v10 = vrot.slane %v6489_v59, 1  ;;  %v6094_v54 = vor.u32 %v6092_v41, %v6090_v61  ;;  %v6102_v57 = vor.u32 %v6100_v32, %v6098_v45  ;;  %v6169_v9 = vrot.slane %v12571_v38, 1 }
 0x524   :  { %6177 = vrot.lane.b32.xlu1 %v6158_v18, %s10230_s15  ;;  %v6166_v18 = vsel %vm1967_vm3, %v6163_v22, %v6165_v6  ;;  %v6106_v59 = vrot.slane %v6104_v5, 1  ;;  %v6108_v2 = vshrl.u32 %v12560_v31, 16  ;;  %v6171_v22 = vrot.slane %v12587_v17, 1  ;;  %v9851_v5 = vld [vmem:[#allocation17 + $0x20] sm:$0xff]  }
 0x525   :  { %v6492_v15 = vor.u32 %v6491_v10, %v6487_v43  ;;  %v6099_v51 = vsel %vm1599_vm4, %v6094_v54, %v6098_v45  ;;  %v6114_v10 = vrot.slane %v6112_v53, 1  ;;  %v9850_v43 = vld [vmem:[#allocation17 + $0x18] sm:$0xff]   ;;  %v6116_v0 = vshrl.u32 %v12571_v38, 16 }
 0x526   :  { %6131 = vrot.lane.b32.xlu0 %v6067_v62, %s10244_s11  ;;  %v6410_v29 = vpop.permute.xlu1 %6409  ;;  %v9849_v62 = vld [vmem:[#allocation17 + $0x10] sm:$0xff]  }
 0x527   :  { %v6118_v45 = vor.u32 %v6116_v0, %v6114_v10 }
 0x528   :  { %6179 = vrot.lane.b32.xlu1 %v6160_v16, %s10230_s15  ;;  %v6168_v16 = vsel %vm1967_vm3, %v6165_v6, %v6167_v20 }
 0x529   :  { %v6364_v42 = vpop.permute.xlu0 %6363 }
 0x52a   :  { %v6433_v23 = vsel %vm2113_vm5, %v12200_v56, %v6364_v42  ;;  %6133 = vrot.lane.b32.xlu0 %v6075_v44, %s10244_s11  ;;  %v6083_v56 = vsel %vm1599_vm4, %v6078_v4, %v6082_v36  ;;  %v6930_v42 = vld [vmem:[#allocation5 + $0x8] sm:$0xe]  ;;  %v6107_v4 = vsel %vm1599_vm4, %v6102_v57, %v6106_v59 }
 0x52b   :  { %v12546_v3 = vsel %vm13312_vm2, %v6433_v23, %v6410_v29  ;;  %v6120_v29 = vshll.u32 %v12587_v17, 16  ;;  %v12597_v23 = vld [vmem:[#allocation5 + $0x10] sm:$0xff]   ;;  %v12608_v8 = vcombine.low %v6930_v42, %v12592_v12  ;;  %v6952_v42 = vld [vmem:[#allocation5 + $0x8] sm:$0xc] }
 0x52c   :  { %v6493_v21 = vshll.u32 %v12546_v3, 16  ;;  %6181 = vrot.lane.b32.xlu1 %v6162_v28, %s10230_s15  ;;  %v6110_v28 = vor.u32 %v6108_v2, %v6106_v59  ;;  %v7017_v37 = vshll.u32 %v12597_v23, 16  ;;  %v9852_v59 = vld [vmem:[#allocation17 + $0x28] sm:$0xff]  }
 0x52d   :  { %v7012_v53 = vshll.u32 %v12608_v8, 16 }
 0x52e   :  { %v12555_v40 = vrot.slane %v6493_v21, 1  ;;  %6135 = vrot.lane.b32.xlu0 %v6083_v56, %s10244_s11  ;;  %v12605_v56 = vld [vmem:[#allocation5 + $0x18] sm:$0xff]   ;;  %v7019_v32 = vrot.slane %v7017_v37, 1 }
 0x52f   :  { %v7025_v54 = vshll.u32 %v12605_v56, 16 }
 0x530   :  { %v6496_v49 = vsel %vm1599_vm4, %v6492_v15, %v12555_v40  ;;  %6183 = vrot.lane.b32.xlu1 %v6164_v50, %s10230_s15  ;;  %v6170_v15 = vsel %vm1967_vm3, %v6167_v20, %v6169_v9  ;;  %v6122_v50 = vrot.slane %v6120_v29, 1  ;;  %v12641_v29 = vld [vmem:[#allocation5 + $0x20] sm:$0xff]  }
 0x531   :  { %9259 = vmatmul.mubr.msk.bf16.vlgmr.msra.gmra.mrb[60].mxu0 %vm13313_vm7, %v6496_v49  ;;  %v6115_v49 = vsel %vm1599_vm4, %v6110_v28, %v6114_v10  ;;  %v7027_v57 = vrot.slane %v7025_v54, 1  ;;  %v7010_v10 = vshrl.u32 %v12608_v8, 16  ;;  %v7124_v28 = vrot.slane %v12605_v56, 1  ;;  %vm13324_vm7 = vmmov %vm13312_vm2 }
 0x532   :  { %9262 = vmatprep.mubr.msk.bf16.mxu0 %vm10247_vm12, %v10246_v63  ;;  %9303 = vmatpush3.bf16.msra.mxu0 %v9842_v55 }
 0x533   :  { %6137 = vrot.lane.b32.xlu0 %v6091_v52, %s10244_s11  ;;  %9304 = vmatprep.subr.bf16.mxu0 %v10246_v63 }
 0x534   :  { %6185 = vrot.lane.b32.xlu1 %v6166_v18, %s10230_s15  ;;  %v6124_v18 = vshrl.u32 %v12587_v17, 16  ;;  %v7021_v17 = vshrl.u32 %v12597_v23, 16 }
 0x536   :  { %9305 = vmatpush3.bf16.msra.mxu0 %v9846_v25  ;;  %v7023_v2 = vor.u32 %v7021_v17, %v7019_v32 }
 0x537   :  { %6139 = vrot.lane.b32.xlu0 %v6099_v51, %s10244_s11  ;;  %9306 = vmatprep.subr.bf16.mxu0 %v10246_v63  ;;  %v6123_v51 = vsel %vm1599_vm4, %v6118_v45, %v6122_v50 }
 0x538   :  { %v6412_v14 = vpop.permute.xlu1 %6411  ;;  %6187 = vrot.lane.b32.xlu1 %v6168_v16, %s10230_s15 }
 0x53a   :  { %9307 = vmatpush3.bf16.msra.mxu0 %v9849_v62  ;;  %v6126_v62 = vor.u32 %v6124_v18, %v6122_v50  ;;  %v7029_v50 = vshrl.u32 %v12605_v56, 16 }
 0x53b   :  { %v6366_v36 = vpop.permute.xlu0 %6365  ;;  %6141 = vrot.lane.b32.xlu0 %v6107_v4, %s10244_s11  ;;  %9308 = vmatprep.subr.bf16.mxu0 %v10246_v63 }
 0x53c   :  { %v6435_v44 = vsel %vm2113_vm5, %v12238_v35, %v6366_v36  ;;  %v6497_v35 = vshrl.u32 %v12546_v3, 16  ;;  %6189 = vrot.lane.b32.xlu1 %v6170_v15, %s10230_s15  ;;  %v6414_v41 = vpop.permute.xlu1 %6413  ;;  %v7031_v45 = vor.u32 %v7029_v50, %v7027_v57 }
 0x53d   :  { %v6457_v21 = vsel %vm13314_vm11, %v6435_v44, %v6412_v14  ;;  %v8567_v44 = vcombine.low %v6952_v42, %v12592_v12  ;;  %v7033_v12 = vshll.u32 %v12641_v29, 16  ;;  %vm13325_vm11 = vmmov %vm13323_vm0 }
 0x53e   :  { %v6500_v61 = vshll.u32 %v6457_v21, 16  ;;  %v6499_v6 = vor.u32 %v6497_v35, %v12555_v40  ;;  %9309 = vmatpush3.bf16.msra.mxu0 %v9850_v43  ;;  %v6504_v14 = vshrl.u32 %v6457_v21, 16  ;;  %v7028_v43 = vsel %vm1599_vm4, %v7023_v2, %v7027_v57 }
 0x53f   :  { %v6368_v55 = vpop.permute.xlu0 %6367  ;;  %6143 = vrot.lane.b32.xlu0 %v6115_v49, %s10244_s11  ;;  %9310 = vmatprep.subr.bf16.mxu0 %v10246_v63  ;;  %v7122_v35 = vrot.slane %v12597_v23, 1  ;;  %v7121_v0 = vrot.slane %v8567_v44, 1  ;;  %v7035_v37 = vrot.slane %v7033_v12, 1  ;;  %v12700_v12 = vld [vmem:[#allocation5 + $0x48] sm:$0xff]  }
 0x540   :  { %v6502_v52 = vrot.slane %v6500_v61, 1  ;;  %v6437_v3 = vsel %vm2113_vm5, %v12311_v1, %v6368_v55  ;;  %v6172_v1 = vsel %vm1967_vm3, %v6169_v9, %v6171_v22  ;;  %v7014_v9 = vrot.slane %v7012_v53, 1  ;;  %v12656_v61 = vld [vmem:[#allocation5 + $0x28] sm:$0xff]  }
 0x541   :  { %v12621_v25 = vsel %vm13315_vm15, %v6437_v3, %v6414_v41  ;;  %6191 = vrot.lane.b32.xlu1 %v6172_v1, %s10230_s15  ;;  %v7125_v15 = vsel %vm1967_vm3, %v7122_v35, %v7124_v28  ;;  %v7126_v55 = vrot.slane %v12641_v29, 1  ;;  %v7123_v49 = vsel %vm1967_vm3, %v7121_v0, %v7122_v35  ;;  %vm13326_vm15 = vmmov %vm13312_vm2 }
 0x542   :  { %v6507_v40 = vshll.u32 %v12621_v25, 16  ;;  %v6503_v20 = vsel %vm1599_vm4, %v6499_v6, %v6502_v52  ;;  %9311 = vmatpush3.bf16.msra.mxu0 %v9851_v5  ;;  %v6506_v36 = vor.u32 %v6504_v14, %v6502_v52  ;;  %v7015_v21 = vor.u32 %v7014_v9, %v7010_v10  ;;  %v12665_v52 = vld [vmem:[#allocation5 + $0x30] sm:$0xff]  }
 0x543   :  { %9263 = vmatmul.mubr.msk.bf16.gmra.mrb[64].mxu0 %vm13316_vm1, %v6503_v20  ;;  %6145 = vrot.lane.b32.xlu0 %v6123_v51, %s10244_s11  ;;  %v7041_v6 = vshll.u32 %v12656_v61, 16  ;;  %v7127_v3 = vsel %vm1967_vm3, %v7124_v28, %v7126_v55  ;;  %v7128_v5 = vrot.slane %v12656_v61, 1  ;;  %v7036_v1 = vsel %vm1599_vm4, %v7031_v45, %v7035_v37  ;;  %vm13327_vm1 = vmmov %vm13323_vm0 }
 0x544   :  { %9266 = vmatprep.mubr.msk.bf16.mxu0 %vm10247_vm12, %v10246_v63  ;;  %9312 = vmatprep.subr.bf16.mxu0 %v10246_v63  ;;  %v6509_v16 = vrot.slane %v6507_v40, 1  ;;  %v7037_v40 = vshrl.u32 %v12641_v29, 16  ;;  %v7049_v51 = vshll.u32 %v12665_v52, 16  ;;  %v7130_v14 = vrot.slane %v12665_v52, 1 }
 0x545   :  { %6193 = vrot.lane.b32.xlu1 %v6171_v22, %s10230_s15  ;;  %v7020_v22 = vsel %vm1599_vm4, %v7015_v21, %v7019_v32  ;;  %v7043_v53 = vrot.slane %v7041_v6, 1  ;;  %v12677_v32 = vld [vmem:[#allocation5 + $0x38] sm:$0xff]   ;;  %v7053_v28 = vshrl.u32 %v12665_v52, 16  ;;  %v7073_v45 = vshll.u32 %v12700_v12, 16 }
 0x546   :  { %9313 = vmatpush3.bf16.msra.mxu0 %v9852_v59  ;;  %v6510_v4 = vsel %vm1599_vm4, %v6506_v36, %v6509_v16  ;;  %v6511_v59 = vshrl.u32 %v12621_v25, 16  ;;  %v7039_v17 = vor.u32 %v7037_v40, %v7035_v37  ;;  %v7045_v36 = vshrl.u32 %v12656_v61, 16  ;;  %v12687_v25 = vld [vmem:[#allocation5 + $0x40] sm:$0xff]   ;;  %v9848_v40 = vld [vmem:[#allocation5 + $0x58] ss:$0 sps:$4 sm:$0x77]  }
 0x547   :  { %6147 = vrot.lane.b32.xlu0 %v6126_v62, %s10244_s11  ;;  %9358 = vmatprep.subr.bf16.mxu0 %v10246_v63  ;;  %v7051_v2 = vrot.slane %v7049_v51, 1  ;;  %v7057_v10 = vshll.u32 %v12677_v32, 16  ;;  %v7065_v35 = vshll.u32 %v12687_v25, 16  ;;  %v7061_v50 = vshrl.u32 %v12677_v32, 16 }
 0x548   :  { %v6513_v57 = vor.u32 %v6511_v59, %v6509_v16  ;;  %v7044_v42 = vsel %vm1599_vm4, %v7039_v17, %v7043_v53  ;;  %v7131_v16 = vsel %vm1967_vm3, %v7128_v5, %v7130_v14  ;;  %v7136_v59 = vrot.slane %v12700_v12, 1 }
 0x549   :  { %7098 = vrot.lane.b32.xlu1 %v7028_v43, %s10244_s11  ;;  %v7132_v43 = vrot.slane %v12677_v32, 1 }
 0x54b   :  { %9267 = vmatmul.mubr.msk.bf16.gmra.mrb[68].mxu0 %vm13317_vm10, %v6510_v4  ;;  %7096 = vrot.lane.b32.xlu0 %v7020_v22, %s10244_s11  ;;  %v7047_v4 = vor.u32 %v7045_v36, %v7043_v53  ;;  %v7059_v22 = vrot.slane %v7057_v10, 1  ;;  %v7133_v0 = vsel %vm1967_vm3, %v7130_v14, %v7132_v43  ;;  %v7089_v36 = vshll.u32 %v9848_v40, 16  ;;  %vm13328_vm10 = vmmov %vm13312_vm2 }
 0x54c   :  { %9270 = vmatprep.mubr.msk.bf16.mxu0 %vm10247_vm12, %v10246_v63 }
 0x54d   :  { %7144 = vrot.lane.b32.xlu1 %v7125_v15, %s10230_s15  ;;  %v7052_v21 = vsel %vm1599_vm4, %v7047_v4, %v7051_v2  ;;  %v7134_v15 = vrot.slane %v12687_v25, 1  ;;  %v7063_v51 = vor.u32 %v7061_v50, %v7059_v22 }
 0x54f   :  { %7142 = vrot.lane.b32.xlu0 %v7123_v49, %s10230_s15  ;;  %v7137_v10 = vsel %vm1967_vm3, %v7134_v15, %v7136_v59 }
 0x550   :  { %v6416_v18 = vpop.permute.xlu1 %6415 }
 0x551   :  { %7146 = vrot.lane.b32.xlu1 %v7127_v3, %s10230_s15  ;;  %v7067_v3 = vrot.slane %v7065_v35, 1  ;;  %v7091_v35 = vrot.slane %v7089_v36, 1 }
 0x552   :  { %v6370_v41 = vpop.permute.xlu0 %6369 }
 0x553   :  { %v6439_v54 = vsel %vm2113_vm5, %v12294_v46, %v6370_v41  ;;  %7100 = vrot.lane.b32.xlu0 %v7036_v1, %s10244_s11  ;;  %v7129_v46 = vsel %vm1967_vm3, %v7126_v55, %v7128_v5  ;;  %v7055_v55 = vor.u32 %v7053_v28, %v7051_v2  ;;  %v7068_v14 = vsel %vm1599_vm4, %v7063_v51, %v7067_v3 }
 0x554   :  { %v6461_v20 = vsel %vm13318_vm14, %v6439_v54, %v6416_v18  ;;  %v7135_v18 = vsel %vm1967_vm3, %v7132_v43, %v7134_v15  ;;  %v12714_v54 = vld [vmem:[#allocation5 + $0x50] sm:$0xff]   ;;  %vm13329_vm14 = vmmov %vm13323_vm0 }
 0x555   :  { %v6514_v62 = vshll.u32 %v6461_v20, 16  ;;  %7148 = vrot.lane.b32.xlu1 %v7129_v46, %s10230_s15  ;;  %v7060_v41 = vsel %vm1599_vm4, %v7055_v55, %v7059_v22  ;;  %v6518_v1 = vshrl.u32 %v6461_v20, 16  ;;  %v7085_v20 = vshrl.u32 %v12714_v54, 16 }
 0x557   :  { %v6516_v9 = vrot.slane %v6514_v62, 1  ;;  %7102 = vrot.lane.b32.xlu0 %v7044_v42, %s10244_s11  ;;  %v7081_v62 = vshll.u32 %v12714_v54, 16  ;;  %v7138_v42 = vrot.slane %v12714_v54, 1 }
 0x559   :  { %v6517_v44 = vsel %vm1599_vm4, %v6513_v57, %v6516_v9  ;;  %7150 = vrot.lane.b32.xlu1 %v7131_v16, %s10230_s15  ;;  %v6520_v46 = vor.u32 %v6518_v1, %v6516_v9  ;;  %v7075_v57 = vrot.slane %v7073_v45, 1  ;;  %v7077_v16 = vshrl.u32 %v12700_v12, 16 }
 0x55a   :  { %9271 = vmatmul.mubr.msk.bf16.gmra.mrb[72].mxu0 %vm13319_vm8, %v6517_v44  ;;  %v7083_v43 = vrot.slane %v7081_v62, 1  ;;  %v7139_v28 = vsel %vm1967_vm3, %v7136_v59, %v7138_v42  ;;  %vm13330_vm8 = vmmov %vm13323_vm0 }
 0x55b   :  { %9274 = vmatprep.mubr.msk.bf16.mxu0 %vm10247_vm12, %v10246_v63  ;;  %7104 = vrot.lane.b32.xlu0 %v7052_v21, %s10244_s11  ;;  %v6418_v37 = vpop.permute.xlu1 %6417  ;;  %v7079_v4 = vor.u32 %v7077_v16, %v7075_v57  ;;  %v7140_v21 = vrot.slane %v9848_v40, 1 }
 0x55c   :  { %v7087_v22 = vor.u32 %v7085_v20, %v7083_v43 }
 0x55d   :  { %v6372_v49 = vpop.permute.xlu0 %6371  ;;  %7152 = vrot.lane.b32.xlu1 %v7133_v0, %s10230_s15  ;;  %v7084_v15 = vsel %vm1599_vm4, %v7079_v4, %v7083_v43  ;;  %v7141_v0 = vsel %vm1967_vm3, %v7138_v42, %v7140_v21 }
 0x55e   :  { %v6441_v6 = vsel %vm2113_vm5, %v12382_v26, %v6372_v49  ;;  %v7069_v26 = vshrl.u32 %v12687_v25, 16  ;;  %v7093_v49 = vshrl.u32 %v9848_v40, 16 }
 0x55f   :  { %v6463_v5 = vsel %vm13320_vm9, %v6441_v6, %v6418_v37  ;;  %7106 = vrot.lane.b32.xlu0 %v7060_v41, %s10244_s11  ;;  %v7092_v6 = vsel %vm1599_vm4, %v7087_v22, %v7091_v35  ;;  %vm13331_vm9 = vmmov %vm13323_vm0 }
 0x560   :  { %v6521_v53 = vshll.u32 %v6463_v5, 16  ;;  %v7071_v44 = vor.u32 %v7069_v26, %v7067_v3  ;;  %v6525_v3 = vshrl.u32 %v6463_v5, 16 }
 0x561   :  { %7154 = vrot.lane.b32.xlu1 %v7135_v18, %s10230_s15  ;;  %v7095_v18 = vor.u32 %v7093_v49, %v7091_v35 }
 0x562   :  { %v6523_v17 = vrot.slane %v6521_v53, 1  ;;  %v7076_v9 = vsel %vm1599_vm4, %v7071_v44, %v7075_v57 }
 0x563   :  { %7108 = vrot.lane.b32.xlu0 %v7068_v14, %s10244_s11 }
 0x564   :  { %v6524_v2 = vsel %vm1599_vm4, %v6520_v46, %v6523_v17  ;;  %v6527_v1 = vor.u32 %v6525_v3, %v6523_v17 }
 0x565   :  { %9275 = vmatmul.mubr.msk.bf16.gmra.mrb[76].mxu0 %vm13321_vm6, %v6524_v2  ;;  %7156 = vrot.lane.b32.xlu1 %v7137_v10, %s10230_s15  ;;  %vm13332_vm6 = vmmov %vm13312_vm2 }
 0x566   :  { %9278 = vmatprep.mubr.msk.bf16.mxu0 %vm10247_vm12, %v10246_v63 }
 0x567   :  { %7110 = vrot.lane.b32.xlu0 %v7076_v9, %s10244_s11 }
 0x568   :  { %v6420_v50 = vpop.permute.xlu1 %6419 }
 0x569   :  { %7158 = vrot.lane.b32.xlu1 %v7139_v28, %s10230_s15 }
 0x56a   :  { %v6374_v55 = vpop.permute.xlu0 %6373 }
 0x56b   :  { %7112 = vrot.lane.b32.xlu0 %v7084_v15, %s10244_s11  ;;  %v6443_v37 = vsel %vm2113_vm5, %v12421_v30, %v6374_v55 }
 0x56c   :  { %v6465_v41 = vsel %vm13322_vm13, %v6443_v37, %v6420_v50  ;;  %vm13334_vm13 = vmmov %vm13312_vm2 }
 0x56d   :  { %7160 = vrot.lane.b32.xlu1 %v7141_v0, %s10230_s15  ;;  %v6528_v45 = vshll.u32 %v6465_v41, 16  ;;  %v6532_v26 = vshrl.u32 %v6465_v41, 16 }
 0x56f   :  { %7114 = vrot.lane.b32.xlu0 %v7092_v6, %s10244_s11  ;;  %v6530_v53 = vrot.slane %v6528_v45, 1 }
 0x571   :  { %7162 = vrot.lane.b32.xlu1 %v7140_v21, %s10230_s15  ;;  %v6531_v40 = vsel %vm1599_vm4, %v6527_v1, %v6530_v53  ;;  %v6534_v17 = vor.u32 %v6532_v26, %v6530_v53  ;;  %v9853_v53 = vld [vmem:[#allocation17 + $0x60] sm:$0xff]   ;;  %v9856_v26 = vld [vmem:[#allocation17 + $0x70] sm:$0xff]   ;;  %s10248_s15 = smov [#allocation28]  }
 0x572   :  { %9279 = vmatmul.mubr.msk.bf16.gmra.mrb[80].mxu0 %vm13323_vm0, %v6531_v40  ;;  %s8097_s3 = sshll.u32 %s10248_s15, 4  ;;  %s8098_s3 = int_to_ptr.vmem [resolvable:$true] %s8097_s3 }
 0x573   :  { %7116 = vrot.lane.b32.xlu0 %v7095_v18, %s10244_s11  ;;  %9282 = vmatprep.mubr.msk.bf16.mxu0 %vm10247_vm12, %v10246_v63  ;;  %s10190_s24 = scalar_lea.vmem %s8098_s3, 32  ;;  %p10195_p13 = scmp.lt.s32.totalorder %s8098_s3, %s8098_s3 }
 0x574   :  { %p10191_p12 = scmp.ne.s32.totalorder %s8098_s3, %s10190_s24  ;;  %p10196_p0 = scmp.lt.s32.totalorder %s10190_s24, %s10190_s24 }
 0x576   :  { %p10197_p1 = por %p10196_p0, %p10195_p13 }
 0x578   :  { %p10198_p2 = pnand %p10197_p1, %p10191_p12 }
 0x57e   :  { %v6422_v30 = vpop.permute.xlu1 %6421 }
 0x580   :  { %v6376_v51 = vpop.permute.xlu0 %6375 }
 0x581   :  { %v6445_v5 = vsel %vm2113_vm5, %v12445_v47, %v6376_v51 }
 0x582   :  { %v6467_v59 = vsel %vm13312_vm2, %v6445_v5, %v6422_v30  ;;  %v6424_v57 = vpop.permute.xlu1 %6423  ;;  %v9855_v5 = vld [vmem:[#allocation17 + $0x68] sm:$0xff]  }
 0x583   :  { %v6535_v62 = vshll.u32 %v6467_v59, 16  ;;  %v6539_v44 = vshrl.u32 %v6467_v59, 16 }
 0x584   :  { %v6378_v46 = vpop.permute.xlu0 %6377 }
 0x585   :  { %v6537_v14 = vrot.slane %v6535_v62, 1  ;;  %v6447_v42 = vsel %vm2113_vm5, %v12470_v27, %v6378_v46 }
 0x586   :  { %v6469_v20 = vsel %vm13324_vm7, %v6447_v42, %v6424_v57  ;;  %v6426_v9 = vpop.permute.xlu1 %6425  ;;  %vm13335_vm7 = vmmov %vm13323_vm0 }
 0x587   :  { %v6542_v36 = vshll.u32 %v6469_v20, 16  ;;  %v6538_v2 = vsel %vm1599_vm4, %v6534_v17, %v6537_v14  ;;  %v6541_v27 = vor.u32 %v6539_v44, %v6537_v14  ;;  %v9857_v17 = vld [vmem:[#allocation17 + $0x78] sm:$0xff]   ;;  %v9858_v14 = vld [vmem:[#allocation17 + $0x80] sm:$0xff]  }
 0x588   :  { %9283 = vmatmul.mubr.msk.bf16.gmra.mrb[84].mxu0 %vm13325_vm11, %v6538_v2  ;;  %v6380_v10 = vpop.permute.xlu0 %6379  ;;  %vm13336_vm11 = vmmov %vm13312_vm2 }
 0x589   :  { %v6449_v47 = vsel %vm2113_vm5, %v12466_v19, %v6380_v10  ;;  %9286 = vmatprep.mubr.msk.bf16.mxu0 %vm10247_vm12, %v10246_v63  ;;  %v6544_v16 = vrot.slane %v6542_v36, 1  ;;  %v6546_v19 = vshrl.u32 %v6469_v20, 16  ;;  %v9859_v36 = vld [vmem:[#allocation17 + $0x88] sm:$0xff]  }
 0x58a   :  { %v6471_v4 = vsel %vm13326_vm15, %v6449_v47, %v6426_v9  ;;  %v6428_v15 = vpop.permute.xlu1 %6427  ;;  %vm13337_vm15 = vmmov %vm13323_vm0 }
 0x58b   :  { %v6549_v43 = vshll.u32 %v6471_v4, 16  ;;  %v6545_v21 = vsel %vm1599_vm4, %v6541_v27, %v6544_v16  ;;  %v6548_v55 = vor.u32 %v6546_v19, %v6544_v16  ;;  %v6553_v49 = vshrl.u32 %v6471_v4, 16 }
 0x58c   :  { %v6382_v28 = vpop.permute.xlu0 %6381 }
 0x58d   :  { %v6451_v22 = vsel %vm2113_vm5, %v12459_v33, %v6382_v28  ;;  %v6551_v35 = vrot.slane %v6549_v43, 1 }
 0x58e   :  { %v6473_v0 = vsel %vm13328_vm10, %v6451_v22, %v6428_v15  ;;  %v6174_v40 = vpop.permute.xlu1 %6173  ;;  %vm13339_vm10 = vmmov %vm13323_vm0 }
 0x58f   :  { %v6556_v50 = vshll.u32 %v6473_v0, 16  ;;  %v6552_v37 = vsel %vm1599_vm4, %v6548_v55, %v6551_v35  ;;  %v6555_v6 = vor.u32 %v6553_v49, %v6551_v35  ;;  %v6560_v3 = vshrl.u32 %v6473_v0, 16 }
 0x590   :  { %9287 = vmatmul.mubr.msk.bf16.gmra.mrb[88].mxu0 %vm13327_vm1, %v6545_v21  ;;  %v6128_v18 = vpop.permute.xlu0 %6127  ;;  %vm13338_vm1 = vmmov %vm13312_vm2 }
 0x591   :  { %9290 = vmatprep.mubr.msk.bf16.mxu0 %vm10247_vm12, %v10246_v63  ;;  %v6558_v33 = vrot.slane %v6556_v50, 1  ;;  %v6196_v1 = vsel %vm2113_vm5, %v12485_v39, %v6128_v18 }
 0x592   :  { %v6219_v30 = vsel %vm13332_vm6, %v6196_v1, %v6174_v40  ;;  %v6176_v39 = vpop.permute.xlu1 %6175  ;;  %vm13343_vm6 = vmmov %vm13323_vm0 }
 0x593   :  { %v6559_v41 = vsel %vm1599_vm4, %v6555_v6, %v6558_v33  ;;  %v6562_v45 = vor.u32 %v6560_v3, %v6558_v33  ;;  %vm13333_vm4 = vmmov %vm13323_vm0 }
 0x594   :  { %v6130_v51 = vpop.permute.xlu0 %6129 }
 0x595   :  { %v6198_v59 = vsel %vm2113_vm5, %v12136_v24, %v6130_v51 }
 0x596   :  { %v6221_v62 = vsel %vm13334_vm13, %v6198_v59, %v6176_v39  ;;  %v6178_v57 = vpop.permute.xlu1 %6177  ;;  %vm13345_vm13 = vmmov %vm13323_vm0 }
 0x598   :  { %9291 = vmatmul.mubr.msk.bf16.gmra.mrb[92].mxu0 %vm13329_vm14, %v6552_v37  ;;  %v6132_v46 = vpop.permute.xlu0 %6131  ;;  %vm13340_vm14 = vmmov %vm13338_vm1 }
 0x599   :  { %9294 = vmatprep.mubr.msk.bf16.mxu0 %vm10247_vm12, %v10246_v63  ;;  %v6200_v24 = vsel %vm2113_vm5, %v12219_v7, %v6132_v46 }
 0x59a   :  { %v6223_v42 = vsel %vm13312_vm2, %v6200_v24, %v6178_v57  ;;  %v6180_v2 = vpop.permute.xlu1 %6179  ;;  %vm13347_vm2 = vmmov %vm13343_vm6 }
 0x59c   :  { %v6134_v20 = vpop.permute.xlu0 %6133 }
 0x59d   :  { %v6202_v7 = vsel %vm2113_vm5, %v12301_v34, %v6134_v20 }
 0x59e   :  { %v6225_v10 = vsel %vm13336_vm11, %v6202_v7, %v6180_v2  ;;  %v6182_v16 = vpop.permute.xlu1 %6181  ;;  %vm13349_vm11 = vmmov %vm13347_vm2  ;;  %v9861_v7 = vld [vmem:[#allocation20] sm:$0xff]  }
 0x5a0   :  { %9295 = vmatmul.mubr.msk.bf16.gmra.mrb[96].mxu0 %vm13330_vm8, %v6559_v41  ;;  %v6136_v47 = vpop.permute.xlu0 %6135  ;;  %vm13341_vm8 = vmmov %vm13323_vm0 }
 0x5a1   :  { %9298 = vmatprep.mubr.msk.bf16.mxu0 %vm10247_vm12, %v10246_v63  ;;  %v6204_v44 = vsel %vm2113_vm5, %v12510_v60, %v6136_v47 }
 0x5a2   :  { %v6227_v9 = vsel %vm13338_vm1, %v6204_v44, %v6182_v16  ;;  %v6184_v27 = vpop.permute.xlu1 %6183 }
 0x5a5   :  { %v6138_v34 = vpop.permute.xlu0 %6137 }
 0x5a6   :  { %v6206_v4 = vsel %vm2113_vm5, %v12519_v48, %v6138_v34  ;;  %v6186_v60 = vpop.permute.xlu1 %6185 }
 0x5a7   :  { %v6229_v43 = vsel %vm13340_vm14, %v6206_v4, %v6184_v27 }
 0x5a8   :  { %9299 = vmatmul.mubr.msk.bf16.gmra.mrb[100].mxu0 %vm13331_vm9, %v6562_v45  ;;  %vm13342_vm9 = vmmov %vm13338_vm1  ;;  %v9854_v45 = vld [vmem:[#allocation5 + $0x50] ss:$0 sps:$4 sm:$0x11]  }
 0x5a9   :  { %9314 = vmatprep.mubr.msk.bf16.mxu0 %vm10247_vm12, %v10246_v63  ;;  %v6140_v21 = vpop.permute.xlu0 %6139 }
 0x5aa   :  { %v6208_v28 = vsel %vm2113_vm5, %v12414_v58, %v6140_v21  ;;  %v6188_v35 = vpop.permute.xlu1 %6187 }
 0x5ab   :  { %v6231_v19 = vsel %vm13342_vm9, %v6208_v28, %v6186_v60  ;;  %vm13355_vm9 = vmmov %vm13347_vm2 }
 0x5ad   :  { %v6142_v22 = vpop.permute.xlu0 %6141 }
 0x5ae   :  { %v6210_v48 = vsel %vm2113_vm5, %v12543_v11, %v6142_v22  ;;  %v6190_v0 = vpop.permute.xlu1 %6189 }
 0x5b0   :  { %9315 = vmatmul.mubr.msk.bf16.vlgmr.msra.gmra.mrb[104].mxu0 %vm13333_vm4, %v6219_v30  ;;  %vm13344_vm4 = vmmov %vm13338_vm1 }
 0x5b1   :  { %9359 = vmatpush3.bf16.msra.mxu0 %v9853_v53  ;;  %9318 = vmatprep.mubr.msk.bf16.mxu0 %vm10247_vm12, %v10246_v63  ;;  %v6144_v15 = vpop.permute.xlu0 %6143  ;;  %v6233_v55 = vsel %vm13344_vm4, %v6210_v48, %v6188_v35  ;;  %vm13357_vm4 = vmmov %vm13347_vm2 }
 0x5b2   :  { %9360 = vmatprep.subr.bf16.mxu0 %v10246_v63  ;;  %v6212_v49 = vsel %vm2113_vm5, %v12560_v31, %v6144_v15 }
 0x5b3   :  { %v6192_v50 = vpop.permute.xlu1 %6191 }
 0x5b5   :  { %9361 = vmatpush3.bf16.msra.mxu0 %v9855_v5  ;;  %v6146_v58 = vpop.permute.xlu0 %6145 }
 0x5b6   :  { %9362 = vmatprep.subr.bf16.mxu0 %v10246_v63  ;;  %v6214_v33 = vsel %vm2113_vm5, %v12571_v38, %v6146_v58 }
 0x5b7   :  { %v6194_v11 = vpop.permute.xlu1 %6193 }
 0x5b8   :  { %9319 = vmatmul.mubr.msk.bf16.gmra.mrb[108].mxu0 %vm13323_vm0, %v6221_v62  ;;  %vm13346_vm0 = vmmov %vm13338_vm1 }
 0x5b9   :  { %9322 = vmatprep.mubr.msk.bf16.mxu0 %vm10247_vm12, %v10246_v63  ;;  %9363 = vmatpush3.bf16.msra.mxu0 %v9856_v26  ;;  %v6235_v37 = vsel %vm13346_vm0, %v6212_v49, %v6190_v0  ;;  %v6148_v6 = vpop.permute.xlu0 %6147  ;;  %vm13351_vm1 = vmmov %vm13346_vm0 }
 0x5ba   :  { %9364 = vmatprep.subr.bf16.mxu0 %v10246_v63  ;;  %v6217_v18 = vsel %vm2113_vm5, %v9854_v45, %v6148_v6  ;;  %vm13353_vm14 = vmmov %vm13346_vm0 }
 0x5bb   :  { %v7099_v31 = vpop.permute.xlu1 %7098 }
 0x5bc   :  { %v7167_v51 = vsel %vm2113_vm5, %v12597_v23, %v7099_v31 }
 0x5bd   :  { %9365 = vmatpush3.bf16.msra.mxu0 %v9857_v17  ;;  %v7097_v41 = vpop.permute.xlu0 %7096 }
 0x5be   :  { %9366 = vmatprep.subr.bf16.mxu0 %v10246_v63  ;;  %v7165_v53 = vsel %vm2113_vm5, %v12608_v8, %v7097_v41 }
 0x5bf   :  { %v7145_v40 = vpop.permute.xlu1 %7144 }
 0x5c0   :  { %9323 = vmatmul.mubr.msk.bf16.gmra.mrb[112].mxu0 %vm13335_vm7, %v6223_v42  ;;  %vm13348_vm7 = vmmov %vm13346_vm0  ;;  %v7190_v5 = vsel %vm13353_vm14, %v7167_v51, %v7145_v40 }
 0x5c1   :  { %9326 = vmatprep.mubr.msk.bf16.mxu0 %vm10247_vm12, %v10246_v63  ;;  %9367 = vmatpush3.bf16.msra.mxu0 %v9858_v14  ;;  %v6237_v3 = vsel %vm13348_vm7, %v6214_v33, %v6192_v50  ;;  %v7143_v1 = vpop.permute.xlu0 %7142  ;;  %v7234_v62 = vrot.slane %v7190_v5, 1  ;;  %v9862_v50 = vld [vmem:[#allocation20 + $0x8] sm:$0xff]   ;;  %v9863_v5 = vld [vmem:[#allocation20 + $0x10] sm:$0xff]   ;;  %vm13365_vm14 = vmmov %vm13351_vm1 }
 0x5c2   :  { %9368 = vmatprep.subr.bf16.mxu0 %v10246_v63  ;;  %v7188_v38 = vsel %vm13351_vm1, %v7165_v53, %v7143_v1 }
 0x5c3   :  { %v7233_v26 = vrot.slane %v7188_v38, 1  ;;  %v7147_v23 = vpop.permute.xlu1 %7146 }
 0x5c5   :  { %9369 = vmatpush3.bf16.msra.mxu0 %v9859_v36  ;;  %v7101_v59 = vpop.permute.xlu0 %7100  ;;  %v7235_v14 = vsel %vm1967_vm3, %v7233_v26, %v7234_v62 }
 0x5c6   :  { %9414 = vmatprep.subr.bf16.mxu0 %v10246_v63  ;;  %v7169_v46 = vsel %vm2113_vm5, %v12605_v56, %v7101_v59 }
 0x5c7   :  { %v7149_v56 = vpop.permute.xlu1 %7148 }
 0x5c8   :  { %9327 = vmatmul.mubr.msk.bf16.gmra.mrb[116].mxu0 %vm13337_vm15, %v6225_v10  ;;  %vm13350_vm15 = vmmov %vm13346_vm0 }
 0x5c9   :  { %9330 = vmatprep.mubr.msk.bf16.mxu0 %vm10247_vm12, %v10246_v63  ;;  %v6239_v30 = vsel %vm13350_vm15, %v6217_v18, %v6194_v11  ;;  %v7103_v42 = vpop.permute.xlu0 %7102 }
 0x5ca   :  { %v7171_v36 = vsel %vm2113_vm5, %v12641_v29, %v7103_v42 }
 0x5cb   :  { %v7151_v27 = vpop.permute.xlu1 %7150 }
 0x5cd   :  { %v7105_v47 = vpop.permute.xlu0 %7104 }
 0x5ce   :  { %v7173_v29 = vsel %vm2113_vm5, %v12656_v61, %v7105_v47 }
 0x5cf   :  { %v7153_v15 = vpop.permute.xlu1 %7152 }
 0x5d0   :  { %9331 = vmatmul.mubr.msk.bf16.gmra.mrb[120].mxu0 %vm13339_vm10, %v6227_v9  ;;  %vm13352_vm10 = vmmov %vm13347_vm2 }
 0x5d1   :  { %9334 = vmatprep.mubr.msk.bf16.mxu0 %vm10247_vm12, %v10246_v63  ;;  %v7107_v60 = vpop.permute.xlu0 %7106 }
 0x5d2   :  { %v7175_v61 = vsel %vm2113_vm5, %v12665_v52, %v7107_v60 }
 0x5d3   :  { %v7155_v52 = vpop.permute.xlu1 %7154 }
 0x5d5   :  { %v7109_v58 = vpop.permute.xlu0 %7108 }
 0x5d7   :  { %v7157_v1 = vpop.permute.xlu1 %7156 }
 0x5d8   :  { %9335 = vmatmul.mubr.msk.bf16.gmra.mrb[124].mxu0 %vm13341_vm8, %v6229_v43  ;;  %vm13354_vm8 = vmmov %vm13346_vm0 }
 0x5d9   :  { %9338 = vmatprep.mubr.msk.bf16.mxu0 %vm10247_vm12, %v10246_v63  ;;  %v7192_v57 = vsel %vm13354_vm8, %v7169_v46, %v7147_v23  ;;  %v7111_v33 = vpop.permute.xlu0 %7110 }
 0x5da   :  { %v7236_v20 = vrot.slane %v7192_v57, 1 }
 0x5db   :  { %v7159_v59 = vpop.permute.xlu1 %7158 }
 0x5dc   :  { %v7237_v2 = vsel %vm1967_vm3, %v7234_v62, %v7236_v20 }
 0x5df   :  { %v7161_v57 = vpop.permute.xlu1 %7160 }
 0x5e0   :  { %9339 = vmatmul.mubr.msk.bf16.gmra.mrb[128].mxu0 %vm13343_vm6, %v6231_v19  ;;  %vm13356_vm6 = vmmov %vm13346_vm0 }
 0x5e1   :  { %9342 = vmatprep.mubr.msk.bf16.mxu0 %vm10247_vm12, %v10246_v63  ;;  %v7194_v10 = vsel %vm13356_vm6, %v7171_v36, %v7149_v56  ;;  %v9860_v36 = vld [vmem:[#allocation5 + $0x58] ss:$0 sps:$4 sm:$0x33]  }
 0x5e2   :  { %v7238_v44 = vrot.slane %v7194_v10, 1 }
 0x5e3   :  { %v7163_v10 = vpop.permute.xlu1 %7162 }
 0x5e4   :  { %v7239_v43 = vsel %vm1967_vm3, %v7236_v20, %v7238_v44 }
 0x5e8   :  { %9343 = vmatmul.mubr.msk.bf16.gmra.mrb[132].mxu0 %vm13345_vm13, %v6233_v55  ;;  %vm13358_vm13 = vmmov %vm13346_vm0 }
 0x5e9   :  { %9346 = vmatprep.mubr.msk.bf16.mxu0 %vm10247_vm12, %v10246_v63  ;;  %v7196_v21 = vsel %vm13358_vm13, %v7173_v29, %v7151_v27  ;;  %vm13359_vm0 = vmmov %vm13347_vm2 }
 0x5ea   :  { %v7240_v28 = vrot.slane %v7196_v21, 1  ;;  %vm13361_vm7 = vmmov %vm13359_vm0 }
 0x5eb   :  { %vm13363_vm15 = vmmov %vm13359_vm0 }
 0x5ec   :  { %v7241_v0 = vsel %vm1967_vm3, %v7238_v44, %v7240_v28  ;;  %vm13366_vm8 = vmmov %vm13359_vm0 }
 0x5ed   :  { %vm13368_vm6 = vmmov %vm13359_vm0 }
 0x5ee   :  { %vm13370_vm13 = vmmov %vm13359_vm0 }
 0x5f0   :  { %9347 = vmatmul.mubr.msk.bf16.gmra.mrb[136].mxu0 %vm13347_vm2, %v6235_v37  ;;  %vm13360_vm2 = vmmov %vm13351_vm1  ;;  %v7177_v37 = vsel %vm2113_vm5, %v12677_v32, %v7109_v58  ;;  %v7179_v32 = vsel %vm2113_vm5, %v12687_v25, %v7111_v33 }
 0x5f1   :  { %9350 = vmatprep.mubr.msk.bf16.mxu0 %vm10247_vm12, %v10246_v63  ;;  %v7198_v55 = vsel %vm13360_vm2, %v7175_v61, %v7153_v15  ;;  %v7202_v40 = vsel %vm13351_vm1, %v7179_v32, %v7157_v1 }
 0x5f2   :  { %v7242_v49 = vrot.slane %v7198_v55, 1  ;;  %v7246_v38 = vrot.slane %v7202_v40, 1 }
 0x5f4   :  { %v7243_v6 = vsel %vm1967_vm3, %v7240_v28, %v7242_v49 }
 0x5f8   :  { %9351 = vmatmul.mubr.msk.bf16.gmra.mrb[140].mxu0 %vm13349_vm11, %v6237_v3  ;;  %vm13362_vm11 = vmmov %vm13351_vm1 }
 0x5f9   :  { %9354 = vmatprep.mubr.msk.bf16.mxu0 %vm10247_vm12, %v10246_v63  ;;  %v7200_v11 = vsel %vm13362_vm11, %v7177_v37, %v7155_v52 }
 0x5fa   :  { %v7244_v3 = vrot.slane %v7200_v11, 1 }
 0x5fc   :  { %v7245_v53 = vsel %vm1967_vm3, %v7242_v49, %v7244_v3  ;;  %v7247_v25 = vsel %vm1967_vm3, %v7244_v3, %v7246_v38 }
 0x600   :  { %9355 = vmatmul.mubr.msk.bf16.gmra.mrb[144].mxu0 %vm13352_vm10, %v6239_v30  ;;  %vm13364_vm10 = vmmov %vm13359_vm0  ;;  %v7113_v30 = vpop.permute.xlu0 %7112 }
 0x601   :  { %9370 = vmatprep.mubr.msk.bf16.mxu0 %vm10247_vm12, %v10246_v63  ;;  %v7181_v51 = vsel %vm2113_vm5, %v12700_v12, %v7113_v30 }
 0x604   :  { %v12858_v39 = vpop.f32.mrb[60].mxu0 }
 0x605   :  { %v9260_v8 = vpop.f32.mrb[61].mxu0 }
 0x606   :  { %v12862_v17 = vpop.f32.mrb[62].mxu0  ;;  %v7204_v8 = vsel %vm13365_vm14, %v7181_v51, %v7159_v59 }
 0x607   :  { %v9261_v24 = vpop.f32.mrb[63].mxu0  ;;  %v7248_v12 = vrot.slane %v7204_v8, 1 }
 0x608   :  { %9371 = vmatmul.mubr.msk.bf16.vlgmr.msra.gmra.mrb[148].mxu0 %vm13355_vm9, %v7235_v14  ;;  %v7115_v24 = vpop.permute.xlu0 %7114  ;;  %vm13367_vm9 = vmmov %vm13351_vm1 }
 0x609   :  { %9374 = vmatprep.mubr.msk.bf16.mxu0 %vm10247_vm12, %v10246_v63  ;;  %9415 = vmatpush3.bf16.msra.mxu0 %v9861_v7  ;;  %v7183_v23 = vsel %vm2113_vm5, %v12714_v54, %v7115_v24  ;;  %v7249_v42 = vsel %vm1967_vm3, %v7246_v38, %v7248_v12 }
 0x60a   :  { %9416 = vmatprep.subr.bf16.mxu0 %v10246_v63  ;;  %v7206_v20 = vsel %vm13367_vm9, %v7183_v23, %v7161_v57 }
 0x60b   :  { %v7250_v56 = vrot.slane %v7206_v20, 1 }
 0x60c   :  { %v7117_v7 = vpop.permute.xlu0 %7116 }
 0x60d   :  { %9417 = vmatpush3.bf16.msra.mxu0 %v9862_v50 }
 0x60e   :  { %9418 = vmatprep.subr.bf16.mxu0 %v10246_v63 }
 0x610   :  { %9375 = vmatmul.mubr.msk.bf16.gmra.mrb[152].mxu0 %vm13357_vm4, %v7237_v2  ;;  %v7186_v2 = vsel %vm2113_vm5, %v9860_v36, %v7117_v7  ;;  %vm13369_vm4 = vmmov %vm13351_vm1 }
 0x611   :  { %9378 = vmatprep.mubr.msk.bf16.mxu0 %vm10247_vm12, %v10246_v63  ;;  %9419 = vmatpush3.bf16.msra.mxu0 %v9863_v5  ;;  %v7208_v29 = vsel %vm13369_vm4, %v7186_v2, %v7163_v10  ;;  %vm13371_vm5 = vmmov %vm13359_vm0 }
 0x612   :  { %9420 = vmatprep.subr.bf16.mxu0 %v10246_v63  ;;  %v7252_v27 = vrot.slane %v7208_v29, 1 }
 0x614   :  { %v7253_v21 = vsel %vm1967_vm3, %v7250_v56, %v7252_v27 }
 0x616   :  { %v12877_v16 = vpop.f32.mrb[64].mxu0 }
 0x617   :  { %v9264_v9 = vpop.f32.mrb[65].mxu0 }
 0x618   :  { %v12881_v34 = vpop.f32.mrb[66].mxu0  ;;  %9379 = vmatmul.mubr.msk.bf16.gmra.mrb[156].mxu0 %vm13359_vm0, %v7239_v43  ;;  %v7251_v9 = vsel %vm1967_vm3, %v7248_v12, %v7250_v56  ;;  %v9864_v43 = vld [vmem:[#allocation20 + $0x18] sm:$0xff]  }
 0x619   :  { %v9265_v4 = vpop.f32.mrb[67].mxu0  ;;  %9382 = vmatprep.mubr.msk.bf16.mxu0 %vm10247_vm12, %v10246_v63  ;;  %9421 = vmatpush3.bf16.msra.mxu0 %v9864_v43 }
 0x61e   :  { %v12888_v22 = vpop.f32.mrb[68].mxu0 }
 0x61f   :  { %v9268_v19 = vpop.f32.mrb[69].mxu0 }
 0x620   :  { %v12892_v35 = vpop.f32.mrb[70].mxu0  ;;  %9383 = vmatmul.mubr.msk.bf16.gmra.mrb[160].mxu0 %vm13361_vm7, %v7241_v0 }
 0x621   :  { %v9269_v48 = vpop.f32.mrb[71].mxu0  ;;  %9386 = vmatprep.mubr.msk.bf16.mxu0 %vm10247_vm12, %v10246_v63 }
 0x628   :  { %9387 = vmatmul.mubr.msk.bf16.gmra.mrb[164].mxu0 %vm13363_vm15, %v7243_v6 }
 0x629   :  { %9390 = vmatprep.mubr.msk.bf16.mxu0 %vm10247_vm12, %v10246_v63 }
 0x62d   :  { %v12907_v41 = vpop.f32.mrb[72].mxu0 }
 0x62e   :  { %v9272_v45 = vpop.f32.mrb[73].mxu0 }
 0x62f   :  { %v12909_v31 = vpop.f32.mrb[74].mxu0 }
 0x630   :  { %v9273_v18 = vpop.f32.mrb[75].mxu0  ;;  %9391 = vmatmul.mubr.msk.bf16.gmra.mrb[168].mxu0 %vm13364_vm10, %v7245_v53 }
 0x631   :  { %9394 = vmatprep.mubr.msk.bf16.mxu0 %vm10247_vm12, %v10246_v63 }
 0x638   :  { %v12920_v26 = vpop.f32.mrb[76].mxu0  ;;  %9395 = vmatmul.mubr.msk.bf16.gmra.mrb[172].mxu0 %vm13366_vm8, %v7247_v25 }
 0x639   :  { %v9276_v62 = vpop.f32.mrb[77].mxu0  ;;  %9398 = vmatprep.mubr.msk.bf16.mxu0 %vm10247_vm12, %v10246_v63 }
 0x63a   :  { %v12925_v46 = vpop.f32.mrb[78].mxu0 }
 0x63b   :  { %v9277_v14 = vpop.f32.mrb[79].mxu0 }
 0x640   :  { %9399 = vmatmul.mubr.msk.bf16.gmra.mrb[176].mxu0 %vm13368_vm6, %v7249_v42 }
 0x641   :  { %9402 = vmatprep.mubr.msk.bf16.mxu0 %vm10247_vm12, %v10246_v63 }
 0x645   :  { %v12938_v47 = vpop.f32.mrb[80].mxu0 }
 0x646   :  { %v9280_v44 = vpop.f32.mrb[81].mxu0 }
 0x647   :  { %v12940_v54 = vpop.f32.mrb[82].mxu0 }
 0x648   :  { %v9281_v4 = vpop.f32.mrb[83].mxu0  ;;  %9403 = vmatmul.mubr.msk.bf16.gmra.mrb[180].mxu0 %vm13370_vm13, %v7251_v9 }
 0x649   :  { %9406 = vmatprep.mubr.msk.bf16.mxu0 %vm10247_vm12, %v10246_v63  ;;  %v7738_v4 = vld [vmem:[#allocation26 + $0x8] sm:$0xff] }
 0x64a   :  { %vm7759_vm3 = vcmp.gt.f32.partialorder %v7738_v4, 0.0 }
 0x650   :  { %9407 = vmatmul.mubr.msk.bf16.gmra.mrb[184].mxu0 %vm13371_vm5, %v7253_v21  ;;  %v7739_v21 = vld [vmem:[#allocation26 + $0x10] sm:$0xff] }
 0x651   :  { %9410 = vmatprep.mubr.msk.bf16.mxu0 %vm10247_vm12, %v10246_v63  ;;  %vm7760_vm2 = vcmp.gt.f32.partialorder %v7739_v21, 0.0 }
 0x658   :  { %9411 = vmatmul.mubr.msk.bf16.gmra.mrb[188].mxu0 %vm13359_vm0, %v7252_v27 }
 0x659   :  { %9422 = vmatprep.mubr.msk.bf16.mxu0 %vm10247_vm12, %v10246_v63 }
 0x65b   :  { %v12954_v60 = vpop.f32.mrb[84].mxu0 }
 0x65c   :  { %v9284_v28 = vpop.f32.mrb[85].mxu0 }
 0x65d   :  { %v12956_v19 = vpop.f32.mrb[86].mxu0  ;;  %v7742_v28 = vld [vmem:[#allocation26 + $0x28] sm:$0xff] }
 0x65e   :  { %v9285_v61 = vpop.f32.mrb[87].mxu0  ;;  %vm7763_vm7 = vcmp.gt.f32.partialorder %v7742_v28, 0.0 }
 0x663   :  { %v12958_v48 = vpop.f32.mrb[88].mxu0 }
 0x664   :  { %v9288_v15 = vpop.f32.mrb[89].mxu0 }
 0x665   :  { %v12960_v0 = vpop.f32.mrb[90].mxu0  ;;  %v7781_v15 = vsel %vm7760_vm2, 1, %v10245_v13 }
 0x666   :  { %v9289_v55 = vpop.f32.mrb[91].mxu0 }
 0x66b   :  { %v12962_v58 = vpop.f32.mrb[92].mxu0 }
 0x66c   :  { %v9292_v49 = vpop.f32.mrb[93].mxu0 }
 0x66d   :  { %v12964_v50 = vpop.f32.mrb[94].mxu0 }
 0x66e   :  { %v9293_v37 = vpop.f32.mrb[95].mxu0 }
 0x66f   :  { %v7784_v37 = vsel %vm7763_vm7, 1, %v10245_v13 }
 0x673   :  { %v12966_v52 = vpop.f32.mrb[96].mxu0 }
 0x674   :  { %v9296_v6 = vpop.f32.mrb[97].mxu0 }
 0x675   :  { %v12968_v11 = vpop.f32.mrb[98].mxu0  ;;  %v7747_v6 = vld [vmem:[#allocation26 + $0x50] sm:$0xff] }
 0x676   :  { %v9297_v33 = vpop.f32.mrb[99].mxu0  ;;  %vm7768_vm11 = vcmp.gt.f32.partialorder %v7747_v6, 0.0 }
 0x677   :  { %v7737_v33 = vld [vmem:[#allocation26] sm:$0xff] }
 0x678   :  { %vm7758_vm15 = vcmp.gt.f32.partialorder %v7737_v33, 0.0 }
 0x67b   :  { %v12970_v3 = vpop.f32.mrb[100].mxu0 }
 0x67c   :  { %v9300_v45 = vpop.f32.mrb[101].mxu0 }
 0x67d   :  { %v6749_v32 = vpop.f32.mrb[102].mxu0  ;;  %v7741_v45 = vld [vmem:[#allocation26 + $0x20] sm:$0xff] }
 0x67e   :  { %v9301_v18 = vpop.f32.mrb[103].mxu0  ;;  %v7749_v32 = vld [vmem:[#allocation26 + $0x60] sm:$0xff]  ;;  %vm7762_vm1 = vcmp.gt.f32.partialorder %v7741_v45, 0.0  ;;  %v7746_v45 = vld [vmem:[#allocation26 + $0x48] sm:$0xff] }
 0x67f   :  { %v7743_v18 = vld [vmem:[#allocation26 + $0x30] sm:$0xff]  ;;  %vm7770_vm10 = vcmp.gt.f32.partialorder %v7749_v32, 0.0  ;;  %v7757_v32 = vld [vmem:[#allocation26 + $0xa0] sm:$0x3] }
 0x680   :  { %vm7764_vm14 = vcmp.gt.f32.partialorder %v7743_v18, 0.0 }
 0x683   :  { %v6844_v1 = vpop.f32.mrb[104].mxu0 }
 0x684   :  { %v12973_v53 = vadd.f32 %v6844_v1, %v12858_v39  ;;  %v9316_v40 = vpop.f32.mrb[105].mxu0  ;;  %v7789_v1 = vsel %vm7768_vm11, 1, %v10245_v13  ;;  %vm7767_vm11 = vcmp.gt.f32.partialorder %v7746_v45, 0.0 }
 0x685   :  { %v6847_v30 = vpop.f32.mrb[106].mxu0 }
 0x686   :  { %v12976_v38 = vadd.f32 %v6847_v30, %v12862_v17  ;;  %v9317_v51 = vpop.f32.mrb[107].mxu0 }
 0x68b   :  { %v6852_v5 = vpop.f32.mrb[108].mxu0 }
 0x68c   :  { %v12979_v59 = vadd.f32 %v6852_v5, %v12877_v16  ;;  %v9320_v25 = vpop.f32.mrb[109].mxu0  ;;  %v7751_v5 = vld [vmem:[#allocation26 + $0x70] sm:$0xff] }
 0x68d   :  { %v6855_v8 = vpop.f32.mrb[110].mxu0  ;;  %v7748_v25 = vld [vmem:[#allocation26 + $0x58] sm:$0xff]  ;;  %vm7772_vm8 = vcmp.gt.f32.partialorder %v7751_v5, 0.0  ;;  %v7788_v5 = vsel %vm7767_vm11, 1, %v10245_v13 }
 0x68e   :  { %v12982_v62 = vadd.f32 %v6855_v8, %v12881_v34  ;;  %v9321_v24 = vpop.f32.mrb[111].mxu0  ;;  %vm7769_vm9 = vcmp.gt.f32.partialorder %v7748_v25, 0.0 }
 0x693   :  { %v6860_v14 = vpop.f32.mrb[112].mxu0 }
 0x694   :  { %v12985_v39 = vadd.f32 %v6860_v14, %v12888_v22  ;;  %v9324_v12 = vpop.f32.mrb[113].mxu0 }
 0x695   :  { %v6863_v23 = vpop.f32.mrb[114].mxu0  ;;  %v7791_v12 = vsel %vm7770_vm10, 1, %v10245_v13  ;;  %vm13372_vm10 = vcmask 523264  }
 0x696   :  { %v12988_v17 = vadd.f32 %v6863_v23, %v12892_v35  ;;  %v9325_v57 = vpop.f32.mrb[115].mxu0  ;;  %v7785_v23 = vsel %vm7764_vm14, 1, %v10245_v13  ;;  %vm13373_vm14 = vmmov %vm13372_vm10 }
 0x697   :  { %v9865_v57 = vld [vmem:[#allocation23] sm:$0xff]  }
 0x698   :  { %9467 = vmatpush3.bf16.msra.mxu1 %v9865_v57 }
 0x699   :  { %9468 = vmatprep.subr.bf16.mxu1 %v10246_v63 }
 0x69b   :  { %v6868_v42 = vpop.f32.mrb[116].mxu0 }
 0x69c   :  { %v12991_v16 = vadd.f32 %v6868_v42, %v12907_v41  ;;  %v9328_v20 = vpop.f32.mrb[117].mxu0  ;;  %v7753_v42 = vld [vmem:[#allocation26 + $0x80] sm:$0xff] }
 0x69d   :  { %v6871_v36 = vpop.f32.mrb[118].mxu0  ;;  %v7793_v20 = vsel %vm7772_vm8, 1, %v10245_v13  ;;  %vm7774_vm6 = vcmp.gt.f32.partialorder %v7753_v42, 0.0  ;;  %vm13374_vm8 = vmmov %vm13372_vm10 }
 0x69e   :  { %v12994_v34 = vadd.f32 %v6871_v36, %v12909_v31  ;;  %v9329_v7 = vpop.f32.mrb[119].mxu0  ;;  %v7790_v36 = vsel %vm7769_vm9, 1, %v10245_v13  ;;  %v7795_v4 = vsel %vm7774_vm6, 1, %v10245_v13  ;;  %vm13375_vm9 = vmmov %vm13374_vm8 }
 0x69f   :  { %vm13376_vm6 = vmmov %vm13374_vm8 }
 0x6a3   :  { %v6876_v56 = vpop.f32.mrb[120].mxu0 }
 0x6a4   :  { %v12997_v22 = vadd.f32 %v6876_v56, %v12920_v26  ;;  %v9332_v2 = vpop.f32.mrb[121].mxu0  ;;  %v7780_v26 = vsel %vm7759_vm3, 1, %v10245_v13 }
 0x6a5   :  { %v6879_v10 = vpop.f32.mrb[122].mxu0  ;;  %7804 = vperm.xlu1 %9652, %v7780_v26   ;;  %v7740_v2 = vld [vmem:[#allocation26 + $0x18] sm:$0xff]  ;;  %v7745_v26 = vld [vmem:[#allocation26 + $0x40] sm:$0xff] }
 0x6a6   :  { %v13000_v35 = vadd.f32 %v6879_v10, %v12925_v46  ;;  %v9333_v44 = vpop.f32.mrb[123].mxu0  ;;  %v7752_v10 = vld [vmem:[#allocation26 + $0x78] sm:$0xff]  ;;  %vm7761_vm13 = vcmp.gt.f32.partialorder %v7740_v2, 0.0  ;;  %vm7766_vm3 = vcmp.gt.f32.partialorder %v7745_v26, 0.0 }
 0x6a7   :  { %vm7773_vm5 = vcmp.gt.f32.partialorder %v7752_v10, 0.0  ;;  %v7787_v33 = vsel %vm7766_vm3, 1, %v10245_v13 }
 0x6a8   :  { %v7794_v21 = vsel %vm7773_vm5, 1, %v10245_v13 }
 0x6a9   :  { %7807 = vperm.xlu1 %9652, %v7781_v15   ;;  %v7755_v15 = vld [vmem:[#allocation26 + $0x90] sm:$0xff] }
 0x6aa   :  { %vm7776_vm7 = vcmp.gt.f32.partialorder %v7755_v15, 0.0 }
 0x6ab   :  { %v6884_v9 = vpop.f32.mrb[124].mxu0 }
 0x6ac   :  { %v13003_v41 = vadd.f32 %v6884_v9, %v12938_v47  ;;  %v9336_v29 = vpop.f32.mrb[125].mxu0 }
 0x6ad   :  { %v6887_v27 = vpop.f32.mrb[126].mxu0  ;;  %7816 = vperm.xlu1 %9652, %v7784_v37  }
 0x6ae   :  { %v13006_v31 = vadd.f32 %v6887_v27, %v12940_v54  ;;  %v9337_v43 = vpop.f32.mrb[127].mxu0 }
 0x6af   :  { %v7754_v43 = vld [vmem:[#allocation26 + $0x88] sm:$0xff] }
 0x6b0   :  { %vm7775_vm0 = vcmp.gt.f32.partialorder %v7754_v43, 0.0 }
 0x6b1   :  { %7831 = vperm.xlu1 %9652, %v7789_v1   ;;  %v7796_v6 = vsel %vm7775_vm0, 1, %v10245_v13 }
 0x6b3   :  { %v6892_v46 = vpop.f32.mrb[128].mxu0 }
 0x6b4   :  { %v13010_v61 = vadd.f32 %v6892_v46, %v12954_v60  ;;  %v9340_v47 = vpop.f32.mrb[129].mxu0  ;;  %v7779_v60 = vsel %vm7758_vm15, 1, %v10245_v13  ;;  %vm7778_vm15 = vcmp.gt.f32.partialorder %v7757_v32, 0.0 }
 0x6b5   :  { %v6895_v55 = vpop.f32.mrb[130].mxu0  ;;  %7801 = vperm.xlu0 %9651, %v7779_v60   ;;  %7837 = vperm.xlu1 %9652, %v7791_v12   ;;  %v7744_v47 = vld [vmem:[#allocation26 + $0x38] sm:$0xff]  ;;  %v7797_v60 = vsel %vm7776_vm7, 1, %v10245_v13  ;;  %v7799_v25 = vsel %vm7778_vm15, 1, %v10245_v13 }
 0x6b6   :  { %v13014_v54 = vadd.f32 %v6895_v55, %v12956_v19  ;;  %v9341_v49 = vpop.f32.mrb[131].mxu0  ;;  %v7783_v19 = vsel %vm7762_vm1, 1, %v10245_v13  ;;  %vm7765_vm2 = vcmp.gt.f32.partialorder %v7744_v47, 0.0  ;;  %v13057_v12 = vld [vmem:[#allocation19] ss:$0 sm:$0xff] }
 0x6b9   :  { %7813 = vperm.xlu0 %9651, %v7783_v19   ;;  %7843 = vperm.xlu1 %9652, %v7793_v20   ;;  %v7756_v19 = vld [vmem:[#allocation26 + $0x98] sm:$0xff] }
 0x6ba   :  { %vm7777_vm1 = vcmp.gt.f32.partialorder %v7756_v19, 0.0 }
 0x6bb   :  { %v6900_v40 = vpop.f32.mrb[132].mxu0 }
 0x6bc   :  { %v13021_v30 = vadd.f32 %v6900_v40, %v12958_v48  ;;  %v9344_v51 = vpop.f32.mrb[133].mxu0  ;;  %v7750_v48 = vld [vmem:[#allocation26 + $0x68] sm:$0xff] }
 0x6bd   :  { %v6903_v8 = vpop.f32.mrb[134].mxu0  ;;  %7819 = vperm.xlu0 %9651, %v7785_v23   ;;  %vm7771_vm4 = vcmp.gt.f32.partialorder %v7750_v48, 0.0  ;;  %7849 = vperm.xlu1 %9652, %v7795_v4  }
 0x6be   :  { %v13024_v24 = vadd.f32 %v6903_v8, %v12960_v0  ;;  %v9345_v14 = vpop.f32.mrb[135].mxu0  ;;  %v7792_v27 = vsel %vm7771_vm4, 1, %v10245_v13  ;;  %v7798_v8 = vsel %vm7777_vm1, 1, %v10245_v13  ;;  %vm13377_vm4 = vmmov %vm13376_vm6 }
 0x6bf   :  { %vm13379_vm5 = vmmov %vm13377_vm4 }
 0x6c0   :  { %vm13380_vm0 = vmmov %vm13377_vm4 }
 0x6c1   :  { %7834 = vperm.xlu0 %9651, %v7790_v36   ;;  %vm13381_vm3 = vmmov %vm13380_vm0 }
 0x6c2   :  { %vm13383_vm11 = vmmov %vm13380_vm0 }
 0x6c3   :  { %v6908_v7 = vpop.f32.mrb[136].mxu0  ;;  %vm13384_vm15 = vmmov %vm13380_vm0 }
 0x6c4   :  { %v13032_v0 = vadd.f32 %v6908_v7, %v12962_v58  ;;  %v9348_v56 = vpop.f32.mrb[137].mxu0  ;;  %v7782_v58 = vsel %vm7761_vm13, 1, %v10245_v13  ;;  %vm13378_vm13 = vmmov %vm13377_vm4 }
 0x6c5   :  { %v6911_v44 = vpop.f32.mrb[138].mxu0  ;;  %7840 = vperm.xlu0 %9651, %v7792_v27   ;;  %7810 = vperm.xlu1 %9652, %v7782_v58  }
 0x6c6   :  { %v13035_v9 = vadd.f32 %v6911_v44, %v12964_v50  ;;  %v9349_v29 = vpop.f32.mrb[139].mxu0 }
 0x6c9   :  { %7846 = vperm.xlu0 %9651, %v7794_v21   ;;  %7825 = vperm.xlu1 %9652, %v7787_v33  }
 0x6cb   :  { %v6916_v28 = vpop.f32.mrb[140].mxu0 }
 0x6cc   :  { %v13042_v50 = vadd.f32 %v6916_v28, %v12966_v52  ;;  %v9352_v46 = vpop.f32.mrb[141].mxu0  ;;  %v7786_v52 = vsel %vm7765_vm2, 1, %v10245_v13  ;;  %vm13382_vm2 = vmmov %vm13380_vm0 }
 0x6cd   :  { %v6919_v55 = vpop.f32.mrb[142].mxu0  ;;  %7852 = vperm.xlu0 %9651, %v7796_v6   ;;  %7855 = vperm.xlu1 %9652, %v7797_v60  }
 0x6ce   :  { %v13045_v49 = vadd.f32 %v6919_v55, %v12968_v11  ;;  %v9353_v37 = vpop.f32.mrb[143].mxu0 }
 0x6d1   :  { %7822 = vperm.xlu0 %9651, %v7786_v52   ;;  %7861 = vperm.xlu1 %9652, %v7799_v25  }
 0x6d3   :  { %v6924_v18 = vpop.f32.mrb[144].mxu0 }
 0x6d4   :  { %v13052_v11 = vadd.f32 %v6924_v18, %v12970_v3  ;;  %v9356_v1 = vpop.f32.mrb[145].mxu0 }
 0x6d5   :  { %v6927_v40 = vpop.f32.mrb[146].mxu0  ;;  %7828 = vperm.xlu0 %9651, %v7788_v5  }
 0x6d6   :  { %v9357_v51 = vpop.f32.mrb[147].mxu0 }
 0x6d9   :  { %7858 = vperm.xlu0 %9651, %v7798_v8  }
 0x6db   :  { %v7357_v14 = vpop.f32.mrb[148].mxu0 }
 0x6dc   :  { %v7443_v3 = vadd.f32 %v7357_v14, %v12973_v53  ;;  %v9372_v23 = vpop.f32.mrb[149].mxu0 }
 0x6dd   :  { %v7360_v57 = vpop.f32.mrb[150].mxu0 }
 0x6de   :  { %v7471_v42 = vadd.f32 %v13057_v12, %v7443_v3  ;;  %v7444_v48 = vadd.f32 %v7360_v57, %v12976_v38  ;;  %v9373_v20 = vpop.f32.mrb[151].mxu0 }
 0x6e0   :  { %v7472_v36 = vadd.f32 %v13057_v12, %v7444_v48  ;;  %v7492_v7 = vmax.f32 %v7471_v42, 0.0 }
 0x6e2   :  { %v7493_v56 = vmax.f32 %v7472_v36, 0.0 }
 0x6e3   :  { %v7365_v2 = vpop.f32.mrb[152].mxu0 }
 0x6e4   :  { %v7513_v10 = vpack.c.bf16 %v7493_v56, %v7492_v7  ;;  %v7445_v13 = vadd.f32 %v7365_v2, %v12979_v59  ;;  %v9376_v44 = vpop.f32.mrb[153].mxu0 }
 0x6e5   :  { %v7368_v29 = vpop.f32.mrb[154].mxu0 }
 0x6e6   :  { %v7473_v53 = vadd.f32 %v13057_v12, %v7445_v13  ;;  %v7446_v4 = vadd.f32 %v7368_v29, %v12982_v62  ;;  %v9377_v27 = vpop.f32.mrb[155].mxu0  ;;  %9423 = vmatmul.mubr.msk.bf16.vlgmr.msra.gmra.mrb[192].mxu0 %vm13372_vm10, %v7513_v10 }
 0x6e7   :  { %9426 = vmatprep.mubr.msk.bf16.mxu0 %vm10247_vm12, %v10246_v63 }
 0x6e8   :  { %v7474_v38 = vadd.f32 %v13057_v12, %v7446_v4  ;;  %v7494_v43 = vmax.f32 %v7473_v53, 0.0 }
 0x6ea   :  { %v7495_v26 = vmax.f32 %v7474_v38, 0.0 }
 0x6eb   :  { %v7373_v58 = vpop.f32.mrb[156].mxu0 }
 0x6ec   :  { %v7514_v21 = vpack.c.bf16 %v7495_v26, %v7494_v43  ;;  %v7447_v59 = vadd.f32 %v7373_v58, %v12985_v39  ;;  %v9380_v28 = vpop.f32.mrb[157].mxu0 }
 0x6ed   :  { %v7376_v46 = vpop.f32.mrb[158].mxu0 }
 0x6ee   :  { %v7475_v47 = vadd.f32 %v13057_v12, %v7447_v59  ;;  %v7448_v62 = vadd.f32 %v7376_v46, %v12988_v17  ;;  %v9381_v15 = vpop.f32.mrb[159].mxu0  ;;  %9427 = vmatmul.mubr.msk.bf16.gmra.mrb[196].mxu0 %vm13373_vm14, %v7514_v21  ;;  %vm13385_vm14 = vmmov %vm13380_vm0 }
 0x6ef   :  { %9430 = vmatprep.mubr.msk.bf16.mxu0 %vm10247_vm12, %v10246_v63 }
 0x6f0   :  { %v7476_v55 = vadd.f32 %v13057_v12, %v7448_v62  ;;  %v7496_v37 = vmax.f32 %v7475_v47, 0.0 }
 0x6f2   :  { %v7497_v6 = vmax.f32 %v7476_v55, 0.0 }
 0x6f3   :  { %v7381_v33 = vpop.f32.mrb[160].mxu0 }
 0x6f4   :  { %v7515_v45 = vpack.c.bf16 %v7497_v6, %v7496_v37  ;;  %v7449_v39 = vadd.f32 %v7381_v33, %v12991_v16  ;;  %v9384_v32 = vpop.f32.mrb[161].mxu0 }
 0x6f5   :  { %v7384_v52 = vpop.f32.mrb[162].mxu0 }
 0x6f6   :  { %v7477_v60 = vadd.f32 %v13057_v12, %v7449_v39  ;;  %v7450_v17 = vadd.f32 %v7384_v52, %v12994_v34  ;;  %v9385_v18 = vpop.f32.mrb[163].mxu0  ;;  %9431 = vmatmul.mubr.msk.bf16.gmra.mrb[200].mxu0 %vm13374_vm8, %v7515_v45  ;;  %vm13386_vm8 = vmmov %vm13380_vm0 }
 0x6f7   :  { %9434 = vmatprep.mubr.msk.bf16.mxu0 %vm10247_vm12, %v10246_v63 }
 0x6f8   :  { %v7478_v1 = vadd.f32 %v13057_v12, %v7450_v17  ;;  %v7498_v19 = vmax.f32 %v7477_v60, 0.0 }
 0x6fa   :  { %v7499_v40 = vmax.f32 %v7478_v1, 0.0 }
 0x6fb   :  { %v7389_v51 = vpop.f32.mrb[164].mxu0 }
 0x6fc   :  { %v7516_v5 = vpack.c.bf16 %v7499_v40, %v7498_v19  ;;  %v7451_v16 = vadd.f32 %v7389_v51, %v12997_v22  ;;  %v9388_v25 = vpop.f32.mrb[165].mxu0 }
 0x6fd   :  { %v7392_v8 = vpop.f32.mrb[166].mxu0 }
 0x6fe   :  { %v7479_v14 = vadd.f32 %v13057_v12, %v7451_v16  ;;  %v7452_v34 = vadd.f32 %v7392_v8, %v13000_v35  ;;  %v9389_v3 = vpop.f32.mrb[167].mxu0  ;;  %9435 = vmatmul.mubr.msk.bf16.gmra.mrb[204].mxu0 %vm13375_vm9, %v7516_v5 }
 0x6ff   :  { %9438 = vmatprep.mubr.msk.bf16.mxu0 %vm10247_vm12, %v10246_v63 }
 0x700   :  { %v7480_v23 = vadd.f32 %v13057_v12, %v7452_v34  ;;  %v7500_v57 = vmax.f32 %v7479_v14, 0.0 }
 0x702   :  { %v7501_v42 = vmax.f32 %v7480_v23, 0.0 }
 0x703   :  { %v7397_v48 = vpop.f32.mrb[168].mxu0 }
 0x704   :  { %v7517_v20 = vpack.c.bf16 %v7501_v42, %v7500_v57  ;;  %v7453_v22 = vadd.f32 %v7397_v48, %v13003_v41  ;;  %v9392_v36 = vpop.f32.mrb[169].mxu0 }
 0x705   :  { %v7400_v7 = vpop.f32.mrb[170].mxu0  ;;  %v9866_v36 = vld [vmem:[#allocation23 + $0x8] sm:$0xff]  }
 0x706   :  { %v7481_v56 = vadd.f32 %v13057_v12, %v7453_v22  ;;  %v7454_v35 = vadd.f32 %v7400_v7, %v13006_v31  ;;  %v9393_v2 = vpop.f32.mrb[171].mxu0  ;;  %9439 = vmatmul.mubr.msk.bf16.gmra.mrb[208].mxu0 %vm13376_vm6, %v7517_v20  ;;  %9469 = vmatpush3.bf16.msra.mxu1 %v9866_v36  ;;  %v9867_v7 = vld [vmem:[#allocation23 + $0x10] sm:$0xff]  }
 0x707   :  { %9442 = vmatprep.mubr.msk.bf16.mxu0 %vm10247_vm12, %v10246_v63  ;;  %9470 = vmatprep.subr.bf16.mxu1 %v10246_v63 }
 0x708   :  { %v7482_v10 = vadd.f32 %v13057_v12, %v7454_v35  ;;  %v7502_v13 = vmax.f32 %v7481_v56, 0.0 }
 0x70a   :  { %v7503_v44 = vmax.f32 %v7482_v10, 0.0  ;;  %9471 = vmatpush3.bf16.msra.mxu1 %v9867_v7  ;;  %v9868_v10 = vld [vmem:[#allocation23 + $0x18] sm:$0xff]  }
 0x70b   :  { %v7405_v29 = vpop.f32.mrb[172].mxu0  ;;  %9472 = vmatprep.subr.bf16.mxu1 %v10246_v63 }
 0x70c   :  { %v7518_v53 = vpack.c.bf16 %v7503_v44, %v7502_v13  ;;  %v7455_v41 = vadd.f32 %v7405_v29, %v13010_v61  ;;  %v9396_v4 = vpop.f32.mrb[173].mxu0 }
 0x70d   :  { %v7408_v27 = vpop.f32.mrb[174].mxu0 }
 0x70e   :  { %v7483_v38 = vadd.f32 %v13057_v12, %v7455_v41  ;;  %v7456_v31 = vadd.f32 %v7408_v27, %v13014_v54  ;;  %v9397_v43 = vpop.f32.mrb[175].mxu0  ;;  %9443 = vmatmul.mubr.msk.bf16.gmra.mrb[212].mxu0 %vm13377_vm4, %v7518_v53  ;;  %9473 = vmatpush3.bf16.msra.mxu1 %v9868_v10  ;;  %v13140_v41 = vld [vmem:[#allocation22] ss:$0 sm:$0xff]  ;;  %vm13387_vm4 = vmmov %vm13380_vm0 }
 0x70f   :  { %9446 = vmatprep.mubr.msk.bf16.mxu0 %vm10247_vm12, %v10246_v63 }
 0x710   :  { %v7484_v26 = vadd.f32 %v13057_v12, %v7456_v31  ;;  %v7504_v58 = vmax.f32 %v7483_v38, 0.0 }
 0x712   :  { %v7505_v21 = vmax.f32 %v7484_v26, 0.0 }
 0x713   :  { %v7413_v59 = vpop.f32.mrb[176].mxu0 }
 0x714   :  { %v7519_v28 = vpack.c.bf16 %v7505_v21, %v7504_v58  ;;  %v7457_v61 = vadd.f32 %v7413_v59, %v13021_v30  ;;  %v9400_v46 = vpop.f32.mrb[177].mxu0 }
 0x715   :  { %v7416_v47 = vpop.f32.mrb[178].mxu0 }
 0x716   :  { %v7485_v62 = vadd.f32 %v13057_v12, %v7457_v61  ;;  %v7458_v54 = vadd.f32 %v7416_v47, %v13024_v24  ;;  %v9401_v15 = vpop.f32.mrb[179].mxu0  ;;  %9447 = vmatmul.mubr.msk.bf16.gmra.mrb[216].mxu0 %vm13378_vm13, %v7519_v28  ;;  %vm13388_vm13 = vmmov %vm13380_vm0 }
 0x717   :  { %9450 = vmatprep.mubr.msk.bf16.mxu0 %vm10247_vm12, %v10246_v63 }
 0x718   :  { %v7486_v55 = vadd.f32 %v13057_v12, %v7458_v54  ;;  %v7506_v37 = vmax.f32 %v7485_v62, 0.0 }
 0x71a   :  { %v7507_v6 = vmax.f32 %v7486_v55, 0.0 }
 0x71b   :  { %v7421_v33 = vpop.f32.mrb[180].mxu0 }
 0x71c   :  { %v7520_v45 = vpack.c.bf16 %v7507_v6, %v7506_v37  ;;  %v7459_v30 = vadd.f32 %v7421_v33, %v13032_v0  ;;  %v9404_v39 = vpop.f32.mrb[181].mxu0 }
 0x71d   :  { %v7424_v32 = vpop.f32.mrb[182].mxu0 }
 0x71e   :  { %v7487_v52 = vadd.f32 %v13057_v12, %v7459_v30  ;;  %v7460_v24 = vadd.f32 %v7424_v32, %v13035_v9  ;;  %v9405_v60 = vpop.f32.mrb[183].mxu0  ;;  %9451 = vmatmul.mubr.msk.bf16.gmra.mrb[220].mxu0 %vm13379_vm5, %v7520_v45 }
 0x71f   :  { %9454 = vmatprep.mubr.msk.bf16.mxu0 %vm10247_vm12, %v10246_v63 }
 0x720   :  { %v7488_v17 = vadd.f32 %v13057_v12, %v7460_v24  ;;  %v7508_v18 = vmax.f32 %v7487_v52, 0.0 }
 0x722   :  { %v7509_v1 = vmax.f32 %v7488_v17, 0.0 }
 0x723   :  { %v7429_v19 = vpop.f32.mrb[184].mxu0 }
 0x724   :  { %v7521_v40 = vpack.c.bf16 %v7509_v1, %v7508_v18  ;;  %v7461_v0 = vadd.f32 %v7429_v19, %v13042_v50  ;;  %v9408_v51 = vpop.f32.mrb[185].mxu0 }
 0x725   :  { %v7432_v5 = vpop.f32.mrb[186].mxu0 }
 0x726   :  { %v7489_v16 = vadd.f32 %v13057_v12, %v7461_v0  ;;  %v7462_v9 = vadd.f32 %v7432_v5, %v13045_v49  ;;  %v9409_v25 = vpop.f32.mrb[187].mxu0  ;;  %9455 = vmatmul.mubr.msk.bf16.gmra.mrb[224].mxu0 %vm13380_vm0, %v7521_v40 }
 0x727   :  { %9458 = vmatprep.mubr.msk.bf16.mxu0 %vm10247_vm12, %v10246_v63 }
 0x728   :  { %v7490_v8 = vadd.f32 %v13057_v12, %v7462_v9  ;;  %v7510_v14 = vmax.f32 %v7489_v16, 0.0 }
 0x72a   :  { %v7511_v34 = vmax.f32 %v7490_v8, 0.0 }
 0x72b   :  { %v7437_v3 = vpop.f32.mrb[188].mxu0 }
 0x72c   :  { %v7522_v23 = vpack.c.bf16 %v7511_v34, %v7510_v14  ;;  %v7463_v50 = vadd.f32 %v7437_v3, %v13052_v11  ;;  %v9412_v57 = vpop.f32.mrb[189].mxu0  ;;  %v7805_v11 = vpop.permute.xlu1 %7804 }
 0x72d   :  { %v7440_v42 = vpop.f32.mrb[190].mxu0  ;;  %vm7864_vm7 = vcmp.eq.s32.totalorder %v7805_v11, 1 }
 0x72e   :  { %v7491_v48 = vadd.f32 %v13057_v12, %v7463_v50  ;;  %v9413_v20 = vpop.f32.mrb[191].mxu0  ;;  %9459 = vmatmul.mubr.msk.bf16.gmra.mrb[228].mxu0 %vm13381_vm3, %v7522_v23  ;;  %vm13389_vm3 = vmmov %vm13382_vm2 }
 0x72f   :  { %9462 = vmatprep.mubr.msk.bf16.mxu0 %vm10247_vm12, %v10246_v63 }
 0x730   :  { %v7512_v49 = vmax.f32 %v7491_v48, 0.0  ;;  %v7808_v12 = vpop.permute.xlu1 %7807 }
 0x731   :  { %vm7865_vm1 = vcmp.eq.s32.totalorder %v7808_v12, 1 }
 0x732   :  { %v7523_v22 = vpack.c.bf16 %v7512_v49, %v7512_v49 }
 0x734   :  { %v7817_v56 = vpop.permute.xlu1 %7816  ;;  %v7802_v35 = vpop.permute.xlu0 %7801 }
 0x735   :  { %vm7863_vm12 = vcmp.eq.s32.totalorder %v7802_v35, 1  ;;  %vm7868_vm6 = vcmp.eq.s32.totalorder %v7817_v56, 1 }
 0x736   :  { %9463 = vmatmul.mubr.msk.bf16.gmra.mrb[232].mxu0 %vm13382_vm2, %v7523_v22 }
 0x738   :  { %v13134_v2 = vpop.permute.xlu1 %7831  ;;  %v7814_v13 = vpop.permute.xlu0 %7813 }
 0x739   :  { %vm7867_vm9 = vcmp.eq.s32.totalorder %v7814_v13, 1 }
 0x73c   :  { %v13136_v44 = vpop.permute.xlu1 %7837  ;;  %v7820_v29 = vpop.permute.xlu0 %7819 }
 0x73d   :  { %vm7869_vm5 = vcmp.eq.s32.totalorder %v7820_v29, 1 }
 0x740   :  { %v13138_v53 = vpop.permute.xlu1 %7843  ;;  %v13143_v38 = vpop.permute.xlu0 %7834 }
 0x744   :  { %v13146_v21 = vpop.permute.xlu1 %7849  ;;  %v13149_v46 = vpop.permute.xlu0 %7840 }
 0x748   :  { %v7811_v15 = vpop.permute.xlu1 %7810  ;;  %v13154_v39 = vpop.permute.xlu0 %7846 }
 0x749   :  { %vm7866_vm10 = vcmp.eq.s32.totalorder %v7811_v15, 1 }
 0x74c   :  { %v13160_v40 = vpop.permute.xlu0 %7852  ;;  %v7826_v48 = vpop.permute.xlu1 %7825 }
 0x750   :  { %v7823_v8 = vpop.permute.xlu0 %7822 }
 0x751   :  { %vm7870_vm0 = vcmp.eq.s32.totalorder %v7823_v8, 1 }
 0x754   :  { %v7829_v36 = vpop.permute.xlu0 %7828 }
 0x7b9   :  { %v7630_v4 = vpop.f32.mrb[192].mxu0 }
 0x7ba   :  { %v7631_v27 = vadd.f32 %v13140_v41, %v7630_v4  ;;  %v9424_v63 = vpop.f32.mrb[193].mxu0 }
 0x7bb   :  { %v7633_v31 = vpop.f32.mrb[194].mxu0 }
 0x7bc   :  { %v7716_v43 = vmax.f32 %v7631_v27, 0.0  ;;  %v7634_v26 = vadd.f32 %v13140_v41, %v7633_v31  ;;  %v9425_v58 = vpop.f32.mrb[195].mxu0 }
 0x7be   :  { %v7884_v59 = vsel %vm7863_vm12, %v7716_v43, 0.0  ;;  %v7717_v28 = vmax.f32 %v7634_v26, 0.0  ;;  %vm7871_vm12 = vcmp.eq.s32.totalorder %v7826_v48, 1 }
 0x7bf   :  { %7905 = vst.msk [vmem:[#allocation6] sm:$0xff] %vm13383_vm11, %v7884_v59  ;;  %vm13390_vm11 = vmmov %vm13382_vm2 }
 0x7c0   :  { %v7885_v61 = vsel %vm7864_vm7, %v7717_v28, 0.0  ;;  %vm7872_vm7 = vcmp.eq.s32.totalorder %v7829_v36, 1 }
 0x7c1   :  { %7906 = vst.msk [vmem:[#allocation6 + $0x8] sm:$0xff] %vm13384_vm15, %v7885_v61  ;;  %v7638_v47 = vpop.f32.mrb[196].mxu0  ;;  %vm13391_vm15 = vmmov %vm13382_vm2 }
 0x7c2   :  { %v7639_v62 = vadd.f32 %v13140_v41, %v7638_v47  ;;  %v9428_v54 = vpop.f32.mrb[197].mxu0 }
 0x7c3   :  { %v7641_v55 = vpop.f32.mrb[198].mxu0 }
 0x7c4   :  { %v7718_v37 = vmax.f32 %v7639_v62, 0.0  ;;  %v7642_v6 = vadd.f32 %v13140_v41, %v7641_v55  ;;  %v9429_v33 = vpop.f32.mrb[199].mxu0 }
 0x7c6   :  { %v7886_v45 = vsel %vm7865_vm1, %v7718_v37, 0.0  ;;  %v7719_v30 = vmax.f32 %v7642_v6, 0.0  ;;  %vm7873_vm1 = vcmp.eq.s32.totalorder %v13134_v2, 1  ;;  %v7927_v55 = vld [vmem:[#allocation6] sm:$0xff] }
 0x7c7   :  { %7907 = vst.msk [vmem:[#allocation6 + $0x10] sm:$0xff] %vm13385_vm14, %v7886_v45  ;;  %vm13392_vm14 = vmmov %vm13382_vm2 }
 0x7c8   :  { %v7887_v32 = vsel %vm7866_vm10, %v7719_v30, 0.0  ;;  %vm7874_vm10 = vcmp.eq.s32.totalorder %v13143_v38, 1  ;;  %v7928_v47 = vld [vmem:[#allocation6 + $0x8] sm:$0xff] }
 0x7c9   :  { %7908 = vst.msk [vmem:[#allocation6 + $0x18] sm:$0xff] %vm13386_vm8, %v7887_v32  ;;  %v7646_v52 = vpop.f32.mrb[200].mxu0  ;;  %vm13393_vm8 = vmmov %vm13382_vm2 }
 0x7ca   :  { %v7647_v24 = vadd.f32 %v13140_v41, %v7646_v52  ;;  %v9432_v60 = vpop.f32.mrb[201].mxu0 }
 0x7cb   :  { %v7649_v17 = vpop.f32.mrb[202].mxu0 }
 0x7cc   :  { %v7720_v18 = vmax.f32 %v7647_v24, 0.0  ;;  %v7650_v1 = vadd.f32 %v13140_v41, %v7649_v17  ;;  %v9433_v19 = vpop.f32.mrb[203].mxu0 }
 0x7ce   :  { %v7888_v0 = vsel %vm7867_vm9, %v7720_v18, 0.0  ;;  %v7721_v51 = vmax.f32 %v7650_v1, 0.0  ;;  %vm13394_vm9 = vmmov %vm13382_vm2  ;;  %v7929_v6 = vld [vmem:[#allocation6 + $0x10] sm:$0xff] }
 0x7cf   :  { %7909 = vst.msk [vmem:[#allocation6 + $0x20] sm:$0xff] %vm13387_vm4, %v7888_v0  ;;  %vm13395_vm4 = vmmov %vm13382_vm2 }
 0x7d0   :  { %v7889_v5 = vsel %vm7868_vm6, %v7721_v51, 0.0  ;;  %vm7875_vm6 = vcmp.eq.s32.totalorder %v13136_v44, 1  ;;  %v7930_v1 = vld [vmem:[#allocation6 + $0x18] sm:$0xff] }
 0x7d1   :  { %7910 = vst.msk [vmem:[#allocation6 + $0x28] sm:$0xff] %vm13388_vm13, %v7889_v5  ;;  %v7654_v16 = vpop.f32.mrb[204].mxu0  ;;  %vm13396_vm13 = vmmov %vm13382_vm2 }
 0x7d2   :  { %v7655_v9 = vadd.f32 %v13140_v41, %v7654_v16  ;;  %v9436_v25 = vpop.f32.mrb[205].mxu0  ;;  %v7939_v52 = vsel %vm13396_vm13, %v7928_v47, -inf  ;;  %vm7879_vm13 = vcmp.eq.s32.totalorder %v13146_v21, 1  ;;  %v7859_v21 = vpop.permute.xlu0 %7858 }
 0x7d3   :  { %v7657_v14 = vpop.f32.mrb[206].mxu0 }
 0x7d4   :  { %v7722_v34 = vmax.f32 %v7655_v9, 0.0  ;;  %v7658_v3 = vadd.f32 %v13140_v41, %v7657_v14  ;;  %v9437_v23 = vpop.f32.mrb[207].mxu0 }
 0x7d6   :  { %v7890_v50 = vsel %vm7869_vm5, %v7722_v34, 0.0  ;;  %v7723_v57 = vmax.f32 %v7658_v3, 0.0  ;;  %v7931_v61 = vld [vmem:[#allocation6 + $0x20] sm:$0xff]  ;;  %vm13397_vm5 = vmmov %vm13382_vm2 }
 0x7d7   :  { %7911 = vst.msk [vmem:[#allocation6 + $0x30] sm:$0xff] %vm13389_vm3, %v7890_v50  ;;  %v7942_v38 = vsel %vm13395_vm4, %v7931_v61, -inf  ;;  %vm7954_vm3 = vcmask 516096  }
 0x7d8   :  { %v7891_v42 = vsel %vm7870_vm0, %v7723_v57, 0.0  ;;  %v7932_v58 = vld [vmem:[#allocation6 + $0x28] sm:$0xff]  ;;  %vm13398_vm0 = vmmov %vm13382_vm2 }
 0x7d9   :  { %7912 = vst.msk [vmem:[#allocation6 + $0x38] sm:$0xff] %vm13382_vm2, %v7891_v42  ;;  %v7662_v20 = vpop.f32.mrb[208].mxu0  ;;  %v7944_v2 = vsel %vm13393_vm8, %v7932_v58, -inf  ;;  %vm13399_vm2 = vmmov %vm13398_vm0  ;;  %vm7877_vm8 = vcmp.eq.s32.totalorder %v13138_v53, 1 }
 0x7da   :  { %v7663_v49 = vadd.f32 %v13140_v41, %v7662_v20  ;;  %v9440_v22 = vpop.f32.mrb[209].mxu0  ;;  %v7938_v18 = vsel %vm13399_vm2, %v7927_v55, -inf  ;;  %v7945_v19 = vmax.f32 %v7939_v52, %v7944_v2  ;;  %vm13407_vm4 = vmmov %vm13398_vm0 }
 0x7db   :  { %v7665_v7 = vpop.f32.mrb[210].mxu0  ;;  %v7943_v9 = vmax.f32 %v7938_v18, %v7942_v38  ;;  %vm13408_vm2 = vmmov %vm13398_vm0 }
 0x7dc   :  { %v7724_v11 = vmax.f32 %v7663_v49, 0.0  ;;  %v7666_v12 = vadd.f32 %v13140_v41, %v7665_v7  ;;  %v9441_v56 = vpop.f32.mrb[211].mxu0 }
 0x7de   :  { %v7725_v35 = vmax.f32 %v7666_v12, 0.0  ;;  %v7892_v10 = vsel %vm7871_vm12, %v7724_v11, 0.0  ;;  %v7933_v62 = vld [vmem:[#allocation6 + $0x30] sm:$0xff]  ;;  %vm13400_vm12 = vmmov %vm13398_vm0 }
 0x7df   :  { %7913 = vst.msk [vmem:[#allocation6 + $0x40] sm:$0xff] %vm13390_vm11, %v7892_v10  ;;  %v7946_v24 = vsel %vm13397_vm5, %v7933_v62, -inf  ;;  %v7940_v16 = vsel %vm13400_vm12, %v7929_v6, -inf  ;;  %vm13402_vm11 = vmmov %vm13398_vm0  ;;  %vm7880_vm5 = vcmp.eq.s32.totalorder %v13160_v40, 1 }
 0x7e0   :  { %v7893_v13 = vsel %vm7872_vm7, %v7725_v35, 0.0  ;;  %v7934_v33 = vld [vmem:[#allocation6 + $0x38] sm:$0xff]  ;;  %vm13401_vm7 = vmmov %vm13398_vm0  ;;  %v7947_v14 = vmax.f32 %v7940_v16, %v7946_v24 }
 0x7e1   :  { %7914 = vst.msk [vmem:[#allocation6 + $0x48] sm:$0xff] %vm13391_vm15, %v7893_v13  ;;  %v7670_v29 = vpop.f32.mrb[212].mxu0  ;;  %v7948_v25 = vsel %vm13401_vm7, %v7934_v33, -inf  ;;  %vm13403_vm15 = vmmov %vm13398_vm0  ;;  %v7856_v33 = vpop.permute.xlu1 %7855  ;;  %vm7882_vm7 = vcmp.eq.s32.totalorder %v7859_v21, 1 }
 0x7e2   :  { %v7671_v4 = vadd.f32 %v13140_v41, %v7670_v29  ;;  %v9444_v27 = vpop.f32.mrb[213].mxu0  ;;  %v7941_v57 = vsel %vm13403_vm15, %v7930_v1, -inf  ;;  %vm7881_vm12 = vcmp.eq.s32.totalorder %v7856_v33, 1  ;;  %vm13410_vm15 = vmmov %vm13398_vm0 }
 0x7e3   :  { %v7673_v63 = vpop.f32.mrb[214].mxu0  ;;  %v7949_v48 = vmax.f32 %v7941_v57, %v7948_v25 }
 0x7e4   :  { %v7726_v31 = vmax.f32 %v7671_v4, 0.0  ;;  %v7674_v43 = vadd.f32 %v13140_v41, %v7673_v63  ;;  %v9445_v26 = vpop.f32.mrb[215].mxu0 }
 0x7e5   :  { %v7862_v18 = vpop.permute.xlu1 %7861 }
 0x7e6   :  { %v7894_v59 = vsel %vm7873_vm1, %v7726_v31, 0.0  ;;  %v7727_v28 = vmax.f32 %v7674_v43, 0.0  ;;  %v7935_v45 = vld [vmem:[#allocation6 + $0x40] sm:$0xff]  ;;  %vm7876_vm1 = vcmp.eq.s32.totalorder %v13149_v46, 1 }
 0x7e7   :  { %7915 = vst.msk [vmem:[#allocation6 + $0x50] sm:$0xff] %vm13392_vm14, %v7894_v59  ;;  %v7950_v8 = vsel %vm13402_vm11, %v7935_v45, -inf  ;;  %vm13405_vm14 = vmmov %vm13398_vm0 }
 0x7e8   :  { %v7936_v54 = vld [vmem:[#allocation6 + $0x48] sm:$0xff]  ;;  %v7895_v15 = vsel %vm7874_vm10, %v7727_v28, 0.0  ;;  %vm13404_vm10 = vmmov %vm13398_vm0  ;;  %v7951_v20 = vmax.f32 %v7943_v9, %v7950_v8 }
 0x7e9   :  { %7916 = vst.msk [vmem:[#allocation6 + $0x58] sm:$0xff] %vm13394_vm9, %v7895_v15  ;;  %v7678_v37 = vpop.f32.mrb[216].mxu0  ;;  %v7952_v60 = vsel %vm13398_vm0, %v7936_v54, -inf  ;;  %vm7878_vm9 = vcmp.eq.s32.totalorder %v13154_v39, 1  ;;  %vm13409_vm11 = vmmov %vm13398_vm0 }
 0x7ea   :  { %v7679_v30 = vadd.f32 %v13140_v41, %v7678_v37  ;;  %v9448_v32 = vpop.f32.mrb[217].mxu0  ;;  %v7953_v34 = vmax.f32 %v7945_v19, %v7952_v60 }
 0x7eb   :  { %v7681_v17 = vpop.f32.mrb[218].mxu0 }
 0x7ec   :  { %v7728_v0 = vmax.f32 %v7679_v30, 0.0  ;;  %v7682_v51 = vadd.f32 %v13140_v41, %v7681_v17  ;;  %v9449_v5 = vpop.f32.mrb[219].mxu0  ;;  %v7957_v7 = vmax.f32 %v7951_v20, %v7953_v34 }
 0x7ee   :  { %v7937_v3 = vld [vmem:[#allocation6 + $0x50] sm:$0x1]  ;;  %v7896_v23 = vsel %vm7875_vm6, %v7728_v0, 0.0  ;;  %v7729_v50 = vmax.f32 %v7682_v51, 0.0  ;;  %vm13406_vm6 = vmmov %vm13398_vm0 }
 0x7ef   :  { %v7955_v42 = vsel %vm7954_vm3, %v7937_v3, -inf  ;;  %7917 = vst.msk [vmem:[#allocation6 + $0x60] sm:$0xff] %vm13404_vm10, %v7896_v23  ;;  %vm7883_vm10 = vcmp.eq.s32.totalorder %v7862_v18, 1 }
 0x7f0   :  { %v7956_v49 = vmax.f32 %v7947_v14, %v7955_v42  ;;  %v7897_v22 = vsel %vm7876_vm1, %v7729_v50, 0.0  ;;  %vm7925_vm1 = vcmask 517120   ;;  %v7967_v14 = vld [vmem:[#allocation6 + $0x51] sm:$0xff] }
 0x7f1   :  { %7918 = vst.msk [vmem:[#allocation6 + $0x68] sm:$0xff] %vm13405_vm14, %v7897_v22  ;;  %v7686_v36 = vpop.f32.mrb[220].mxu0  ;;  %vm13411_vm14 = vmmov %vm13398_vm0 }
 0x7f2   :  { %v7958_v11 = vmax.f32 %v7956_v49, %v7949_v48  ;;  %v7687_v44 = vadd.f32 %v13140_v41, %v7686_v36  ;;  %v9452_v12 = vpop.f32.mrb[221].mxu0 }
 0x7f3   :  { %v7689_v56 = vpop.f32.mrb[222].mxu0 }
 0x7f4   :  { %v7959_v35 = vmax.f32 %v7957_v7, %v7958_v11  ;;  %v7730_v10 = vmax.f32 %v7687_v44, 0.0  ;;  %v7690_v46 = vadd.f32 %v13140_v41, %v7689_v56  ;;  %v9453_v13 = vpop.f32.mrb[223].mxu0 }
 0x7f6   :  { %v7960_v29 = vrot.slane %v7959_v35, 4  ;;  %v7898_v4 = vsel %vm7877_vm8, %v7730_v10, 0.0  ;;  %v7731_v27 = vmax.f32 %v7690_v46, 0.0  ;;  %v7968_v34 = vld [vmem:[#allocation6 + $0x59] sm:$0xff]  ;;  %vm13412_vm8 = vmmov %vm13398_vm0 }
 0x7f7   :  { %7919 = vst.msk [vmem:[#allocation6 + $0x70] sm:$0xff] %vm13406_vm6, %v7898_v4  ;;  %vm13414_vm6 = vmmov %vm13398_vm0 }
 0x7f8   :  { %v7961_v63 = vmax.f32 %v7959_v35, %v7960_v29  ;;  %v7899_v31 = vsel %vm7878_vm9, %v7731_v27, 0.0  ;;  %v7969_v3 = vld [vmem:[#allocation6 + $0x61] sm:$0xff]  ;;  %vm13413_vm9 = vmmov %vm13398_vm0  ;;  %v7978_v48 = vsel %vm13414_vm6, %v7967_v14, -inf }
 0x7f9   :  { %7920 = vst.msk [vmem:[#allocation6 + $0x78] sm:$0xff] %vm13407_vm4, %v7899_v31  ;;  %v7694_v43 = vpop.f32.mrb[224].mxu0  ;;  %vm13415_vm4 = vmmov %vm13398_vm0 }
 0x7fa   :  { %v7962_v26 = vrot.slane %v7961_v63, 2  ;;  %v7695_v58 = vadd.f32 %v13140_v41, %v7694_v43  ;;  %v9456_v59 = vpop.f32.mrb[225].mxu0  ;;  %v7979_v49 = vsel %vm13415_vm4, %v7968_v34, -inf }
 0x7fb   :  { %v7697_v28 = vpop.f32.mrb[226].mxu0 }
 0x7fc   :  { %v7963_v61 = vmax.f32 %v7961_v63, %v7962_v26  ;;  %v7732_v47 = vmax.f32 %v7695_v58, 0.0  ;;  %v7698_v53 = vadd.f32 %v13140_v41, %v7697_v28  ;;  %v9457_v62 = vpop.f32.mrb[227].mxu0 }
 0x7fe   :  { %v7964_v39 = vrot.slane %v7963_v61, 1  ;;  %v7900_v54 = vsel %vm7879_vm13, %v7732_v47, 0.0  ;;  %v7733_v15 = vmax.f32 %v7698_v53, 0.0  ;;  %v7970_v20 = vld [vmem:[#allocation6 + $0x69] sm:$0xff]  ;;  %vm13416_vm13 = vmmov %vm13398_vm0 }
 0x7ff   :  { %7921 = vst.msk [vmem:[#allocation6 + $0x80] sm:$0xff] %vm13398_vm0, %v7900_v54  ;;  %v7980_v22 = vsel %vm13416_vm13, %v7969_v3, -inf  ;;  %v8602_v54 = vld [vmem:[#allocation25] ss:$0 sm:$0xff] }
 0x800   :  { %v7965_v55 = vmax.f32 %v7963_v61, %v7964_v39  ;;  %v7901_v2 = vsel %vm7880_vm5, %v7733_v15, 0.0  ;;  %v7971_v9 = vld [vmem:[#allocation6 + $0x71] sm:$0xff]  ;;  %vm13417_vm5 = vmmov %vm13398_vm0 }
 0x801   :  { %7922 = vst.msk [vmem:[#allocation6 + $0x88] sm:$0xff] %vm13408_vm2, %v7901_v2  ;;  %v7702_v37 = vpop.f32.mrb[228].mxu0  ;;  %v7982_v57 = vsel %vm13411_vm14, %v7971_v9, -inf  ;;  %vm13418_vm2 = vmmov %vm13398_vm0 }
 0x802   :  { %7966 = vst.msk [vmem:[#allocation7] sm:$0x1] %vm7954_vm3, %v7965_v55  ;;  %v7703_v6 = vadd.f32 %v13140_v41, %v7702_v37  ;;  %v9460_v38 = vpop.f32.mrb[229].mxu0  ;;  %v7983_v11 = vmax.f32 %v7978_v48, %v7982_v57  ;;  %v7981_v10 = vsel %vm13418_vm2, %v7970_v20, -inf }
 0x803   :  { %v7705_v45 = vpop.f32.mrb[230].mxu0 }
 0x804   :  { %v7734_v30 = vmax.f32 %v7703_v6, 0.0  ;;  %v7706_v32 = vadd.f32 %v13140_v41, %v7705_v45  ;;  %v9461_v52 = vpop.f32.mrb[231].mxu0 }
 0x806   :  { %v7902_v40 = vsel %vm7881_vm12, %v7734_v30, 0.0  ;;  %v7735_v24 = vmax.f32 %v7706_v32, 0.0  ;;  %v7972_v25 = vld [vmem:[#allocation6 + $0x79] sm:$0xff]  ;;  %vm13419_vm12 = vmmov %vm13398_vm0 }
 0x807   :  { %7923 = vst.msk [vmem:[#allocation6 + $0x90] sm:$0xff] %vm13409_vm11, %v7902_v40 }
 0x808   :  { %v7903_v60 = vsel %vm7882_vm7, %v7735_v24, 0.0  ;;  %v7973_v8 = vld [vmem:[#allocation6 + $0x81] sm:$0xff]  ;;  %vm13420_vm7 = vmmov %vm13398_vm0 }
 0x809   :  { %7924 = vst.msk [vmem:[#allocation6 + $0x98] sm:$0xff] %vm13410_vm15, %v7903_v60  ;;  %v7710_v17 = vpop.f32.mrb[232].mxu0  ;;  %v7986_v42 = vsel %vm13413_vm9, %v7973_v8, -inf }
 0x80a   :  { %v7711_v1 = vadd.f32 %v13140_v41, %v7710_v17  ;;  %v9464_v19 = vpop.f32.mrb[233].mxu0  ;;  %v7984_v41 = vsel %vm13412_vm8, %v7972_v25, -inf  ;;  %v7987_v12 = vmax.f32 %v7980_v22, %v7986_v42 }
 0x80b   :  { %v7713_v0 = vpop.f32.mrb[234].mxu0  ;;  %v7985_v44 = vmax.f32 %v7979_v49, %v7984_v41 }
 0x80c   :  { %v7736_v51 = vmax.f32 %v7711_v1, 0.0  ;;  %v9465_v5 = vpop.f32.mrb[235].mxu0 }
 0x80e   :  { %v7904_v16 = vsel %vm7883_vm10, %v7736_v51, 0.0  ;;  %v7974_v23 = vld [vmem:[#allocation6 + $0x89] sm:$0xff] }
 0x80f   :  { %7926 = vst.msk [vmem:[#allocation6 + $0xa0] sm:$0x3] %vm7925_vm1, %v7904_v16  ;;  %v7988_v36 = vsel %vm13417_vm5, %v7974_v23, -inf }
 0x810   :  { %v7975_v50 = vld [vmem:[#allocation6 + $0x91] sm:$0xff]  ;;  %v7989_v29 = vmax.f32 %v7981_v10, %v7988_v36 }
 0x811   :  { %v7990_v7 = vsel %vm13398_vm0, %v7975_v50, -inf }
 0x812   :  { %v7991_v4 = vmax.f32 %v7983_v11, %v7990_v7 }
 0x816   :  { %v7976_v56 = vld [vmem:[#allocation6 + $0x99] sm:$0xff]  ;;  %v7977_v35 = vld [vmem:[#allocation6 + $0xa1] sm:$0x1] }
 0x817   :  { %v7992_v46 = vsel %vm13419_vm12, %v7976_v56, -inf  ;;  %v7994_v13 = vsel %vm7954_vm3, %v7977_v35, -inf }
 0x818   :  { %v7993_v27 = vmax.f32 %v7985_v44, %v7992_v46  ;;  %v7995_v63 = vmax.f32 %v7987_v12, %v7994_v13 }
 0x81a   :  { %v7996_v31 = vmax.f32 %v7991_v4, %v7993_v27  ;;  %v7997_v43 = vmax.f32 %v7995_v63, %v7989_v29 }
 0x81c   :  { %v7998_v26 = vmax.f32 %v7996_v31, %v7997_v43 }
 0x81e   :  { %v7999_v58 = vrot.slane %v7998_v26, 4 }
 0x820   :  { %v8000_v59 = vmax.f32 %v7998_v26, %v7999_v58 }
 0x822   :  { %v8001_v28 = vrot.slane %v8000_v59, 2 }
 0x824   :  { %v8002_v61 = vmax.f32 %v8000_v59, %v8001_v28 }
 0x826   :  { %v8003_v47 = vrot.slane %v8002_v61, 1 }
 0x828   :  { %v8004_v53 = vmax.f32 %v8002_v61, %v8003_v47 }
 0x82a   :  { %8005 = vst.msk [vmem:[#allocation7 + $0x1] sm:$0x1] %vm7954_vm3, %v8004_v53 }
 0x831   :  { %v8006_v62 = vld [vmem:[#allocation7] sm:$0x3] }
 0x832   :  { %v8007_v39 = vpack.c.bf16 %v8006_v62, %v8006_v62 }
 0x834   :  { %9475 = vmatmul.mubr.msk.bf16.vlgmr.msra.gmra.mrb[84].mxu1 %vm13420_vm7, %v8007_v39 }
 0x907   :  { %v8084_v15 = vpop.f32.mrb[84].mxu1 }
 0x908   :  { %v8085_v55 = vadd.f32 %v8602_v54, %v8084_v15  ;;  %v9476_v2 = vpop.f32.mrb[85].mxu1 }
 0x909   :  { %v8087_v37 = vpop.f32.mrb[86].mxu1 }
 0x90a   :  { %8090 = vst [vmem:[#allocation28] sm:$0x3] %v8085_v55  ;;  %v9477_v6 = vpop.f32.mrb[87].mxu1 }
 0x90b   :  { %10201 = shalt.err (!%p10198_p2)
}
 0x90c   :  { %s10202_s7 = scalar_lea.hbm %s13252_s12, 32 }
 0x90d   :  { %p10203_p3 = scmp.ne.s32.totalorder %s13252_s12, %s10202_s7  ;;  %p10206_p4 = scmp.lt.u32.totalorder %s10202_s7, %s13252_s12 }
 0x90f   :  { %p10208_p5 = pnand %p10206_p4, %p10203_p3 }
 0x911   :  { %10211 = shalt.err (!%p10208_p5)
}
 0x912   :  { %8100 = dma.vmem_to_hbm [thread:$0]  %s8098_s3, 32, %s13252_s12, [#allocation10]  }
 0x913   :  { %10226 = dma.done.wait [#allocation10], 32  }
 0x914   :  { %10227 = vsyncadd [#allocation10], 4294967264 }
 0x915   :  { %8104 = vsyncpa [#allocation9], 1 }
 0x916   :  { %8105 = vsyncpa [#allocation12], 1 }
 0x917   :  { %8106 = vsyncpa [#allocation15], 1 }
 0x918   :  { %8107 = vsyncpa [#allocation18], 1 }
 0x919   :  { %8108 = vsyncpa [#allocation21], 1 }
 0x91a   :  { %8109 = vsyncpa [#allocation24], 1 }
 0x91b   :  { %8110 = vsyncpa [#allocation27], 1 }
 0x91c   :  { %8111 = vsyncpa [#allocation10], 1 }

</bundles_post_ra>
